<compile_context>
chip_gen: v6e
topology: v6e:2x2x1
jax: 0.10.0
libtpu: 0.0.40
codegen_flags: <defaults>
</compile_context>

<pallas_src>
import functools
import math

import jax
import jax.numpy as jnp
from jax.experimental import pallas as pl
from jax.experimental.pallas import tpu as pltpu


# ------------------------------ helpers -------------------------------------

def _layernorm_f32(x, g, b, eps):
    mean = jnp.mean(x, axis=-1, keepdims=True)
    xc = x - mean
    var = jnp.mean(xc * xc, axis=-1, keepdims=True)
    return xc * jax.lax.rsqrt(var + eps) * g + b


def build_neighborhood_bias(resolution, window, neg=-1e30, dtype=jnp.float32):
    """Additive (L, L) NATTEN-3D neighborhood bias: 0 inside the clamped window,
    `neg` outside (dilation=1, non-causal).  Built ONCE host-side (hoisted out of
    the per-batch grid loop) and passed to the kernel as a plain input."""
    D, H, W = resolution
    kd, kh, kw = window
    L = D * H * W
    idx = jnp.arange(L, dtype=jnp.int32)
    d, h, w = idx // (H * W), (idx // W) % H, idx % W

    def axis_ok(c, n, k):
        start = jnp.clip(c - k // 2, 0, n - k)            # clamped window start
        return (c[None, :] >= start[:, None]) & (c[None, :] < start[:, None] + k)

    ok = axis_ok(d, D, kd) & axis_ok(h, H, kh) & axis_ok(w, W, kw)
    return jnp.where(ok, 0.0, neg).astype(dtype)


# ------------------------------ Pallas kernel -------------------------------

def _block_kernel(xf_ref, xt_ref, bias_ref,
                  ln1g_ref, ln1b_ref,
                  wq_ref, bq_ref, wkv_ref, bkv_ref,
                  wp_ref, bp_ref,
                  ln2g_ref, ln2b_ref,
                  fc1w_ref, fc1b_ref, fc2w_ref, fc2b_ref,
                  o_ref, *, num_heads, head_dim, eps):
    f32, bf16 = jnp.float32, jnp.bfloat16
    C = num_heads * head_dim

    x_full = xf_ref[0].astype(f32)                 # (L,  C) — key/value source rows
    x_t = xt_ref[0].astype(f32)                    # (TQ, C) — query tile / residual

    # ---------------- LN1 (f32 statistics) ----------------
    yf = _layernorm_f32(x_full, ln1g_ref[...], ln1b_ref[...], eps).astype(bf16)
    yt = _layernorm_f32(x_t, ln1g_ref[...], ln1b_ref[...], eps).astype(bf16)

    # ---------------- fused projections (bf16 weights, f32 accumulate) --------
    # scale (1/head_dim) and q-bias scaling are pre-folded into wq/bq host-side.
    q = (jnp.dot(yt, wq_ref[...], preferred_element_type=f32)
         + bq_ref[...]).astype(bf16)               # (TQ, C)
    kv = (jnp.dot(yf, wkv_ref[...], preferred_element_type=f32)
          + bkv_ref[...]).astype(bf16)             # (L, 2C)  == [K | V]

    bias = bias_ref[...]                           # (TQ, L) additive neighborhood mask

    # ---------------- neighborhood attention (short static head loop) --------
    # Heads use static lane slices of the fused q/kv results; the (TQ, L) score
    # live-set is bounded by the query-tile grid axis.
    head_out = []
    for h in range(num_heads):
        lo = h * head_dim
        qh = q[:, lo:lo + head_dim]                # (TQ, hd)
        kh = kv[:, lo:lo + head_dim]               # (L,  hd)
        vh = kv[:, C + lo:C + lo + head_dim]       # (L,  hd)

        s = jax.lax.dot_general(qh, kh, (((1,), (1,)), ((), ())),
                                preferred_element_type=f32)        # (TQ, L)
        s = s + bias
        s = s - jnp.max(s, axis=-1, keepdims=True)
        p = jnp.exp(s)
        p = p * pl.reciprocal(jnp.sum(p, axis=-1, keepdims=True), approx=True)
        head_out.append(jnp.dot(p.astype(bf16), vh,
                                preferred_element_type=f32))        # (TQ, hd)

    # ---------------- fused output projection ----------------
    ctx = jnp.concatenate(head_out, axis=-1).astype(bf16)           # (TQ, C)
    attn = jnp.dot(ctx, wp_ref[...], preferred_element_type=f32) + bp_ref[...]
    x_t = x_t + attn                                                # residual 1

    # ---------------- MLP ----------------
    y2 = _layernorm_f32(x_t, ln2g_ref[...], ln2b_ref[...], eps).astype(bf16)
    h1 = jnp.dot(y2, fc1w_ref[...], preferred_element_type=f32) + fc1b_ref[...]
    # exact (erf-based) GELU, matching torch.nn.GELU() default
    h1 = 0.5 * h1 * (1.0 + jax.lax.erf(h1 * (1.0 / math.sqrt(2.0))))
    h2 = jnp.dot(h1.astype(bf16), fc2w_ref[...], preferred_element_type=f32) + fc2b_ref[...]

    o_ref[0] = (x_t + h2).astype(o_ref.dtype)                       # residual 2


# ------------------------------ block wrapper -------------------------------

def _prepare_block_params(p, C, num_heads):
    """Fold the score scale into Wq/bq, split qkv into q / kv (contiguous column
    blocks, head-major within each), and ship bf16 matmul weights."""
    hd = C // num_heads
    bf16 = jnp.bfloat16
    # effective scale = hd**-0.5 (module pre-scale) * hd**-0.5 (tuned_na3d) = 1/hd
    scale = 1.0 / float(hd)
    qkv_w, qkv_b = p["qkv_w"], p["qkv_b"]          # (C, 3C), (1, 3C): cols = q|k|v
    return dict(
        ln1_g=p["ln1_g"], ln1_b=p["ln1_b"],
        wq=(qkv_w[:, :C] * scale).astype(bf16), bq=qkv_b[:, :C] * scale,
        wkv=qkv_w[:, C:].astype(bf16), bkv=qkv_b[:, C:],
        wp=p["proj_w"].astype(bf16), bp=p["proj_b"],
        ln2_g=p["ln2_g"], ln2_b=p["ln2_b"],
        fc1_w=p["fc1_w"].astype(bf16), fc1_b=p["fc1_b"],
        fc2_w=p["fc2_w"].astype(bf16), fc2_b=p["fc2_b"],
    )


def natten_block_forward(x, p, attn_bias, num_heads, q_tile=None):
    B, L, C = x.shape
    hd = C // num_heads
    hidden = p["fc1_w"].shape[1]
    pp = _prepare_block_params(p, C, num_heads)

    if q_tile is None:
        q_tile = 128 if (L % 128 == 0 and L > 128) else L
    assert L % q_tile == 0 and (q_tile % 8 == 0 or q_tile == L)
    n_qt = L // q_tile

    kern = functools.partial(_block_kernel, num_heads=num_heads, head_dim=hd, eps=1e-5)

    def const_spec(shape):
        return pl.BlockSpec(shape, lambda b, q, _z=(0,) * len(shape): _z)

    # Everything here fits comfortably inside the default scoped-VMEM limit on
    # v5e/v6e/v7x; raise vmem_limit_bytes in CompilerParams if tiles are enlarged.
    return pl.pallas_call(
        kern,
        out_shape=jax.ShapeDtypeStruct((B, L, C), x.dtype),
        grid_spec=pltpu.PrefetchScalarGridSpec(
            num_scalar_prefetch=0,
            grid=(B, n_qt),                                          # qt innermost
            in_specs=[
                pl.BlockSpec((1, L, C), lambda b, q: (b, 0, 0)),      # x (K/V rows)
                pl.BlockSpec((1, q_tile, C), lambda b, q: (b, q, 0)), # x (query tile)
                pl.BlockSpec((q_tile, L), lambda b, q: (q, 0)),       # neighborhood bias
                const_spec((1, C)), const_spec((1, C)),               # ln1 g/b
                const_spec((C, C)), const_spec((1, C)),               # wq / bq
                const_spec((C, 2 * C)), const_spec((1, 2 * C)),       # wkv / bkv
                const_spec((C, C)), const_spec((1, C)),               # proj w/b
                const_spec((1, C)), const_spec((1, C)),               # ln2 g/b
                const_spec((C, hidden)), const_spec((1, hidden)),     # fc1 w/b
                const_spec((hidden, C)), const_spec((1, C)),          # fc2 w/b
            ],
            out_specs=pl.BlockSpec((1, q_tile, C), lambda b, q: (b, q, 0)),
        ),
        compiler_params=pltpu.CompilerParams(
            dimension_semantics=("parallel", "parallel")),
    )(x, x, attn_bias,
      pp["ln1_g"], pp["ln1_b"],
      pp["wq"], pp["bq"], pp["wkv"], pp["bkv"],
      pp["wp"], pp["bp"],
      pp["ln2_g"], pp["ln2_b"],
      pp["fc1_w"], pp["fc1_b"], pp["fc2_w"], pp["fc2_b"])


def slide_layer_3d_forward(x, params, resolution, window_size, num_heads, q_tile=None):
    """SlideLayer3D.forward (checkpoint_chunks=1, padded_lon=False, eval mode)."""
    attn_bias = build_neighborhood_bias(resolution, window_size)     # built once
    for p in params:                         # depth blocks, applied sequentially
        x = natten_block_forward(x, p, attn_bias, num_heads, q_tile=q_tile)
    return x


# --------------------------------- params -----------------------------------

def init_block_params(key, C, mlp_ratio=4.0):
    hidden = int(C * mlp_ratio)
    ks = jax.random.split(key, 8)
    w = lambda k, shp: (jax.random.normal(k, shp, jnp.float32) * 0.02)
    return dict(
        ln1_g=jnp.ones((1, C), jnp.float32),
        ln1_b=jnp.zeros((1, C), jnp.float32),
        qkv_w=w(ks[0], (C, 3 * C)),
        qkv_b=w(ks[1], (1, 3 * C)),
        proj_w=w(ks[2], (C, C)),
        proj_b=w(ks[3], (1, C)),
        ln2_g=jnp.ones((1, C), jnp.float32),
        ln2_b=jnp.zeros((1, C), jnp.float32),
        fc1_w=w(ks[4], (C, hidden)),
        fc1_b=w(ks[5], (1, hidden)),
        fc2_w=w(ks[6], (hidden, C)),
        fc2_b=w(ks[7], (1, C)),
    )


if __name__ == "__main__":
    # Small config consistent with SlideLayer3D:
    #   dim=32, input_resolution=(4, 8, 8), depth=2, num_heads=4, window=(3,3,3)
    B = 2
    resolution = (4, 8, 8)            # (D, H, W)
    C = 32
    num_heads = 4
    depth = 2
    window_size = (3, 3, 3)
    L = resolution[0] * resolution[1] * resolution[2]   # 256

    key = jax.random.PRNGKey(0)
    kx, kp = jax.random.split(key)
    x = jax.random.normal(kx, (B, L, C), jnp.float32)
    params = [init_block_params(k, C) for k in jax.random.split(kp, depth)]

    fwd = jax.jit(functools.partial(
        slide_layer_3d_forward,
        resolution=resolution, window_size=window_size, num_heads=num_heads))
    out = fwd(x, params)
    jax.block_until_ready(out)
    assert out.shape == (B, L, C) and out.dtype == jnp.float32
    assert bool(jnp.all(jnp.isfinite(out)))
    print("KERNEL_OK")
</pallas_src>

<mosaic_0001>
module attributes {stable_mosaic.version = 11 : i64} {
  func.func @_block_kernel(%arg0: i32, %arg1: i32, %arg2: memref<1x256x32xf32, #tpu.memory_space<vmem>>, %arg3: memref<1x128x32xf32, #tpu.memory_space<vmem>>, %arg4: memref<128x256xf32, #tpu.memory_space<vmem>>, %arg5: memref<1x32xf32, #tpu.memory_space<vmem>>, %arg6: memref<1x32xf32, #tpu.memory_space<vmem>>, %arg7: memref<32x32xbf16, #tpu.memory_space<vmem>>, %arg8: memref<1x32xf32, #tpu.memory_space<vmem>>, %arg9: memref<32x64xbf16, #tpu.memory_space<vmem>>, %arg10: memref<1x64xf32, #tpu.memory_space<vmem>>, %arg11: memref<32x32xbf16, #tpu.memory_space<vmem>>, %arg12: memref<1x32xf32, #tpu.memory_space<vmem>>, %arg13: memref<1x32xf32, #tpu.memory_space<vmem>>, %arg14: memref<1x32xf32, #tpu.memory_space<vmem>>, %arg15: memref<32x128xbf16, #tpu.memory_space<vmem>>, %arg16: memref<1x128xf32, #tpu.memory_space<vmem>>, %arg17: memref<128x32xbf16, #tpu.memory_space<vmem>>, %arg18: memref<1x32xf32, #tpu.memory_space<vmem>>, %arg19: memref<1x128x32xf32, #tpu.memory_space<vmem>>) attributes {dimension_semantics = [#tpu.dimension_semantics<parallel>, #tpu.dimension_semantics<parallel>], iteration_bounds = array<i64: 2, 2>, scalar_prefetch = 0 : i64, scratch_operands = 0 : i64, tpu.core_type = #tpu.core_type<tc>, window_params = [{transform_indices = @transform_0, window_bounds = array<i64: 1, 256, 32>}, {transform_indices = @transform_1, window_bounds = array<i64: 1, 128, 32>}, {transform_indices = @transform_2, window_bounds = array<i64: 128, 256>}, {pipeline_mode = #tpu.pipeline_mode<synchronous>, transform_indices = @transform_3, window_bounds = array<i64: 1, 32>}, {pipeline_mode = #tpu.pipeline_mode<synchronous>, transform_indices = @transform_4, window_bounds = array<i64: 1, 32>}, {pipeline_mode = #tpu.pipeline_mode<synchronous>, transform_indices = @transform_5, window_bounds = array<i64: 32, 32>}, {pipeline_mode = #tpu.pipeline_mode<synchronous>, transform_indices = @transform_6, window_bounds = array<i64: 1, 32>}, {pipeline_mode = #tpu.pipeline_mode<synchronous>, transform_indices = @transform_7, window_bounds = array<i64: 32, 64>}, {pipeline_mode = #tpu.pipeline_mode<synchronous>, transform_indices = @transform_8, window_bounds = array<i64: 1, 64>}, {pipeline_mode = #tpu.pipeline_mode<synchronous>, transform_indices = @transform_9, window_bounds = array<i64: 32, 32>}, {pipeline_mode = #tpu.pipeline_mode<synchronous>, transform_indices = @transform_10, window_bounds = array<i64: 1, 32>}, {pipeline_mode = #tpu.pipeline_mode<synchronous>, transform_indices = @transform_11, window_bounds = array<i64: 1, 32>}, {pipeline_mode = #tpu.pipeline_mode<synchronous>, transform_indices = @transform_12, window_bounds = array<i64: 1, 32>}, {pipeline_mode = #tpu.pipeline_mode<synchronous>, transform_indices = @transform_13, window_bounds = array<i64: 32, 128>}, {pipeline_mode = #tpu.pipeline_mode<synchronous>, transform_indices = @transform_14, window_bounds = array<i64: 1, 128>}, {pipeline_mode = #tpu.pipeline_mode<synchronous>, transform_indices = @transform_15, window_bounds = array<i64: 128, 32>}, {pipeline_mode = #tpu.pipeline_mode<synchronous>, transform_indices = @transform_16, window_bounds = array<i64: 1, 32>}, {transform_indices = @transform_17, window_bounds = array<i64: 1, 128, 32>}]} {
    %c0 = arith.constant 0 : index
    %c0_0 = arith.constant 0 : index
    %c0_1 = arith.constant 0 : index
    %0 = vector.load %arg2[%c0, %c0_0, %c0_1] : memref<1x256x32xf32, #tpu.memory_space<vmem>>, vector<1x256x32xf32>
    %1 = vector.shape_cast %0 : vector<1x256x32xf32> to vector<256x32xf32>
    %c0_2 = arith.constant 0 : index
    %c0_3 = arith.constant 0 : index
    %c0_4 = arith.constant 0 : index
    %2 = vector.load %arg3[%c0_2, %c0_3, %c0_4] : memref<1x128x32xf32, #tpu.memory_space<vmem>>, vector<1x128x32xf32>
    %3 = vector.shape_cast %2 : vector<1x128x32xf32> to vector<128x32xf32>
    %c0_5 = arith.constant 0 : index
    %c0_6 = arith.constant 0 : index
    %4 = vector.load %arg5[%c0_5, %c0_6] : memref<1x32xf32, #tpu.memory_space<vmem>>, vector<1x32xf32>
    %c0_7 = arith.constant 0 : index
    %c0_8 = arith.constant 0 : index
    %5 = vector.load %arg6[%c0_7, %c0_8] : memref<1x32xf32, #tpu.memory_space<vmem>>, vector<1x32xf32>
    %cst = arith.constant dense<0.000000e+00> : vector<256xf32>
    %6 = vector.multi_reduction <add>, %1, %cst [1] : vector<256x32xf32> to vector<256xf32>
    %7 = vector.shape_cast %6 : vector<256xf32> to vector<256x1xf32>
    %cst_9 = arith.constant 3.200000e+01 : f32
    %8 = vector.broadcast %cst_9 : f32 to vector<256x1xf32>
    %9 = arith.divf %7, %8 : vector<256x1xf32>
    %10 = vector.broadcast %9 : vector<256x1xf32> to vector<256x32xf32>
    %11 = arith.subf %1, %10 : vector<256x32xf32>
    %12 = arith.mulf %11, %11 : vector<256x32xf32>
    %cst_10 = arith.constant dense<0.000000e+00> : vector<256xf32>
    %13 = vector.multi_reduction <add>, %12, %cst_10 [1] : vector<256x32xf32> to vector<256xf32>
    %14 = vector.shape_cast %13 : vector<256xf32> to vector<256x1xf32>
    %cst_11 = arith.constant 3.200000e+01 : f32
    %15 = vector.broadcast %cst_11 : f32 to vector<256x1xf32>
    %16 = arith.divf %14, %15 : vector<256x1xf32>
    %cst_12 = arith.constant 9.99999974E-6 : f32
    %17 = vector.broadcast %cst_12 : f32 to vector<256x1xf32>
    %18 = arith.addf %16, %17 : vector<256x1xf32>
    %19 = math.rsqrt %18 : vector<256x1xf32>
    %20 = vector.broadcast %19 : vector<256x1xf32> to vector<256x32xf32>
    %21 = arith.mulf %11, %20 : vector<256x32xf32>
    %22 = vector.broadcast %4 : vector<1x32xf32> to vector<256x32xf32>
    %23 = arith.mulf %21, %22 : vector<256x32xf32>
    %24 = vector.broadcast %5 : vector<1x32xf32> to vector<256x32xf32>
    %25 = arith.addf %23, %24 : vector<256x32xf32>
    %26 = arith.truncf %25 : vector<256x32xf32> to vector<256x32xbf16>
    %c0_13 = arith.constant 0 : index
    %c0_14 = arith.constant 0 : index
    %27 = vector.load %arg5[%c0_13, %c0_14] : memref<1x32xf32, #tpu.memory_space<vmem>>, vector<1x32xf32>
    %c0_15 = arith.constant 0 : index
    %c0_16 = arith.constant 0 : index
    %28 = vector.load %arg6[%c0_15, %c0_16] : memref<1x32xf32, #tpu.memory_space<vmem>>, vector<1x32xf32>
    %cst_17 = arith.constant dense<0.000000e+00> : vector<128xf32>
    %29 = vector.multi_reduction <add>, %3, %cst_17 [1] : vector<128x32xf32> to vector<128xf32>
    %30 = vector.shape_cast %29 : vector<128xf32> to vector<128x1xf32>
    %cst_18 = arith.constant 3.200000e+01 : f32
    %31 = vector.broadcast %cst_18 : f32 to vector<128x1xf32>
    %32 = arith.divf %30, %31 : vector<128x1xf32>
    %33 = vector.broadcast %32 : vector<128x1xf32> to vector<128x32xf32>
    %34 = arith.subf %3, %33 : vector<128x32xf32>
    %35 = arith.mulf %34, %34 : vector<128x32xf32>
    %cst_19 = arith.constant dense<0.000000e+00> : vector<128xf32>
    %36 = vector.multi_reduction <add>, %35, %cst_19 [1] : vector<128x32xf32> to vector<128xf32>
    %37 = vector.shape_cast %36 : vector<128xf32> to vector<128x1xf32>
    %cst_20 = arith.constant 3.200000e+01 : f32
    %38 = vector.broadcast %cst_20 : f32 to vector<128x1xf32>
    %39 = arith.divf %37, %38 : vector<128x1xf32>
    %cst_21 = arith.constant 9.99999974E-6 : f32
    %40 = vector.broadcast %cst_21 : f32 to vector<128x1xf32>
    %41 = arith.addf %39, %40 : vector<128x1xf32>
    %42 = math.rsqrt %41 : vector<128x1xf32>
    %43 = vector.broadcast %42 : vector<128x1xf32> to vector<128x32xf32>
    %44 = arith.mulf %34, %43 : vector<128x32xf32>
    %45 = vector.broadcast %27 : vector<1x32xf32> to vector<128x32xf32>
    %46 = arith.mulf %44, %45 : vector<128x32xf32>
    %47 = vector.broadcast %28 : vector<1x32xf32> to vector<128x32xf32>
    %48 = arith.addf %46, %47 : vector<128x32xf32>
    %49 = arith.truncf %48 : vector<128x32xf32> to vector<128x32xbf16>
    %c0_22 = arith.constant 0 : index
    %c0_23 = arith.constant 0 : index
    %50 = vector.load %arg7[%c0_22, %c0_23] : memref<32x32xbf16, #tpu.memory_space<vmem>>, vector<32x32xbf16>
    %cst_24 = arith.constant dense<0.000000e+00> : vector<128x32xf32>
    %51 = tpu.matmul %49, %50, %cst_24 {dimension_numbers = #tpu.dot_dimension_numbers<[1], [0], [0], [1], [0, 0, 1, 1], [], []>} : vector<128x32xbf16>, vector<32x32xbf16>, vector<128x32xf32> -> vector<128x32xf32>
    %c0_25 = arith.constant 0 : index
    %c0_26 = arith.constant 0 : index
    %52 = vector.load %arg8[%c0_25, %c0_26] : memref<1x32xf32, #tpu.memory_space<vmem>>, vector<1x32xf32>
    %53 = vector.broadcast %52 : vector<1x32xf32> to vector<128x32xf32>
    %54 = arith.addf %51, %53 : vector<128x32xf32>
    %55 = arith.truncf %54 : vector<128x32xf32> to vector<128x32xbf16>
    %c0_27 = arith.constant 0 : index
    %c0_28 = arith.constant 0 : index
    %56 = vector.load %arg9[%c0_27, %c0_28] : memref<32x64xbf16, #tpu.memory_space<vmem>>, vector<32x64xbf16>
    %cst_29 = arith.constant dense<0.000000e+00> : vector<256x64xf32>
    %57 = tpu.matmul %26, %56, %cst_29 {dimension_numbers = #tpu.dot_dimension_numbers<[1], [0], [0], [1], [0, 0, 1, 1], [], []>} : vector<256x32xbf16>, vector<32x64xbf16>, vector<256x64xf32> -> vector<256x64xf32>
    %c0_30 = arith.constant 0 : index
    %c0_31 = arith.constant 0 : index
    %58 = vector.load %arg10[%c0_30, %c0_31] : memref<1x64xf32, #tpu.memory_space<vmem>>, vector<1x64xf32>
    %59 = vector.broadcast %58 : vector<1x64xf32> to vector<256x64xf32>
    %60 = arith.addf %57, %59 : vector<256x64xf32>
    %61 = arith.truncf %60 : vector<256x64xf32> to vector<256x64xbf16>
    %c0_32 = arith.constant 0 : index
    %c0_33 = arith.constant 0 : index
    %62 = vector.load %arg4[%c0_32, %c0_33] : memref<128x256xf32, #tpu.memory_space<vmem>>, vector<128x256xf32>
    %63 = vector.extract_strided_slice %55 {offsets = [0, 0], sizes = [128, 8], strides = [1, 1]} : vector<128x32xbf16> to vector<128x8xbf16>
    %64 = vector.extract_strided_slice %61 {offsets = [0, 0], sizes = [256, 8], strides = [1, 1]} : vector<256x64xbf16> to vector<256x8xbf16>
    %65 = vector.extract_strided_slice %61 {offsets = [0, 32], sizes = [256, 8], strides = [1, 1]} : vector<256x64xbf16> to vector<256x8xbf16>
    %cst_34 = arith.constant dense<0.000000e+00> : vector<128x256xf32>
    %66 = tpu.matmul %63, %64, %cst_34 {dimension_numbers = #tpu.dot_dimension_numbers<[1], [1], [0], [0], [0, 0, 1, 0], [], []>} : vector<128x8xbf16>, vector<256x8xbf16>, vector<128x256xf32> -> vector<128x256xf32>
    %67 = arith.addf %66, %62 : vector<128x256xf32>
    %cst_35 = arith.constant dense<0xFF800000> : vector<128xf32>
    %68 = vector.multi_reduction <maximumf>, %67, %cst_35 [1] : vector<128x256xf32> to vector<128xf32>
    %69 = vector.shape_cast %68 : vector<128xf32> to vector<128x1xf32>
    %70 = vector.broadcast %69 : vector<128x1xf32> to vector<128x256xf32>
    %71 = arith.subf %67, %70 : vector<128x256xf32>
    %72 = math.exp %71 : vector<128x256xf32>
    %cst_36 = arith.constant dense<0.000000e+00> : vector<128xf32>
    %73 = vector.multi_reduction <add>, %72, %cst_36 [1] : vector<128x256xf32> to vector<128xf32>
    %74 = vector.shape_cast %73 : vector<128xf32> to vector<128x1xf32>
    %75 = tpu.reciprocal %74 {approx = true} : vector<128x1xf32> -> vector<128x1xf32>
    %76 = vector.broadcast %75 : vector<128x1xf32> to vector<128x256xf32>
    %77 = arith.mulf %72, %76 : vector<128x256xf32>
    %78 = arith.truncf %77 : vector<128x256xf32> to vector<128x256xbf16>
    %cst_37 = arith.constant dense<0.000000e+00> : vector<128x8xf32>
    %79 = tpu.matmul %78, %65, %cst_37 {dimension_numbers = #tpu.dot_dimension_numbers<[1], [0], [0], [1], [0, 0, 1, 1], [], []>} : vector<128x256xbf16>, vector<256x8xbf16>, vector<128x8xf32> -> vector<128x8xf32>
    %80 = vector.extract_strided_slice %55 {offsets = [0, 8], sizes = [128, 8], strides = [1, 1]} : vector<128x32xbf16> to vector<128x8xbf16>
    %81 = vector.extract_strided_slice %61 {offsets = [0, 8], sizes = [256, 8], strides = [1, 1]} : vector<256x64xbf16> to vector<256x8xbf16>
    %82 = vector.extract_strided_slice %61 {offsets = [0, 40], sizes = [256, 8], strides = [1, 1]} : vector<256x64xbf16> to vector<256x8xbf16>
    %cst_38 = arith.constant dense<0.000000e+00> : vector<128x256xf32>
    %83 = tpu.matmul %80, %81, %cst_38 {dimension_numbers = #tpu.dot_dimension_numbers<[1], [1], [0], [0], [0, 0, 1, 0], [], []>} : vector<128x8xbf16>, vector<256x8xbf16>, vector<128x256xf32> -> vector<128x256xf32>
    %84 = arith.addf %83, %62 : vector<128x256xf32>
    %cst_39 = arith.constant dense<0xFF800000> : vector<128xf32>
    %85 = vector.multi_reduction <maximumf>, %84, %cst_39 [1] : vector<128x256xf32> to vector<128xf32>
    %86 = vector.shape_cast %85 : vector<128xf32> to vector<128x1xf32>
    %87 = vector.broadcast %86 : vector<128x1xf32> to vector<128x256xf32>
    %88 = arith.subf %84, %87 : vector<128x256xf32>
    %89 = math.exp %88 : vector<128x256xf32>
    %cst_40 = arith.constant dense<0.000000e+00> : vector<128xf32>
    %90 = vector.multi_reduction <add>, %89, %cst_40 [1] : vector<128x256xf32> to vector<128xf32>
    %91 = vector.shape_cast %90 : vector<128xf32> to vector<128x1xf32>
    %92 = tpu.reciprocal %91 {approx = true} : vector<128x1xf32> -> vector<128x1xf32>
    %93 = vector.broadcast %92 : vector<128x1xf32> to vector<128x256xf32>
    %94 = arith.mulf %89, %93 : vector<128x256xf32>
    %95 = arith.truncf %94 : vector<128x256xf32> to vector<128x256xbf16>
    %cst_41 = arith.constant dense<0.000000e+00> : vector<128x8xf32>
    %96 = tpu.matmul %95, %82, %cst_41 {dimension_numbers = #tpu.dot_dimension_numbers<[1], [0], [0], [1], [0, 0, 1, 1], [], []>} : vector<128x256xbf16>, vector<256x8xbf16>, vector<128x8xf32> -> vector<128x8xf32>
    %97 = vector.extract_strided_slice %55 {offsets = [0, 16], sizes = [128, 8], strides = [1, 1]} : vector<128x32xbf16> to vector<128x8xbf16>
    %98 = vector.extract_strided_slice %61 {offsets = [0, 16], sizes = [256, 8], strides = [1, 1]} : vector<256x64xbf16> to vector<256x8xbf16>
    %99 = vector.extract_strided_slice %61 {offsets = [0, 48], sizes = [256, 8], strides = [1, 1]} : vector<256x64xbf16> to vector<256x8xbf16>
    %cst_42 = arith.constant dense<0.000000e+00> : vector<128x256xf32>
    %100 = tpu.matmul %97, %98, %cst_42 {dimension_numbers = #tpu.dot_dimension_numbers<[1], [1], [0], [0], [0, 0, 1, 0], [], []>} : vector<128x8xbf16>, vector<256x8xbf16>, vector<128x256xf32> -> vector<128x256xf32>
    %101 = arith.addf %100, %62 : vector<128x256xf32>
    %cst_43 = arith.constant dense<0xFF800000> : vector<128xf32>
    %102 = vector.multi_reduction <maximumf>, %101, %cst_43 [1] : vector<128x256xf32> to vector<128xf32>
    %103 = vector.shape_cast %102 : vector<128xf32> to vector<128x1xf32>
    %104 = vector.broadcast %103 : vector<128x1xf32> to vector<128x256xf32>
    %105 = arith.subf %101, %104 : vector<128x256xf32>
    %106 = math.exp %105 : vector<128x256xf32>
    %cst_44 = arith.constant dense<0.000000e+00> : vector<128xf32>
    %107 = vector.multi_reduction <add>, %106, %cst_44 [1] : vector<128x256xf32> to vector<128xf32>
    %108 = vector.shape_cast %107 : vector<128xf32> to vector<128x1xf32>
    %109 = tpu.reciprocal %108 {approx = true} : vector<128x1xf32> -> vector<128x1xf32>
    %110 = vector.broadcast %109 : vector<128x1xf32> to vector<128x256xf32>
    %111 = arith.mulf %106, %110 : vector<128x256xf32>
    %112 = arith.truncf %111 : vector<128x256xf32> to vector<128x256xbf16>
    %cst_45 = arith.constant dense<0.000000e+00> : vector<128x8xf32>
    %113 = tpu.matmul %112, %99, %cst_45 {dimension_numbers = #tpu.dot_dimension_numbers<[1], [0], [0], [1], [0, 0, 1, 1], [], []>} : vector<128x256xbf16>, vector<256x8xbf16>, vector<128x8xf32> -> vector<128x8xf32>
    %114 = vector.extract_strided_slice %55 {offsets = [0, 24], sizes = [128, 8], strides = [1, 1]} : vector<128x32xbf16> to vector<128x8xbf16>
    %115 = vector.extract_strided_slice %61 {offsets = [0, 24], sizes = [256, 8], strides = [1, 1]} : vector<256x64xbf16> to vector<256x8xbf16>
    %116 = vector.extract_strided_slice %61 {offsets = [0, 56], sizes = [256, 8], strides = [1, 1]} : vector<256x64xbf16> to vector<256x8xbf16>
    %cst_46 = arith.constant dense<0.000000e+00> : vector<128x256xf32>
    %117 = tpu.matmul %114, %115, %cst_46 {dimension_numbers = #tpu.dot_dimension_numbers<[1], [1], [0], [0], [0, 0, 1, 0], [], []>} : vector<128x8xbf16>, vector<256x8xbf16>, vector<128x256xf32> -> vector<128x256xf32>
    %118 = arith.addf %117, %62 : vector<128x256xf32>
    %cst_47 = arith.constant dense<0xFF800000> : vector<128xf32>
    %119 = vector.multi_reduction <maximumf>, %118, %cst_47 [1] : vector<128x256xf32> to vector<128xf32>
    %120 = vector.shape_cast %119 : vector<128xf32> to vector<128x1xf32>
    %121 = vector.broadcast %120 : vector<128x1xf32> to vector<128x256xf32>
    %122 = arith.subf %118, %121 : vector<128x256xf32>
    %123 = math.exp %122 : vector<128x256xf32>
    %cst_48 = arith.constant dense<0.000000e+00> : vector<128xf32>
    %124 = vector.multi_reduction <add>, %123, %cst_48 [1] : vector<128x256xf32> to vector<128xf32>
    %125 = vector.shape_cast %124 : vector<128xf32> to vector<128x1xf32>
    %126 = tpu.reciprocal %125 {approx = true} : vector<128x1xf32> -> vector<128x1xf32>
    %127 = vector.broadcast %126 : vector<128x1xf32> to vector<128x256xf32>
    %128 = arith.mulf %123, %127 : vector<128x256xf32>
    %129 = arith.truncf %128 : vector<128x256xf32> to vector<128x256xbf16>
    %cst_49 = arith.constant dense<0.000000e+00> : vector<128x8xf32>
    %130 = tpu.matmul %129, %116, %cst_49 {dimension_numbers = #tpu.dot_dimension_numbers<[1], [0], [0], [1], [0, 0, 1, 1], [], []>} : vector<128x256xbf16>, vector<256x8xbf16>, vector<128x8xf32> -> vector<128x8xf32>
    %131 = tpu.concatenate %79, %96, %113, %130 in 1 : vector<128x8xf32>, vector<128x8xf32>, vector<128x8xf32>, vector<128x8xf32> -> vector<128x32xf32>
    %132 = arith.truncf %131 : vector<128x32xf32> to vector<128x32xbf16>
    %c0_50 = arith.constant 0 : index
    %c0_51 = arith.constant 0 : index
    %133 = vector.load %arg11[%c0_50, %c0_51] : memref<32x32xbf16, #tpu.memory_space<vmem>>, vector<32x32xbf16>
    %cst_52 = arith.constant dense<0.000000e+00> : vector<128x32xf32>
    %134 = tpu.matmul %132, %133, %cst_52 {dimension_numbers = #tpu.dot_dimension_numbers<[1], [0], [0], [1], [0, 0, 1, 1], [], []>} : vector<128x32xbf16>, vector<32x32xbf16>, vector<128x32xf32> -> vector<128x32xf32>
    %c0_53 = arith.constant 0 : index
    %c0_54 = arith.constant 0 : index
    %135 = vector.load %arg12[%c0_53, %c0_54] : memref<1x32xf32, #tpu.memory_space<vmem>>, vector<1x32xf32>
    %136 = vector.broadcast %135 : vector<1x32xf32> to vector<128x32xf32>
    %137 = arith.addf %134, %136 : vector<128x32xf32>
    %138 = arith.addf %3, %137 : vector<128x32xf32>
    %c0_55 = arith.constant 0 : index
    %c0_56 = arith.constant 0 : index
    %139 = vector.load %arg13[%c0_55, %c0_56] : memref<1x32xf32, #tpu.memory_space<vmem>>, vector<1x32xf32>
    %c0_57 = arith.constant 0 : index
    %c0_58 = arith.constant 0 : index
    %140 = vector.load %arg14[%c0_57, %c0_58] : memref<1x32xf32, #tpu.memory_space<vmem>>, vector<1x32xf32>
    %cst_59 = arith.constant dense<0.000000e+00> : vector<128xf32>
    %141 = vector.multi_reduction <add>, %138, %cst_59 [1] : vector<128x32xf32> to vector<128xf32>
    %142 = vector.shape_cast %141 : vector<128xf32> to vector<128x1xf32>
    %cst_60 = arith.constant 3.200000e+01 : f32
    %143 = vector.broadcast %cst_60 : f32 to vector<128x1xf32>
    %144 = arith.divf %142, %143 : vector<128x1xf32>
    %145 = vector.broadcast %144 : vector<128x1xf32> to vector<128x32xf32>
    %146 = arith.subf %138, %145 : vector<128x32xf32>
    %147 = arith.mulf %146, %146 : vector<128x32xf32>
    %cst_61 = arith.constant dense<0.000000e+00> : vector<128xf32>
    %148 = vector.multi_reduction <add>, %147, %cst_61 [1] : vector<128x32xf32> to vector<128xf32>
    %149 = vector.shape_cast %148 : vector<128xf32> to vector<128x1xf32>
    %cst_62 = arith.constant 3.200000e+01 : f32
    %150 = vector.broadcast %cst_62 : f32 to vector<128x1xf32>
    %151 = arith.divf %149, %150 : vector<128x1xf32>
    %cst_63 = arith.constant 9.99999974E-6 : f32
    %152 = vector.broadcast %cst_63 : f32 to vector<128x1xf32>
    %153 = arith.addf %151, %152 : vector<128x1xf32>
    %154 = math.rsqrt %153 : vector<128x1xf32>
    %155 = vector.broadcast %154 : vector<128x1xf32> to vector<128x32xf32>
    %156 = arith.mulf %146, %155 : vector<128x32xf32>
    %157 = vector.broadcast %139 : vector<1x32xf32> to vector<128x32xf32>
    %158 = arith.mulf %156, %157 : vector<128x32xf32>
    %159 = vector.broadcast %140 : vector<1x32xf32> to vector<128x32xf32>
    %160 = arith.addf %158, %159 : vector<128x32xf32>
    %161 = arith.truncf %160 : vector<128x32xf32> to vector<128x32xbf16>
    %c0_64 = arith.constant 0 : index
    %c0_65 = arith.constant 0 : index
    %162 = vector.load %arg15[%c0_64, %c0_65] : memref<32x128xbf16, #tpu.memory_space<vmem>>, vector<32x128xbf16>
    %cst_66 = arith.constant dense<0.000000e+00> : vector<128x128xf32>
    %163 = tpu.matmul %161, %162, %cst_66 {dimension_numbers = #tpu.dot_dimension_numbers<[1], [0], [0], [1], [0, 0, 1, 1], [], []>} : vector<128x32xbf16>, vector<32x128xbf16>, vector<128x128xf32> -> vector<128x128xf32>
    %c0_67 = arith.constant 0 : index
    %c0_68 = arith.constant 0 : index
    %164 = vector.load %arg16[%c0_67, %c0_68] : memref<1x128xf32, #tpu.memory_space<vmem>>, vector<1x128xf32>
    %165 = vector.broadcast %164 : vector<1x128xf32> to vector<128x128xf32>
    %166 = arith.addf %163, %165 : vector<128x128xf32>
    %cst_69 = arith.constant 5.000000e-01 : f32
    %167 = vector.broadcast %cst_69 : f32 to vector<128x128xf32>
    %168 = arith.mulf %167, %166 : vector<128x128xf32>
    %cst_70 = arith.constant 0.707106769 : f32
    %169 = vector.broadcast %cst_70 : f32 to vector<128x128xf32>
    %170 = arith.mulf %166, %169 : vector<128x128xf32>
    %171 = math.erf %170 : vector<128x128xf32>
    %cst_71 = arith.constant 1.000000e+00 : f32
    %172 = vector.broadcast %cst_71 : f32 to vector<128x128xf32>
    %173 = arith.addf %172, %171 : vector<128x128xf32>
    %174 = arith.mulf %168, %173 : vector<128x128xf32>
    %175 = arith.truncf %174 : vector<128x128xf32> to vector<128x128xbf16>
    %c0_72 = arith.constant 0 : index
    %c0_73 = arith.constant 0 : index
    %176 = vector.load %arg17[%c0_72, %c0_73] : memref<128x32xbf16, #tpu.memory_space<vmem>>, vector<128x32xbf16>
    %cst_74 = arith.constant dense<0.000000e+00> : vector<128x32xf32>
    %177 = tpu.matmul %175, %176, %cst_74 {dimension_numbers = #tpu.dot_dimension_numbers<[1], [0], [0], [1], [0, 0, 1, 1], [], []>} : vector<128x128xbf16>, vector<128x32xbf16>, vector<128x32xf32> -> vector<128x32xf32>
    %c0_75 = arith.constant 0 : index
    %c0_76 = arith.constant 0 : index
    %178 = vector.load %arg18[%c0_75, %c0_76] : memref<1x32xf32, #tpu.memory_space<vmem>>, vector<1x32xf32>
    %179 = vector.broadcast %178 : vector<1x32xf32> to vector<128x32xf32>
    %180 = arith.addf %177, %179 : vector<128x32xf32>
    %181 = arith.addf %138, %180 : vector<128x32xf32>
    %c0_77 = arith.constant 0 : index
    %c0_78 = arith.constant 0 : index
    %c0_79 = arith.constant 0 : index
    %182 = vector.load %arg19[%c0_77, %c0_78, %c0_79] : memref<1x128x32xf32, #tpu.memory_space<vmem>>, vector<1x128x32xf32>
    %183 = vector.shape_cast %182 : vector<1x128x32xf32> to vector<128x32xf32>
    %184 = vector.shape_cast %181 : vector<128x32xf32> to vector<1x128x32xf32>
    tpu.vector_store %arg19[%c0_77, %c0_78, %c0_79], %184 {strides = array<i32>} : memref<1x128x32xf32, #tpu.memory_space<vmem>>, vector<1x128x32xf32>,
    return
  }
  func.func @transform_0(%arg0: i32, %arg1: i32) -> (i32, i32, i32) {
    %c0_i32 = arith.constant 0 : i32
    %c0_i32_0 = arith.constant 0 : i32
    %c0_i32_1 = arith.constant 0 : i32
    return %arg0, %c0_i32, %c0_i32_0 : i32, i32, i32
  }
  func.func @transform_1(%arg0: i32, %arg1: i32) -> (i32, i32, i32) {
    %c0_i32 = arith.constant 0 : i32
    %c0_i32_0 = arith.constant 0 : i32
    return %arg0, %arg1, %c0_i32 : i32, i32, i32
  }
  func.func @transform_2(%arg0: i32, %arg1: i32) -> (i32, i32) {
    %c0_i32 = arith.constant 0 : i32
    %c0_i32_0 = arith.constant 0 : i32
    return %arg1, %c0_i32 : i32, i32
  }
  func.func @transform_3(%arg0: i32, %arg1: i32) -> (i32, i32) {
    %c0_i32 = arith.constant 0 : i32
    %c0_i32_0 = arith.constant 0 : i32
    %c0_i32_1 = arith.constant 0 : i32
    return %c0_i32, %c0_i32_0 : i32, i32
  }
  func.func @transform_4(%arg0: i32, %arg1: i32) -> (i32, i32) {
    %c0_i32 = arith.constant 0 : i32
    %c0_i32_0 = arith.constant 0 : i32
    %c0_i32_1 = arith.constant 0 : i32
    return %c0_i32, %c0_i32_0 : i32, i32
  }
  func.func @transform_5(%arg0: i32, %arg1: i32) -> (i32, i32) {
    %c0_i32 = arith.constant 0 : i32
    %c0_i32_0 = arith.constant 0 : i32
    %c0_i32_1 = arith.constant 0 : i32
    return %c0_i32, %c0_i32_0 : i32, i32
  }
  func.func @transform_6(%arg0: i32, %arg1: i32) -> (i32, i32) {
    %c0_i32 = arith.constant 0 : i32
    %c0_i32_0 = arith.constant 0 : i32
    %c0_i32_1 = arith.constant 0 : i32
    return %c0_i32, %c0_i32_0 : i32, i32
  }
  func.func @transform_7(%arg0: i32, %arg1: i32) -> (i32, i32) {
    %c0_i32 = arith.constant 0 : i32
    %c0_i32_0 = arith.constant 0 : i32
    %c0_i32_1 = arith.constant 0 : i32
    return %c0_i32, %c0_i32_0 : i32, i32
  }
  func.func @transform_8(%arg0: i32, %arg1: i32) -> (i32, i32) {
    %c0_i32 = arith.constant 0 : i32
    %c0_i32_0 = arith.constant 0 : i32
    %c0_i32_1 = arith.constant 0 : i32
    return %c0_i32, %c0_i32_0 : i32, i32
  }
  func.func @transform_9(%arg0: i32, %arg1: i32) -> (i32, i32) {
    %c0_i32 = arith.constant 0 : i32
    %c0_i32_0 = arith.constant 0 : i32
    %c0_i32_1 = arith.constant 0 : i32
    return %c0_i32, %c0_i32_0 : i32, i32
  }
  func.func @transform_10(%arg0: i32, %arg1: i32) -> (i32, i32) {
    %c0_i32 = arith.constant 0 : i32
    %c0_i32_0 = arith.constant 0 : i32
    %c0_i32_1 = arith.constant 0 : i32
    return %c0_i32, %c0_i32_0 : i32, i32
  }
  func.func @transform_11(%arg0: i32, %arg1: i32) -> (i32, i32) {
    %c0_i32 = arith.constant 0 : i32
    %c0_i32_0 = arith.constant 0 : i32
    %c0_i32_1 = arith.constant 0 : i32
    return %c0_i32, %c0_i32_0 : i32, i32
  }
  func.func @transform_12(%arg0: i32, %arg1: i32) -> (i32, i32) {
    %c0_i32 = arith.constant 0 : i32
    %c0_i32_0 = arith.constant 0 : i32
    %c0_i32_1 = arith.constant 0 : i32
    return %c0_i32, %c0_i32_0 : i32, i32
  }
  func.func @transform_13(%arg0: i32, %arg1: i32) -> (i32, i32) {
    %c0_i32 = arith.constant 0 : i32
    %c0_i32_0 = arith.constant 0 : i32
    %c0_i32_1 = arith.constant 0 : i32
    return %c0_i32, %c0_i32_0 : i32, i32
  }
  func.func @transform_14(%arg0: i32, %arg1: i32) -> (i32, i32) {
    %c0_i32 = arith.constant 0 : i32
    %c0_i32_0 = arith.constant 0 : i32
    %c0_i32_1 = arith.constant 0 : i32
    return %c0_i32, %c0_i32_0 : i32, i32
  }
  func.func @transform_15(%arg0: i32, %arg1: i32) -> (i32, i32) {
    %c0_i32 = arith.constant 0 : i32
    %c0_i32_0 = arith.constant 0 : i32
    %c0_i32_1 = arith.constant 0 : i32
    return %c0_i32, %c0_i32_0 : i32, i32
  }
  func.func @transform_16(%arg0: i32, %arg1: i32) -> (i32, i32) {
    %c0_i32 = arith.constant 0 : i32
    %c0_i32_0 = arith.constant 0 : i32
    %c0_i32_1 = arith.constant 0 : i32
    return %c0_i32, %c0_i32_0 : i32, i32
  }
  func.func @transform_17(%arg0: i32, %arg1: i32) -> (i32, i32, i32) {
    %c0_i32 = arith.constant 0 : i32
    %c0_i32_0 = arith.constant 0 : i32
    return %arg0, %arg1, %c0_i32 : i32, i32, i32
  }
}

</mosaic_0001>

<bundles_post_ra>
// kernel: slide_layer_3d_forward.2
= control target key start
LH: loop header
LB: loop body
LE: loop exit
PB: predicated region body
PF: predicated region fallthrough
CT: control target
= control target key end

     0   :  { %s7266_s24 = smov 0   ;;  %s7268_s25 = smov 0   ;;  %s11018_s0 = inlined_call_operand.vmem [shape: f32[2,256,32], index: 0, kind: input, shape index: {}, may-alias: {0,1}]   ;;  %s11019_s1 = inlined_call_operand.vmem [shape: f32[2,256,32], index: 1, kind: input, shape index: {}, may-alias: {0,1}]   ;;  %s11020_s2 = inlined_call_operand.vmem [shape: f32[256,256], index: 2, kind: input, shape index: {}]   ;;  %s11021_s3 = inlined_call_operand.vmem [shape: f32[1,32], index: 3, kind: input, shape index: {}]   ;;  %s11022_s4 = inlined_call_operand.vmem [shape: f32[1,32], index: 4, kind: input, shape index: {}]   ;;  %s11023_s5 = inlined_call_operand.vmem [shape: bf16[32,32], index: 5, kind: input, shape index: {}]   ;;  %s11024_s6 = inlined_call_operand.vmem [shape: f32[1,32], index: 6, kind: input, shape index: {}]   ;;  %s11025_s7 = inlined_call_operand.vmem [shape: bf16[32,64], index: 7, kind: input, shape index: {}]   ;;  %s11026_s8 = inlined_call_operand.vmem [shape: f32[1,64], index: 8, kind: input, shape index: {}]   ;;  %s11027_s9 = inlined_call_operand.vmem [shape: bf16[32,32], index: 9, kind: input, shape index: {}]   ;;  %s11028_s10 = inlined_call_operand.vmem [shape: f32[1,32], index: 10, kind: input, shape index: {}]   ;;  %s11029_s11 = inlined_call_operand.vmem [shape: f32[1,32], index: 11, kind: input, shape index: {}]   ;;  %s11030_s12 = inlined_call_operand.vmem [shape: f32[1,32], index: 12, kind: input, shape index: {}]   ;;  %s11031_s13 = inlined_call_operand.vmem [shape: bf16[32,128], index: 13, kind: input, shape index: {}]   ;;  %s11032_s14 = inlined_call_operand.vmem [shape: f32[1,128], index: 14, kind: input, shape index: {}]   ;;  %s11033_s15 = inlined_call_operand.vmem [shape: bf16[128,32], index: 15, kind: input, shape index: {}]   ;;  %s11034_s16 = inlined_call_operand.vmem [shape: f32[1,32], index: 16, kind: input, shape index: {}]   ;;  %s11035_s17 = inlined_call_operand.vmem [shape: f32[2,256,32], index: 17, kind: output, shape index: {}]  }
   0x1   :  { %11253 = sst [smem:[#allocation127_spill]] %s11018_s0  ;;  %s7270_s26 = smov 0  }
   0x2   :  { %11254 = sst [smem:[#allocation128_spill]] %s11019_s1  ;;  %s7272_s27 = smov 0  }
   0x3   :  { %s7274_s28 = smov 0  }
   0x4 LB: > { %s36_s29 = sadd.s32 1, %s7156_s26  ;;  %s39_s0 = sadd.s32 1, %s7160_s27  ;;  %s7164_s28 = sphi %s7274_s28, %s27_s28   ;;  %s7160_s27 = sphi %s7272_s27, %s11812_s27   ;;  %s7156_s26 = sphi %s7270_s26, %s11811_s26   ;;  %s7152_s25 = sphi %s7268_s25, %s11810_s25   ;;  %s7148_s24 = sphi %s7266_s24, %s11809_s24  }
   0x5   : > { %p37_p0 = scmp.ge.s32.totalorder %s36_s29, 2  ;;  %p5609_p1 = scmp.ge.s32.totalorder %s7164_s28, 1 }
   0x6   : > { %p530_p2 = scmp.lt.s32.totalorder %s7164_s28, 5 }
   0x7   : > { %s11814_s29 = smov (%p37_p0, %s36_s29), 0  ;;  %s11816_s0 = smov (!%p37_p0, %s39_s0), %s7160_s27 }
   0x8   : > { %p531_p3 = pnand %p5609_p1, %p530_p2  ;;  %p41_p4 = scmp.ge.s32.totalorder %s11816_s0, 2 }
   0xa   : > { %s11818_s0 = smov (%p41_p4, %s11816_s0), 0  ;;  %534 = sbr.rel (%p531_p3) target bundleno = 3255 (0xcb7), region = 88 }
   0xf   : > { %p601_p5 = scmp.lt.s32.totalorder %s7152_s25, 1  ;;  %vm684_vm0 = vcmask 261120   ;;  %s11255_s1 = sld [smem:[#allocation127_spill]]  ;;  %vm1874_vm1 = vcmask 64512   ;;  %vm4595_vm2 = vcmask 130048   ;;  %vm4612_vm3 = vcmask 195584  }
  0x10   : > { %s5612_s21 = sshll.u32 %s7148_s24, 4  ;;  %s11256_s18 = sld [smem:[#allocation128_spill]] }
  0x11   : > { %s11820_s25 = smov (!%p601_p5, %s7152_s25), 1  ;;  %p609_p6 = scmp.lt.s32.totalorder %s5612_s21, 31 }
  0x12   : > { %s5720_s30 = sshll.u32 %s11820_s25, 8  ;;  %s5613_s22 = sshll.u32 %s11820_s25, 5 }
  0x13   : > { %s11822_s21 = smov (!%p609_p6, %s5612_s21), 31  ;;  %s7167_s25 = smov 120  }
  0x14   : > { %s7451_s23 = sadd.s32 %s5613_s22, %s11822_s21  ;;  %s7166_s22 = smov 112  }
  0x15   : > { %s7304_s20 = scalar_lea.vmem %s11255_s1, %s5720_s30  ;;  %s11040_s24 = sshll.u32 %s7451_s23, 3 }
  0x16   : > { %v7307_v0 = vld [vmem:[%s7304_s20] sm:$0xff]  ;;  %v7310_v1 = vld [vmem:[%s7304_s20 + $0x10] sm:$0xff]  ;;  %v7313_v2 = vld [vmem:[%s7304_s20 + $0x8] sm:$0xff]  ;;  %s7475_s19 = scalar_lea.vmem %s11256_s18, %s11040_s24  ;;  %s7168_s30 = smov 104  }
  0x17   : > { %v685_v3 = vsel %vm684_vm0, %v7307_v0, 0.0  ;;  %v691_v4 = vsel %vm684_vm0, %v7310_v1, 0.0  ;;  %v7320_v5 = vld [vmem:[%s7304_s20 + $0x18] sm:$0xff]  ;;  %v688_v6 = vsel %vm684_vm0, %v7313_v2, 0.0  ;;  %v7327_v8 = vld [vmem:[%s7304_s20 + $0x20] sm:$0xff]  ;;  %v7330_v9 = vld [vmem:[%s7304_s20 + $0x28] sm:$0xff] }
  0x18   : > { %686 = vadd.xlane.f32.xlu0 %v685_v3  ;;  %692 = vadd.xlane.f32.xlu1 %v691_v4  ;;  %v694_v7 = vsel %vm684_vm0, %v7320_v5, 0.0  ;;  %v697_v10 = vsel %vm684_vm0, %v7327_v8, 0.0  ;;  %v700_v11 = vsel %vm684_vm0, %v7330_v9, 0.0  ;;  %v7337_v12 = vld [vmem:[%s7304_s20 + $0x30] sm:$0xff]  ;;  %v7340_v13 = vld [vmem:[%s7304_s20 + $0x38] sm:$0xff]  ;;  %v7343_v14 = vld [vmem:[%s7304_s20 + $0x40] sm:$0xff] }
  0x19   : > { %v7346_v15 = vld [vmem:[%s7304_s20 + $0x48] sm:$0xff]  ;;  %v7349_v16 = vld [vmem:[%s7304_s20 + $0x50] sm:$0xff]  ;;  %v7352_v17 = vld [vmem:[%s7304_s20 + $0x58] sm:$0xff]  ;;  %v703_v18 = vsel %vm684_vm0, %v7337_v12, 0.0  ;;  %v706_v19 = vsel %vm684_vm0, %v7340_v13, 0.0  ;;  %v709_v20 = vsel %vm684_vm0, %v7343_v14, 0.0 }
  0x1a   : > { %v712_v21 = vsel %vm684_vm0, %v7346_v15, 0.0  ;;  %v715_v22 = vsel %vm684_vm0, %v7349_v16, 0.0  ;;  %v718_v23 = vsel %vm684_vm0, %v7352_v17, 0.0  ;;  %v7367_v24 = vld [vmem:[%s7304_s20 + $0x60] sm:$0xff]  ;;  %v7370_v25 = vld [vmem:[%s7304_s20 + $0x68] sm:$0xff]  ;;  %v7377_v28 = vld [vmem:[%s7304_s20 + $0x70] sm:$0xff] }
  0x1b   : > { %v721_v26 = vsel %vm684_vm0, %v7367_v24, 0.0  ;;  %v724_v27 = vsel %vm684_vm0, %v7370_v25, 0.0  ;;  %v7380_v29 = vld [vmem:[%s7304_s20 + $0x78] sm:$0xff]  ;;  %v727_v30 = vsel %vm684_vm0, %v7377_v28, 0.0  ;;  %v7387_v32 = vld [vmem:[%s7304_s20 + $0x80] sm:$0xff]  ;;  %v7390_v33 = vld [vmem:[%s7304_s20 + $0x88] sm:$0xff] }
  0x1c   : > { %689 = vadd.xlane.f32.xlu0 %v688_v6  ;;  %695 = vadd.xlane.f32.xlu1 %v694_v7  ;;  %v730_v31 = vsel %vm684_vm0, %v7380_v29, 0.0  ;;  %v733_v34 = vsel %vm684_vm0, %v7387_v32, 0.0  ;;  %v736_v35 = vsel %vm684_vm0, %v7390_v33, 0.0  ;;  %v7397_v36 = vld [vmem:[%s7304_s20 + $0x90] sm:$0xff]  ;;  %v7400_v37 = vld [vmem:[%s7304_s20 + $0x98] sm:$0xff]  ;;  %v7407_v40 = vld [vmem:[%s7304_s20 + $0xa0] sm:$0xff] }
  0x1d   : > { %v739_v38 = vsel %vm684_vm0, %v7397_v36, 0.0  ;;  %v742_v39 = vsel %vm684_vm0, %v7400_v37, 0.0  ;;  %v7410_v41 = vld [vmem:[%s7304_s20 + $0xa8] sm:$0xff]  ;;  %v745_v42 = vsel %vm684_vm0, %v7407_v40, 0.0  ;;  %v7417_v44 = vld [vmem:[%s7304_s20 + $0xb0] sm:$0xff]  ;;  %v7420_v45 = vld [vmem:[%s7304_s20 + $0xb8] sm:$0xff] }
  0x1e   : > { %v748_v43 = vsel %vm684_vm0, %v7410_v41, 0.0  ;;  %v751_v46 = vsel %vm684_vm0, %v7417_v44, 0.0  ;;  %v754_v47 = vsel %vm684_vm0, %v7420_v45, 0.0  ;;  %v7428_v48 = vld [vmem:[%s7304_s20 + $0xc0] sm:$0xff]  ;;  %v7431_v49 = vld [vmem:[%s7304_s20 + $0xc8] sm:$0xff]  ;;  %v7440_v52 = vld [vmem:[%s7304_s20 + $0xd0] sm:$0xff] }
  0x1f   : > { %v757_v50 = vsel %vm684_vm0, %v7428_v48, 0.0  ;;  %v760_v51 = vsel %vm684_vm0, %v7431_v49, 0.0  ;;  %v7443_v53 = vld [vmem:[%s7304_s20 + $0xd8] sm:$0xff]  ;;  %v763_v54 = vsel %vm684_vm0, %v7440_v52, 0.0  ;;  %v7454_v56 = vld [vmem:[%s7304_s20 + $0xe0] sm:$0xff]  ;;  %v7457_v57 = vld [vmem:[%s7304_s20 + $0xe8] sm:$0xff] }
  0x20   : > { %698 = vadd.xlane.f32.xlu0 %v697_v10  ;;  %701 = vadd.xlane.f32.xlu1 %v700_v11  ;;  %v766_v55 = vsel %vm684_vm0, %v7443_v53, 0.0  ;;  %v769_v58 = vsel %vm684_vm0, %v7454_v56, 0.0  ;;  %v772_v59 = vsel %vm684_vm0, %v7457_v57, 0.0  ;;  %v7465_v60 = vld [vmem:[%s7304_s20 + $0xf0] sm:$0xff]  ;;  %v7468_v61 = vld [vmem:[%s7304_s20 + $0xf8] sm:$0xff]  ;;  %v7482_v3 = vld [vmem:[%s7475_s19] sm:$0xff] }
  0x21   : > { %v775_v62 = vsel %vm684_vm0, %v7465_v60, 0.0  ;;  %v778_v63 = vsel %vm684_vm0, %v7468_v61, 0.0  ;;  %v7485_v4 = vld [vmem:[%s7475_s19 + $0x8] sm:$0xff]  ;;  %v1194_v6 = vsel %vm684_vm0, %v7482_v3, 0.0  ;;  %v7492_v10 = vld [vmem:[%s7475_s19 + $0x10] sm:$0xff]  ;;  %v7495_v11 = vld [vmem:[%s7475_s19 + $0x18] sm:$0xff] }
  0x22   : > { %v1197_v7 = vsel %vm684_vm0, %v7485_v4, 0.0  ;;  %s7169_s18 = smov 96   ;;  %s7170_s1 = smov 88  }
  0x23   : > { %s7171_s24 = smov 80   ;;  %s7174_s20 = smov 16  }
  0x24   : > { %704 = vadd.xlane.f32.xlu0 %v703_v18  ;;  %707 = vadd.xlane.f32.xlu1 %v706_v19  ;;  %v1200_v18 = vsel %vm684_vm0, %v7492_v10, 0.0  ;;  %v1203_v19 = vsel %vm684_vm0, %v7495_v11, 0.0 }
  0x28   : > { %710 = vadd.xlane.f32.xlu0 %v709_v20  ;;  %713 = vadd.xlane.f32.xlu1 %v712_v21  ;;  %v7502_v20 = vld [vmem:[%s7475_s19 + $0x20] sm:$0xff]  ;;  %v7505_v21 = vld [vmem:[%s7475_s19 + $0x28] sm:$0xff] }
  0x2c   : > { %716 = vadd.xlane.f32.xlu0 %v715_v22  ;;  %719 = vadd.xlane.f32.xlu1 %v718_v23  ;;  %v1206_v22 = vsel %vm684_vm0, %v7502_v20, 0.0  ;;  %v1209_v23 = vsel %vm684_vm0, %v7505_v21, 0.0 }
  0x30   : > { %722 = vadd.xlane.f32.xlu0 %v721_v26  ;;  %725 = vadd.xlane.f32.xlu1 %v724_v27 }
  0x34   : > { %728 = vadd.xlane.f32.xlu0 %v727_v30  ;;  %731 = vadd.xlane.f32.xlu1 %v730_v31 }
  0x38   : > { %734 = vadd.xlane.f32.xlu0 %v733_v34  ;;  %737 = vadd.xlane.f32.xlu1 %v736_v35 }
  0x3c   : > { %740 = vadd.xlane.f32.xlu0 %v739_v38  ;;  %743 = vadd.xlane.f32.xlu1 %v742_v39 }
  0x40   : > { %746 = vadd.xlane.f32.xlu0 %v745_v42  ;;  %749 = vadd.xlane.f32.xlu1 %v748_v43 }
  0x44   : > { %752 = vadd.xlane.f32.xlu0 %v751_v46  ;;  %755 = vadd.xlane.f32.xlu1 %v754_v47 }
  0x48   : > { %758 = vadd.xlane.f32.xlu0 %v757_v50  ;;  %761 = vadd.xlane.f32.xlu1 %v760_v51 }
  0x4c   : > { %764 = vadd.xlane.f32.xlu0 %v763_v54  ;;  %767 = vadd.xlane.f32.xlu1 %v766_v55 }
  0x50   : > { %770 = vadd.xlane.f32.xlu0 %v769_v58  ;;  %773 = vadd.xlane.f32.xlu1 %v772_v59 }
  0x54   : > { %776 = vadd.xlane.f32.xlu0 %v775_v62  ;;  %779 = vadd.xlane.f32.xlu1 %v778_v63 }
  0x58   : > { %1195 = vadd.xlane.f32.xlu0 %v1194_v6  ;;  %1198 = vadd.xlane.f32.xlu1 %v1197_v7 }
  0x5c   : > { %1201 = vadd.xlane.f32.xlu0 %v1200_v18  ;;  %1204 = vadd.xlane.f32.xlu1 %v1203_v19 }
  0x60   : > { %1207 = vadd.xlane.f32.xlu0 %v1206_v22  ;;  %1210 = vadd.xlane.f32.xlu1 %v1209_v23 }
  0xa1   : > { %v687_v26 = vpop.xlane.xlu0 %686  ;;  %v693_v27 = vpop.xlane.xlu1 %692 }
  0xa2   : > { %v782_v30 = vmul.f32 0.03125, %v687_v26  ;;  %v784_v31 = vmul.f32 0.03125, %v693_v27 }
  0xa4   : > { %v7512_v34 = vsub.f32 %v7307_v0, %v782_v30  ;;  %v7515_v35 = vsub.f32 %v7310_v1, %v784_v31 }
  0xa5   : > { %v690_v38 = vpop.xlane.xlu0 %689  ;;  %v696_v39 = vpop.xlane.xlu1 %695 }
  0xa6   : > { %v783_v42 = vmul.f32 0.03125, %v690_v38  ;;  %v785_v43 = vmul.f32 0.03125, %v696_v39  ;;  %v846_v46 = vmul.f32 %v7512_v34, %v7512_v34  ;;  %v848_v47 = vmul.f32 %v7515_v35, %v7515_v35 }
  0xa8   : > { %v7522_v50 = vsub.f32 %v7313_v2, %v783_v42  ;;  %v7525_v51 = vsub.f32 %v7320_v5, %v785_v43  ;;  %v878_v0 = vsel %vm684_vm0, %v846_v46, 0.0  ;;  %v884_v55 = vsel %vm684_vm0, %v848_v47, 0.0 }
  0xa9   : > { %879 = vadd.xlane.f32.xlu0 %v878_v0  ;;  %v699_v1 = vpop.xlane.xlu0 %698  ;;  %v702_v54 = vpop.xlane.xlu1 %701 }
  0xaa   : > { %v786_v58 = vmul.f32 0.03125, %v699_v1  ;;  %v787_v59 = vmul.f32 0.03125, %v702_v54  ;;  %v847_v62 = vmul.f32 %v7522_v50, %v7522_v50  ;;  %v849_v63 = vmul.f32 %v7525_v51, %v7525_v51 }
  0xac   : > { %v7534_v2 = vsub.f32 %v7327_v8, %v786_v58  ;;  %v7537_v5 = vsub.f32 %v7330_v9, %v787_v59  ;;  %v881_v6 = vsel %vm684_vm0, %v847_v62, 0.0  ;;  %v887_v19 = vsel %vm684_vm0, %v849_v63, 0.0 }
  0xad   : > { %885 = vadd.xlane.f32.xlu0 %v884_v55  ;;  %882 = vadd.xlane.f32.xlu1 %v881_v6  ;;  %v705_v7 = vpop.xlane.xlu0 %704  ;;  %v708_v18 = vpop.xlane.xlu1 %707 }
  0xae   : > { %v788_v22 = vmul.f32 0.03125, %v705_v7  ;;  %v789_v23 = vmul.f32 0.03125, %v708_v18  ;;  %v850_v26 = vmul.f32 %v7534_v2, %v7534_v2  ;;  %v851_v8 = vmul.f32 %v7537_v5, %v7537_v5 }
  0xb0   : > { %v7546_v27 = vsub.f32 %v7337_v12, %v788_v22  ;;  %v7549_v9 = vsub.f32 %v7340_v13, %v789_v23  ;;  %v890_v30 = vsel %vm684_vm0, %v850_v26, 0.0  ;;  %v893_v39 = vsel %vm684_vm0, %v851_v8, 0.0 }
  0xb1   : > { %888 = vadd.xlane.f32.xlu1 %v887_v19  ;;  %891 = vadd.xlane.f32.xlu0 %v890_v30  ;;  %v711_v31 = vpop.xlane.xlu0 %710  ;;  %v714_v38 = vpop.xlane.xlu1 %713 }
  0xb2   : > { %v790_v42 = vmul.f32 0.03125, %v711_v31  ;;  %v791_v43 = vmul.f32 0.03125, %v714_v38  ;;  %v852_v46 = vmul.f32 %v7546_v27, %v7546_v27  ;;  %v853_v12 = vmul.f32 %v7549_v9, %v7549_v9 }
  0xb4   : > { %v7558_v47 = vsub.f32 %v7343_v14, %v790_v42  ;;  %v7561_v13 = vsub.f32 %v7346_v15, %v791_v43  ;;  %v896_v0 = vsel %vm684_vm0, %v852_v46, 0.0  ;;  %v899_v55 = vsel %vm684_vm0, %v853_v12, 0.0 }
  0xb5   : > { %894 = vadd.xlane.f32.xlu1 %v893_v39  ;;  %897 = vadd.xlane.f32.xlu0 %v896_v0  ;;  %v717_v1 = vpop.xlane.xlu0 %716  ;;  %v720_v54 = vpop.xlane.xlu1 %719 }
  0xb6   : > { %v792_v58 = vmul.f32 0.03125, %v717_v1  ;;  %v793_v59 = vmul.f32 0.03125, %v720_v54  ;;  %v854_v62 = vmul.f32 %v7558_v47, %v7558_v47  ;;  %v855_v14 = vmul.f32 %v7561_v13, %v7561_v13 }
  0xb8   : > { %v7570_v63 = vsub.f32 %v7349_v16, %v792_v58  ;;  %v7573_v15 = vsub.f32 %v7352_v17, %v793_v59  ;;  %v902_v6 = vsel %vm684_vm0, %v854_v62, 0.0  ;;  %v905_v19 = vsel %vm684_vm0, %v855_v14, 0.0 }
  0xb9   : > { %900 = vadd.xlane.f32.xlu1 %v899_v55  ;;  %903 = vadd.xlane.f32.xlu0 %v902_v6  ;;  %v723_v7 = vpop.xlane.xlu0 %722  ;;  %v726_v18 = vpop.xlane.xlu1 %725 }
  0xba   : > { %v794_v22 = vmul.f32 0.03125, %v723_v7  ;;  %v795_v23 = vmul.f32 0.03125, %v726_v18  ;;  %v856_v26 = vmul.f32 %v7570_v63, %v7570_v63  ;;  %v857_v16 = vmul.f32 %v7573_v15, %v7573_v15 }
  0xbc   : > { %v7582_v8 = vsub.f32 %v7367_v24, %v794_v22  ;;  %v7585_v17 = vsub.f32 %v7370_v25, %v795_v23  ;;  %v908_v30 = vsel %vm684_vm0, %v856_v26, 0.0  ;;  %v911_v39 = vsel %vm684_vm0, %v857_v16, 0.0 }
  0xbd   : > { %906 = vadd.xlane.f32.xlu1 %v905_v19  ;;  %909 = vadd.xlane.f32.xlu0 %v908_v30  ;;  %v729_v31 = vpop.xlane.xlu0 %728  ;;  %v732_v38 = vpop.xlane.xlu1 %731 }
  0xbe   : > { %v796_v42 = vmul.f32 0.03125, %v729_v31  ;;  %v797_v43 = vmul.f32 0.03125, %v732_v38  ;;  %v858_v46 = vmul.f32 %v7582_v8, %v7582_v8  ;;  %v859_v24 = vmul.f32 %v7585_v17, %v7585_v17 }
  0xc0   : > { %v7594_v12 = vsub.f32 %v7377_v28, %v796_v42  ;;  %v7597_v25 = vsub.f32 %v7380_v29, %v797_v43  ;;  %v914_v0 = vsel %vm684_vm0, %v858_v46, 0.0  ;;  %v917_v55 = vsel %vm684_vm0, %v859_v24, 0.0 }
  0xc1   : > { %912 = vadd.xlane.f32.xlu1 %v911_v39  ;;  %915 = vadd.xlane.f32.xlu0 %v914_v0  ;;  %v735_v1 = vpop.xlane.xlu0 %734  ;;  %v738_v54 = vpop.xlane.xlu1 %737 }
  0xc2   : > { %v798_v58 = vmul.f32 0.03125, %v735_v1  ;;  %v799_v59 = vmul.f32 0.03125, %v738_v54  ;;  %v860_v62 = vmul.f32 %v7594_v12, %v7594_v12  ;;  %v861_v28 = vmul.f32 %v7597_v25, %v7597_v25  ;;  %v6516_v1 = vld [vmem:[%s11025_s7 + $0x8] sm:$0xff]  }
  0xc3   : > { %6190 = vmatprep.subr.bf16.mxu1 %v6516_v1 }
  0xc4   : > { %v7606_v14 = vsub.f32 %v7387_v32, %v798_v58  ;;  %v7609_v29 = vsub.f32 %v7390_v33, %v799_v59  ;;  %v920_v6 = vsel %vm684_vm0, %v860_v62, 0.0  ;;  %v923_v19 = vsel %vm684_vm0, %v861_v28, 0.0  ;;  %6191 = vmatpush3.bf16.msra.mxu1 %v6516_v1 }
  0xc5   : > { %918 = vadd.xlane.f32.xlu1 %v917_v55  ;;  %921 = vadd.xlane.f32.xlu0 %v920_v6  ;;  %v741_v7 = vpop.xlane.xlu0 %740  ;;  %v744_v18 = vpop.xlane.xlu1 %743 }
  0xc6   : > { %v800_v22 = vmul.f32 0.03125, %v741_v7  ;;  %v801_v23 = vmul.f32 0.03125, %v744_v18  ;;  %v862_v26 = vmul.f32 %v7606_v14, %v7606_v14  ;;  %v863_v32 = vmul.f32 %v7609_v29, %v7609_v29  ;;  %v6517_v18 = vld [vmem:[%s11025_s7] sm:$0xff]  }
  0xc7   : > { %6192 = vmatprep.subr.bf16.mxu1 %v6517_v18 }
  0xc8   : > { %v7618_v16 = vsub.f32 %v7397_v36, %v800_v22  ;;  %v7621_v33 = vsub.f32 %v7400_v37, %v801_v23  ;;  %v926_v30 = vsel %vm684_vm0, %v862_v26, 0.0  ;;  %v929_v39 = vsel %vm684_vm0, %v863_v32, 0.0  ;;  %6193 = vmatpush3.bf16.msra.mxu1 %v6517_v18 }
  0xc9   : > { %924 = vadd.xlane.f32.xlu1 %v923_v19  ;;  %927 = vadd.xlane.f32.xlu0 %v926_v30  ;;  %v747_v31 = vpop.xlane.xlu0 %746  ;;  %v750_v38 = vpop.xlane.xlu1 %749 }
  0xca   : > { %v802_v42 = vmul.f32 0.03125, %v747_v31  ;;  %v803_v43 = vmul.f32 0.03125, %v750_v38  ;;  %v864_v46 = vmul.f32 %v7618_v16, %v7618_v16  ;;  %v865_v36 = vmul.f32 %v7621_v33, %v7621_v33 }
  0xcc   : > { %v7630_v24 = vsub.f32 %v7407_v40, %v802_v42  ;;  %v7633_v37 = vsub.f32 %v7410_v41, %v803_v43  ;;  %v932_v0 = vsel %vm684_vm0, %v864_v46, 0.0  ;;  %v935_v58 = vsel %vm684_vm0, %v865_v36, 0.0 }
  0xcd   : > { %930 = vadd.xlane.f32.xlu1 %v929_v39  ;;  %933 = vadd.xlane.f32.xlu0 %v932_v0  ;;  %v753_v54 = vpop.xlane.xlu0 %752  ;;  %v756_v55 = vpop.xlane.xlu1 %755 }
  0xce   : > { %v804_v59 = vmul.f32 0.03125, %v753_v54  ;;  %v805_v62 = vmul.f32 0.03125, %v756_v55  ;;  %v866_v40 = vmul.f32 %v7630_v24, %v7630_v24  ;;  %v867_v41 = vmul.f32 %v7633_v37, %v7633_v37 }
  0xd0   : > { %v7645_v28 = vsub.f32 %v7417_v44, %v804_v59  ;;  %v7648_v6 = vsub.f32 %v7420_v45, %v805_v62  ;;  %v938_v7 = vsel %vm684_vm0, %v866_v40, 0.0  ;;  %v941_v23 = vsel %vm684_vm0, %v867_v41, 0.0 }
  0xd1   : > { %936 = vadd.xlane.f32.xlu1 %v935_v58  ;;  %939 = vadd.xlane.f32.xlu0 %v938_v7  ;;  %v759_v19 = vpop.xlane.xlu0 %758  ;;  %v762_v22 = vpop.xlane.xlu1 %761 }
  0xd2   : > { %v806_v26 = vmul.f32 0.03125, %v759_v19  ;;  %v807_v32 = vmul.f32 0.03125, %v762_v22  ;;  %v868_v44 = vmul.f32 %v7645_v28, %v7645_v28  ;;  %v869_v45 = vmul.f32 %v7648_v6, %v7648_v6 }
  0xd4   : > { %v7660_v30 = vsub.f32 %v7428_v48, %v806_v26  ;;  %v7663_v31 = vsub.f32 %v7431_v49, %v807_v32  ;;  %v944_v38 = vsel %vm684_vm0, %v868_v44, 0.0  ;;  %v947_v43 = vsel %vm684_vm0, %v869_v45, 0.0 }
  0xd5   : > { %942 = vadd.xlane.f32.xlu1 %v941_v23  ;;  %945 = vadd.xlane.f32.xlu0 %v944_v38  ;;  %v765_v39 = vpop.xlane.xlu0 %764  ;;  %v768_v42 = vpop.xlane.xlu1 %767 }
  0xd6   : > { %v808_v46 = vmul.f32 0.03125, %v765_v39  ;;  %v809_v36 = vmul.f32 0.03125, %v768_v42  ;;  %v870_v0 = vmul.f32 %v7660_v30, %v7660_v30  ;;  %v871_v48 = vmul.f32 %v7663_v31, %v7663_v31 }
  0xd8   : > { %v7672_v1 = vsub.f32 %v7440_v52, %v808_v46  ;;  %v7675_v49 = vsub.f32 %v7443_v53, %v809_v36  ;;  %v950_v54 = vsel %vm684_vm0, %v870_v0, 0.0  ;;  %v953_v59 = vsel %vm684_vm0, %v871_v48, 0.0  ;;  %v7708_v46 = vld [vmem:[%s7475_s19 + $0x30] sm:$0xff]  ;;  %v7715_v0 = vld [vmem:[%s7475_s19 + $0x38] sm:$0xff]  ;;  %v7718_v48 = vld [vmem:[%s7475_s19 + $0x40] sm:$0xff] }
  0xd9   : > { %948 = vadd.xlane.f32.xlu1 %v947_v43  ;;  %951 = vadd.xlane.f32.xlu0 %v950_v54  ;;  %v771_v55 = vpop.xlane.xlu0 %770  ;;  %v774_v58 = vpop.xlane.xlu1 %773  ;;  %v1212_v36 = vsel %vm684_vm0, %v7708_v46, 0.0 }
  0xda   : > { %v810_v62 = vmul.f32 0.03125, %v771_v55  ;;  %v811_v40 = vmul.f32 0.03125, %v774_v58  ;;  %v872_v41 = vmul.f32 %v7672_v1, %v7672_v1  ;;  %v873_v52 = vmul.f32 %v7675_v49, %v7675_v49 }
  0xdb   : > { %v1215_v55 = vsel %vm684_vm0, %v7715_v0, 0.0  ;;  %v1218_v58 = vsel %vm684_vm0, %v7718_v48, 0.0 }
  0xdc   : > { %v7684_v7 = vsub.f32 %v7454_v56, %v810_v62  ;;  %v7687_v53 = vsub.f32 %v7457_v57, %v811_v40  ;;  %v956_v18 = vsel %vm684_vm0, %v872_v41, 0.0  ;;  %v959_v23 = vsel %vm684_vm0, %v873_v52, 0.0  ;;  %v7728_v62 = vld [vmem:[%s7475_s19 + $0x50] sm:$0xff] }
  0xdd   : > { %954 = vadd.xlane.f32.xlu1 %v953_v59  ;;  %957 = vadd.xlane.f32.xlu0 %v956_v18  ;;  %v777_v19 = vpop.xlane.xlu0 %776  ;;  %v780_v22 = vpop.xlane.xlu1 %779  ;;  %v7725_v59 = vld [vmem:[%s7475_s19 + $0x48] sm:$0xff]  ;;  %v1224_v18 = vsel %vm684_vm0, %v7728_v62, 0.0 }
  0xde   : > { %v812_v26 = vmul.f32 0.03125, %v777_v19  ;;  %v813_v32 = vmul.f32 0.03125, %v780_v22  ;;  %v874_v44 = vmul.f32 %v7684_v7, %v7684_v7  ;;  %v875_v56 = vmul.f32 %v7687_v53, %v7687_v53  ;;  %v7735_v22 = vld [vmem:[%s7475_s19 + $0x58] sm:$0xff] }
  0xdf   : > { %v1221_v52 = vsel %vm684_vm0, %v7725_v59, 0.0 }
  0xe0   : > { %v7696_v57 = vsub.f32 %v7465_v60, %v812_v26  ;;  %v7699_v45 = vsub.f32 %v7468_v61, %v813_v32  ;;  %v962_v38 = vsel %vm684_vm0, %v874_v44, 0.0  ;;  %v965_v39 = vsel %vm684_vm0, %v875_v56, 0.0 }
  0xe1   : > { %960 = vadd.xlane.f32.xlu1 %v959_v23  ;;  %963 = vadd.xlane.f32.xlu0 %v962_v38  ;;  %v1196_v54 = vpop.xlane.xlu0 %1195  ;;  %v1199_v40 = vpop.xlane.xlu1 %1198  ;;  %v7738_v23 = vld [vmem:[%s7475_s19 + $0x60] sm:$0xff]  ;;  %v1227_v44 = vsel %vm684_vm0, %v7735_v22, 0.0 }
  0xe2   : > { %v876_v42 = vmul.f32 %v7696_v57, %v7696_v57  ;;  %v877_v43 = vmul.f32 %v7699_v45, %v7699_v45  ;;  %v1242_v19 = vmul.f32 0.03125, %v1196_v54  ;;  %v1243_v26 = vmul.f32 0.03125, %v1199_v40 }
  0xe3   : > { %v1230_v56 = vsel %vm684_vm0, %v7738_v23, 0.0 }
  0xe4   : > { %v968_v60 = vsel %vm684_vm0, %v876_v42, 0.0  ;;  %v971_v61 = vsel %vm684_vm0, %v877_v43, 0.0  ;;  %v7745_v38 = vsub.f32 %v7482_v3, %v1242_v19  ;;  %v7751_v43 = vld [vmem:[%s7475_s19 + $0x70] sm:$0xff] }
  0xe5   : > { %966 = vadd.xlane.f32.xlu1 %v965_v39  ;;  %969 = vadd.xlane.f32.xlu0 %v968_v60  ;;  %v1202_v41 = vpop.xlane.xlu0 %1201  ;;  %v1205_v32 = vpop.xlane.xlu1 %1204  ;;  %v7748_v39 = vld [vmem:[%s7475_s19 + $0x68] sm:$0xff] }
  0xe6   : > { %v1244_v42 = vmul.f32 0.03125, %v1202_v41  ;;  %v1245_v54 = vmul.f32 0.03125, %v1205_v32  ;;  %v1274_v40 = vmul.f32 %v7745_v38, %v7745_v38 }
  0xe8   : > { %v7761_v3 = vsub.f32 %v7492_v10, %v1244_v42  ;;  %v1290_v10 = vsel %vm684_vm0, %v1274_v40, 0.0  ;;  %v6518_v40 = vld [vmem:[%s11023_s5 + $0x8] sm:$0xff]  }
  0xe9   : > { %972 = vadd.xlane.f32.xlu1 %v971_v61  ;;  %1213 = vadd.xlane.f32.xlu0 %v1212_v36  ;;  %v1208_v60 = vpop.xlane.xlu0 %1207  ;;  %v7754_v61 = vsub.f32 %v7485_v4, %v1243_v26  ;;  %v1233_v36 = vsel %vm684_vm0, %v7748_v39, 0.0  ;;  %v7769_v4 = vsub.f32 %v7495_v11, %v1245_v54 }
  0xea   : > { %11257 = vst [vmem:[#allocation2_spill] sm:$0xff] %v7761_v3  ;;  %v1246_v41 = vmul.f32 0.03125, %v1208_v60  ;;  %6170 = vmatprep.subr.bf16.mxu0 %v6518_v40 }
  0xeb   : > { %11258 = vst [vmem:[#allocation3_spill] sm:$0xff] %v7769_v4  ;;  %v1275_v19 = vmul.f32 %v7754_v61, %v7754_v61  ;;  %v1277_v60 = vmul.f32 %v7769_v4, %v7769_v4  ;;  %6171 = vmatpush3.bf16.msra.mxu0 %v6518_v40 }
  0xec   : > { %v7777_v26 = vsub.f32 %v7502_v20, %v1246_v41  ;;  %v6519_v41 = vld [vmem:[%s11023_s5] sm:$0xff]  }
  0xed   : > { %1216 = vadd.xlane.f32.xlu1 %v1215_v55  ;;  %1219 = vadd.xlane.f32.xlu0 %v1218_v58  ;;  %v1236_v55 = vsel %vm684_vm0, %v7751_v43, 0.0  ;;  %v7764_v58 = vld [vmem:[%s7475_s19 + $0x78] sm:$0xff]  ;;  %v1293_v11 = vsel %vm684_vm0, %v1275_v19, 0.0 }
  0xee   : > { %11259 = vst [vmem:[#allocation4_spill] sm:$0xff] %v7777_v26  ;;  %v1278_v20 = vmul.f32 %v7777_v26, %v7777_v26  ;;  %6172 = vmatprep.subr.bf16.mxu0 %v6519_v41 }
  0xef   : > { %6173 = vmatpush3.bf16.msra.mxu0 %v6519_v41 }
  0xf0   : > { %v1302_v54 = vsel %vm684_vm0, %v1278_v20, 0.0 }
  0xf1   : > { %1222 = vadd.xlane.f32.xlu1 %v1221_v52  ;;  %1225 = vadd.xlane.f32.xlu0 %v1224_v18  ;;  %v1211_v52 = vpop.xlane.xlu1 %1210  ;;  %v1239_v18 = vsel %vm684_vm0, %v7764_v58, 0.0 }
  0xf2   : > { %v1247_v32 = vmul.f32 0.03125, %v1211_v52 }
  0xf5   : > { %1228 = vadd.xlane.f32.xlu1 %v1227_v44  ;;  %1231 = vadd.xlane.f32.xlu0 %v1230_v56  ;;  %v1276_v44 = vmul.f32 %v7761_v3, %v7761_v3  ;;  %v7783_v56 = vsub.f32 %v7505_v21, %v1247_v32 }
  0xf7   : > { %11260 = vst [vmem:[#allocation5_spill] sm:$0xff] %v7783_v56  ;;  %v1296_v42 = vsel %vm684_vm0, %v1276_v44, 0.0 }
  0xf9   : > { %1234 = vadd.xlane.f32.xlu1 %v1233_v36  ;;  %1237 = vadd.xlane.f32.xlu0 %v1236_v55  ;;  %v1299_v36 = vsel %vm684_vm0, %v1277_v60, 0.0  ;;  %v1279_v55 = vmul.f32 %v7783_v56, %v7783_v56 }
  0xfb   : > { %v1305_v21 = vsel %vm684_vm0, %v1279_v55, 0.0 }
  0xfd   : > { %1240 = vadd.xlane.f32.xlu1 %v1239_v18  ;;  %1291 = vadd.xlane.f32.xlu0 %v1290_v10 }
 0x101   : > { %1294 = vadd.xlane.f32.xlu1 %v1293_v11  ;;  %1297 = vadd.xlane.f32.xlu0 %v1296_v42 }
 0x105   : > { %1300 = vadd.xlane.f32.xlu1 %v1299_v36  ;;  %1303 = vadd.xlane.f32.xlu0 %v1302_v54 }
 0x109   : > { %1306 = vadd.xlane.f32.xlu1 %v1305_v21 }
 0x132   : > { %v880_v52 = vpop.xlane.xlu0 %879 }
 0x133   : > { %v974_v18 = vmul.f32 0.03125, %v880_v52 }
 0x135   : > { %v1006_v19 = vadd.f32 1e-05, %v974_v18 }
 0x136   : > { %v883_v10 = vpop.xlane.xlu1 %882  ;;  %v886_v32 = vpop.xlane.xlu0 %885 }
 0x137   : > { %6532 = vrsqrt.f32 %v1006_v19  ;;  %v975_v44 = vmul.f32 0.03125, %v883_v10  ;;  %v976_v11 = vmul.f32 0.03125, %v886_v32 }
 0x139   : > { %v1007_v42 = vadd.f32 1e-05, %v975_v44  ;;  %v1008_v60 = vadd.f32 1e-05, %v976_v11 }
 0x13a   : > { %v889_v20 = vpop.xlane.xlu1 %888  ;;  %v892_v36 = vpop.xlane.xlu0 %891 }
 0x13b   : > { %6534 = vrsqrt.f32 %v1007_v42  ;;  %v977_v54 = vmul.f32 0.03125, %v889_v20  ;;  %v978_v55 = vmul.f32 0.03125, %v892_v36 }
 0x13c   : > { %6536 = vrsqrt.f32 %v1008_v60  ;;  %v7804_v60 = vld [vmem:[%s11021_s3] ss:$0 sm:$0xff] }
 0x13d   : > { %v1009_v21 = vadd.f32 1e-05, %v977_v54  ;;  %v1010_v40 = vadd.f32 1e-05, %v978_v55 }
 0x13e   : > { %v895_v56 = vpop.xlane.xlu1 %894  ;;  %v898_v41 = vpop.xlane.xlu0 %897 }
 0x13f   : > { %6538 = vrsqrt.f32 %v1009_v21  ;;  %v979_v52 = vmul.f32 0.03125, %v895_v56  ;;  %v980_v18 = vmul.f32 0.03125, %v898_v41 }
 0x140   : > { %6540 = vrsqrt.f32 %v1010_v40 }
 0x141   : > { %v1011_v26 = vadd.f32 1e-05, %v979_v52  ;;  %v1012_v19 = vadd.f32 1e-05, %v980_v18 }
 0x142   : > { %v901_v10 = vpop.xlane.xlu1 %900  ;;  %v904_v32 = vpop.xlane.xlu0 %903 }
 0x143   : > { %6542 = vrsqrt.f32 %v1011_v26  ;;  %v981_v44 = vmul.f32 0.03125, %v901_v10  ;;  %v982_v11 = vmul.f32 0.03125, %v904_v32 }
 0x144   : > { %v6533_v4 = vpop.eup %6532  ;;  %6544 = vrsqrt.f32 %v1012_v19  ;;  %v7811_v19 = vld [vmem:[%s11022_s4] ss:$0 sm:$0xff] }
 0x145   : > { %v1013_v42 = vadd.f32 1e-05, %v981_v44  ;;  %v1014_v20 = vadd.f32 1e-05, %v982_v11  ;;  %v1070_v56 = vmul.f32 %v6533_v4, %v7512_v34 }
 0x146   : > { %v907_v36 = vpop.xlane.xlu1 %906  ;;  %v910_v54 = vpop.xlane.xlu0 %909 }
 0x147   : > { %6546 = vrsqrt.f32 %v1013_v42  ;;  %v983_v55 = vmul.f32 0.03125, %v907_v36  ;;  %v984_v21 = vmul.f32 0.03125, %v910_v54  ;;  %v1108_v26 = vmul.f32 %v7804_v60, %v1070_v56 }
 0x148   : > { %v6535_v40 = vpop.eup %6534  ;;  %6548 = vrsqrt.f32 %v1014_v20 }
 0x149   : > { %v6537_v41 = vpop.eup %6536  ;;  %v1015_v52 = vadd.f32 1e-05, %v983_v55  ;;  %v1016_v18 = vadd.f32 1e-05, %v984_v21  ;;  %v1071_v10 = vmul.f32 %v6535_v40, %v7522_v50  ;;  %v1146_v56 = vadd.f32 %v7811_v19, %v1108_v26 }
 0x14a   : > { %v913_v34 = vpop.xlane.xlu1 %912  ;;  %v916_v4 = vpop.xlane.xlu0 %915  ;;  %v1072_v32 = vmul.f32 %v6537_v41, %v7515_v35 }
 0x14b   : > { %6550 = vrsqrt.f32 %v1015_v52  ;;  %v985_v44 = vmul.f32 0.03125, %v913_v34  ;;  %v986_v11 = vmul.f32 0.03125, %v916_v4  ;;  %v1109_v42 = vmul.f32 %v7804_v60, %v1071_v10 }
 0x14c   : > { %v6539_v20 = vpop.eup %6538  ;;  %6552 = vrsqrt.f32 %v1016_v18  ;;  %v1110_v35 = vmul.f32 %v7804_v60, %v1072_v32 }
 0x14d   : > { %v6541_v36 = vpop.eup %6540  ;;  %v1017_v54 = vadd.f32 1e-05, %v985_v44  ;;  %v1018_v55 = vadd.f32 1e-05, %v986_v11  ;;  %v1147_v21 = vadd.f32 %v7811_v19, %v1109_v42  ;;  %v1073_v50 = vmul.f32 %v6539_v20, %v7525_v51 }
 0x14e   : > { %v919_v40 = vpop.xlane.xlu1 %918  ;;  %v922_v3 = vpop.xlane.xlu0 %921  ;;  %v1074_v41 = vmul.f32 %v6541_v36, %v7534_v2  ;;  %v1148_v2 = vadd.f32 %v7811_v19, %v1110_v35 }
 0x14f   : > { %6554 = vrsqrt.f32 %v1017_v54  ;;  %v987_v52 = vmul.f32 0.03125, %v919_v40  ;;  %v988_v10 = vmul.f32 0.03125, %v922_v3  ;;  %v1178_v34 = vpack.c.bf16 %v1147_v21, %v1146_v56 }
 0x150   : > { %v6543_v18 = vpop.eup %6542  ;;  %6556 = vrsqrt.f32 %v1018_v55  ;;  %v1111_v26 = vmul.f32 %v7804_v60, %v1073_v50  ;;  %v1112_v4 = vmul.f32 %v7804_v60, %v1074_v41 }
 0x151   : > { %v6545_v44 = vpop.eup %6544  ;;  %v1019_v11 = vadd.f32 1e-05, %v987_v52  ;;  %v1020_v42 = vadd.f32 1e-05, %v988_v10  ;;  %6194 = vmatprep.mubr.msk.bf16.mxu1 %vm684_vm0, %v1178_v34  ;;  %v1075_v51 = vmul.f32 %v6543_v18, %v7537_v5 }
 0x152   : > { %v925_v32 = vpop.xlane.xlu1 %924  ;;  %v928_v20 = vpop.xlane.xlu0 %927  ;;  %v1149_v3 = vadd.f32 %v7811_v19, %v1111_v26  ;;  %v1076_v56 = vmul.f32 %v6545_v44, %v7546_v27  ;;  %v1150_v40 = vadd.f32 %v7811_v19, %v1112_v4 }
 0x153   : > { %6558 = vrsqrt.f32 %v1019_v11  ;;  %v989_v36 = vmul.f32 0.03125, %v925_v32  ;;  %v990_v54 = vmul.f32 0.03125, %v928_v20  ;;  %v1113_v55 = vmul.f32 %v7804_v60, %v1075_v51 }
 0x154   : > { %v6547_v21 = vpop.eup %6546  ;;  %6560 = vrsqrt.f32 %v1020_v42  ;;  %v1179_v50 = vpack.c.bf16 %v1149_v3, %v1148_v2  ;;  %v1114_v18 = vmul.f32 %v7804_v60, %v1076_v56 }
 0x155   : > { %v6549_v41 = vpop.eup %6548  ;;  %v1021_v5 = vadd.f32 1e-05, %v989_v36  ;;  %v1022_v52 = vadd.f32 1e-05, %v990_v54  ;;  %v1151_v10 = vadd.f32 %v7811_v19, %v1113_v55  ;;  %v1077_v35 = vmul.f32 %v6547_v21, %v7549_v9 }
 0x156   : > { %6195 = vmatmul.mubr.msk.bf16.vlgmr.msra.gmra.mxu1 %vm684_vm0, %v1179_v50  ;;  %v931_v27 = vpop.xlane.xlu1 %930  ;;  %v934_v34 = vpop.xlane.xlu0 %933  ;;  %v1078_v26 = vmul.f32 %v6549_v41, %v7558_v47  ;;  %v1152_v47 = vadd.f32 %v7811_v19, %v1114_v18 }
 0x157   : > { %6562 = vrsqrt.f32 %v1021_v5  ;;  %v991_v44 = vmul.f32 0.03125, %v931_v27  ;;  %v992_v11 = vmul.f32 0.03125, %v934_v34  ;;  %v1180_v42 = vpack.c.bf16 %v1151_v10, %v1150_v40 }
 0x158   : > { %v6551_v4 = vpop.eup %6550  ;;  %6564 = vrsqrt.f32 %v1022_v52  ;;  %v1115_v51 = vmul.f32 %v7804_v60, %v1077_v35  ;;  %v1116_v32 = vmul.f32 %v7804_v60, %v1078_v26 }
 0x159   : > { %v6553_v20 = vpop.eup %6552  ;;  %v1023_v9 = vadd.f32 1e-05, %v991_v44  ;;  %v1024_v2 = vadd.f32 1e-05, %v992_v11  ;;  %6198 = vmatprep.mubr.msk.bf16.mxu1 %vm684_vm0, %v1180_v42  ;;  %v1079_v3 = vmul.f32 %v6551_v4, %v7561_v13 }
 0x15a   : > { %v937_v56 = vpop.xlane.xlu1 %936  ;;  %v940_v36 = vpop.xlane.xlu0 %939  ;;  %v1153_v54 = vadd.f32 %v7811_v19, %v1115_v51  ;;  %v1080_v55 = vmul.f32 %v6553_v20, %v7570_v63  ;;  %v1154_v52 = vadd.f32 %v7811_v19, %v1116_v32 }
 0x15b   : > { %6566 = vrsqrt.f32 %v1023_v9  ;;  %v993_v21 = vmul.f32 0.03125, %v937_v56  ;;  %v994_v50 = vmul.f32 0.03125, %v940_v36  ;;  %v1117_v40 = vmul.f32 %v7804_v60, %v1079_v3 }
 0x15c   : > { %v6555_v41 = vpop.eup %6554  ;;  %6568 = vrsqrt.f32 %v1024_v2  ;;  %v1181_v5 = vpack.c.bf16 %v1153_v54, %v1152_v47  ;;  %v1118_v26 = vmul.f32 %v7804_v60, %v1080_v55 }
 0x15d   : > { %v6557_v10 = vpop.eup %6556  ;;  %v1025_v13 = vadd.f32 1e-05, %v993_v21  ;;  %v1026_v35 = vadd.f32 1e-05, %v994_v50  ;;  %v1155_v27 = vadd.f32 %v7811_v19, %v1117_v40  ;;  %v1081_v34 = vmul.f32 %v6555_v41, %v7573_v15 }
 0x15e   : > { %6199 = vmatmul.mubr.msk.bf16.gmra.mxu1 %vm684_vm0, %v1181_v5  ;;  %v943_v63 = vpop.xlane.xlu1 %942  ;;  %v946_v18 = vpop.xlane.xlu0 %945  ;;  %v1082_v44 = vmul.f32 %v6557_v10, %v7582_v8  ;;  %v1156_v8 = vadd.f32 %v7811_v19, %v1118_v26 }
 0x15f   : > { %6570 = vrsqrt.f32 %v1025_v13  ;;  %v995_v11 = vmul.f32 0.03125, %v943_v63  ;;  %v996_v42 = vmul.f32 0.03125, %v946_v18  ;;  %v1182_v4 = vpack.c.bf16 %v1155_v27, %v1154_v52 }
 0x160   : > { %v6559_v51 = vpop.eup %6558  ;;  %6572 = vrsqrt.f32 %v1026_v35  ;;  %v1119_v32 = vmul.f32 %v7804_v60, %v1081_v34  ;;  %v1120_v20 = vmul.f32 %v7804_v60, %v1082_v44 }
 0x161   : > { %v6561_v9 = vpop.eup %6560  ;;  %v1027_v15 = vadd.f32 1e-05, %v995_v11  ;;  %v1028_v2 = vadd.f32 1e-05, %v996_v42  ;;  %6202 = vmatprep.mubr.msk.bf16.mxu1 %vm684_vm0, %v1182_v4  ;;  %v1083_v3 = vmul.f32 %v6559_v51, %v7585_v17 }
 0x162   : > { %v949_v56 = vpop.xlane.xlu1 %948  ;;  %v952_v36 = vpop.xlane.xlu0 %951  ;;  %v1157_v47 = vadd.f32 %v7811_v19, %v1119_v32  ;;  %v1084_v54 = vmul.f32 %v6561_v9, %v7594_v12  ;;  %v1158_v5 = vadd.f32 %v7811_v19, %v1120_v20 }
 0x163   : > { %6574 = vrsqrt.f32 %v1027_v15  ;;  %v997_v55 = vmul.f32 0.03125, %v949_v56  ;;  %v998_v21 = vmul.f32 0.03125, %v952_v36  ;;  %v1121_v50 = vmul.f32 %v7804_v60, %v1083_v3 }
 0x164   : > { %v6563_v40 = vpop.eup %6562  ;;  %6576 = vrsqrt.f32 %v1028_v2  ;;  %v1183_v41 = vpack.c.bf16 %v1157_v47, %v1156_v8  ;;  %v1122_v34 = vmul.f32 %v7804_v60, %v1084_v54 }
 0x165   : > { %v6565_v52 = vpop.eup %6564  ;;  %v1029_v17 = vadd.f32 1e-05, %v997_v55  ;;  %v1030_v10 = vadd.f32 1e-05, %v998_v21  ;;  %v1159_v13 = vadd.f32 %v7811_v19, %v1121_v50  ;;  %v1085_v35 = vmul.f32 %v6563_v40, %v7597_v25 }
 0x166   : > { %6203 = vmatmul.mubr.msk.bf16.gmra.mxu1 %vm684_vm0, %v1183_v41  ;;  %v955_v12 = vpop.xlane.xlu1 %954  ;;  %v958_v27 = vpop.xlane.xlu0 %957  ;;  %v1086_v63 = vmul.f32 %v6565_v52, %v7606_v14  ;;  %v1160_v14 = vadd.f32 %v7811_v19, %v1122_v34 }
 0x167   : > { %6578 = vrsqrt.f32 %v1029_v17  ;;  %v999_v18 = vmul.f32 0.03125, %v955_v12  ;;  %v1000_v26 = vmul.f32 0.03125, %v958_v27  ;;  %v1184_v44 = vpack.c.bf16 %v1159_v13, %v1158_v5 }
 0x168   : > { %v6567_v11 = vpop.eup %6566  ;;  %6580 = vrsqrt.f32 %v1030_v10  ;;  %v1123_v42 = vmul.f32 %v7804_v60, %v1085_v35  ;;  %v1124_v4 = vmul.f32 %v7804_v60, %v1086_v63 }
 0x169   : > { %v6569_v51 = vpop.eup %6568  ;;  %v1031_v25 = vadd.f32 1e-05, %v999_v18  ;;  %v1032_v32 = vadd.f32 1e-05, %v1000_v26  ;;  %6206 = vmatprep.mubr.msk.bf16.mxu1 %vm684_vm0, %v1184_v44  ;;  %v1087_v20 = vmul.f32 %v6567_v11, %v7609_v29 }
 0x16a   : > { %v961_v9 = vpop.xlane.xlu1 %960  ;;  %v964_v15 = vpop.xlane.xlu0 %963  ;;  %v1161_v2 = vadd.f32 %v7811_v19, %v1123_v42  ;;  %v1088_v3 = vmul.f32 %v6569_v51, %v7618_v16  ;;  %v1162_v55 = vadd.f32 %v7811_v19, %v1124_v4 }
 0x16b   : > { %6582 = vrsqrt.f32 %v1031_v25  ;;  %v1001_v56 = vmul.f32 0.03125, %v961_v9  ;;  %v1002_v36 = vmul.f32 0.03125, %v964_v15  ;;  %v1125_v8 = vmul.f32 %v7804_v60, %v1087_v20 }
 0x16c   : > { %v6571_v47 = vpop.eup %6570  ;;  %6584 = vrsqrt.f32 %v1032_v32  ;;  %v1185_v54 = vpack.c.bf16 %v1161_v2, %v1160_v14  ;;  %v1126_v52 = vmul.f32 %v7804_v60, %v1088_v3 }
 0x16d   : > { %v6573_v21 = vpop.eup %6572  ;;  %v1033_v29 = vadd.f32 1e-05, %v1001_v56  ;;  %v1034_v50 = vadd.f32 1e-05, %v1002_v36  ;;  %v1163_v40 = vadd.f32 %v7811_v19, %v1125_v8  ;;  %v1089_v41 = vmul.f32 %v6571_v47, %v7621_v33 }
 0x16e   : > { %6207 = vmatmul.mubr.msk.bf16.gmra.mxu1 %vm684_vm0, %v1185_v54  ;;  %v967_v16 = vpop.xlane.xlu1 %966  ;;  %v970_v5 = vpop.xlane.xlu0 %969  ;;  %v1090_v17 = vmul.f32 %v6573_v21, %v7630_v24  ;;  %v1164_v24 = vadd.f32 %v7811_v19, %v1126_v52 }
 0x16f   : > { %6586 = vrsqrt.f32 %v1033_v29  ;;  %v1003_v10 = vmul.f32 0.03125, %v967_v16  ;;  %v1004_v13 = vmul.f32 0.03125, %v970_v5  ;;  %v1186_v35 = vpack.c.bf16 %v1163_v40, %v1162_v55 }
 0x170   : > { %v6575_v12 = vpop.eup %6574  ;;  %6588 = vrsqrt.f32 %v1034_v50  ;;  %v1127_v27 = vmul.f32 %v7804_v60, %v1089_v41  ;;  %v1128_v34 = vmul.f32 %v7804_v60, %v1090_v17 }
 0x171   : > { %v6577_v63 = vpop.eup %6576  ;;  %v1035_v33 = vadd.f32 1e-05, %v1003_v10  ;;  %v1036_v18 = vadd.f32 1e-05, %v1004_v13  ;;  %6210 = vmatprep.mubr.msk.bf16.mxu1 %vm684_vm0, %v1186_v35  ;;  %v1091_v26 = vmul.f32 %v6575_v12, %v7633_v37 }
 0x172   : > { %v973_v44 = vpop.xlane.xlu1 %972  ;;  %v1214_v11 = vpop.xlane.xlu0 %1213  ;;  %v1165_v42 = vadd.f32 %v7811_v19, %v1127_v27  ;;  %v1092_v4 = vmul.f32 %v6577_v63, %v7645_v28  ;;  %v1166_v15 = vadd.f32 %v7811_v19, %v1128_v34 }
 0x173   : > { %6590 = vrsqrt.f32 %v1035_v33  ;;  %v1005_v51 = vmul.f32 0.03125, %v973_v44  ;;  %v1248_v25 = vmul.f32 0.03125, %v1214_v11  ;;  %v1129_v32 = vmul.f32 %v7804_v60, %v1091_v26 }
 0x174   : > { %v6579_v20 = vpop.eup %6578  ;;  %6592 = vrsqrt.f32 %v1036_v18  ;;  %v1187_v9 = vpack.c.bf16 %v1165_v42, %v1164_v24  ;;  %v1130_v37 = vmul.f32 %v7804_v60, %v1092_v4 }
 0x175   : > { %v6581_v14 = vpop.eup %6580  ;;  %v1037_v2 = vadd.f32 1e-05, %v1005_v51  ;;  %v7888_v3 = vsub.f32 %v7708_v46, %v1248_v25  ;;  %v1167_v56 = vadd.f32 %v7811_v19, %v1129_v32  ;;  %v1093_v28 = vmul.f32 %v6579_v20, %v7648_v6 }
 0x176   : > { %6211 = vmatmul.mubr.msk.bf16.gmra.mxu1 %vm684_vm0, %v1187_v9  ;;  %v1217_v36 = vpop.xlane.xlu1 %1216  ;;  %v1220_v8 = vpop.xlane.xlu0 %1219  ;;  %v1094_v47 = vmul.f32 %v6581_v14, %v7660_v30  ;;  %v1168_v30 = vadd.f32 %v7811_v19, %v1130_v37 }
 0x177   : > { %6594 = vrsqrt.f32 %v1037_v2  ;;  %v1249_v54 = vmul.f32 0.03125, %v1217_v36  ;;  %v1250_v55 = vmul.f32 0.03125, %v1220_v8  ;;  %v1188_v21 = vpack.c.bf16 %v1167_v56, %v1166_v15 }
 0x178   : > { %v6583_v29 = vpop.eup %6582  ;;  %v1280_v50 = vmul.f32 %v7888_v3, %v7888_v3  ;;  %v1131_v46 = vmul.f32 %v7804_v60, %v1093_v28  ;;  %v1132_v13 = vmul.f32 %v7804_v60, %v1094_v47 }
 0x179   : > { %v6585_v40 = vpop.eup %6584  ;;  %v7898_v41 = vsub.f32 %v7715_v0, %v1249_v54  ;;  %v7901_v6 = vsub.f32 %v7718_v48, %v1250_v55  ;;  %6214 = vmatprep.mubr.msk.bf16.mxu1 %vm684_vm0, %v1188_v21  ;;  %v1095_v16 = vmul.f32 %v6583_v29, %v7663_v31 }
 0x17a   : > { %v1223_v5 = vpop.xlane.xlu1 %1222  ;;  %v1308_v52 = vsel %vm684_vm0, %v1280_v50, 0.0  ;;  %v1226_v17 = vpop.xlane.xlu0 %1225  ;;  %v1169_v10 = vadd.f32 %v7811_v19, %v1131_v46  ;;  %v1096_v0 = vmul.f32 %v6585_v40, %v7672_v1  ;;  %v1170_v4 = vadd.f32 %v7811_v19, %v1132_v13 }
 0x17b   : > { %v1251_v35 = vmul.f32 0.03125, %v1223_v5  ;;  %1309 = vadd.xlane.f32.xlu0 %v1308_v52  ;;  %v1252_v48 = vmul.f32 0.03125, %v1226_v17  ;;  %v1281_v12 = vmul.f32 %v7898_v41, %v7898_v41  ;;  %v1282_v27 = vmul.f32 %v7901_v6, %v7901_v6 }
 0x17c   : > { %v6587_v31 = vpop.eup %6586  ;;  %v1189_v34 = vpack.c.bf16 %v1169_v10, %v1168_v30  ;;  %v1133_v63 = vmul.f32 %v7804_v60, %v1095_v16  ;;  %v1134_v33 = vmul.f32 %v7804_v60, %v1096_v0 }
 0x17d   : > { %v6589_v18 = vpop.eup %6588  ;;  %v7917_v26 = vsub.f32 %v7725_v59, %v1251_v35  ;;  %v7920_v1 = vsub.f32 %v7728_v62, %v1252_v48  ;;  %v1311_v44 = vsel %vm684_vm0, %v1281_v12, 0.0  ;;  %v1314_v11 = vsel %vm684_vm0, %v1282_v27, 0.0 }
 0x17e   : > { %6215 = vmatmul.mubr.msk.bf16.gmra.mxu1 %vm684_vm0, %v1189_v34  ;;  %1312 = vadd.xlane.f32.xlu1 %v1311_v44  ;;  %v1229_v24 = vpop.xlane.xlu1 %1228  ;;  %v1232_v42 = vpop.xlane.xlu0 %1231  ;;  %v1171_v51 = vadd.f32 %v7811_v19, %v1133_v63  ;;  %v1097_v25 = vmul.f32 %v6587_v31, %v7675_v49  ;;  %v1172_v14 = vadd.f32 %v7811_v19, %v1134_v33 }
 0x17f   : > { %v1253_v59 = vmul.f32 0.03125, %v1229_v24  ;;  %1315 = vadd.xlane.f32.xlu0 %v1314_v11  ;;  %v1254_v32 = vmul.f32 0.03125, %v1232_v42  ;;  %v1283_v62 = vmul.f32 %v7917_v26, %v7917_v26  ;;  %v1284_v20 = vmul.f32 %v7920_v1, %v7920_v1 }
 0x180   : > { %v6591_v9 = vpop.eup %6590  ;;  %v1190_v15 = vpack.c.bf16 %v1171_v51, %v1170_v4  ;;  %v1135_v37 = vmul.f32 %v7804_v60, %v1097_v25  ;;  %v1098_v2 = vmul.f32 %v6589_v18, %v7684_v7 }
 0x181   : > { %v6593_v56 = vpop.eup %6592  ;;  %v7936_v49 = vsub.f32 %v7735_v22, %v1253_v59  ;;  %v7939_v28 = vsub.f32 %v7738_v23, %v1254_v32  ;;  %v1317_v36 = vsel %vm684_vm0, %v1283_v62, 0.0  ;;  %v1320_v8 = vsel %vm684_vm0, %v1284_v20, 0.0 }
 0x182   : > { %6218 = vmatprep.mubr.msk.bf16.mxu1 %vm684_vm0, %v1190_v15  ;;  %1318 = vadd.xlane.f32.xlu1 %v1317_v36  ;;  %v1235_v47 = vpop.xlane.xlu1 %1234  ;;  %v1238_v54 = vpop.xlane.xlu0 %1237  ;;  %v1173_v55 = vadd.f32 %v7811_v19, %v1135_v37  ;;  %v1099_v7 = vmul.f32 %v6591_v9, %v7687_v53  ;;  %v1136_v21 = vmul.f32 %v7804_v60, %v1098_v2 }
 0x183   : > { %v1255_v22 = vmul.f32 0.03125, %v1235_v47  ;;  %1321 = vadd.xlane.f32.xlu0 %v1320_v8  ;;  %v1256_v29 = vmul.f32 0.03125, %v1238_v54  ;;  %v1285_v23 = vmul.f32 %v7936_v49, %v7936_v49  ;;  %v1286_v50 = vmul.f32 %v7939_v28, %v7939_v28 }
 0x184   : > { %v6595_v46 = vpop.eup %6594  ;;  %v1191_v40 = vpack.c.bf16 %v1173_v55, %v1172_v14  ;;  %v1137_v30 = vmul.f32 %v7804_v60, %v1099_v7  ;;  %v1174_v16 = vadd.f32 %v7811_v19, %v1136_v21  ;;  %v1100_v5 = vmul.f32 %v6593_v56, %v7696_v57 }
 0x185   : > { %v7955_v53 = vsub.f32 %v7748_v39, %v1255_v22  ;;  %v7958_v52 = vsub.f32 %v7751_v43, %v1256_v29  ;;  %v1323_v17 = vsel %vm684_vm0, %v1285_v23, 0.0  ;;  %v1326_v10 = vsel %vm684_vm0, %v1286_v50, 0.0  ;;  %v11261_v29 = vld [vmem:[#allocation2_spill] sm:$0xff] }
 0x186   : > { %6219 = vmatmul.mubr.msk.bf16.gmra.mxu1 %vm684_vm0, %v1191_v40  ;;  %1324 = vadd.xlane.f32.xlu1 %v1323_v17  ;;  %v1241_v13 = vpop.xlane.xlu1 %1240  ;;  %v1292_v0 = vpop.xlane.xlu0 %1291  ;;  %v1175_v35 = vadd.f32 %v7811_v19, %v1137_v30  ;;  %v1101_v48 = vmul.f32 %v6595_v46, %v7699_v45  ;;  %v1138_v57 = vmul.f32 %v7804_v60, %v1100_v5  ;;  %v11262_v5 = vld [vmem:[#allocation3_spill] sm:$0xff] }
 0x187   : > { %v1257_v39 = vmul.f32 0.03125, %v1241_v13  ;;  %1327 = vadd.xlane.f32.xlu0 %v1326_v10  ;;  %v1338_v12 = vmul.f32 0.03125, %v1292_v0  ;;  %v1287_v43 = vmul.f32 %v7955_v53, %v7955_v53  ;;  %v1288_v27 = vmul.f32 %v7958_v52, %v7958_v52  ;;  %v11263_v10 = vld [vmem:[#allocation4_spill] sm:$0xff] }
 0x188   : > { %v1192_v31 = vpack.c.bf16 %v1175_v35, %v1174_v16  ;;  %v1139_v34 = vmul.f32 %v7804_v60, %v1101_v48  ;;  %v1176_v24 = vadd.f32 %v7811_v19, %v1138_v57 }
 0x189   : > { %v7972_v63 = vsub.f32 %v7764_v58, %v1257_v39  ;;  %v1354_v33 = vadd.f32 1e-05, %v1338_v12  ;;  %v1329_v45 = vsel %vm684_vm0, %v1287_v43, 0.0  ;;  %v1332_v18 = vsel %vm684_vm0, %v1288_v27, 0.0  ;;  %v11264_v39 = vld [vmem:[#allocation5_spill] sm:$0xff] }
 0x18a   : > { %6222 = vmatprep.mubr.msk.bf16.mxu1 %vm684_vm0, %v1192_v31  ;;  %1330 = vadd.xlane.f32.xlu1 %v1329_v45  ;;  %v1295_v44 = vpop.xlane.xlu1 %1294  ;;  %v1298_v11 = vpop.xlane.xlu0 %1297  ;;  %v1177_v42 = vadd.f32 %v7811_v19, %v1139_v34 }
 0x18b   : > { %6596 = vrsqrt.f32 %v1354_v33  ;;  %v1339_v4 = vmul.f32 0.03125, %v1295_v44  ;;  %1333 = vadd.xlane.f32.xlu0 %v1332_v18  ;;  %v1340_v51 = vmul.f32 0.03125, %v1298_v11  ;;  %v1289_v58 = vmul.f32 %v7972_v63, %v7972_v63 }
 0x18c   : > { %v1193_v25 = vpack.c.bf16 %v1177_v42, %v1176_v24 }
 0x18d   : > { %v1355_v59 = vadd.f32 1e-05, %v1339_v4  ;;  %v1356_v32 = vadd.f32 1e-05, %v1340_v51  ;;  %v1335_v62 = vsel %vm684_vm0, %v1289_v58, 0.0 }
 0x18e   : > { %6223 = vmatmul.mubr.msk.bf16.gmra.mxu1 %vm684_vm0, %v1193_v25  ;;  %1336 = vadd.xlane.f32.xlu1 %v1335_v62  ;;  %v1301_v20 = vpop.xlane.xlu1 %1300  ;;  %v1304_v9 = vpop.xlane.xlu0 %1303 }
 0x18f   : > { %6598 = vrsqrt.f32 %v1355_v59  ;;  %v1341_v15 = vmul.f32 0.03125, %v1301_v20  ;;  %v1342_v37 = vmul.f32 0.03125, %v1304_v9 }
 0x190   : > { %6600 = vrsqrt.f32 %v1356_v32 }
 0x191   : > { %v1357_v14 = vadd.f32 1e-05, %v1341_v15  ;;  %v1358_v2 = vadd.f32 1e-05, %v1342_v37 }
 0x192   : > { %v1307_v56 = vpop.xlane.xlu1 %1306 }
 0x193   : > { %6602 = vrsqrt.f32 %v1357_v14  ;;  %v1343_v36 = vmul.f32 0.03125, %v1307_v56 }
 0x194   : > { %6604 = vrsqrt.f32 %v1358_v2 }
 0x195   : > { %v1359_v8 = vadd.f32 1e-05, %v1343_v36 }
 0x197   : > { %6606 = vrsqrt.f32 %v1359_v8 }
 0x198   : > { %v6597_v47 = vpop.eup %6596 }
 0x199   : > { %v1386_v54 = vmul.f32 %v6597_v47, %v7745_v38 }
 0x19b   : > { %v1402_v22 = vmul.f32 %v7804_v60, %v1386_v54 }
 0x19c   : > { %v6599_v55 = vpop.eup %6598 }
 0x19d   : > { %v6601_v7 = vpop.eup %6600  ;;  %v1387_v21 = vmul.f32 %v6599_v55, %v7754_v61  ;;  %v1418_v30 = vadd.f32 %v7811_v19, %v1402_v22 }
 0x19e   : > { %v1388_v23 = vmul.f32 %v6601_v7, %v11261_v29 }
 0x19f   : > { %v1403_v50 = vmul.f32 %v7804_v60, %v1387_v21 }
 0x1a0   : > { %v6603_v46 = vpop.eup %6602  ;;  %v1404_v38 = vmul.f32 %v7804_v60, %v1388_v23 }
 0x1a1   : > { %v6605_v40 = vpop.eup %6604  ;;  %v1419_v16 = vadd.f32 %v7811_v19, %v1403_v50  ;;  %v1389_v17 = vmul.f32 %v6603_v46, %v11262_v5 }
 0x1a2   : > { %v1390_v13 = vmul.f32 %v6605_v40, %v11263_v10  ;;  %v1420_v48 = vadd.f32 %v7811_v19, %v1404_v38  ;;  %v8008_v40 = vld [vmem:[%s11026_s8] ss:$0 sm:$0xff] }
 0x1a3   : > { %v1434_v0 = vpack.c.bf16 %v1419_v16, %v1418_v30  ;;  %v1405_v61 = vmul.f32 %v7804_v60, %v1389_v17 }
 0x1a4   : > { %v6607_v35 = vpop.eup %6606  ;;  %v1406_v43 = vmul.f32 %v7804_v60, %v1390_v13 }
 0x1a5   : > { %6174 = vmatprep.mubr.msk.bf16.mxu0 %vm684_vm0, %v1434_v0  ;;  %v1421_v57 = vadd.f32 %v7811_v19, %v1405_v61  ;;  %v1391_v12 = vmul.f32 %v6607_v35, %v11264_v39 }
 0x1a6   : > { %v1422_v34 = vadd.f32 %v7811_v19, %v1406_v43 }
 0x1a7   : > { %v1435_v27 = vpack.c.bf16 %v1421_v57, %v1420_v48  ;;  %v1407_v31 = vmul.f32 %v7804_v60, %v1391_v12 }
 0x1a9   : > { %6175 = vmatmul.mubr.msk.bf16.vlgmr.msra.gmra.mxu0 %vm684_vm0, %v1435_v27  ;;  %v1423_v33 = vadd.f32 %v7811_v19, %v1407_v31 }
 0x1ab   : > { %v1436_v45 = vpack.c.bf16 %v1423_v33, %v1422_v34 }
 0x1ad   : > { %6178 = vmatprep.mubr.msk.bf16.mxu0 %vm684_vm0, %v1436_v45 }
 0x204   : > { %v1310_v18 = vpop.xlane.xlu0 %1309 }
 0x205   : > { %v1344_v44 = vmul.f32 0.03125, %v1310_v18 }
 0x207   : > { %v1360_v11 = vadd.f32 1e-05, %v1344_v44  ;;  %v1313_v24 = vpop.xlane.xlu1 %1312 }
 0x208   : > { %v1345_v42 = vmul.f32 0.03125, %v1313_v24  ;;  %v1316_v4 = vpop.xlane.xlu0 %1315 }
 0x209   : > { %6608 = vrsqrt.f32 %v1360_v11  ;;  %v1346_v51 = vmul.f32 0.03125, %v1316_v4 }
 0x20a   : > { %v1361_v58 = vadd.f32 1e-05, %v1345_v42 }
 0x20b   : > { %v1362_v25 = vadd.f32 1e-05, %v1346_v51  ;;  %v1319_v59 = vpop.xlane.xlu1 %1318 }
 0x20c   : > { %6610 = vrsqrt.f32 %v1361_v58  ;;  %v1347_v32 = vmul.f32 0.03125, %v1319_v59  ;;  %v1322_v62 = vpop.xlane.xlu0 %1321 }
 0x20d   : > { %6612 = vrsqrt.f32 %v1362_v25  ;;  %v1348_v20 = vmul.f32 0.03125, %v1322_v62 }
 0x20e   : > { %v1363_v9 = vadd.f32 1e-05, %v1347_v32 }
 0x20f   : > { %v1364_v15 = vadd.f32 1e-05, %v1348_v20  ;;  %v1325_v37 = vpop.xlane.xlu1 %1324 }
 0x210   : > { %6614 = vrsqrt.f32 %v1363_v9  ;;  %v1349_v14 = vmul.f32 0.03125, %v1325_v37  ;;  %v1328_v2 = vpop.xlane.xlu0 %1327 }
 0x211   : > { %6616 = vrsqrt.f32 %v1364_v15  ;;  %v1350_v56 = vmul.f32 0.03125, %v1328_v2 }
 0x212   : > { %v1365_v36 = vadd.f32 1e-05, %v1349_v14 }
 0x213   : > { %v1366_v8 = vadd.f32 1e-05, %v1350_v56  ;;  %v1331_v47 = vpop.xlane.xlu1 %1330 }
 0x214   : > { %6618 = vrsqrt.f32 %v1365_v36  ;;  %v1351_v54 = vmul.f32 0.03125, %v1331_v47  ;;  %v1334_v55 = vpop.xlane.xlu0 %1333 }
 0x215   : > { %6620 = vrsqrt.f32 %v1366_v8  ;;  %v1352_v7 = vmul.f32 0.03125, %v1334_v55 }
 0x216   : > { %v6609_v21 = vpop.eup %6608  ;;  %v1367_v22 = vadd.f32 1e-05, %v1351_v54  ;;  %v6196_v29 = vpop.f32.mrf.mxu1 }
 0x217   : > { %v1368_v23 = vadd.f32 1e-05, %v1352_v7  ;;  %v1337_v50 = vpop.xlane.xlu1 %1336  ;;  %v1392_v46 = vmul.f32 %v6609_v21, %v7888_v3  ;;  %v1708_v61 = vadd.f32 %v6196_v29, %v8008_v40 }
 0x218   : > { %6622 = vrsqrt.f32 %v1367_v22  ;;  %v1353_v30 = vmul.f32 0.03125, %v1337_v50  ;;  %v1699_v16 = vpop.f32.mrf.mxu1 }
 0x219   : > { %v6611_v5 = vpop.eup %6610  ;;  %6624 = vrsqrt.f32 %v1368_v23  ;;  %v1408_v0 = vmul.f32 %v7804_v60, %v1392_v46 }
 0x21a   : > { %v6613_v17 = vpop.eup %6612  ;;  %v1369_v38 = vadd.f32 1e-05, %v1353_v30  ;;  %v6197_v10 = vpop.f32.mrf.mxu1  ;;  %v1393_v13 = vmul.f32 %v6611_v5, %v7898_v41 }
 0x21b   : > { %v1711_v3 = vadd.f32 %v6197_v10, %v8008_v40  ;;  %v1394_v35 = vmul.f32 %v6613_v17, %v7901_v6  ;;  %v1424_v41 = vadd.f32 %v7811_v19, %v1408_v0  ;;  %v1700_v6 = vadd.f32 %v8008_v40, %v1699_v16 }
 0x21c   : > { %6626 = vrsqrt.f32 %v1369_v38  ;;  %v1702_v48 = vpop.f32.mrf.mxu1  ;;  %v1409_v57 = vmul.f32 %v7804_v60, %v1393_v13 }
 0x21d   : > { %v6615_v39 = vpop.eup %6614  ;;  %v8016_v12 = vpack.c.bf16 %v1711_v3, %v1708_v61  ;;  %v1703_v43 = vadd.f32 %v8008_v40, %v1702_v48  ;;  %v1410_v45 = vmul.f32 %v7804_v60, %v1394_v35 }
 0x21e   : > { %v6617_v27 = vpop.eup %6616  ;;  %v6200_v31 = vpop.f32.mrf.mxu1  ;;  %v1425_v34 = vadd.f32 %v7811_v19, %v1409_v57  ;;  %v1395_v33 = vmul.f32 %v6615_v39, %v7917_v26 }
 0x21f   : > { %11265 = vst [vmem:[#allocation2_spill] sm:$0xff] %v8016_v12  ;;  %v1724_v18 = vadd.f32 %v6200_v31, %v8008_v40  ;;  %3137 = vrot.lane.b32.xlu1 %v8016_v12, %s7166_s22  ;;  %2503 = vrot.lane.b32.xlu0 %v8016_v12, %s7167_s25  ;;  %v1396_v26 = vmul.f32 %v6617_v27, %v7920_v1 }
 0x220   : > { %v1715_v44 = vpop.f32.mrf.mxu1  ;;  %v1437_v11 = vpack.c.bf16 %v1425_v34, %v1424_v41  ;;  %v1411_v24 = vmul.f32 %v7804_v60, %v1395_v33  ;;  %v8031_v4 = vpack.c.bf16 %v1703_v43, %v1700_v6  ;;  %v1426_v59 = vadd.f32 %v7811_v19, %v1410_v45 }
 0x221   : > { %v6619_v42 = vpop.eup %6618  ;;  %v1716_v51 = vadd.f32 %v8008_v40, %v1715_v44  ;;  %v1412_v20 = vmul.f32 %v7804_v60, %v1396_v26 }
 0x222   : > { %11266 = vst [vmem:[#allocation3_spill] sm:$0xff] %v8031_v4  ;;  %v6621_v58 = vpop.eup %6620  ;;  %v6201_v25 = vpop.f32.mrf.mxu1  ;;  %6179 = vmatmul.mubr.msk.bf16.gmra.mxu0 %vm684_vm0, %v1437_v11  ;;  %v1427_v32 = vadd.f32 %v7811_v19, %v1411_v24  ;;  %v1397_v62 = vmul.f32 %v6619_v42, %v7936_v49 }
 0x223   : > { %v1727_v9 = vadd.f32 %v6201_v25, %v8008_v40  ;;  %3771 = vrot.lane.b32.xlu1 %v8016_v12, %s7168_s30  ;;  %2501 = vrot.lane.b32.xlu0 %v8031_v4, %s7167_s25  ;;  %v1398_v1 = vmul.f32 %v6621_v58, %v7939_v28  ;;  %v1428_v47 = vadd.f32 %v7811_v19, %v1412_v20 }
 0x224   : > { %v1718_v15 = vpop.f32.mrf.mxu1  ;;  %v1438_v37 = vpack.c.bf16 %v1427_v32, %v1426_v59  ;;  %v1413_v14 = vmul.f32 %v7804_v60, %v1397_v62 }
 0x225   : > { %v6623_v2 = vpop.eup %6622  ;;  %v8046_v56 = vpack.c.bf16 %v1727_v9, %v1724_v18  ;;  %v1719_v49 = vadd.f32 %v8008_v40, %v1718_v15  ;;  %v1414_v55 = vmul.f32 %v7804_v60, %v1398_v1 }
 0x226   : > { %v6625_v36 = vpop.eup %6624  ;;  %v8049_v8 = vpop.f32.mrf.mxu1  ;;  %6182 = vmatprep.mubr.msk.bf16.mxu0 %vm684_vm0, %v1438_v37  ;;  %v1429_v54 = vadd.f32 %v7811_v19, %v1413_v14  ;;  %v1399_v28 = vmul.f32 %v6623_v2, %v7955_v53 }
 0x227   : > { %11267 = vst [vmem:[#allocation4_spill] sm:$0xff] %v8046_v56  ;;  %v8056_v7 = vpack.c.bf16 %v1719_v49, %v1716_v51  ;;  %2334 = vrot.lane.b32.xlu1 %v8016_v12, %s7169_s18  ;;  %3135 = vrot.lane.b32.xlu0 %v8031_v4, %s7166_s22  ;;  %v1400_v23 = vmul.f32 %v6625_v36, %v7958_v52 }
 0x228   : > { %v1731_v21 = vpop.f32.mrf.mxu1  ;;  %v1439_v22 = vpack.c.bf16 %v1429_v54, %v1428_v47  ;;  %v1415_v29 = vmul.f32 %v7804_v60, %v1399_v28  ;;  %v1430_v30 = vadd.f32 %v7811_v19, %v1414_v55 }
 0x229   : > { %11268 = vst [vmem:[#allocation5_spill] sm:$0xff] %v8056_v7  ;;  %v6627_v50 = vpop.eup %6626  ;;  %v1732_v53 = vadd.f32 %v8008_v40, %v1731_v21  ;;  %v1416_v17 = vmul.f32 %v7804_v60, %v1400_v23 }
 0x22a   : > { %v8065_v46 = vpop.f32.mrf.mxu1  ;;  %6183 = vmatmul.mubr.msk.bf16.gmra.mxu0 %vm684_vm0, %v1439_v22  ;;  %v1431_v16 = vadd.f32 %v7811_v19, %v1415_v29  ;;  %v1401_v5 = vmul.f32 %v6627_v50, %v7972_v63 }
 0x22b   : > { %2976 = vrot.lane.b32.xlu1 %v8016_v12, %s7170_s1  ;;  %3769 = vrot.lane.b32.xlu0 %v8031_v4, %s7168_s30  ;;  %v1432_v63 = vadd.f32 %v7811_v19, %v1416_v17  ;;  %v1743_v29 = vadd.f32 %v8065_v46, %v8008_v40 }
 0x22c   : > { %v1734_v52 = vpop.f32.mrf.mxu1  ;;  %v1440_v38 = vpack.c.bf16 %v1431_v16, %v1430_v30  ;;  %v1417_v10 = vmul.f32 %v7804_v60, %v1401_v5 }
 0x22d   : > { %v1735_v13 = vadd.f32 %v8008_v40, %v1734_v52 }
 0x22e   : > { %v6208_v0 = vpop.f32.mrf.mxu1  ;;  %6186 = vmatprep.mubr.msk.bf16.mxu0 %vm684_vm0, %v1440_v38  ;;  %v1433_v61 = vadd.f32 %v7811_v19, %v1417_v10  ;;  %v8144_v38 = vld [vmem:[%s11024_s6] ss:$0 sm:$0xff] }
 0x22f   : > { %v8081_v3 = vpack.c.bf16 %v1735_v13, %v1732_v53  ;;  %2332 = vrot.lane.b32.xlu0 %v8031_v4, %s7169_s18  ;;  %v1756_v62 = vadd.f32 %v6208_v0, %v8008_v40  ;;  %v1740_v53 = vadd.f32 %v8049_v8, %v8008_v40 }
 0x230   : > { %v1747_v35 = vpop.f32.mrf.mxu1  ;;  %v1441_v48 = vpack.c.bf16 %v1433_v61, %v1432_v63 }
 0x231   : > { %11269 = vst [vmem:[#allocation6_spill] sm:$0xff] %v8081_v3  ;;  %v1748_v28 = vadd.f32 %v8008_v40, %v1747_v35  ;;  %v8130_v30 = vpack.c.bf16 %v1743_v29, %v1740_v53 }
 0x232   : > { %v6209_v57 = vpop.f32.mrf.mxu1  ;;  %6187 = vmatmul.mubr.msk.bf16.gmra.mxu0 %vm684_vm0, %v1441_v48 }
 0x233   : > { %v1759_v59 = vadd.f32 %v6209_v57, %v8008_v40  ;;  %11277 = vst [vmem:[#allocation14_spill] sm:$0xff] %v8130_v30  ;;  %v1915_v46 = vsel %vm1874_vm1, %v8130_v30, 0  ;;  %v1912_v57 = vsel %vm1874_vm1, %v8081_v3, 0 }
 0x234   : > { %v1750_v60 = vpop.f32.mrf.mxu1 }
 0x235   : > { %v8098_v9 = vpack.c.bf16 %v1759_v59, %v1756_v62  ;;  %v1751_v36 = vadd.f32 %v8008_v40, %v1750_v60 }
 0x236   : > { %v6212_v39 = vpop.f32.mrf.mxu1 }
 0x237   : > { %v1772_v43 = vadd.f32 %v6212_v39, %v8008_v40  ;;  %11272 = vst [vmem:[#allocation9_spill] sm:$0xff] %v8098_v9  ;;  %v1921_v54 = vsel %vm1874_vm1, %v8098_v9, 0  ;;  %v8116_v55 = vpack.c.bf16 %v1751_v36, %v1748_v28 }
 0x238   : > { %v1763_v27 = vpop.f32.mrf.mxu1 }
 0x239   : > { %v1764_v31 = vadd.f32 %v8008_v40, %v1763_v27  ;;  %11275 = vst [vmem:[#allocation12_spill] sm:$0xff] %v8116_v55  ;;  %v1918_v50 = vsel %vm1874_vm1, %v8116_v55, 0 }
 0x23a   : > { %v6213_v41 = vpop.f32.mrf.mxu1 }
 0x23b   : > { %v1775_v19 = vadd.f32 %v6213_v41, %v8008_v40 }
 0x23c   : > { %v1766_v34 = vpop.f32.mrf.mxu1 }
 0x23d   : > { %v8089_v33 = vpack.c.bf16 %v1775_v19, %v1772_v43  ;;  %v1767_v45 = vadd.f32 %v8008_v40, %v1766_v34  ;;  %v1909_v34 = vsel %vm1874_vm1, %v8046_v56, 0 }
 0x23e   : > { %v6216_v6 = vpop.f32.mrf.mxu1 }
 0x23f   : > { %11270 = vst [vmem:[#allocation7_spill] sm:$0xff] %v8089_v33  ;;  %v8092_v18 = vpack.c.bf16 %v1767_v45, %v1764_v31  ;;  %v1788_v13 = vadd.f32 %v6216_v6, %v8008_v40  ;;  %v1903_v45 = vsel %vm1874_vm1, %v8016_v12, 0  ;;  %v1900_v6 = vsel %vm1874_vm1, %v8031_v4, 0 }
 0x240   : > { %v8094_v44 = vpop.f32.mrf.mxu1 }
 0x241   : > { %11271 = vst [vmem:[#allocation8_spill] sm:$0xff] %v8092_v18  ;;  %v1780_v41 = vadd.f32 %v8008_v40, %v8094_v44 }
 0x242   : > { %v6217_v11 = vpop.f32.mrf.mxu1 }
 0x243   : > { %v1791_v8 = vadd.f32 %v6217_v11, %v8008_v40 }
 0x244   : > { %v1782_v24 = vpop.f32.mrf.mxu1 }
 0x245   : > { %v8149_v35 = vpack.c.bf16 %v1791_v8, %v1788_v13  ;;  %v1783_v31 = vadd.f32 %v8008_v40, %v1782_v24 }
 0x246   : > { %v6220_v26 = vpop.f32.mrf.mxu1 }
 0x247   : > { %v1804_v22 = vadd.f32 %v6220_v26, %v8008_v40  ;;  %11279 = vst [vmem:[#allocation16_spill] sm:$0xff] %v8149_v35  ;;  %v8164_v19 = vpack.c.bf16 %v1783_v31, %v1780_v41 }
 0x248   : > { %v1795_v42 = vpop.f32.mrf.mxu1 }
 0x249   : > { %v1796_v5 = vadd.f32 %v8008_v40, %v1795_v42  ;;  %11280 = vst [vmem:[#allocation17_spill] sm:$0xff] %v8164_v19 }
 0x24a   : > { %v6221_v51 = vpop.f32.mrf.mxu1 }
 0x24b   : > { %v1807_v21 = vadd.f32 %v6221_v51, %v8008_v40 }
 0x24c   : > { %v1798_v58 = vpop.f32.mrf.mxu1 }
 0x24d   : > { %v8122_v23 = vpack.c.bf16 %v1807_v21, %v1804_v22  ;;  %v1799_v16 = vadd.f32 %v8008_v40, %v1798_v58 }
 0x24e   : > { %v6224_v25 = vpop.f32.mrf.mxu1 }
 0x24f   : > { %v1820_v1 = vadd.f32 %v6224_v25, %v8008_v40  ;;  %11276 = vst [vmem:[#allocation13_spill] sm:$0xff] %v8122_v23  ;;  %v8134_v17 = vpack.c.bf16 %v1799_v16, %v1796_v5 }
 0x250   : > { %v1811_v32 = vpop.f32.mrf.mxu1 }
 0x251   : > { %v1812_v14 = vadd.f32 %v8008_v40, %v1811_v32  ;;  %11278 = vst [vmem:[#allocation15_spill] sm:$0xff] %v8134_v17 }
 0x252   : > { %v6225_v20 = vpop.f32.mrf.mxu1 }
 0x253   : > { %v1823_v15 = vadd.f32 %v6225_v20, %v8008_v40 }
 0x254   : > { %v1814_v37 = vpop.f32.mrf.mxu1 }
 0x255   : > { %v8103_v2 = vpack.c.bf16 %v1823_v15, %v1820_v1  ;;  %v1815_v49 = vadd.f32 %v8008_v40, %v1814_v37  ;;  %v1906_v40 = vsel %vm1874_vm1, %v8056_v7, 0 }
 0x257   : > { %11273 = vst [vmem:[#allocation10_spill] sm:$0xff] %v8103_v2  ;;  %v8107_v47 = vpack.c.bf16 %v1815_v49, %v1812_v14  ;;  %6314 = vmatprep.subr.msk.bf16.mxu0 %vm1874_vm1, %v8103_v2 }
 0x258   : > { %5751 = vmatpush3.bf16.xpose.msra.mxu0 %v1921_v54 }
 0x259   : > { %11274 = vst [vmem:[#allocation11_spill] sm:$0xff] %v8107_v47  ;;  %6315 = vmatprep.subr.msk.bf16.mxu0 %vm1874_vm1, %v8107_v47 }
 0x260   : > { %5753 = vmatpush3.bf16.xpose.msra.mxu0 %v1918_v50 }
 0x261   : > { %6316 = vmatprep.subr.msk.bf16.mxu0 %vm1874_vm1, %v8122_v23 }
 0x268   : > { %5755 = vmatpush3.bf16.xpose.msra.mxu0 %v1915_v46 }
 0x269   : > { %6317 = vmatprep.subr.msk.bf16.mxu0 %vm1874_vm1, %v8134_v17  ;;  %v6176_v52 = vpop.f32.mrf.mxu0 }
 0x26a   : > { %v1532_v63 = vadd.f32 %v6176_v52, %v8144_v38 }
 0x26b   : > { %v1523_v10 = vpop.f32.mrf.mxu0 }
 0x26c   : > { %v1524_v60 = vadd.f32 %v8144_v38, %v1523_v10 }
 0x26d   : > { %v6177_v0 = vpop.f32.mrf.mxu0 }
 0x26e   : > { %v1535_v61 = vadd.f32 %v6177_v0, %v8144_v38 }
 0x26f   : > { %v1526_v48 = vpop.f32.mrf.mxu0 }
 0x270   : > { %v1587_v39 = vpack.c.bf16 %v1535_v61, %v1532_v63  ;;  %v1527_v43 = vadd.f32 %v8144_v38, %v1526_v48  ;;  %5757 = vmatpush3.bf16.xpose.msra.mxu0 %v1912_v57 }
 0x271   : > { %6318 = vmatprep.subr.msk.bf16.mxu0 %vm1874_vm1, %v8149_v35 }
 0x272   : > { %v1586_v27 = vpack.c.bf16 %v1527_v43, %v1524_v60  ;;  %2487 = vrot.lane.b32.xlu1 %v1587_v39, %s7167_s25 }
 0x274   : > { %2485 = vrot.lane.b32.xlu0 %v1586_v27, %s7167_s25  ;;  %5766 = vmatprep.mubr.msk.bf16.mxu0 %vm1874_vm1, %v1586_v27 }
 0x276   : > { %3121 = vrot.lane.b32.xlu1 %v1587_v39, %s7166_s22 }
 0x278   : > { %5759 = vmatpush3.bf16.xpose.msra.mxu0 %v1909_v34  ;;  %3119 = vrot.lane.b32.xlu0 %v1586_v27, %s7166_s22 }
 0x279   : > { %6319 = vmatprep.subr.msk.bf16.mxu0 %vm1874_vm1, %v8164_v19 }
 0x27a   : > { %3755 = vrot.lane.b32.xlu1 %v1587_v39, %s7168_s30 }
 0x27c   : > { %3753 = vrot.lane.b32.xlu0 %v1586_v27, %s7168_s30 }
 0x27e   : > { %3141 = vrot.lane.b32.xlu1 %v8046_v56, %s7166_s22 }
 0x280   : > { %5761 = vmatpush3.bf16.xpose.msra.mxu0 %v1906_v40  ;;  %2507 = vrot.lane.b32.xlu0 %v8046_v56, %s7167_s25 }
 0x281   : > { %6320 = vmatprep.subr.msk.bf16.mxu0 %vm1874_vm1, %v8089_v33 }
 0x282   : > { %3775 = vrot.lane.b32.xlu1 %v8046_v56, %s7168_s30 }
 0x284   : > { %2505 = vrot.lane.b32.xlu0 %v8056_v7, %s7167_s25 }
 0x286   : > { %2338 = vrot.lane.b32.xlu1 %v8046_v56, %s7169_s18 }
 0x288   : > { %5763 = vmatpush3.bf16.xpose.msra.mxu0 %v1903_v45  ;;  %3139 = vrot.lane.b32.xlu0 %v8056_v7, %s7166_s22 }
 0x289   : > { %6321 = vmatprep.subr.msk.bf16.mxu0 %vm1874_vm1, %v8092_v18 }
 0x28a   : > { %2980 = vrot.lane.b32.xlu1 %v8046_v56, %s7170_s1 }
 0x28c   : > { %3773 = vrot.lane.b32.xlu0 %v8056_v7, %s7168_s30 }
 0x290   : > { %5765 = vmatpush3.bf16.xpose.msra.mxu0 %v1900_v6  ;;  %2336 = vrot.lane.b32.xlu0 %v8056_v7, %s7169_s18 }
 0x291   : > { %v8228_v21 = vpop.permute.xlu0 %2503  ;;  %v8284_v48 = vpop.permute.xlu1 %3137 }
 0x292   : > { %11283 = vst [vmem:[#allocation20_spill] sm:$0xff] %v8284_v48 }
 0x294   : > { %2978 = vrot.lane.b32.xlu0 %v8056_v7, %s7170_s1 }
 0x295   : > { %v8239_v16 = vpop.permute.xlu0 %2501  ;;  %v8292_v57 = vpop.permute.xlu1 %3771 }
 0x296   : > { %11284 = vst [vmem:[#allocation21_spill] sm:$0xff] %v8292_v57 }
 0x297   : > { %5767 = vmatmul.mubr.msk.bf16.vlgmr.msra.gmra.mxu0 %vm1874_vm1, %v1586_v27 }
 0x298   : > { %5768 = vmatprep.mubr.msk.bf16.mxu0 %vm1874_vm1, %v1587_v39 }
 0x299   : > { %v8249_v8 = vpop.permute.xlu0 %3135  ;;  %v8298_v60 = vpop.permute.xlu1 %2334 }
 0x29a   : > { %11281 = vst [vmem:[#allocation18_spill] sm:$0xff] %v8249_v8 }
 0x29d   : > { %v8259_v0 = vpop.permute.xlu0 %3769 }
 0x29e   : > { %11282 = vst [vmem:[#allocation19_spill] sm:$0xff] %v8259_v0 }
 0x29f   : > { %5769 = vmatmul.mubr.msk.bf16.gmra.mxu0 %vm1874_vm1, %v1587_v39  ;;  %v8303_v39 = vpop.permute.xlu1 %2976 }
 0x2a0   : > { %11285 = vst [vmem:[#allocation22_spill] sm:$0xff] %v8303_v39 }
 0x2a1   : > { %v8267_v61 = vpop.permute.xlu0 %2332 }
 0x2e2   : > { %v6180_v44 = vpop.f32.mrf.mxu0 }
 0x2e3   : > { %v1548_v26 = vadd.f32 %v6180_v44, %v8144_v38 }
 0x2e4   : > { %v1539_v11 = vpop.f32.mrf.mxu0  ;;  %v8310_v27 = vpop.permute.xlu1 %2487 }
 0x2e5   : > { %v1540_v58 = vadd.f32 %v8144_v38, %v1539_v11 }
 0x2e6   : > { %v6181_v24 = vpop.f32.mrf.mxu0 }
 0x2e7   : > { %v1551_v42 = vadd.f32 %v6181_v24, %v8144_v38 }
 0x2e8   : > { %v1542_v51 = vpop.f32.mrf.mxu0  ;;  %v8320_v41 = vpop.permute.xlu1 %3121 }
 0x2e9   : > { %v1589_v25 = vpack.c.bf16 %v1551_v42, %v1548_v26  ;;  %v1543_v59 = vadd.f32 %v8144_v38, %v1542_v51  ;;  %11288 = vst [vmem:[#allocation25_spill] sm:$0xff] %v8320_v41 }
 0x2ea   : > { %v6184_v32 = vpop.f32.mrf.mxu0 }
 0x2eb   : > { %v1588_v62 = vpack.c.bf16 %v1543_v59, %v1540_v58  ;;  %2491 = vrot.lane.b32.xlu1 %v1589_v25, %s7167_s25  ;;  %v1564_v29 = vadd.f32 %v6184_v32, %v8144_v38 }
 0x2ec   : > { %v1555_v20 = vpop.f32.mrf.mxu0  ;;  %v8330_v40 = vpop.permute.xlu1 %3755 }
 0x2ed   : > { %2489 = vrot.lane.b32.xlu0 %v1588_v62, %s7167_s25  ;;  %5770 = vmatprep.mubr.msk.bf16.mxu0 %vm1874_vm1, %v1588_v62  ;;  %v1556_v49 = vadd.f32 %v8144_v38, %v1555_v20  ;;  %11289 = vst [vmem:[#allocation26_spill] sm:$0xff] %v8330_v40 }
 0x2ee   : > { %v6185_v1 = vpop.f32.mrf.mxu0  ;;  %5771 = vmatmul.mubr.msk.bf16.gmra.mxu0 %vm1874_vm1, %v1588_v62 }
 0x2ef   : > { %3125 = vrot.lane.b32.xlu1 %v1589_v25, %s7166_s22  ;;  %5772 = vmatprep.mubr.msk.bf16.mxu0 %vm1874_vm1, %v1589_v25  ;;  %v1567_v28 = vadd.f32 %v6185_v1, %v8144_v38 }
 0x2f0   : > { %v1558_v15 = vpop.f32.mrf.mxu0  ;;  %v8340_v6 = vpop.permute.xlu1 %3141 }
 0x2f1   : > { %v1559_v37 = vadd.f32 %v8144_v38, %v1558_v15  ;;  %3123 = vrot.lane.b32.xlu0 %v1588_v62, %s7166_s22  ;;  %v1591_v50 = vpack.c.bf16 %v1567_v28, %v1564_v29  ;;  %11290 = vst [vmem:[#allocation27_spill] sm:$0xff] %v8340_v6 }
 0x2f2   : > { %v6188_v14 = vpop.f32.mrf.mxu0 }
 0x2f3   : > { %3759 = vrot.lane.b32.xlu1 %v1589_v25, %s7168_s30  ;;  %v1590_v36 = vpack.c.bf16 %v1559_v37, %v1556_v49  ;;  %v1580_v13 = vadd.f32 %v6188_v14, %v8144_v38 }
 0x2f4   : > { %v1571_v54 = vpop.f32.mrf.mxu0  ;;  %v8350_v11 = vpop.permute.xlu1 %3775 }
 0x2f5   : > { %3757 = vrot.lane.b32.xlu0 %v1588_v62, %s7168_s30  ;;  %v1572_v46 = vadd.f32 %v8144_v38, %v1571_v54  ;;  %11292 = vst [vmem:[#allocation29_spill] sm:$0xff] %v8350_v11 }
 0x2f6   : > { %5773 = vmatmul.mubr.msk.bf16.gmra.mxu0 %vm1874_vm1, %v1589_v25  ;;  %v6189_v22 = vpop.f32.mrf.mxu0 }
 0x2f7   : > { %3145 = vrot.lane.b32.xlu1 %v8130_v30, %s7166_s22  ;;  %5774 = vmatprep.mubr.msk.bf16.mxu0 %vm1874_vm1, %v1590_v36  ;;  %v1583_v10 = vadd.f32 %v6189_v22, %v8144_v38 }
 0x2f8   : > { %v1574_v53 = vpop.f32.mrf.mxu0  ;;  %v8360_v26 = vpop.permute.xlu1 %2338 }
 0x2f9   : > { %2511 = vrot.lane.b32.xlu0 %v8130_v30, %s7167_s25  ;;  %v1575_v5 = vadd.f32 %v8144_v38, %v1574_v53  ;;  %v1593_v63 = vpack.c.bf16 %v1583_v10, %v1580_v13  ;;  %v8272_v38 = vpop.permute.xlu0 %2485 }
 0x2fb   : > { %3779 = vrot.lane.b32.xlu1 %v8130_v30, %s7168_s30  ;;  %v1592_v52 = vpack.c.bf16 %v1575_v5, %v1572_v46 }
 0x2fc   : > { %v8370_v51 = vpop.permute.xlu1 %2980 }
 0x2fd   : > { %2509 = vrot.lane.b32.xlu0 %v8081_v3, %s7167_s25  ;;  %v8305_v43 = vpop.permute.xlu0 %3119  ;;  %11294 = vst [vmem:[#allocation31_spill] sm:$0xff] %v8370_v51 }
 0x2fe   : > { %5775 = vmatmul.mubr.msk.bf16.gmra.mxu0 %vm1874_vm1, %v1590_v36  ;;  %11286 = vst [vmem:[#allocation23_spill] sm:$0xff] %v8305_v43 }
 0x2ff   : > { %2342 = vrot.lane.b32.xlu1 %v8130_v30, %s7169_s18  ;;  %5776 = vmatprep.mubr.msk.bf16.mxu0 %vm1874_vm1, %v1591_v50 }
 0x301   : > { %3143 = vrot.lane.b32.xlu0 %v8081_v3, %s7166_s22  ;;  %v8314_v31 = vpop.permute.xlu0 %3753 }
 0x302   : > { %11287 = vst [vmem:[#allocation24_spill] sm:$0xff] %v8314_v31 }
 0x303   : > { %2984 = vrot.lane.b32.xlu1 %v8130_v30, %s7170_s1 }
 0x305   : > { %3777 = vrot.lane.b32.xlu0 %v8081_v3, %s7168_s30  ;;  %v8324_v34 = vpop.permute.xlu0 %2507 }
 0x306   : > { %5777 = vmatmul.mubr.msk.bf16.gmra.mxu0 %vm1874_vm1, %v1591_v50 }
 0x307   : > { %2495 = vrot.lane.b32.xlu1 %v1591_v50, %s7167_s25  ;;  %5778 = vmatprep.mubr.msk.bf16.mxu0 %vm1874_vm1, %v1592_v52 }
 0x309   : > { %2340 = vrot.lane.b32.xlu0 %v8081_v3, %s7169_s18  ;;  %v8334_v45 = vpop.permute.xlu0 %2505 }
 0x30b   : > { %3129 = vrot.lane.b32.xlu1 %v1591_v50, %s7166_s22 }
 0x30d   : > { %2982 = vrot.lane.b32.xlu0 %v8081_v3, %s7170_s1  ;;  %v8344_v44 = vpop.permute.xlu0 %3139 }
 0x30e   : > { %5779 = vmatmul.mubr.msk.bf16.gmra.mxu0 %vm1874_vm1, %v1592_v52  ;;  %11291 = vst [vmem:[#allocation28_spill] sm:$0xff] %v8344_v44 }
 0x30f   : > { %3763 = vrot.lane.b32.xlu1 %v1591_v50, %s7168_s30  ;;  %5780 = vmatprep.mubr.msk.bf16.mxu0 %vm1874_vm1, %v1593_v63 }
 0x311   : > { %2493 = vrot.lane.b32.xlu0 %v1590_v36, %s7167_s25  ;;  %v8354_v24 = vpop.permute.xlu0 %3773 }
 0x312   : > { %11293 = vst [vmem:[#allocation30_spill] sm:$0xff] %v8354_v24 }
 0x313   : > { %3149 = vrot.lane.b32.xlu1 %v8098_v9, %s7166_s22 }
 0x315   : > { %3127 = vrot.lane.b32.xlu0 %v1590_v36, %s7166_s22  ;;  %v8364_v42 = vpop.permute.xlu0 %2336 }
 0x316   : > { %5781 = vmatmul.mubr.msk.bf16.gmra.mxu0 %vm1874_vm1, %v1593_v63 }
 0x317   : > { %3783 = vrot.lane.b32.xlu1 %v8098_v9, %s7168_s30  ;;  %5862 = vmatprep.mubr.msk.bf16.mxu0 %vm1874_vm1, %v8272_v38 }
 0x319   : > { %3761 = vrot.lane.b32.xlu0 %v1590_v36, %s7168_s30  ;;  %v8374_v58 = vpop.permute.xlu0 %2978 }
 0x31a   : > { %11295 = vst [vmem:[#allocation32_spill] sm:$0xff] %v8374_v58 }
 0x31b   : > { %2346 = vrot.lane.b32.xlu1 %v8098_v9, %s7169_s18 }
 0x31d   : > { %2515 = vrot.lane.b32.xlu0 %v8098_v9, %s7167_s25 }
 0x31f   : > { %2988 = vrot.lane.b32.xlu1 %v8098_v9, %s7170_s1 }
 0x321   : > { %3147 = vrot.lane.b32.xlu0 %v8116_v55, %s7166_s22 }
 0x323   : > { %2513 = vrot.lane.b32.xlu1 %v8116_v55, %s7167_s25 }
 0x325   : > { %3781 = vrot.lane.b32.xlu0 %v8116_v55, %s7168_s30 }
 0x327   : > { %2499 = vrot.lane.b32.xlu1 %v1593_v63, %s7167_s25 }
 0x329   : > { %2497 = vrot.lane.b32.xlu0 %v1592_v52, %s7167_s25 }
 0x32b   : > { %3133 = vrot.lane.b32.xlu1 %v1593_v63, %s7166_s22 }
 0x32d   : > { %3131 = vrot.lane.b32.xlu0 %v1592_v52, %s7166_s22 }
 0x32f   : > { %3767 = vrot.lane.b32.xlu1 %v1593_v63, %s7168_s30 }
 0x331   : > { %3765 = vrot.lane.b32.xlu0 %v1592_v52, %s7168_s30 }
 0x333   : > { %2344 = vrot.lane.b32.xlu1 %v8116_v55, %s7169_s18 }
 0x335   : > { %3153 = vrot.lane.b32.xlu0 %v8089_v33, %s7166_s22 }
 0x337   : > { %2986 = vrot.lane.b32.xlu1 %v8116_v55, %s7170_s1 }
 0x339   : > { %3787 = vrot.lane.b32.xlu0 %v8089_v33, %s7168_s30 }
 0x33b   : > { %2519 = vrot.lane.b32.xlu1 %v8089_v33, %s7167_s25 }
 0x33d   : > { %2350 = vrot.lane.b32.xlu0 %v8089_v33, %s7169_s18 }
 0x33f   : > { %2517 = vrot.lane.b32.xlu1 %v8092_v18, %s7167_s25 }
 0x341   : > { %2992 = vrot.lane.b32.xlu0 %v8089_v33, %s7170_s1 }
 0x343   : > { %3151 = vrot.lane.b32.xlu1 %v8092_v18, %s7166_s22 }
 0x345   : > { %2348 = vrot.lane.b32.xlu0 %v8092_v18, %s7169_s18 }
 0x347   : > { %3785 = vrot.lane.b32.xlu1 %v8092_v18, %s7168_s30 }
 0x349   : > { %2990 = vrot.lane.b32.xlu0 %v8092_v18, %s7170_s1 }
 0x34b   : > { %2523 = vrot.lane.b32.xlu1 %v8149_v35, %s7167_s25 }
 0x34d   : > { %3157 = vrot.lane.b32.xlu0 %v8149_v35, %s7166_s22 }
 0x34f   : > { %2521 = vrot.lane.b32.xlu1 %v8164_v19, %s7167_s25 }
 0x351   : > { %3791 = vrot.lane.b32.xlu0 %v8149_v35, %s7168_s30 }
 0x353   : > { %3155 = vrot.lane.b32.xlu1 %v8164_v19, %s7166_s22 }
 0x355   : > { %2354 = vrot.lane.b32.xlu0 %v8149_v35, %s7169_s18 }
 0x357   : > { %3789 = vrot.lane.b32.xlu1 %v8164_v19, %s7168_s30  ;;  %v8478_v18 = vpop.f32.mrf.mxu0 }
 0x359   : > { %2996 = vrot.lane.b32.xlu0 %v8149_v35, %s7170_s1  ;;  %v8486_v12 = vpop.f32.mrf.mxu0 }
 0x35b   : > { %2527 = vrot.lane.b32.xlu1 %v8122_v23, %s7167_s25  ;;  %v1985_v51 = vpop.f32.mrf.mxu0 }
 0x35d   : > { %v8378_v25 = vpop.permute.xlu1 %2491  ;;  %2352 = vrot.lane.b32.xlu0 %v8164_v19, %s7169_s18 }
 0x35f   : > { %2525 = vrot.lane.b32.xlu1 %v8134_v17, %s7167_s25  ;;  %v8384_v59 = vpop.permute.xlu0 %2489 }
 0x361   : > { %v8386_v32 = vpop.permute.xlu1 %3125  ;;  %2994 = vrot.lane.b32.xlu0 %v8164_v19, %s7170_s1 }
 0x362   : > { %11296 = vst [vmem:[#allocation33_spill] sm:$0xff] %v8386_v32 }
 0x363   : > { %3159 = vrot.lane.b32.xlu1 %v8134_v17, %s7166_s22  ;;  %v8392_v62 = vpop.permute.xlu0 %3123 }
 0x364   : > { %11297 = vst [vmem:[#allocation34_spill] sm:$0xff] %v8392_v62 }
 0x365   : > { %v8394_v20 = vpop.permute.xlu1 %3759  ;;  %3161 = vrot.lane.b32.xlu0 %v8122_v23, %s7166_s22 }
 0x366   : > { %11298 = vst [vmem:[#allocation35_spill] sm:$0xff] %v8394_v20 }
 0x367   : > { %3793 = vrot.lane.b32.xlu1 %v8134_v17, %s7168_s30  ;;  %v8400_v1 = vpop.permute.xlu0 %3757 }
 0x368   : > { %11299 = vst [vmem:[#allocation36_spill] sm:$0xff] %v8400_v1 }
 0x369   : > { %v8402_v15 = vpop.permute.xlu1 %3145  ;;  %3795 = vrot.lane.b32.xlu0 %v8122_v23, %s7168_s30 }
 0x36b   : > { %2531 = vrot.lane.b32.xlu1 %v8103_v2, %s7167_s25  ;;  %v8408_v37 = vpop.permute.xlu0 %2511 }
 0x36d   : > { %v8410_v14 = vpop.permute.xlu1 %3779  ;;  %2358 = vrot.lane.b32.xlu0 %v8122_v23, %s7169_s18 }
 0x36e   : > { %11300 = vst [vmem:[#allocation37_spill] sm:$0xff] %v8410_v14 }
 0x36f   : > { %2529 = vrot.lane.b32.xlu1 %v8107_v47, %s7167_s25  ;;  %v8416_v49 = vpop.permute.xlu0 %2509 }
 0x371   : > { %v8418_v36 = vpop.permute.xlu1 %2342  ;;  %3000 = vrot.lane.b32.xlu0 %v8122_v23, %s7170_s1 }
 0x373   : > { %3163 = vrot.lane.b32.xlu1 %v8107_v47, %s7166_s22  ;;  %v8424_v54 = vpop.permute.xlu0 %3143 }
 0x375   : > { %v8426_v28 = vpop.permute.xlu1 %2984  ;;  %2356 = vrot.lane.b32.xlu0 %v8134_v17, %s7169_s18 }
 0x376   : > { %11301 = vst [vmem:[#allocation38_spill] sm:$0xff] %v8426_v28 }
 0x377   : > { %3797 = vrot.lane.b32.xlu1 %v8107_v47, %s7168_s30  ;;  %v8432_v22 = vpop.permute.xlu0 %3777 }
 0x378   : > { %11302 = vst [vmem:[#allocation39_spill] sm:$0xff] %v8432_v22 }
 0x379   : > { %v8434_v29 = vpop.permute.xlu1 %2495  ;;  %2998 = vrot.lane.b32.xlu0 %v8134_v17, %s7170_s1 }
 0x37a   : > { %11303 = vst [vmem:[#allocation40_spill] sm:$0xff] %v8434_v29 }
 0x37b   : > { %3622 = vrot.lane.b32.xlu1 %v8098_v9, %s7171_s24  ;;  %v8440_v50 = vpop.permute.xlu0 %2340 }
 0x37d   : > { %v8442_v53 = vpop.permute.xlu1 %3129  ;;  %3165 = vrot.lane.b32.xlu0 %v8103_v2, %s7166_s22  ;;  %s5721_s22 = sshll.u32 %s11822_s21, 4  ;;  %s7172_s21 = smov 72  }
 0x37e   : > { %11304 = vst [vmem:[#allocation41_spill] sm:$0xff] %v8442_v53 }
 0x37f   : > { %3620 = vrot.lane.b32.xlu1 %v8116_v55, %s7171_s24  ;;  %v8448_v5 = vpop.permute.xlu0 %2982 }
 0x380   : > { %11305 = vst [vmem:[#allocation42_spill] sm:$0xff] %v8448_v5 }
 0x381   : > { %v8450_v46 = vpop.permute.xlu1 %3763  ;;  %3799 = vrot.lane.b32.xlu0 %v8103_v2, %s7168_s30 }
 0x382   : > { %11306 = vst [vmem:[#allocation43_spill] sm:$0xff] %v8450_v46 }
 0x383   : > { %3618 = vrot.lane.b32.xlu1 %v8130_v30, %s7171_s24  ;;  %v8456_v52 = vpop.permute.xlu0 %2493 }
 0x385   : > { %v8458_v10 = vpop.permute.xlu1 %3149  ;;  %2362 = vrot.lane.b32.xlu0 %v8103_v2, %s7169_s18 }
 0x387   : > { %3614 = vrot.lane.b32.xlu1 %v8046_v56, %s7171_s24  ;;  %v8464_v13 = vpop.permute.xlu0 %3127 }
 0x388   : > { %11307 = vst [vmem:[#allocation44_spill] sm:$0xff] %v8464_v13 }
 0x389   : > { %v8466_v63 = vpop.permute.xlu1 %3783  ;;  %3004 = vrot.lane.b32.xlu0 %v8103_v2, %s7170_s1 }
 0x38a   : > { %11308 = vst [vmem:[#allocation45_spill] sm:$0xff] %v8466_v63 }
 0x38b   : > { %v8470_v55 = vpop.permute.xlu0 %3761 }
 0x38c   : > { %11309 = vst [vmem:[#allocation46_spill] sm:$0xff] %v8470_v55 }
 0x38d   : > { %v8472_v30 = vpop.permute.xlu1 %2346  ;;  %2360 = vrot.lane.b32.xlu0 %v8107_v47, %s7169_s18  ;;  %s8512_s18 = scalar_lea.vmem %s11020_s2, %s5721_s22 }
 0x38e   : > { %v8519_v20 = vld [vmem:[%s8512_s18 + $0x18] sm:$0xff]  ;;  %v8524_v1 = vld [vmem:[%s8512_s18 + $0x10] sm:$0xff] }
 0x38f   : > { %v8476_v9 = vpop.permute.xlu0 %2515  ;;  %11317 = vst [vmem:[#allocation54_spill] sm:$0xff] %v8519_v20  ;;  %11319 = vst [vmem:[#allocation56_spill] sm:$0xff] %v8524_v1 }
 0x390   : > { %v2579_v6 = vsel %vm1874_vm1, %v8476_v9, 0 }
 0x391   : > { %v8480_v56 = vpop.permute.xlu1 %2988  ;;  %3002 = vrot.lane.b32.xlu0 %v8107_v47, %s7170_s1 }
 0x392   : > { %11310 = vst [vmem:[#allocation47_spill] sm:$0xff] %v8480_v56  ;;  %v1987_v56 = vpop.f32.mrf.mxu0 }
 0x393   : > { %v8484_v33 = vpop.permute.xlu0 %3147  ;;  %v8529_v31 = vadd.f32 %v1987_v56, %v8519_v20 }
 0x395   : > { %v8488_v39 = vpop.permute.xlu1 %2513  ;;  %2974 = vrot.lane.b32.xlu0 %v8031_v4, %s7170_s1  ;;  %v8507_v4 = vpop.f32.mrf.mxu0  ;;  %11320 = vst [vmem:[#allocation57_spill] sm:$0xff] %v8529_v31  ;;  %s7173_s1 = smov 8  }
 0x397   : > { %v8492_v58 = vpop.permute.xlu0 %3781  ;;  %v8526_v40 = vpop.f32.mrf.mxu0 }
 0x398   : > { %11311 = vst [vmem:[#allocation48_spill] sm:$0xff] %v8492_v58 }
 0x399   : > { %v8494_v5 = vpop.permute.xlu1 %2499  ;;  %3638 = vrot.lane.b32.xlu0 %v8103_v2, %s7171_s24 }
 0x39a   : > { %11312 = vst [vmem:[#allocation49_spill] sm:$0xff] %v8494_v5 }
 0x39b   : > { %v8498_v28 = vpop.permute.xlu0 %2497 }
 0x39c   : > { %11313 = vst [vmem:[#allocation50_spill] sm:$0xff] %v8498_v28 }
 0x39d   : > { %v8500_v46 = vpop.permute.xlu1 %3133  ;;  %3636 = vrot.lane.b32.xlu0 %v8107_v47, %s7171_s24 }
 0x39e   : > { %11314 = vst [vmem:[#allocation51_spill] sm:$0xff] %v8500_v46  ;;  %v8540_v46 = vpop.f32.mrf.mxu0 }
 0x39f   : > { %v8505_v55 = vpop.permute.xlu0 %3131 }
 0x3a0   : > { %11315 = vst [vmem:[#allocation52_spill] sm:$0xff] %v8505_v55 }
 0x3a1   : > { %v8514_v2 = vpop.permute.xlu1 %3767  ;;  %3634 = vrot.lane.b32.xlu0 %v8122_v23, %s7171_s24 }
 0x3a2   : > { %11316 = vst [vmem:[#allocation53_spill] sm:$0xff] %v8514_v2  ;;  %v8536_v2 = vadd.f32 %v1985_v51, %v8524_v1 }
 0x3a3   : > { %v8521_v47 = vpop.permute.xlu0 %3765 }
 0x3a4   : > { %11318 = vst [vmem:[#allocation55_spill] sm:$0xff] %v8521_v47  ;;  %11321 = vst [vmem:[#allocation58_spill] sm:$0xff] %v8536_v2  ;;  %v2063_v47 = vmax.f32 %v8536_v2, %v8529_v31  ;;  %v8570_v2 = vld [vmem:[%s8512_s18 + $0x58] sm:$0xff] }
 0x3a5   : > { %v8531_v0 = vpop.permute.xlu1 %2344  ;;  %3632 = vrot.lane.b32.xlu0 %v8134_v17, %s7171_s24  ;;  %v8550_v17 = vpop.f32.mrf.mxu0  ;;  %11326 = vst [vmem:[#allocation63_spill] sm:$0xff] %v8570_v2 }
 0x3a7   : > { %v8538_v23 = vpop.permute.xlu0 %3153 }
 0x3a8   : > { %11322 = vst [vmem:[#allocation59_spill] sm:$0xff] %v8538_v23 }
 0x3a9   : > { %v8544_v57 = vpop.permute.xlu1 %2986  ;;  %3616 = vrot.lane.b32.xlu0 %v8081_v3, %s7171_s24 }
 0x3aa   : > { %11323 = vst [vmem:[#allocation60_spill] sm:$0xff] %v8544_v57 }
 0x3ab   : > { %2064 = vmax.xlane.f32.xlu1 %v2063_v47  ;;  %v8548_v56 = vpop.permute.xlu0 %3787  ;;  %v8567_v47 = vld [vmem:[%s8512_s18 + $0x50] sm:$0xff] }
 0x3ac   : > { %11324 = vst [vmem:[#allocation61_spill] sm:$0xff] %v8548_v56  ;;  %11325 = vst [vmem:[#allocation62_spill] sm:$0xff] %v8567_v47 }
 0x3ad   : > { %v8552_v51 = vpop.permute.xlu1 %2519  ;;  %3630 = vrot.lane.b32.xlu0 %v8149_v35, %s7171_s24 }
 0x3ae   : > { %v8556_v20 = vpop.f32.mrf.mxu0 }
 0x3af   : > { %v8558_v1 = vpop.permute.xlu0 %2350 }
 0x3b0   : > { %v8560_v31 = vpop.f32.mrf.mxu0 }
 0x3b1   : > { %v8562_v57 = vpop.permute.xlu1 %2517  ;;  %3628 = vrot.lane.b32.xlu0 %v8164_v19, %s7171_s24 }
 0x3b2   : > { %v2005_v3 = vpop.f32.mrf.mxu0 }
 0x3b3   : > { %v8572_v56 = vpop.permute.xlu0 %2992  ;;  %v8575_v55 = vadd.f32 %v2005_v3, %v8567_v47  ;;  %v8595_v3 = vld [vmem:[%s8512_s18 + $0x70] sm:$0xff] }
 0x3b4   : > { %11327 = vst [vmem:[#allocation64_spill] sm:$0xff] %v8572_v56  ;;  %v2007_v35 = vpop.f32.mrf.mxu0  ;;  %11332 = vst [vmem:[#allocation69_spill] sm:$0xff] %v8595_v3 }
 0x3b5   : > { %11328 = vst [vmem:[#allocation65_spill] sm:$0xff] %v8575_v55  ;;  %v8578_v24 = vadd.f32 %v2007_v35, %v8570_v2  ;;  %v8580_v53 = vpop.permute.xlu1 %3151  ;;  %3612 = vrot.lane.b32.xlu0 %v8056_v7, %s7171_s24  ;;  %v8598_v2 = vld [vmem:[%s8512_s18 + $0x78] sm:$0xff] }
 0x3b6   : > { %11330 = vst [vmem:[#allocation67_spill] sm:$0xff] %v8580_v53  ;;  %v8584_v19 = vpop.f32.mrf.mxu0  ;;  %11333 = vst [vmem:[#allocation70_spill] sm:$0xff] %v8598_v2 }
 0x3b7   : > { %11329 = vst [vmem:[#allocation66_spill] sm:$0xff] %v8578_v24  ;;  %v2075_v11 = vmax.f32 %v8575_v55, %v8578_v24  ;;  %v8588_v13 = vpop.permute.xlu0 %2348 }
 0x3b8   : > { %v8590_v56 = vpop.f32.mrf.mxu0 }
 0x3b9   : > { %v8592_v22 = vpop.permute.xlu1 %3785  ;;  %2076 = vmax.xlane.f32.xlu1 %v2075_v11 }
 0x3ba   : > { %11331 = vst [vmem:[#allocation68_spill] sm:$0xff] %v8592_v22  ;;  %v2015_v35 = vpop.f32.mrf.mxu0 }
 0x3bb   : > { %v8600_v7 = vpop.permute.xlu0 %2990  ;;  %v8603_v32 = vadd.f32 %v2015_v35, %v8595_v3  ;;  %v8621_v35 = vld [vmem:[%s8512_s18 + $0x90] sm:$0xff] }
 0x3bc   : > { %11334 = vst [vmem:[#allocation71_spill] sm:$0xff] %v8600_v7  ;;  %v2017_v47 = vpop.f32.mrf.mxu0  ;;  %11337 = vst [vmem:[#allocation74_spill] sm:$0xff] %v8621_v35  ;;  %v8624_v7 = vld [vmem:[%s8512_s18 + $0x98] sm:$0xff] }
 0x3bd   : > { %11335 = vst [vmem:[#allocation72_spill] sm:$0xff] %v8603_v32  ;;  %v8606_v24 = vadd.f32 %v2017_v47, %v8598_v2  ;;  %v8608_v55 = vpop.permute.xlu1 %2523  ;;  %11338 = vst [vmem:[#allocation75_spill] sm:$0xff] %v8624_v7 }
 0x3be   : > { %v8610_v22 = vpop.f32.mrf.mxu0 }
 0x3bf   : > { %11336 = vst [vmem:[#allocation73_spill] sm:$0xff] %v8606_v24  ;;  %v2081_v11 = vmax.f32 %v8603_v32, %v8606_v24  ;;  %v8614_v14 = vpop.permute.xlu0 %3157 }
 0x3c0   : > { %v8616_v62 = vpop.f32.mrf.mxu0 }
 0x3c1   : > { %v8618_v58 = vpop.permute.xlu1 %2521  ;;  %2082 = vmax.xlane.f32.xlu1 %v2081_v11 }
 0x3c2   : > { %v2025_v47 = vpop.f32.mrf.mxu0 }
 0x3c3   : > { %v8626_v2 = vpop.permute.xlu0 %3791  ;;  %v8629_v24 = vadd.f32 %v2025_v47, %v8621_v35  ;;  %v8647_v47 = vld [vmem:[%s8512_s18 + $0xb0] sm:$0xff] }
 0x3c4   : > { %11339 = vst [vmem:[#allocation76_spill] sm:$0xff] %v8626_v2  ;;  %v2027_v3 = vpop.f32.mrf.mxu0  ;;  %11344 = vst [vmem:[#allocation81_spill] sm:$0xff] %v8647_v47 }
 0x3c5   : > { %11340 = vst [vmem:[#allocation77_spill] sm:$0xff] %v8629_v24  ;;  %v8632_v32 = vadd.f32 %v2027_v3, %v8624_v7  ;;  %v8634_v41 = vpop.permute.xlu1 %3155  ;;  %v8650_v3 = vld [vmem:[%s8512_s18 + $0xb8] sm:$0xff]  ;;  %v8653_v7 = vld [vmem:[%s8512_s18 + $0x8] sm:$0xff] }
 0x3c6   : > { %11342 = vst [vmem:[#allocation79_spill] sm:$0xff] %v8634_v41  ;;  %v8636_v11 = vpop.f32.mrf.mxu0  ;;  %11345 = vst [vmem:[#allocation82_spill] sm:$0xff] %v8650_v3  ;;  %v8670_v48 = vadd.f32 %v8486_v12, %v8653_v7 }
 0x3c7   : > { %11341 = vst [vmem:[#allocation78_spill] sm:$0xff] %v8632_v32  ;;  %v2087_v63 = vmax.f32 %v8629_v24, %v8632_v32  ;;  %v8640_v43 = vpop.permute.xlu0 %2354  ;;  %11346 = vst [vmem:[#allocation83_spill] sm:$0xff] %v8653_v7  ;;  %v8658_v32 = vld [vmem:[%s8512_s18] sm:$0xff] }
 0x3c8   : > { %v8642_v8 = vpop.f32.mrf.mxu0  ;;  %11348 = vst [vmem:[#allocation85_spill] sm:$0xff] %v8658_v32  ;;  %11351 = vst [vmem:[#allocation88_spill] sm:$0xff] %v8670_v48 }
 0x3c9   : > { %v8644_v2 = vpop.permute.xlu1 %3789  ;;  %2088 = vmax.xlane.f32.xlu1 %v2087_v63 }
 0x3ca   : > { %11343 = vst [vmem:[#allocation80_spill] sm:$0xff] %v8644_v2  ;;  %v2035_v35 = vpop.f32.mrf.mxu0 }
 0x3cb   : > { %v8655_v53 = vpop.permute.xlu0 %2996  ;;  %v8661_v24 = vadd.f32 %v2035_v35, %v8647_v47  ;;  %v8688_v47 = vld [vmem:[%s8512_s18 + $0x20] sm:$0xff] }
 0x3cc   : > { %11347 = vst [vmem:[#allocation84_spill] sm:$0xff] %v8655_v53  ;;  %v2037_v5 = vpop.f32.mrf.mxu0  ;;  %v8675_v53 = vld [vmem:[%s8512_s18 + $0x28] sm:$0xff]  ;;  %11354 = vst [vmem:[#allocation91_spill] sm:$0xff] %v8688_v47 }
 0x3cd   : > { %11349 = vst [vmem:[#allocation86_spill] sm:$0xff] %v8661_v24  ;;  %v8664_v2 = vadd.f32 %v2037_v5, %v8650_v3  ;;  %v8666_v63 = vpop.permute.xlu1 %2527  ;;  %11352 = vst [vmem:[#allocation89_spill] sm:$0xff] %v8675_v53  ;;  %v8683_v5 = vadd.f32 %v8478_v18, %v8658_v32  ;;  %v8702_v18 = vld [vmem:[%s8512_s18 + $0xd8] sm:$0xff] }
 0x3ce   : > { %v8672_v23 = vpop.f32.mrf.mxu0  ;;  %11357 = vst [vmem:[#allocation94_spill] sm:$0xff] %v8702_v18  ;;  %v8705_v32 = vld [vmem:[%s8512_s18 + $0x38] sm:$0xff] }
 0x3cf   : > { %11350 = vst [vmem:[#allocation87_spill] sm:$0xff] %v8664_v2  ;;  %v2093_v28 = vmax.f32 %v8661_v24, %v8664_v2  ;;  %v8679_v35 = vpop.permute.xlu0 %2352  ;;  %11353 = vst [vmem:[#allocation90_spill] sm:$0xff] %v8683_v5  ;;  %v2060_v7 = vmax.f32 %v8683_v5, %v8670_v48  ;;  %v8696_v2 = vadd.f32 %v8526_v40, %v8675_v53  ;;  %v8699_v24 = vld [vmem:[%s8512_s18 + $0xd0] sm:$0xff] }
 0x3d0   : > { %v8685_v3 = vpop.f32.mrf.mxu0  ;;  %11356 = vst [vmem:[#allocation93_spill] sm:$0xff] %v8699_v24  ;;  %11358 = vst [vmem:[#allocation95_spill] sm:$0xff] %v8705_v32  ;;  %v8714_v5 = vld [vmem:[%s8512_s18 + $0x30] sm:$0xff] }
 0x3d1   : > { %v8690_v12 = vpop.permute.xlu1 %2525  ;;  %2094 = vmax.xlane.f32.xlu1 %v2093_v28  ;;  %11355 = vst [vmem:[#allocation92_spill] sm:$0xff] %v8696_v2  ;;  %v8711_v28 = vadd.f32 %v8507_v4, %v8688_v47  ;;  %11361 = vst [vmem:[#allocation98_spill] sm:$0xff] %v8714_v5  ;;  %v8728_v4 = vadd.f32 %v8550_v17, %v8705_v32  ;;  %v8733_v47 = vld [vmem:[%s8512_s18 + $0x48] sm:$0xff]  ;;  %v8758_v32 = vld [vmem:[%s8512_s18 + $0xf8] sm:$0xff] }
 0x3d2   : > { %v2045_v44 = vpop.f32.mrf.mxu0  ;;  %11365 = vst [vmem:[#allocation102_spill] sm:$0xff] %v8733_v47  ;;  %11370 = vst [vmem:[#allocation107_spill] sm:$0xff] %v8758_v32 }
 0x3d3   : > { %v8707_v41 = vpop.permute.xlu0 %2994  ;;  %11360 = vst [vmem:[#allocation97_spill] sm:$0xff] %v8711_v28  ;;  %v8717_v40 = vadd.f32 %v2045_v44, %v8699_v24  ;;  %11364 = vst [vmem:[#allocation101_spill] sm:$0xff] %v8728_v4  ;;  %v8741_v24 = vadd.f32 %v8540_v46, %v8714_v5  ;;  %v8761_v5 = vld [vmem:[%s8512_s18 + $0x68] sm:$0xff] }
 0x3d4   : > { %11359 = vst [vmem:[#allocation96_spill] sm:$0xff] %v8707_v41  ;;  %v2047_v48 = vpop.f32.mrf.mxu0  ;;  %2061 = vmax.xlane.f32.xlu0 %v2060_v7  ;;  %v2066_v41 = vmax.f32 %v8711_v28, %v8696_v2  ;;  %v8744_v2 = vld [vmem:[%s8512_s18 + $0x40] sm:$0xff] }
 0x3d5   : > { %11362 = vst [vmem:[#allocation99_spill] sm:$0xff] %v8717_v40  ;;  %v8720_v53 = vadd.f32 %v2047_v48, %v8702_v18  ;;  %v8722_v29 = vpop.permute.xlu1 %3159  ;;  %11366 = vst [vmem:[#allocation103_spill] sm:$0xff] %v8741_v24  ;;  %v2069_v28 = vmax.f32 %v8741_v24, %v8728_v4  ;;  %v8770_v4 = vld [vmem:[%s8512_s18 + $0x60] sm:$0xff] }
 0x3d6   : > { %v8730_v7 = vpop.f32.mrf.mxu0  ;;  %11367 = vst [vmem:[#allocation104_spill] sm:$0xff] %v8744_v2  ;;  %v8794_v9 = vadd.f32 %v8584_v19, %v8770_v4 }
 0x3d7   : > { %11363 = vst [vmem:[#allocation100_spill] sm:$0xff] %v8720_v53  ;;  %v2099_v48 = vmax.f32 %v8717_v40, %v8720_v53  ;;  %v8737_v44 = vpop.permute.xlu0 %3161  ;;  %v8752_v53 = vadd.f32 %v8560_v31, %v8733_v47  ;;  %v8755_v40 = vld [vmem:[%s8512_s18 + $0xf0] sm:$0xff] }
 0x3d8   : > { %v2053_v18 = vpop.f32.mrf.mxu0  ;;  %2067 = vmax.xlane.f32.xlu0 %v2066_v41  ;;  %11369 = vst [vmem:[#allocation106_spill] sm:$0xff] %v8755_v40 }
 0x3d9   : > { %v8746_v17 = vpop.permute.xlu1 %3793  ;;  %2100 = vmax.xlane.f32.xlu1 %v2099_v48  ;;  %v8767_v48 = vadd.f32 %v8556_v20, %v8744_v2  ;;  %v8784_v2 = vadd.f32 %v8590_v56, %v8761_v5 }
 0x3da   : > { %11368 = vst [vmem:[#allocation105_spill] sm:$0xff] %v8746_v17  ;;  %v2055_v46 = vpop.f32.mrf.mxu0 }
 0x3db   : > { %v8763_v41 = vpop.permute.xlu0 %3795  ;;  %v8773_v31 = vadd.f32 %v2055_v46, %v8755_v40  ;;  %v2072_v20 = vmax.f32 %v8767_v48, %v8752_v53  ;;  %v8797_v40 = vld [vmem:[%s8512_s18 + $0x80] sm:$0xff] }
 0x3dc   : > { %v2057_v17 = vpop.f32.mrf.mxu0  ;;  %2070 = vmax.xlane.f32.xlu0 %v2069_v28  ;;  %v8788_v28 = vld [vmem:[%s8512_s18 + $0x88] sm:$0xff] }
 0x3dd   : > { %11371 = vst [vmem:[#allocation108_spill] sm:$0xff] %v8773_v31  ;;  %v8776_v24 = vadd.f32 %v2057_v17, %v8758_v32  ;;  %v2532_v47 = vpop.permute.xlu1 %2531  ;;  %v8803_v32 = vadd.f32 %v8616_v62, %v8788_v28 }
 0x3de   : > { %6322 = vmatprep.subr.msk.bf16.mxu0 %vm1874_vm1, %v2532_v47  ;;  %v2078_v47 = vmax.f32 %v8794_v9, %v8784_v2 }
 0x3df   : > { %11372 = vst [vmem:[#allocation109_spill] sm:$0xff] %v8776_v24  ;;  %v2105_v17 = vmax.f32 %v8773_v31, %v8776_v24  ;;  %5847 = vmatpush3.bf16.xpose.msra.mxu0 %v2579_v6  ;;  %v2359_v46 = vpop.permute.xlu0 %2358  ;;  %11373 = vst [vmem:[#allocation110_spill] sm:$0xff] %v8803_v32  ;;  %v8807_v6 = vld [vmem:[%s8512_s18 + $0xa8] sm:$0xff]  ;;  %v2576_v24 = vsel %vm1874_vm1, %v8488_v39, 0  ;;  %v8836_v39 = vld [vmem:[%s8512_s18 + $0xc0] sm:$0xff] }
 0x3e0   : > { %2073 = vmax.xlane.f32.xlu0 %v2072_v20  ;;  %v8813_v20 = vadd.f32 %v8610_v22, %v8797_v40 }
 0x3e1   : > { %v2530_v56 = vpop.permute.xlu1 %2529  ;;  %2106 = vmax.xlane.f32.xlu1 %v2105_v17  ;;  %v8816_v17 = vld [vmem:[%s8512_s18 + $0xa0] sm:$0xff] }
 0x3e2   : > { %6323 = vmatprep.subr.msk.bf16.mxu0 %vm1874_vm1, %v2530_v56  ;;  %v2084_v62 = vmax.f32 %v8813_v20, %v8803_v32  ;;  %v8824_v56 = vadd.f32 %v8642_v8, %v8807_v6  ;;  %v8831_v22 = vadd.f32 %v8636_v11, %v8816_v17  ;;  %v8845_v32 = vld [vmem:[%s8512_s18 + $0xe8] sm:$0xff]  ;;  %v8851_v11 = vadd.f32 %v8672_v23, %v8836_v39 }
 0x3e3   : > { %v8809_v19 = vpop.permute.xlu0 %3000 }
 0x3e4   : > { %11374 = vst [vmem:[#allocation111_spill] sm:$0xff] %v8809_v19  ;;  %2079 = vmax.xlane.f32.xlu0 %v2078_v47  ;;  %11375 = vst [vmem:[#allocation112_spill] sm:$0xff] %v8824_v56  ;;  %v8827_v19 = vld [vmem:[%s8512_s18 + $0xc8] sm:$0xff]  ;;  %v2090_v47 = vmax.f32 %v8831_v22, %v8824_v56 }
 0x3e5   : > { %11376 = vst [vmem:[#allocation113_spill] sm:$0xff] %v8831_v22  ;;  %v8842_v8 = vadd.f32 %v8685_v3, %v8827_v19  ;;  %v8861_v3 = vadd.f32 %v2053_v18, %v8845_v32  ;;  %v2570_v18 = vsel %vm1874_vm1, %v8416_v49, 0  ;;  %v11388_v49 = vld [vmem:[#allocation23_spill] sm:$0xff] }
 0x3e7   : > { %5849 = vmatpush3.bf16.xpose.msra.mxu0 %v2576_v24  ;;  %v2357_v31 = vpop.permute.xlu0 %2356  ;;  %v2096_v56 = vmax.f32 %v8851_v11, %v8842_v8 }
 0x3e8   : > { %2085 = vmax.xlane.f32.xlu0 %v2084_v62  ;;  %6324 = vmatprep.subr.msk.bf16.mxu0 %vm1874_vm1, %v8666_v63  ;;  %v8854_v62 = vld [vmem:[%s8512_s18 + $0xe0] sm:$0xff]  ;;  %v2573_v63 = vsel %vm1874_vm1, %v8408_v37, 0 }
 0x3eb   : > { %v8847_v24 = vpop.permute.xlu0 %2998 }
 0x3ec   : > { %11377 = vst [vmem:[#allocation114_spill] sm:$0xff] %v8847_v24  ;;  %2091 = vmax.xlane.f32.xlu0 %v2090_v47  ;;  %v8865_v24 = vadd.f32 %v8730_v7, %v8854_v62 }
 0x3ee   : > { %v2102_v23 = vmax.f32 %v8865_v24, %v8861_v3 }
 0x3ef   : > { %5851 = vmatpush3.bf16.xpose.msra.mxu0 %v2573_v63  ;;  %v3166_v22 = vpop.permute.xlu0 %3165  ;;  %v11398_v63 = vld [vmem:[#allocation76_spill] sm:$0xff] }
 0x3f0   : > { %2097 = vmax.xlane.f32.xlu0 %v2096_v56  ;;  %6325 = vmatprep.subr.msk.bf16.mxu0 %vm1874_vm1, %v8690_v12  ;;  %v2567_v12 = vsel %vm1874_vm1, %v8324_v34, 0  ;;  %v11381_v34 = vld [vmem:[#allocation28_spill] sm:$0xff] }
 0x3f3   : > { %v8871_v37 = vpop.permute.xlu0 %3799 }
 0x3f4   : > { %2103 = vmax.xlane.f32.xlu0 %v2102_v23  ;;  %v11399_v23 = vld [vmem:[#allocation29_spill] sm:$0xff] }
 0x3f7   : > { %5853 = vmatpush3.bf16.xpose.msra.mxu0 %v2570_v18  ;;  %v2363_v47 = vpop.permute.xlu0 %2362  ;;  %v11400_v18 = vld [vmem:[#allocation41_spill] sm:$0xff] }
 0x3f8   : > { %5782 = vmatprep.subr.bf16.mxu1 %v2363_v47  ;;  %6326 = vmatprep.subr.msk.bf16.mxu0 %vm1874_vm1, %v8608_v55  ;;  %v2564_v55 = vsel %vm1874_vm1, %v8334_v45, 0  ;;  %v3198_v45 = vsel %vm1874_vm1, %v11381_v34, 0  ;;  %v11401_v47 = vld [vmem:[#allocation80_spill] sm:$0xff]  ;;  %v11414_v34 = vld [vmem:[#allocation46_spill] sm:$0xff] }
 0x3f9   : > { %5783 = vmatpush3.bf16.msra.mxu1 %v8472_v30  ;;  %v2561_v30 = vsel %vm1874_vm1, %v8228_v21, 0  ;;  %v3213_v21 = vsel %vm1874_vm1, %v8458_v10, 0 }
 0x3fb   : > { %v3005_v7 = vpop.permute.xlu0 %3004 }
 0x3ff   : > { %5855 = vmatpush3.bf16.xpose.msra.mxu0 %v2567_v12  ;;  %v2361_v56 = vpop.permute.xlu0 %2360 }
 0x400   : > { %5784 = vmatprep.subr.bf16.mxu1 %v2361_v56  ;;  %6327 = vmatprep.subr.msk.bf16.mxu0 %vm1874_vm1, %v8618_v58  ;;  %v11384_v58 = vld [vmem:[#allocation20_spill] sm:$0xff] }
 0x401   : > { %5785 = vmatpush3.bf16.msra.mxu1 %v8531_v0  ;;  %v2558_v0 = vsel %vm1874_vm1, %v8239_v16, 0  ;;  %v3210_v16 = vsel %vm1874_vm1, %v8484_v33, 0  ;;  %v3204_v33 = vsel %vm1874_vm1, %v8424_v54, 0  ;;  %v11403_v56 = vld [vmem:[#allocation52_spill] sm:$0xff] }
 0x402   : > { %5786 = vmatprep.subr.bf16.mxu1 %v2359_v46  ;;  %v11396_v46 = vld [vmem:[#allocation39_spill] sm:$0xff] }
 0x405   : > { %5787 = vmatpush3.bf16.msra.mxu1 %v8418_v36  ;;  %v11389_v36 = vld [vmem:[#allocation45_spill] sm:$0xff] }
 0x406   : > { %5788 = vmatprep.subr.bf16.mxu1 %v2357_v31  ;;  %v3847_v54 = vsel %vm1874_vm1, %v11389_v36, 0  ;;  %v11395_v31 = vld [vmem:[#allocation105_spill] sm:$0xff] }
 0x407   : > { %5857 = vmatpush3.bf16.xpose.msra.mxu0 %v2564_v55  ;;  %v11404_v55 = vld [vmem:[#allocation61_spill] sm:$0xff] }
 0x408   : > { %6328 = vmatprep.subr.msk.bf16.mxu0 %vm1874_vm1, %v8552_v51  ;;  %v11393_v51 = vld [vmem:[#allocation37_spill] sm:$0xff] }
 0x409   : > { %5789 = vmatpush3.bf16.msra.mxu1 %v8440_v50  ;;  %v11390_v50 = vld [vmem:[#allocation25_spill] sm:$0xff] }
 0x40a   : > { %5790 = vmatprep.subr.bf16.mxu1 %v8640_v43  ;;  %v11379_v43 = vld [vmem:[#allocation40_spill] sm:$0xff] }
 0x40d   : > { %5791 = vmatpush3.bf16.msra.mxu1 %v8360_v26  ;;  %v11382_v26 = vld [vmem:[#allocation50_spill] sm:$0xff] }
 0x40e   : > { %5792 = vmatprep.subr.bf16.mxu1 %v8679_v35  ;;  %v3841_v35 = vsel %vm1874_vm1, %v11393_v51, 0 }
 0x40f   : > { %5859 = vmatpush3.bf16.xpose.msra.mxu0 %v2561_v30  ;;  %v11405_v30 = vld [vmem:[#allocation21_spill] sm:$0xff] }
 0x410   : > { %6329 = vmatprep.subr.msk.bf16.mxu0 %vm1874_vm1, %v8562_v57  ;;  %v3164_v57 = vpop.permute.xlu1 %3163 }
 0x411   : > { %5793 = vmatpush3.bf16.msra.mxu1 %v8364_v42  ;;  %v11383_v42 = vld [vmem:[#allocation59_spill] sm:$0xff] }
 0x412   : > { %5794 = vmatprep.subr.bf16.mxu1 %v8558_v1  ;;  %v11386_v1 = vld [vmem:[#allocation67_spill] sm:$0xff] }
 0x415   : > { %5795 = vmatpush3.bf16.msra.mxu1 %v8298_v60 }
 0x416   : > { %5796 = vmatprep.subr.bf16.mxu1 %v8588_v13  ;;  %v11392_v13 = vld [vmem:[#allocation34_spill] sm:$0xff] }
 0x417   : > { %5861 = vmatpush3.bf16.xpose.msra.mxu0 %v2558_v0  ;;  %v3829_v0 = vsel %vm1874_vm1, %v11405_v30, 0 }
 0x418   : > { %6330 = vmatprep.subr.msk.bf16.mxu0 %vm1874_vm1, %v3166_v22  ;;  %v3838_v22 = vsel %vm1874_vm1, %v11396_v46, 0  ;;  %v11429_v46 = vld [vmem:[#allocation56_spill] sm:$0xff] }
 0x419   : > { %5797 = vmatpush3.bf16.msra.mxu1 %v8267_v61  ;;  %v3207_v61 = vsel %vm1874_vm1, %v8402_v15, 0  ;;  %v11387_v15 = vld [vmem:[#allocation18_spill] sm:$0xff] }
 0x41a   : > { %5878 = vmatprep.subr.bf16.mxu1 %v3005_v7  ;;  %v11402_v7 = vld [vmem:[#allocation30_spill] sm:$0xff] }
 0x41b   : > { %v3832_v12 = vsel %vm1874_vm1, %v11402_v7, 0  ;;  %v11432_v7 = vld [vmem:[#allocation91_spill] sm:$0xff] }
 0x41e   : > { %5863 = vmatmul.mubr.msk.bf16.vlgmr.msra.gmra.mxu0 %vm1874_vm1, %v8272_v38  ;;  %v11378_v38 = vld [vmem:[#allocation27_spill] sm:$0xff] }
 0x41f   : > { %5864 = vmatprep.mubr.msk.bf16.mxu0 %vm1874_vm1, %v8310_v27  ;;  %5943 = vmatpush3.bf16.xpose.msra.mxu0 %v3213_v21  ;;  %v3201_v60 = vsel %vm1874_vm1, %v11378_v38, 0  ;;  %v11406_v21 = vld [vmem:[#allocation51_spill] sm:$0xff]  ;;  %v11410_v38 = vld [vmem:[#allocation26_spill] sm:$0xff] }
 0x420   : > { %6331 = vmatprep.subr.msk.bf16.mxu0 %vm1874_vm1, %v3164_v57  ;;  %v11407_v57 = vld [vmem:[#allocation68_spill] sm:$0xff] }
 0x426   : > { %5865 = vmatmul.mubr.msk.bf16.gmra.mxu0 %vm1874_vm1, %v8310_v27  ;;  %v11380_v27 = vld [vmem:[#allocation79_spill] sm:$0xff] }
 0x427   : > { %5866 = vmatprep.mubr.msk.bf16.mxu0 %vm1874_vm1, %v8384_v59  ;;  %5945 = vmatpush3.bf16.xpose.msra.mxu0 %v3210_v16  ;;  %v11408_v16 = vld [vmem:[#allocation19_spill] sm:$0xff] }
 0x428   : > { %6332 = vmatprep.subr.msk.bf16.mxu0 %vm1874_vm1, %v8737_v44  ;;  %v11394_v44 = vld [vmem:[#allocation33_spill] sm:$0xff] }
 0x42e   : > { %5867 = vmatmul.mubr.msk.bf16.gmra.mxu0 %vm1874_vm1, %v8384_v59  ;;  %v11385_v59 = vld [vmem:[#allocation49_spill] sm:$0xff] }
 0x42f   : > { %5868 = vmatprep.mubr.msk.bf16.mxu0 %vm1874_vm1, %v8378_v25  ;;  %5947 = vmatpush3.bf16.xpose.msra.mxu0 %v3207_v61  ;;  %v3826_v61 = vsel %vm1874_vm1, %v11408_v16, 0 }
 0x430   : > { %6333 = vmatprep.subr.msk.bf16.mxu0 %vm1874_vm1, %v8722_v29  ;;  %v3798_v29 = vpop.permute.xlu1 %3797 }
 0x436   : > { %5869 = vmatmul.mubr.msk.bf16.gmra.mxu0 %vm1874_vm1, %v8378_v25  ;;  %v3195_v25 = vsel %vm1874_vm1, %v11384_v58, 0 }
 0x437   : > { %5870 = vmatprep.mubr.msk.bf16.mxu0 %vm1874_vm1, %v8456_v52  ;;  %5949 = vmatpush3.bf16.xpose.msra.mxu0 %v3204_v33  ;;  %v11409_v33 = vld [vmem:[#allocation24_spill] sm:$0xff] }
 0x438   : > { %6334 = vmatprep.subr.msk.bf16.mxu0 %vm1874_vm1, %v8614_v14  ;;  %v3192_v14 = vsel %vm1874_vm1, %v11387_v15, 0 }
 0x43e   : > { %5871 = vmatmul.mubr.msk.bf16.gmra.mxu0 %vm1874_vm1, %v8456_v52  ;;  %v11391_v52 = vld [vmem:[#allocation48_spill] sm:$0xff] }
 0x43f   : > { %5872 = vmatprep.mubr.msk.bf16.mxu0 %vm1874_vm1, %v11379_v43  ;;  %5951 = vmatpush3.bf16.xpose.msra.mxu0 %v3201_v60  ;;  %v3844_v10 = vsel %vm1874_vm1, %v11391_v52, 0  ;;  %v11411_v60 = vld [vmem:[#allocation36_spill] sm:$0xff] }
 0x440   : > { %6335 = vmatprep.subr.msk.bf16.mxu0 %vm1874_vm1, %v11380_v27  ;;  %v9040_v27 = vpop.permute.xlu0 %3002 }
 0x441   : > { %11413 = vst [vmem:[#allocation27_spill] sm:$0xff] %v9040_v27 }
 0x446   : > { %5873 = vmatmul.mubr.msk.bf16.gmra.mxu0 %vm1874_vm1, %v11379_v43  ;;  %v11412_v43 = vld [vmem:[#allocation35_spill] sm:$0xff] }
 0x447   : > { %5874 = vmatprep.mubr.msk.bf16.mxu0 %vm1874_vm1, %v11382_v26  ;;  %5953 = vmatpush3.bf16.xpose.msra.mxu0 %v3198_v45  ;;  %v9046_v45 = vpop.permute.xlu0 %2974 }
 0x448   : > { %6336 = vmatprep.subr.msk.bf16.mxu0 %vm1874_vm1, %v11383_v42  ;;  %11415 = vst [vmem:[#allocation40_spill] sm:$0xff] %v9046_v45 }
 0x44b   : > { %v9052_v42 = vpop.permute.xlu0 %3638 }
 0x44c   : > { %11417 = vst [vmem:[#allocation79_spill] sm:$0xff] %v9052_v42 }
 0x44e   : > { %5875 = vmatmul.mubr.msk.bf16.gmra.mxu0 %vm1874_vm1, %v11382_v26  ;;  %v11416_v26 = vld [vmem:[#allocation43_spill] sm:$0xff] }
 0x44f   : > { %5876 = vmatprep.mubr.msk.bf16.mxu0 %vm1874_vm1, %v11385_v59  ;;  %5955 = vmatpush3.bf16.xpose.msra.mxu0 %v3195_v25  ;;  %v9056_v58 = vpop.permute.xlu0 %3636  ;;  %v11419_v25 = vld [vmem:[#allocation55_spill] sm:$0xff] }
 0x450   : > { %6337 = vmatprep.subr.msk.bf16.mxu0 %vm1874_vm1, %v11386_v1  ;;  %11418 = vst [vmem:[#allocation28_spill] sm:$0xff] %v9056_v58  ;;  %v11421_v1 = vld [vmem:[#allocation53_spill] sm:$0xff]  ;;  %v11453_v58 = vld [vmem:[#allocation92_spill] sm:$0xff] }
 0x456   : > { %5877 = vmatmul.mubr.msk.bf16.gmra.mxu0 %vm1874_vm1, %v11385_v59  ;;  %v9060_v59 = vpop.permute.xlu0 %3634 }
 0x457   : > { %5957 = vmatpush3.bf16.xpose.msra.mxu0 %v3192_v14  ;;  %5958 = vmatprep.mubr.msk.bf16.mxu0 %vm1874_vm1, %v11388_v49  ;;  %11420 = vst [vmem:[#allocation50_spill] sm:$0xff] %v9060_v59 }
 0x458   : > { %6338 = vmatprep.subr.msk.bf16.mxu0 %vm1874_vm1, %v8871_v37  ;;  %v3835_v37 = vsel %vm1874_vm1, %v11399_v23, 0 }
 0x45a   : > { %v9066_v15 = vpop.permute.xlu0 %3632 }
 0x45b   : > { %11422 = vst [vmem:[#allocation59_spill] sm:$0xff] %v9066_v15  ;;  %v11448_v15 = vld [vmem:[#allocation69_spill] sm:$0xff] }
 0x45e   : > { %5959 = vmatmul.mubr.msk.bf16.vlgmr.msra.gmra.mxu0 %vm1874_vm1, %v11388_v49  ;;  %v9070_v14 = vpop.permute.xlu0 %3616 }
 0x45f   : > { %5960 = vmatprep.mubr.msk.bf16.mxu0 %vm1874_vm1, %v11390_v50  ;;  %6039 = vmatpush3.bf16.xpose.msra.mxu0 %v3847_v54  ;;  %11423 = vst [vmem:[#allocation20_spill] sm:$0xff] %v9070_v14 }
 0x460   : > { %6339 = vmatprep.subr.msk.bf16.mxu0 %vm1874_vm1, %v3798_v29  ;;  %v9074_v29 = vpop.permute.xlu1 %3622 }
 0x461   : > { %11425 = vst [vmem:[#allocation67_spill] sm:$0xff] %v9074_v29 }
 0x462   : > { %v9072_v36 = vpop.permute.xlu0 %3630 }
 0x463   : > { %11424 = vst [vmem:[#allocation49_spill] sm:$0xff] %v9072_v36 }
 0x466   : > { %5961 = vmatmul.mubr.msk.bf16.gmra.mxu0 %vm1874_vm1, %v11390_v50  ;;  %v11426_v50 = vld [vmem:[#allocation85_spill] sm:$0xff] }
 0x467   : > { %5962 = vmatprep.mubr.msk.bf16.mxu0 %vm1874_vm1, %v11392_v13  ;;  %6041 = vmatpush3.bf16.xpose.msra.mxu0 %v3844_v10  ;;  %v11427_v10 = vld [vmem:[#allocation83_spill] sm:$0xff] }
 0x468   : > { %6340 = vmatprep.subr.msk.bf16.mxu0 %vm1874_vm1, %v8763_v41  ;;  %v11397_v41 = vld [vmem:[#allocation44_spill] sm:$0xff] }
 0x46e   : > { %5963 = vmatmul.mubr.msk.bf16.gmra.mxu0 %vm1874_vm1, %v11392_v13 }
 0x46f   : > { %5964 = vmatprep.mubr.msk.bf16.mxu0 %vm1874_vm1, %v11394_v44  ;;  %6043 = vmatpush3.bf16.xpose.msra.mxu0 %v3841_v35 }
 0x470   : > { %6341 = vmatprep.subr.msk.bf16.mxu0 %vm1874_vm1, %v11395_v31  ;;  %v9084_v31 = vpop.permute.xlu0 %3628 }
 0x471   : > { %11428 = vst [vmem:[#allocation18_spill] sm:$0xff] %v9084_v31 }
 0x476   : > { %5965 = vmatmul.mubr.msk.bf16.gmra.mxu0 %vm1874_vm1, %v11394_v44 }
 0x477   : > { %5966 = vmatprep.mubr.msk.bf16.mxu0 %vm1874_vm1, %v11397_v41  ;;  %6045 = vmatpush3.bf16.xpose.msra.mxu0 %v3838_v22 }
 0x478   : > { %6342 = vmatprep.subr.msk.bf16.mxu0 %vm1874_vm1, %v11398_v63 }
 0x47e   : > { %5967 = vmatmul.mubr.msk.bf16.gmra.mxu0 %vm1874_vm1, %v11397_v41  ;;  %v11430_v41 = vld [vmem:[#allocation54_spill] sm:$0xff] }
 0x47f   : > { %5968 = vmatprep.mubr.msk.bf16.mxu0 %vm1874_vm1, %v11400_v18  ;;  %6047 = vmatpush3.bf16.xpose.msra.mxu0 %v3835_v37  ;;  %v9092_v37 = vpop.permute.xlu1 %3620 }
 0x480   : > { %6343 = vmatprep.subr.msk.bf16.mxu0 %vm1874_vm1, %v11401_v47  ;;  %11431 = vst [vmem:[#allocation23_spill] sm:$0xff] %v9092_v37 }
 0x483   : > { %v9106_v16 = vpop.permute.xlu1 %3618 }
 0x484   : > { %11435 = vst [vmem:[#allocation25_spill] sm:$0xff] %v9106_v16 }
 0x486   : > { %5969 = vmatmul.mubr.msk.bf16.gmra.mxu0 %vm1874_vm1, %v11400_v18 }
 0x487   : > { %5970 = vmatprep.mubr.msk.bf16.mxu0 %vm1874_vm1, %v11403_v56  ;;  %6049 = vmatpush3.bf16.xpose.msra.mxu0 %v3832_v12 }
 0x488   : > { %6344 = vmatprep.subr.msk.bf16.mxu0 %vm1874_vm1, %v11404_v55 }
 0x48e   : > { %5971 = vmatmul.mubr.msk.bf16.gmra.mxu0 %vm1874_vm1, %v11403_v56  ;;  %v11433_v56 = vld [vmem:[#allocation89_spill] sm:$0xff] }
 0x48f   : > { %5972 = vmatprep.mubr.msk.bf16.mxu0 %vm1874_vm1, %v11406_v21  ;;  %6051 = vmatpush3.bf16.xpose.msra.mxu0 %v3829_v0  ;;  %v9102_v0 = vpop.permute.xlu0 %3612 }
 0x490   : > { %6345 = vmatprep.subr.msk.bf16.mxu0 %vm1874_vm1, %v11407_v57  ;;  %11434 = vst [vmem:[#allocation45_spill] sm:$0xff] %v9102_v0 }
 0x496   : > { %5973 = vmatmul.mubr.msk.bf16.gmra.mxu0 %vm1874_vm1, %v11406_v21 }
 0x497   : > { %6053 = vmatpush3.bf16.xpose.msra.mxu0 %v3826_v61  ;;  %6054 = vmatprep.mubr.msk.bf16.mxu0 %vm1874_vm1, %v11409_v33  ;;  %v11436_v61 = vld [vmem:[#allocation98_spill] sm:$0xff] }
 0x49e   : > { %6055 = vmatmul.mubr.msk.bf16.vlgmr.msra.gmra.mxu0 %vm1874_vm1, %v11409_v33 }
 0x49f   : > { %6056 = vmatprep.mubr.msk.bf16.mxu0 %vm1874_vm1, %v11410_v38 }
 0x4a6   : > { %6057 = vmatmul.mubr.msk.bf16.gmra.mxu0 %vm1874_vm1, %v11410_v38  ;;  %v11437_v38 = vld [vmem:[#allocation95_spill] sm:$0xff] }
 0x4a7   : > { %6058 = vmatprep.mubr.msk.bf16.mxu0 %vm1874_vm1, %v11411_v60 }
 0x4ae   : > { %6059 = vmatmul.mubr.msk.bf16.gmra.mxu0 %vm1874_vm1, %v11411_v60 }
 0x4af   : > { %6060 = vmatprep.mubr.msk.bf16.mxu0 %vm1874_vm1, %v11412_v43 }
 0x4b6   : > { %6061 = vmatmul.mubr.msk.bf16.gmra.mxu0 %vm1874_vm1, %v11412_v43 }
 0x4b7   : > { %6062 = vmatprep.mubr.msk.bf16.mxu0 %vm1874_vm1, %v11414_v34 }
 0x4be   : > { %6063 = vmatmul.mubr.msk.bf16.gmra.mxu0 %vm1874_vm1, %v11414_v34  ;;  %v2062_v34 = vpop.xlane.xlu0 %2061 }
 0x4bf   : > { %6064 = vmatprep.mubr.msk.bf16.mxu0 %vm1874_vm1, %v11416_v26 }
 0x4c6   : > { %6065 = vmatmul.mubr.msk.bf16.gmra.mxu0 %vm1874_vm1, %v11416_v26 }
 0x4c7   : > { %6066 = vmatprep.mubr.msk.bf16.mxu0 %vm1874_vm1, %v11419_v25 }
 0x4ce   : > { %6067 = vmatmul.mubr.msk.bf16.gmra.mxu0 %vm1874_vm1, %v11419_v25 }
 0x4cf   : > { %6068 = vmatprep.mubr.msk.bf16.mxu0 %vm1874_vm1, %v11421_v1 }
 0x4d6   : > { %6069 = vmatmul.mubr.msk.bf16.gmra.mxu0 %vm1874_vm1, %v11421_v1  ;;  %v11438_v1 = vld [vmem:[#allocation104_spill] sm:$0xff] }
 0x4de   : > { %v2639_v49 = vpop.f32.mrf.mxu0 }
 0x4df   : > { %v9077_v52 = vadd.f32 %v2639_v49, %v11426_v50 }
 0x4e0   : > { %v2641_v54 = vpop.f32.mrf.mxu0 }
 0x4e1   : > { %v9080_v13 = vadd.f32 %v2641_v54, %v11427_v10  ;;  %v11439_v54 = vld [vmem:[#allocation102_spill] sm:$0xff] }
 0x4e2   : > { %v2643_v51 = vpop.f32.mrf.mxu0 }
 0x4e3   : > { %v2718_v35 = vmax.f32 %v9077_v52, %v9080_v13  ;;  %v9087_v22 = vadd.f32 %v2643_v51, %v11429_v46 }
 0x4e4   : > { %v2645_v44 = vpop.f32.mrf.mxu0 }
 0x4e5   : > { %v9090_v63 = vadd.f32 %v2645_v44, %v11430_v41  ;;  %2719 = vmax.xlane.f32.xlu0 %v2718_v35  ;;  %v11440_v35 = vld [vmem:[#allocation90_spill] sm:$0xff]  ;;  %v9123_v41 = vpop.permute.xlu1 %3614 }
 0x4e6   : > { %v2649_v23 = vpop.f32.mrf.mxu0  ;;  %v2108_v44 = vsub.f32 %v11440_v35, %v2062_v34  ;;  %11441 = vst [vmem:[#allocation48_spill] sm:$0xff] %v9123_v41 }
 0x4e7   : > { %v2721_v18 = vmax.f32 %v9087_v22, %v9090_v63  ;;  %v9097_v12 = vadd.f32 %v2649_v23, %v11432_v7  ;;  %v11442_v23 = vld [vmem:[#allocation88_spill] sm:$0xff] }
 0x4e8   : > { %v2651_v47 = vpop.f32.mrf.mxu0 }
 0x4e9   : > { %v9100_v55 = vadd.f32 %v2651_v47, %v11433_v56  ;;  %2722 = vmax.xlane.f32.xlu1 %v2721_v18  ;;  %v2109_v18 = vsub.f32 %v11442_v23, %v2062_v34  ;;  %v2065_v31 = vpop.xlane.xlu1 %2064 }
 0x4ea   : > { %v2653_v30 = vpop.f32.mrf.mxu0 }
 0x4eb   : > { %v2724_v21 = vmax.f32 %v9097_v12, %v9100_v55  ;;  %v9109_v33 = vadd.f32 %v2653_v30, %v11436_v61  ;;  %v2142_v35 = vmul.f32 1.442695, %v2109_v18 }
 0x4ec   : > { %v2655_v57 = vpop.f32.mrf.mxu0 }
 0x4ed   : > { %v9112_v60 = vadd.f32 %v2655_v57, %v11437_v38  ;;  %2725 = vmax.xlane.f32.xlu0 %v2724_v21  ;;  %v11443_v21 = vld [vmem:[#allocation62_spill] sm:$0xff] }
 0x4ee   : > { %v2659_v43 = vpop.f32.mrf.mxu0 }
 0x4ef   : > { %v2727_v26 = vmax.f32 %v9109_v33, %v9112_v60  ;;  %v9117_v49 = vadd.f32 %v2659_v43, %v11438_v1  ;;  %v11444_v43 = vld [vmem:[#allocation63_spill] sm:$0xff] }
 0x4f0   : > { %v2661_v25 = vpop.f32.mrf.mxu0 }
 0x4f1   : > { %v9120_v51 = vadd.f32 %v2661_v25, %v11439_v54  ;;  %2728 = vmax.xlane.f32.xlu1 %v2727_v26  ;;  %v2140_v25 = vmul.f32 1.442695, %v2108_v44 }
 0x4f2   : > { %v2663_v46 = vpop.f32.mrf.mxu0 }
 0x4f3   : > { %v2730_v47 = vmax.f32 %v9117_v49, %v9120_v51  ;;  %v9129_v57 = vadd.f32 %v2663_v46, %v11443_v21  ;;  %v11446_v46 = vld [vmem:[#allocation58_spill] sm:$0xff]  ;;  %6628 = vpow2.f32 %v2140_v25 }
 0x4f4   : > { %v2665_v30 = vpop.f32.mrf.mxu0  ;;  %v2110_v21 = vsub.f32 %v11446_v46, %v2065_v31  ;;  %6630 = vpow2.f32 %v2142_v35 }
 0x4f5   : > { %v9132_v0 = vadd.f32 %v2665_v30, %v11444_v43  ;;  %2731 = vmax.xlane.f32.xlu0 %v2730_v47  ;;  %v11447_v47 = vld [vmem:[#allocation57_spill] sm:$0xff]  ;;  %v2068_v43 = vpop.xlane.xlu0 %2067 }
 0x4f6   : > { %v2669_v26 = vpop.f32.mrf.mxu0  ;;  %v2111_v44 = vsub.f32 %v11447_v47, %v2065_v31  ;;  %v2113_v31 = vsub.f32 %v11453_v58, %v2068_v43 }
 0x4f7   : > { %v2733_v41 = vmax.f32 %v9129_v57, %v9132_v0  ;;  %v9137_v34 = vadd.f32 %v2669_v26, %v8770_v4  ;;  %v11450_v26 = vld [vmem:[#allocation70_spill] sm:$0xff] }
 0x4f8   : > { %v2671_v36 = vpop.f32.mrf.mxu0  ;;  %v2146_v37 = vmul.f32 1.442695, %v2111_v44 }
 0x4f9   : > { %v9140_v23 = vadd.f32 %v2671_v36, %v8761_v5  ;;  %2734 = vmax.xlane.f32.xlu1 %v2733_v41  ;;  %v2144_v36 = vmul.f32 1.442695, %v2110_v21  ;;  %v11452_v41 = vld [vmem:[#allocation97_spill] sm:$0xff]  ;;  %v2071_v29 = vpop.xlane.xlu0 %2070 }
 0x4fa   : > { %v2673_v30 = vpop.f32.mrf.mxu0  ;;  %v2112_v46 = vsub.f32 %v11452_v41, %v2068_v43  ;;  %v11456_v43 = vld [vmem:[#allocation74_spill] sm:$0xff] }
 0x4fb   : > { %11445 = vst [vmem:[#allocation34_spill] sm:$0xff] %v9140_v23  ;;  %v2736_v18 = vmax.f32 %v9137_v34, %v9140_v23  ;;  %v9147_v16 = vadd.f32 %v2673_v30, %v11448_v15  ;;  %6632 = vpow2.f32 %v2144_v36  ;;  %v2150_v30 = vmul.f32 1.442695, %v2113_v31 }
 0x4fc   : > { %v2675_v14 = vpop.f32.mrf.mxu0  ;;  %6634 = vpow2.f32 %v2146_v37  ;;  %v11462_v37 = vld [vmem:[#allocation101_spill] sm:$0xff] }
 0x4fd   : > { %11449 = vst [vmem:[#allocation37_spill] sm:$0xff] %v9147_v16  ;;  %v9150_v59 = vadd.f32 %v2675_v14, %v11450_v26  ;;  %2737 = vmax.xlane.f32.xlu0 %v2736_v18  ;;  %v2148_v14 = vmul.f32 1.442695, %v2112_v46  ;;  %v11458_v26 = vld [vmem:[#allocation75_spill] sm:$0xff]  ;;  %v2115_v46 = vsub.f32 %v11462_v37, %v2071_v29  ;;  %v2074_v31 = vpop.xlane.xlu0 %2073 }
 0x4fe   : > { %v2679_v25 = vpop.f32.mrf.mxu0 }
 0x4ff   : > { %11451 = vst [vmem:[#allocation33_spill] sm:$0xff] %v9150_v59  ;;  %v2739_v35 = vmax.f32 %v9147_v16, %v9150_v59  ;;  %v9157_v42 = vadd.f32 %v2679_v25, %v8797_v40  ;;  %6636 = vpow2.f32 %v2148_v14  ;;  %v11460_v25 = vld [vmem:[#allocation103_spill] sm:$0xff]  ;;  %v11466_v59 = vld [vmem:[#allocation81_spill] sm:$0xff]  ;;  %v11476_v16 = vld [vmem:[#allocation110_spill] sm:$0xff] }
 0x500   : > { %v2681_v47 = vpop.f32.mrf.mxu0  ;;  %v9171_v36 = vpop.eup %6628  ;;  %6638 = vpow2.f32 %v2150_v30 }
 0x501   : > { %11454 = vst [vmem:[#allocation105_spill] sm:$0xff] %v9157_v42  ;;  %v9160_v15 = vadd.f32 %v2681_v47, %v8788_v28  ;;  %2740 = vmax.xlane.f32.xlu1 %v2739_v35  ;;  %v2114_v47 = vsub.f32 %v11460_v25, %v2071_v29  ;;  %11461 = vst [vmem:[#allocation29_spill] sm:$0xff] %v9171_v36  ;;  %v9176_v27 = vpop.eup %6630  ;;  %v2117_v29 = vsub.f32 %v8752_v53, %v2074_v31 }
 0x502   : > { %v2683_v21 = vpop.f32.mrf.mxu0  ;;  %11463 = vst [vmem:[#allocation41_spill] sm:$0xff] %v9176_v27  ;;  %v2204_v37 = vadd.f32 %v9176_v27, %v9171_v36 }
 0x503   : > { %11455 = vst [vmem:[#allocation39_spill] sm:$0xff] %v9160_v15  ;;  %v2742_v58 = vmax.f32 %v9157_v42, %v9160_v15  ;;  %v9165_v18 = vadd.f32 %v2683_v21, %v11456_v43  ;;  %v2116_v43 = vsub.f32 %v8767_v48, %v2074_v31  ;;  %v2158_v31 = vmul.f32 1.442695, %v2117_v29 }
 0x504   : > { %v2685_v44 = vpop.f32.mrf.mxu0 }
 0x505   : > { %11457 = vst [vmem:[#allocation44_spill] sm:$0xff] %v9165_v18  ;;  %v9168_v41 = vadd.f32 %v2685_v44, %v11458_v26  ;;  %2743 = vmax.xlane.f32.xlu0 %v2742_v58  ;;  %v2152_v58 = vmul.f32 1.442695, %v2114_v47  ;;  %v2154_v26 = vmul.f32 1.442695, %v2115_v46 }
 0x506   : > { %v2689_v35 = vpop.f32.mrf.mxu0  ;;  %v2156_v48 = vmul.f32 1.442695, %v2116_v43 }
 0x507   : > { %11459 = vst [vmem:[#allocation76_spill] sm:$0xff] %v9168_v41  ;;  %v2745_v45 = vmax.f32 %v9165_v18, %v9168_v41  ;;  %v9179_v44 = vadd.f32 %v2689_v35, %v8816_v17  ;;  %v2077_v35 = vpop.xlane.xlu1 %2076  ;;  %v2080_v18 = vpop.xlane.xlu0 %2079  ;;  %6640 = vpow2.f32 %v2152_v58  ;;  %v11474_v58 = vld [vmem:[#allocation65_spill] sm:$0xff] }
 0x508   : > { %v2691_v21 = vpop.f32.mrf.mxu0  ;;  %v9196_v46 = vpop.eup %6632  ;;  %6642 = vpow2.f32 %v2154_v26  ;;  %v2118_v43 = vsub.f32 %v11474_v58, %v2077_v35 }
 0x509   : > { %11464 = vst [vmem:[#allocation80_spill] sm:$0xff] %v9179_v44  ;;  %v9182_v14 = vadd.f32 %v2691_v21, %v8807_v6  ;;  %2746 = vmax.xlane.f32.xlu1 %v2745_v45  ;;  %v11468_v45 = vld [vmem:[#allocation82_spill] sm:$0xff]  ;;  %11470 = vst [vmem:[#allocation21_spill] sm:$0xff] %v9196_v46  ;;  %v9200_v27 = vpop.eup %6634  ;;  %6644 = vpow2.f32 %v2156_v48  ;;  %v2121_v48 = vsub.f32 %v8784_v2, %v2080_v18 }
 0x50a   : > { %v2693_v30 = vpop.f32.mrf.mxu0  ;;  %11471 = vst [vmem:[#allocation51_spill] sm:$0xff] %v9200_v27  ;;  %6646 = vpow2.f32 %v2158_v31 }
 0x50b   : > { %11465 = vst [vmem:[#allocation30_spill] sm:$0xff] %v9182_v14  ;;  %v2748_v25 = vmax.f32 %v9179_v44, %v9182_v14  ;;  %v9191_v21 = vadd.f32 %v2693_v30, %v11466_v59  ;;  %v9202_v59 = vpop.xlane.xlu1 %2082  ;;  %v2160_v44 = vmul.f32 1.442695, %v2118_v43  ;;  %v2166_v2 = vmul.f32 1.442695, %v2121_v48 }
 0x50c   : > { %v2695_v41 = vpop.f32.mrf.mxu0  ;;  %v9211_v29 = vpop.eup %6636 }
 0x50d   : > { %11467 = vst [vmem:[#allocation52_spill] sm:$0xff] %v9191_v21  ;;  %v9194_v47 = vadd.f32 %v2695_v41, %v11468_v45  ;;  %2749 = vmax.xlane.f32.xlu0 %v2748_v25  ;;  %2205 = vadd.xlane.f32.xlu1 %v2204_v37  ;;  %v11475_v25 = vld [vmem:[#allocation66_spill] sm:$0xff]  ;;  %v2086_v45 = vpop.xlane.xlu0 %2085  ;;  %6648 = vpow2.f32 %v2160_v44  ;;  %v11481_v44 = vld [vmem:[#allocation72_spill] sm:$0xff] }
 0x50e   : > { %v2699_v53 = vpop.f32.mrf.mxu0  ;;  %v2119_v37 = vsub.f32 %v11475_v25, %v2077_v35  ;;  %v2124_v35 = vsub.f32 %v8813_v20, %v2086_v45 }
 0x50f   : > { %11469 = vst [vmem:[#allocation61_spill] sm:$0xff] %v9194_v47  ;;  %v2751_v36 = vmax.f32 %v9191_v21, %v9194_v47  ;;  %v9205_v41 = vadd.f32 %v2699_v53, %v8836_v39  ;;  %v2207_v53 = vadd.f32 %v9200_v27, %v9196_v46  ;;  %v9218_v21 = vpop.eup %6638  ;;  %v2089_v58 = vpop.xlane.xlu1 %2088 }
 0x510   : > { %v2701_v14 = vpop.f32.mrf.mxu0  ;;  %v2162_v25 = vmul.f32 1.442695, %v2119_v37  ;;  %v2210_v46 = vadd.f32 %v9218_v21, %v9211_v29  ;;  %v2172_v37 = vmul.f32 1.442695, %v2124_v35 }
 0x511   : > { %11472 = vst [vmem:[#allocation68_spill] sm:$0xff] %v9205_v41  ;;  %v9208_v30 = vadd.f32 %v2701_v14, %v8827_v19  ;;  %2752 = vmax.xlane.f32.xlu1 %v2751_v36  ;;  %v2120_v36 = vsub.f32 %v8794_v9, %v2080_v18  ;;  %v11478_v9 = vld [vmem:[#allocation77_spill] sm:$0xff] }
 0x512   : > { %v2703_v26 = vpop.f32.mrf.mxu0  ;;  %v2126_v27 = vsub.f32 %v11478_v9, %v2089_v58  ;;  %v11479_v18 = vld [vmem:[#allocation93_spill] sm:$0xff]  ;;  %6650 = vpow2.f32 %v2162_v25  ;;  %v2092_v25 = vpop.xlane.xlu0 %2091 }
 0x513   : > { %11473 = vst [vmem:[#allocation19_spill] sm:$0xff] %v9208_v30  ;;  %v2754_v47 = vmax.f32 %v9205_v41, %v9208_v30  ;;  %v2125_v30 = vsub.f32 %v11476_v16, %v2086_v45  ;;  %v11477_v41 = vld [vmem:[#allocation94_spill] sm:$0xff]  ;;  %v2164_v42 = vmul.f32 1.442695, %v2120_v36 }
 0x514   : > { %v2705_v14 = vpop.f32.mrf.mxu0  ;;  %v11480_v16 = vld [vmem:[#allocation78_spill] sm:$0xff] }
 0x515   : > { %2755 = vmax.xlane.f32.xlu0 %v2754_v47  ;;  %2208 = vadd.xlane.f32.xlu1 %v2207_v53  ;;  %v9225_v15 = vadd.f32 %v2705_v14, %v11477_v41  ;;  %v9231_v47 = vadd.f32 %v2703_v26, %v11479_v18  ;;  %v2127_v41 = vsub.f32 %v11480_v16, %v2089_v58  ;;  %v9240_v53 = vpop.eup %6640  ;;  %v2174_v36 = vmul.f32 1.442695, %v2125_v30  ;;  %v11482_v58 = vld [vmem:[#allocation73_spill] sm:$0xff] }
 0x516   : > { %v2709_v31 = vpop.f32.mrf.mxu0  ;;  %v9246_v14 = vpop.eup %6642  ;;  %6652 = vpow2.f32 %v2164_v42  ;;  %v2123_v30 = vsub.f32 %v11482_v58, %v9202_v59 }
 0x517   : > { %v9234_v20 = vadd.f32 %v2709_v31, %v8854_v62  ;;  %v2757_v26 = vmax.f32 %v9231_v47, %v9225_v15  ;;  %6654 = vpow2.f32 %v2166_v2  ;;  %v2178_v48 = vmul.f32 1.442695, %v2127_v41  ;;  %v9252_v31 = vpop.eup %6644  ;;  %v11486_v41 = vld [vmem:[#allocation113_spill] sm:$0xff] }
 0x518   : > { %v2711_v23 = vpop.f32.mrf.mxu0  ;;  %6656 = vpow2.f32 %v2172_v37  ;;  %11483 = vst [vmem:[#allocation24_spill] sm:$0xff] %v9252_v31  ;;  %v2213_v42 = vadd.f32 %v9246_v14, %v9240_v53  ;;  %v2170_v16 = vmul.f32 1.442695, %v2123_v30  ;;  %v2128_v37 = vsub.f32 %v11486_v41, %v2092_v25 }
 0x519   : > { %v9237_v43 = vadd.f32 %v2711_v23, %v8845_v32  ;;  %2211 = vadd.xlane.f32.xlu1 %v2210_v46  ;;  %v2176_v23 = vmul.f32 1.442695, %v2126_v27  ;;  %v2122_v46 = vsub.f32 %v11481_v44, %v9202_v59  ;;  %6658 = vpow2.f32 %v2174_v36  ;;  %v9256_v27 = vpop.eup %6646  ;;  %v11488_v44 = vld [vmem:[#allocation107_spill] sm:$0xff] }
 0x51a   : > { %v2713_v45 = vpop.f32.mrf.mxu0  ;;  %v2180_v30 = vmul.f32 1.442695, %v2128_v37 }
 0x51b   : > { %v2760_v62 = vmax.f32 %v9234_v20, %v9237_v43  ;;  %6660 = vpow2.f32 %v2176_v23  ;;  %v2168_v59 = vmul.f32 1.442695, %v2122_v46 }
 0x51c   : > { %v2715_v32 = vpop.f32.mrf.mxu0  ;;  %6662 = vpow2.f32 %v2178_v48 }
 0x51d   : > { %2761 = vmax.xlane.f32.xlu0 %v2760_v62  ;;  %2758 = vmax.xlane.f32.xlu1 %v2757_v26  ;;  %v11487_v26 = vld [vmem:[#allocation112_spill] sm:$0xff]  ;;  %v9267_v58 = vadd.f32 %v2715_v32, %v11488_v44  ;;  %6664 = vpow2.f32 %v2168_v59  ;;  %v11494_v44 = vld [vmem:[#allocation86_spill] sm:$0xff] }
 0x51e   : > { %v3273_v35 = vpop.f32.mrf.mxu0  ;;  %v2129_v62 = vsub.f32 %v11487_v26, %v2092_v25  ;;  %v9276_v25 = vpop.eup %6648  ;;  %6666 = vpow2.f32 %v2170_v16 }
 0x51f   : > { %v9259_v2 = vadd.f32 %v3273_v35, %v11426_v50  ;;  %11489 = vst [vmem:[#allocation35_spill] sm:$0xff] %v9267_v58  ;;  %v2216_v50 = vadd.f32 %v9256_v27, %v9252_v31  ;;  %v2095_v35 = vpop.xlane.xlu1 %2094  ;;  %11492 = vst [vmem:[#allocation43_spill] sm:$0xff] %v9276_v25  ;;  %v9280_v26 = vpop.eup %6650  ;;  %6668 = vpow2.f32 %v2180_v30 }
 0x520   : > { %v3275_v9 = vpop.f32.mrf.mxu0  ;;  %v2182_v32 = vmul.f32 1.442695, %v2129_v62  ;;  %11493 = vst [vmem:[#allocation55_spill] sm:$0xff] %v9280_v26 }
 0x521   : > { %11484 = vst [vmem:[#allocation26_spill] sm:$0xff] %v9259_v2  ;;  %v9262_v18 = vadd.f32 %v3275_v9, %v11427_v10  ;;  %2214 = vadd.xlane.f32.xlu1 %v2213_v42  ;;  %v11490_v42 = vld [vmem:[#allocation106_spill] sm:$0xff]  ;;  %v2098_v9 = vpop.xlane.xlu0 %2097 }
 0x522   : > { %v3277_v36 = vpop.f32.mrf.mxu0  ;;  %v9274_v46 = vadd.f32 %v2713_v45, %v11490_v42  ;;  %v2132_v62 = vsub.f32 %v8851_v11, %v2098_v9  ;;  %6670 = vpow2.f32 %v2182_v32 }
 0x523   : > { %11485 = vst [vmem:[#allocation36_spill] sm:$0xff] %v9262_v18  ;;  %v3352_v23 = vmax.f32 %v9259_v2, %v9262_v18  ;;  %v2130_v18 = vsub.f32 %v11494_v44, %v2095_v35  ;;  %v9283_v45 = vpop.eup %6652  ;;  %v2101_v44 = vpop.xlane.xlu1 %2100 }
 0x524   : > { %v3279_v10 = vpop.f32.mrf.mxu0  ;;  %11491 = vst [vmem:[#allocation46_spill] sm:$0xff] %v9274_v46  ;;  %v2763_v41 = vmax.f32 %v9274_v46, %v9267_v58  ;;  %11495 = vst [vmem:[#allocation53_spill] sm:$0xff] %v9283_v45  ;;  %v9292_v16 = vpop.eup %6654  ;;  %v2133_v46 = vsub.f32 %v8842_v8, %v2098_v9  ;;  %v2188_v8 = vmul.f32 1.442695, %v2132_v62 }
 0x525   : > { %3353 = vmax.xlane.f32.xlu0 %v3352_v23  ;;  %2217 = vadd.xlane.f32.xlu1 %v2216_v50  ;;  %v11496_v23 = vld [vmem:[#allocation87_spill] sm:$0xff]  ;;  %11499 = vst [vmem:[#allocation56_spill] sm:$0xff] %v9292_v16  ;;  %v9295_v58 = vpop.eup %6656  ;;  %v2104_v9 = vpop.xlane.xlu0 %2103 }
 0x526   : > { %v3283_v48 = vpop.f32.mrf.mxu0  ;;  %v2131_v50 = vsub.f32 %v11496_v23, %v2095_v35  ;;  %11500 = vst [vmem:[#allocation54_spill] sm:$0xff] %v9295_v58  ;;  %v2184_v35 = vmul.f32 1.442695, %v2130_v18  ;;  %v2222_v18 = vadd.f32 %v9292_v16, %v9283_v45  ;;  %v2137_v45 = vsub.f32 %v8861_v3, %v2104_v9 }
 0x527   : > { %v9287_v59 = vadd.f32 %v3283_v48, %v11432_v7 }
 0x528   : > { %v3285_v2 = vpop.f32.mrf.mxu0  ;;  %v2186_v48 = vmul.f32 1.442695, %v2131_v50  ;;  %6672 = vpow2.f32 %v2184_v35 }
 0x529   : > { %11497 = vst [vmem:[#allocation85_spill] sm:$0xff] %v9287_v59  ;;  %v9290_v37 = vadd.f32 %v3285_v2, %v11433_v56  ;;  %2764 = vmax.xlane.f32.xlu1 %v2763_v41  ;;  %v2219_v56 = vadd.f32 %v9280_v26, %v9276_v25  ;;  %v9302_v2 = vpop.eup %6658  ;;  %v11501_v41 = vld [vmem:[#allocation99_spill] sm:$0xff]  ;;  %v9322_v26 = vld [vmem:[%s8512_s18 + $0x10] sm:$0xff] }
 0x52a   : > { %v3287_v42 = vpop.f32.mrf.mxu0  ;;  %v9304_v11 = vpop.eup %6660  ;;  %v2134_v32 = vsub.f32 %v11501_v41, %v2101_v44  ;;  %v2228_v50 = vadd.f32 %v9302_v2, %v9295_v58  ;;  %6674 = vpow2.f32 %v2186_v48  ;;  %v2136_v41 = vsub.f32 %v8865_v24, %v2104_v9 }
 0x52b   : > { %11498 = vst [vmem:[#allocation83_spill] sm:$0xff] %v9290_v37  ;;  %v3358_v7 = vmax.f32 %v9287_v59, %v9290_v37  ;;  %v9307_v31 = vpop.eup %6662  ;;  %v2190_v37 = vmul.f32 1.442695, %v2133_v46  ;;  %v9310_v59 = vld [vmem:[%s8512_s18 + $0x18] sm:$0xff]  ;;  %v9325_v46 = vadd.f32 %v9322_v26, %v3277_v36  ;;  %6676 = vpow2.f32 %v2188_v8 }
 0x52c   : > { %v3289_v30 = vpop.f32.mrf.mxu0  ;;  %v9313_v25 = vadd.f32 %v9310_v59, %v3279_v10  ;;  %v2192_v10 = vmul.f32 1.442695, %v2134_v32  ;;  %v9328_v58 = vpop.eup %6664  ;;  %v2231_v36 = vadd.f32 %v9307_v31, %v9304_v11  ;;  %v2196_v8 = vmul.f32 1.442695, %v2136_v41 }
 0x52d   : > { %3359 = vmax.xlane.f32.xlu0 %v3358_v7  ;;  %2220 = vadd.xlane.f32.xlu1 %v2219_v56  ;;  %v11502_v7 = vld [vmem:[#allocation100_spill] sm:$0xff]  ;;  %6678 = vpow2.f32 %v2190_v37  ;;  %v9337_v35 = vpop.eup %6666  ;;  %v2198_v37 = vmul.f32 1.442695, %v2137_v45  ;;  %v9354_v45 = vadd.f32 %v3287_v42, %v11436_v61 }
 0x52e   : > { %v3293_v23 = vpop.f32.mrf.mxu0  ;;  %v2135_v56 = vsub.f32 %v11502_v7, %v2101_v44  ;;  %v3355_v44 = vmax.f32 %v9325_v46, %v9313_v25  ;;  %6680 = vpow2.f32 %v2192_v10 }
 0x52f   : > { %v9340_v3 = vadd.f32 %v3293_v23, %v11438_v1 }
 0x530   : > { %v3295_v62 = vpop.f32.mrf.mxu0  ;;  %v2194_v48 = vmul.f32 1.442695, %v2135_v56  ;;  %v2225_v56 = vadd.f32 %v9337_v35, %v9328_v58 }
 0x531   : > { %2223 = vadd.xlane.f32.xlu1 %v2222_v18  ;;  %2229 = vadd.xlane.f32.xlu0 %v2228_v50  ;;  %v9333_v24 = vadd.f32 %v3295_v62, %v11439_v54  ;;  %11504 = vst [vmem:[#allocation89_spill] sm:$0xff] %v9340_v3  ;;  %v9342_v18 = vpop.eup %6668  ;;  %v2107_v54 = vpop.xlane.xlu1 %2106  ;;  %v9345_v50 = vadd.f32 %v3289_v30, %v11437_v38  ;;  %v11506_v62 = vld [vmem:[#allocation108_spill] sm:$0xff]  ;;  %v11507_v30 = vld [vmem:[#allocation109_spill] sm:$0xff] }
 0x532   : > { %v3297_v16 = vpop.f32.mrf.mxu0  ;;  %v9351_v1 = vpop.eup %6670  ;;  %6682 = vpow2.f32 %v2194_v48  ;;  %v2138_v38 = vsub.f32 %v11506_v62, %v2107_v54  ;;  %v2139_v41 = vsub.f32 %v11507_v30, %v2107_v54  ;;  %v9374_v54 = vld [vmem:[%s8512_s18 + $0x50] sm:$0xff] }
 0x533   : > { %11503 = vst [vmem:[#allocation91_spill] sm:$0xff] %v9333_v24  ;;  %11505 = vst [vmem:[#allocation98_spill] sm:$0xff] %v9345_v50  ;;  %v3364_v7 = vmax.f32 %v9340_v3, %v9333_v24  ;;  %6684 = vpow2.f32 %v2196_v8  ;;  %v2234_v61 = vadd.f32 %v9351_v1, %v9342_v18 }
 0x534   : > { %v3299_v32 = vpop.f32.mrf.mxu0  ;;  %6686 = vpow2.f32 %v2198_v37  ;;  %v9377_v37 = vadd.f32 %v9374_v54, %v3297_v16  ;;  %v2202_v30 = vmul.f32 1.442695, %v2139_v41 }
 0x535   : > { %3356 = vmax.xlane.f32.xlu1 %v3355_v44  ;;  %2232 = vadd.xlane.f32.xlu0 %v2231_v36  ;;  %v3361_v44 = vmax.f32 %v9354_v45, %v9345_v50  ;;  %v9361_v36 = vld [vmem:[%s8512_s18 + $0x58] sm:$0xff]  ;;  %v9440_v50 = vld [vmem:[%s8512_s18 + $0x90] sm:$0xff] }
 0x536   : > { %v3303_v9 = vpop.f32.mrf.mxu0  ;;  %v9364_v48 = vadd.f32 %v9361_v36, %v3299_v32  ;;  %11510 = vst [vmem:[#allocation102_spill] sm:$0xff] %v9377_v37 }
 0x538   : > { %v3305_v23 = vpop.f32.mrf.mxu0  ;;  %11508 = vst [vmem:[#allocation95_spill] sm:$0xff] %v9364_v48  ;;  %v3367_v24 = vmax.f32 %v9377_v37, %v9364_v48 }
 0x539   : > { %2226 = vadd.xlane.f32.xlu1 %v2225_v56  ;;  %3365 = vmax.xlane.f32.xlu0 %v3364_v7  ;;  %v9367_v8 = vadd.f32 %v3305_v23, %v8761_v5  ;;  %v9371_v7 = vpop.eup %6672  ;;  %v9380_v56 = vadd.f32 %v3303_v9, %v8770_v4  ;;  %v2200_v5 = vmul.f32 1.442695, %v2138_v38 }
 0x53a   : > { %v3307_v10 = vpop.f32.mrf.mxu0  ;;  %v9382_v32 = vpop.eup %6674 }
 0x53b   : > { %11509 = vst [vmem:[#allocation104_spill] sm:$0xff] %v9367_v8  ;;  %11511 = vst [vmem:[#allocation90_spill] sm:$0xff] %v9380_v56  ;;  %v9384_v62 = vpop.eup %6676  ;;  %v3370_v16 = vmax.f32 %v9380_v56, %v9367_v8  ;;  %6688 = vpow2.f32 %v2200_v5  ;;  %v2237_v38 = vadd.f32 %v9382_v32, %v9371_v7 }
 0x53c   : > { %v3309_v42 = vpop.f32.mrf.mxu0  ;;  %11512 = vst [vmem:[#allocation88_spill] sm:$0xff] %v9384_v62  ;;  %v9390_v3 = vpop.eup %6678  ;;  %6690 = vpow2.f32 %v2202_v30 }
 0x53d   : > { %3362 = vmax.xlane.f32.xlu1 %v3361_v44  ;;  %2235 = vadd.xlane.f32.xlu0 %v2234_v61  ;;  %11513 = vst [vmem:[#allocation62_spill] sm:$0xff] %v9390_v3  ;;  %v9395_v44 = vld [vmem:[%s8512_s18 + $0x78] sm:$0xff]  ;;  %v2240_v8 = vadd.f32 %v9390_v3, %v9384_v62  ;;  %v9405_v56 = vpop.eup %6680 }
 0x53e   : > { %v3313_v23 = vpop.f32.mrf.mxu0  ;;  %v9398_v41 = vadd.f32 %v9395_v44, %v3309_v42  ;;  %11515 = vst [vmem:[#allocation58_spill] sm:$0xff] %v9405_v56 }
 0x53f   : > { %v9407_v5 = vpop.eup %6682  ;;  %v9416_v42 = vadd.f32 %v3313_v23, %v8797_v40  ;;  %v9427_v40 = vld [vmem:[%s8512_s18 + $0x98] sm:$0xff] }
 0x540   : > { %v3315_v4 = vpop.f32.mrf.mxu0  ;;  %11514 = vst [vmem:[#allocation63_spill] sm:$0xff] %v9398_v41  ;;  %11516 = vst [vmem:[#allocation57_spill] sm:$0xff] %v9407_v5 }
 0x541   : > { %3368 = vmax.xlane.f32.xlu1 %v3367_v24  ;;  %3371 = vmax.xlane.f32.xlu0 %v3370_v16  ;;  %v9401_v61 = vadd.f32 %v3315_v4, %v8788_v28  ;;  %v9410_v16 = vld [vmem:[%s8512_s18 + $0x70] sm:$0xff]  ;;  %v9418_v28 = vpop.eup %6684 }
 0x542   : > { %v3317_v9 = vpop.f32.mrf.mxu0  ;;  %v9413_v30 = vadd.f32 %v9410_v16, %v3307_v10  ;;  %11518 = vst [vmem:[#allocation70_spill] sm:$0xff] %v9418_v28  ;;  %v9420_v48 = vpop.eup %6686 }
 0x543   : > { %11519 = vst [vmem:[#allocation97_spill] sm:$0xff] %v9420_v48  ;;  %v3376_v62 = vmax.f32 %v9416_v42, %v9401_v61 }
 0x544   : > { %v3319_v24 = vpop.f32.mrf.mxu0  ;;  %11517 = vst [vmem:[#allocation69_spill] sm:$0xff] %v9413_v30  ;;  %v3373_v37 = vmax.f32 %v9413_v30, %v9398_v41  ;;  %v2246_v41 = vadd.f32 %v9420_v48, %v9418_v28 }
 0x545   : > { %2238 = vadd.xlane.f32.xlu1 %v2237_v38  ;;  %2241 = vadd.xlane.f32.xlu0 %v2240_v8  ;;  %v9430_v8 = vadd.f32 %v9427_v40, %v3319_v24  ;;  %v2243_v38 = vadd.f32 %v9407_v5, %v9405_v56  ;;  %v7090_v5 = vld [vmem:[%s8512_s18 + $0xf0] sm:$0xff] }
 0x546   : > { %v3323_v4 = vpop.f32.mrf.mxu0 }
 0x547   : > { %11520 = vst [vmem:[#allocation92_spill] sm:$0xff] %v9430_v8 }
 0x548   : > { %v3325_v3 = vpop.f32.mrf.mxu0 }
 0x549   : > { %3374 = vmax.xlane.f32.xlu1 %v3373_v37  ;;  %3377 = vmax.xlane.f32.xlu0 %v3376_v62  ;;  %v9433_v23 = vadd.f32 %v3325_v3, %v8807_v6  ;;  %v9443_v37 = vadd.f32 %v9440_v50, %v3317_v9  ;;  %v9446_v62 = vadd.f32 %v3323_v4, %v8816_v17  ;;  %v9448_v3 = vpop.eup %6688  ;;  %v9463_v4 = vld [vmem:[%s8512_s18 + $0xb8] sm:$0xff] }
 0x54a   : > { %v3327_v10 = vpop.f32.mrf.mxu0  ;;  %11524 = vst [vmem:[#allocation101_spill] sm:$0xff] %v9448_v3  ;;  %v9454_v48 = vpop.eup %6690 }
 0x54b   : > { %11521 = vst [vmem:[#allocation74_spill] sm:$0xff] %v9433_v23  ;;  %11522 = vst [vmem:[#allocation75_spill] sm:$0xff] %v9443_v37  ;;  %v3379_v24 = vmax.f32 %v9443_v37, %v9430_v8  ;;  %v3382_v28 = vmax.f32 %v9446_v62, %v9433_v23 }
 0x54c   : > { %v3329_v30 = vpop.f32.mrf.mxu0  ;;  %11523 = vst [vmem:[#allocation103_spill] sm:$0xff] %v9446_v62  ;;  %11525 = vst [vmem:[#allocation81_spill] sm:$0xff] %v9454_v48 }
 0x54d   : > { %2244 = vadd.xlane.f32.xlu1 %v2243_v38  ;;  %2247 = vadd.xlane.f32.xlu0 %v2246_v41  ;;  %v9466_v38 = vadd.f32 %v9463_v4, %v3329_v30 }
 0x54e   : > { %v3333_v6 = vpop.f32.mrf.mxu0 }
 0x54f   : > { %v9457_v9 = vadd.f32 %v3333_v6, %v8836_v39  ;;  %11528 = vst [vmem:[#allocation66_spill] sm:$0xff] %v9466_v38  ;;  %v2249_v39 = vadd.f32 %v9454_v48, %v9448_v3  ;;  %v9487_v48 = vld [vmem:[%s8512_s18 + $0xd0] sm:$0xff] }
 0x550   : > { %v3335_v56 = vpop.f32.mrf.mxu0 }
 0x551   : > { %11526 = vst [vmem:[#allocation82_spill] sm:$0xff] %v9457_v9  ;;  %v9460_v17 = vadd.f32 %v3335_v56, %v8827_v19  ;;  %3380 = vmax.xlane.f32.xlu1 %v3379_v24  ;;  %3383 = vmax.xlane.f32.xlu0 %v3382_v28  ;;  %v9473_v19 = vld [vmem:[%s8512_s18 + $0xb0] sm:$0xff]  ;;  %v9481_v24 = vld [vmem:[%s8512_s18 + $0xd8] sm:$0xff] }
 0x552   : > { %v3337_v41 = vpop.f32.mrf.mxu0  ;;  %v9476_v56 = vadd.f32 %v9473_v19, %v3327_v10  ;;  %v9493_v10 = vld [vmem:[%s8512_s18 + $0xe0] sm:$0xff] }
 0x553   : > { %11527 = vst [vmem:[#allocation65_spill] sm:$0xff] %v9460_v17  ;;  %v3388_v23 = vmax.f32 %v9457_v9, %v9460_v17  ;;  %v9490_v9 = vadd.f32 %v9487_v48, %v3337_v41  ;;  %11532 = vst [vmem:[#allocation93_spill] sm:$0xff] %v9493_v10 }
 0x554   : > { %v3339_v6 = vpop.f32.mrf.mxu0  ;;  %11529 = vst [vmem:[#allocation110_spill] sm:$0xff] %v9476_v56  ;;  %v3385_v30 = vmax.f32 %v9476_v56, %v9466_v38 }
 0x555   : > { %2250 = vadd.xlane.f32.xlu1 %v2249_v39  ;;  %3389 = vmax.xlane.f32.xlu0 %v3388_v23  ;;  %v9484_v17 = vadd.f32 %v9481_v24, %v3339_v6  ;;  %11531 = vst [vmem:[#allocation77_spill] sm:$0xff] %v9490_v9  ;;  %v9499_v39 = vld [vmem:[%s8512_s18 + $0xe8] sm:$0xff] }
 0x556   : > { %v3343_v28 = vpop.f32.mrf.mxu0  ;;  %11533 = vst [vmem:[#allocation78_spill] sm:$0xff] %v9499_v39 }
 0x557   : > { %11530 = vst [vmem:[#allocation94_spill] sm:$0xff] %v9484_v17  ;;  %v9496_v23 = vadd.f32 %v9493_v10, %v3343_v28  ;;  %v3391_v56 = vmax.f32 %v9490_v9, %v9484_v17  ;;  %v7091_v28 = vld [vmem:[%s8512_s18 + $0xf8] sm:$0xff]  ;;  %v7092_v10 = vld [vmem:[%s8512_s18] sm:$0xff]  ;;  %v7093_v9 = vld [vmem:[%s8512_s18 + $0x8] sm:$0xff] }
 0x558   : > { %v3345_v3 = vpop.f32.mrf.mxu0 }
 0x559   : > { %v9502_v38 = vadd.f32 %v9499_v39, %v3345_v3  ;;  %3386 = vmax.xlane.f32.xlu1 %v3385_v30 }
 0x55a   : > { %v3347_v6 = vpop.f32.mrf.mxu0 }
 0x55b   : > { %11534 = vst [vmem:[#allocation72_spill] sm:$0xff] %v9502_v38  ;;  %v3394_v41 = vmax.f32 %v9496_v23, %v9502_v38  ;;  %v9509_v8 = vadd.f32 %v7090_v5, %v3347_v6 }
 0x55c   : > { %v3349_v62 = vpop.f32.mrf.mxu0 }
 0x55d   : > { %11535 = vst [vmem:[#allocation73_spill] sm:$0xff] %v9509_v8  ;;  %v9512_v37 = vadd.f32 %v7091_v28, %v3349_v62  ;;  %3392 = vmax.xlane.f32.xlu1 %v3391_v56  ;;  %3395 = vmax.xlane.f32.xlu0 %v3394_v41  ;;  %v7094_v28 = vld [vmem:[%s8512_s18 + $0x20] sm:$0xff] }
 0x55e   : > { %v3907_v3 = vpop.f32.mrf.mxu0 }
 0x55f   : > { %11536 = vst [vmem:[#allocation113_spill] sm:$0xff] %v9512_v37  ;;  %v3397_v30 = vmax.f32 %v9509_v8, %v9512_v37  ;;  %v9517_v17 = vadd.f32 %v7092_v10, %v3907_v3 }
 0x560   : > { %v3909_v39 = vpop.f32.mrf.mxu0 }
 0x561   : > { %11537 = vst [vmem:[#allocation112_spill] sm:$0xff] %v9517_v17  ;;  %v9520_v38 = vadd.f32 %v7093_v9, %v3909_v39  ;;  %3398 = vmax.xlane.f32.xlu1 %v3397_v30  ;;  %v7095_v30 = vld [vmem:[%s8512_s18 + $0x28] sm:$0xff] }
 0x562   : > { %v3911_v5 = vpop.f32.mrf.mxu0 }
 0x563   : > { %11538 = vst [vmem:[#allocation107_spill] sm:$0xff] %v9520_v38  ;;  %v3986_v62 = vmax.f32 %v9517_v17, %v9520_v38  ;;  %v9525_v6 = vadd.f32 %v9322_v26, %v3911_v5  ;;  %v7097_v17 = vld [vmem:[%s8512_s18 + $0x38] sm:$0xff] }
 0x564   : > { %v3913_v56 = vpop.f32.mrf.mxu0 }
 0x565   : > { %11539 = vst [vmem:[#allocation106_spill] sm:$0xff] %v9525_v6  ;;  %v9528_v41 = vadd.f32 %v9310_v59, %v3913_v56  ;;  %3987 = vmax.xlane.f32.xlu0 %v3986_v62  ;;  %v7096_v62 = vld [vmem:[%s8512_s18 + $0x30] sm:$0xff] }
 0x566   : > { %v3917_v10 = vpop.f32.mrf.mxu0 }
 0x567   : > { %11540 = vst [vmem:[#allocation86_spill] sm:$0xff] %v9528_v41  ;;  %v3989_v9 = vmax.f32 %v9525_v6, %v9528_v41  ;;  %v9533_v3 = vadd.f32 %v7094_v28, %v3917_v10 }
 0x568   : > { %v3919_v39 = vpop.f32.mrf.mxu0 }
 0x569   : > { %11541 = vst [vmem:[#allocation87_spill] sm:$0xff] %v9533_v3  ;;  %v9536_v38 = vadd.f32 %v7095_v30, %v3919_v39  ;;  %3990 = vmax.xlane.f32.xlu1 %v3989_v9 }
 0x56a   : > { %v3921_v26 = vpop.f32.mrf.mxu0 }
 0x56b   : > { %11542 = vst [vmem:[#allocation99_spill] sm:$0xff] %v9536_v38  ;;  %v3992_v5 = vmax.f32 %v9533_v3, %v9536_v38  ;;  %v9541_v56 = vadd.f32 %v7096_v62, %v3921_v26  ;;  %v7098_v38 = vld [vmem:[%s8512_s18 + $0x40] sm:$0xff]  ;;  %v7099_v62 = vld [vmem:[%s8512_s18 + $0x48] sm:$0xff] }
 0x56c   : > { %v3923_v59 = vpop.f32.mrf.mxu0 }
 0x56d   : > { %v9544_v41 = vadd.f32 %v7097_v17, %v3923_v59  ;;  %3993 = vmax.xlane.f32.xlu0 %v3992_v5 }
 0x56e   : > { %v3927_v10 = vpop.f32.mrf.mxu0  ;;  %v2720_v28 = vpop.xlane.xlu0 %2719 }
 0x56f   : > { %v3995_v39 = vmax.f32 %v9541_v56, %v9544_v41  ;;  %v2766_v9 = vsub.f32 %v9077_v52, %v2720_v28  ;;  %v2767_v30 = vsub.f32 %v9080_v13, %v2720_v28  ;;  %v9551_v3 = vadd.f32 %v7098_v38, %v3927_v10 }
 0x570   : > { %v3929_v6 = vpop.f32.mrf.mxu0 }
 0x571   : > { %11543 = vst [vmem:[#allocation100_spill] sm:$0xff] %v9551_v3  ;;  %v2798_v37 = vmul.f32 1.442695, %v2766_v9  ;;  %v2800_v26 = vmul.f32 1.442695, %v2767_v30  ;;  %v9554_v8 = vadd.f32 %v7099_v62, %v3929_v6  ;;  %3996 = vmax.xlane.f32.xlu1 %v3995_v39  ;;  %v7100_v62 = vld [vmem:[%s8512_s18 + $0x60] sm:$0xff] }
 0x572   : > { %v2723_v17 = vpop.xlane.xlu1 %2722  ;;  %v3931_v5 = vpop.f32.mrf.mxu0 }
 0x573   : > { %11544 = vst [vmem:[#allocation108_spill] sm:$0xff] %v9554_v8  ;;  %6692 = vpow2.f32 %v2798_v37  ;;  %v3998_v59 = vmax.f32 %v9551_v3, %v9554_v8  ;;  %v2768_v52 = vsub.f32 %v9087_v22, %v2723_v17  ;;  %v2769_v13 = vsub.f32 %v9090_v63, %v2723_v17 }
 0x574   : > { %6694 = vpow2.f32 %v2800_v26  ;;  %v3933_v38 = vpop.f32.mrf.mxu0  ;;  %v9561_v6 = vadd.f32 %v9374_v54, %v3931_v5  ;;  %v7101_v54 = vld [vmem:[%s8512_s18 + $0x68] sm:$0xff] }
 0x575   : > { %v2802_v10 = vmul.f32 1.442695, %v2768_v52  ;;  %v2804_v28 = vmul.f32 1.442695, %v2769_v13  ;;  %v9564_v39 = vadd.f32 %v9361_v36, %v3933_v38  ;;  %3999 = vmax.xlane.f32.xlu0 %v3998_v59 }
 0x576   : > { %11545 = vst [vmem:[#allocation109_spill] sm:$0xff] %v9561_v6  ;;  %v3937_v37 = vpop.f32.mrf.mxu0  ;;  %v2726_v9 = vpop.xlane.xlu0 %2725 }
 0x577   : > { %11546 = vst [vmem:[#allocation115_spill] sm:$0xff] %v9564_v39  ;;  %6696 = vpow2.f32 %v2802_v10  ;;  %v4001_v22 = vmax.f32 %v9561_v6, %v9564_v39  ;;  %v2770_v63 = vsub.f32 %v9097_v12, %v2726_v9  ;;  %v2771_v30 = vsub.f32 %v9100_v55, %v2726_v9  ;;  %v11588_v39 = vld [vmem:[#allocation21_spill] sm:$0xff] }
 0x578   : > { %6698 = vpow2.f32 %v2804_v28  ;;  %v3939_v26 = vpop.f32.mrf.mxu0  ;;  %v9571_v17 = vadd.f32 %v7100_v62, %v3937_v37 }
 0x579   : > { %v9574_v5 = vadd.f32 %v7101_v54, %v3939_v26  ;;  %4002 = vmax.xlane.f32.xlu1 %v4001_v22  ;;  %v2806_v36 = vmul.f32 1.442695, %v2770_v63  ;;  %v2808_v13 = vmul.f32 1.442695, %v2771_v30 }
 0x57a   : > { %11547 = vst [vmem:[#allocation116_spill] sm:$0xff] %v9571_v17  ;;  %v2729_v59 = vpop.xlane.xlu1 %2728  ;;  %v3941_v52 = vpop.f32.mrf.mxu0 }
 0x57b   : > { %11548 = vst [vmem:[#allocation117_spill] sm:$0xff] %v9574_v5  ;;  %v4004_v38 = vmax.f32 %v9571_v17, %v9574_v5  ;;  %v2772_v12 = vsub.f32 %v9109_v33, %v2729_v59  ;;  %v2773_v10 = vsub.f32 %v9112_v60, %v2729_v59  ;;  %v9581_v37 = vadd.f32 %v9410_v16, %v3941_v52  ;;  %v7102_v16 = vld [vmem:[%s8512_s18 + $0x80] sm:$0xff] }
 0x57c   : > { %v3943_v55 = vpop.f32.mrf.mxu0  ;;  %6700 = vpow2.f32 %v2806_v36  ;;  %v7106_v17 = vld [vmem:[%s8512_s18 + $0xc0] sm:$0xff] }
 0x57d   : > { %v2810_v28 = vmul.f32 1.442695, %v2772_v12  ;;  %11549 = vst [vmem:[#allocation118_spill] sm:$0xff] %v9581_v37  ;;  %v9584_v9 = vadd.f32 %v9395_v44, %v3943_v55  ;;  %4005 = vmax.xlane.f32.xlu0 %v4004_v38  ;;  %v2812_v22 = vmul.f32 1.442695, %v2773_v10  ;;  %6702 = vpow2.f32 %v2808_v13  ;;  %v7103_v44 = vld [vmem:[%s8512_s18 + $0x88] sm:$0xff] }
 0x57e   : > { %v3947_v63 = vpop.f32.mrf.mxu0  ;;  %v2732_v30 = vpop.xlane.xlu0 %2731 }
 0x57f   : > { %11550 = vst [vmem:[#allocation119_spill] sm:$0xff] %v9584_v9  ;;  %v4007_v33 = vmax.f32 %v9581_v37, %v9584_v9  ;;  %6704 = vpow2.f32 %v2810_v28  ;;  %v9593_v54 = vadd.f32 %v7102_v16, %v3947_v63  ;;  %v2774_v36 = vsub.f32 %v9117_v49, %v2732_v30  ;;  %v7107_v37 = vld [vmem:[%s8512_s18 + $0xc8] sm:$0xff] }
 0x580   : > { %v9588_v60 = vpop.eup %6692  ;;  %v3949_v26 = vpop.f32.mrf.mxu0  ;;  %6706 = vpow2.f32 %v2812_v22  ;;  %v2775_v13 = vsub.f32 %v9120_v51, %v2732_v30 }
 0x581   : > { %v9590_v62 = vpop.eup %6694  ;;  %11551 = vst [vmem:[#allocation120_spill] sm:$0xff] %v9593_v54  ;;  %v9596_v59 = vadd.f32 %v7103_v44, %v3949_v26  ;;  %4008 = vmax.xlane.f32.xlu1 %v4007_v33  ;;  %v2814_v49 = vmul.f32 1.442695, %v2774_v36 }
 0x582   : > { %v3951_v52 = vpop.f32.mrf.mxu0  ;;  %v2735_v12 = vpop.xlane.xlu1 %2734  ;;  %v2862_v10 = vadd.f32 %v9590_v62, %v9588_v60  ;;  %v2816_v33 = vmul.f32 1.442695, %v2775_v13 }
 0x583   : > { %11552 = vst [vmem:[#allocation121_spill] sm:$0xff] %v9596_v59  ;;  %v4010_v38 = vmax.f32 %v9593_v54, %v9596_v59  ;;  %v2776_v22 = vsub.f32 %v9129_v57, %v2735_v12  ;;  %v2777_v30 = vsub.f32 %v9132_v0, %v2735_v12  ;;  %v9616_v59 = vadd.f32 %v9440_v50, %v3951_v52  ;;  %v7104_v54 = vld [vmem:[%s8512_s18 + $0xa0] sm:$0xff] }
 0x584   : > { %v9604_v55 = vpop.eup %6696  ;;  %v3953_v28 = vpop.f32.mrf.mxu0  ;;  %6708 = vpow2.f32 %v2814_v49 }
 0x585   : > { %v9606_v63 = vpop.eup %6698  ;;  %4011 = vmax.xlane.f32.xlu0 %v4010_v38  ;;  %2863 = vadd.xlane.f32.xlu1 %v2862_v10  ;;  %v9611_v26 = vadd.f32 %v9427_v40, %v3953_v28  ;;  %11554 = vst [vmem:[#allocation123_spill] sm:$0xff] %v9616_v59  ;;  %v7105_v10 = vld [vmem:[%s8512_s18 + $0xa8] sm:$0xff]  ;;  %v2818_v0 = vmul.f32 1.442695, %v2776_v22  ;;  %6710 = vpow2.f32 %v2816_v33  ;;  %v2820_v12 = vmul.f32 1.442695, %v2777_v30 }
 0x586   : > { %v3957_v51 = vpop.f32.mrf.mxu0  ;;  %v2865_v16 = vadd.f32 %v9606_v63, %v9604_v55  ;;  %v2738_v36 = vpop.xlane.xlu0 %2737 }
 0x587   : > { %11553 = vst [vmem:[#allocation122_spill] sm:$0xff] %v9611_v26  ;;  %v9619_v38 = vadd.f32 %v7104_v54, %v3957_v51  ;;  %v4013_v28 = vmax.f32 %v9616_v59, %v9611_v26  ;;  %v2778_v52 = vsub.f32 %v9137_v34, %v2738_v36  ;;  %v11557_v51 = vld [vmem:[#allocation34_spill] sm:$0xff]  ;;  %6712 = vpow2.f32 %v2818_v0  ;;  %v11558_v26 = vld [vmem:[#allocation105_spill] sm:$0xff] }
 0x588   : > { %v3959_v44 = vpop.f32.mrf.mxu0  ;;  %6714 = vpow2.f32 %v2820_v12  ;;  %v11563_v12 = vld [vmem:[#allocation33_spill] sm:$0xff] }
 0x589   : > { %11555 = vst [vmem:[#allocation124_spill] sm:$0xff] %v9619_v38  ;;  %v9622_v57 = vadd.f32 %v7105_v10, %v3959_v44  ;;  %2866 = vadd.xlane.f32.xlu1 %v2865_v16  ;;  %v9624_v40 = vpop.eup %6700  ;;  %v2779_v44 = vsub.f32 %v11557_v51, %v2738_v36  ;;  %v2822_v36 = vmul.f32 1.442695, %v2778_v52 }
 0x58a   : > { %v3961_v13 = vpop.f32.mrf.mxu0  ;;  %v9630_v54 = vpop.eup %6702 }
 0x58b   : > { %11556 = vst [vmem:[#allocation125_spill] sm:$0xff] %v9622_v57  ;;  %v4016_v50 = vmax.f32 %v9619_v38, %v9622_v57  ;;  %v2741_v49 = vpop.xlane.xlu1 %2740  ;;  %v2868_v34 = vadd.f32 %v9630_v54, %v9624_v40  ;;  %v2824_v51 = vmul.f32 1.442695, %v2779_v44  ;;  %v11559_v57 = vld [vmem:[#allocation39_spill] sm:$0xff] }
 0x58c   : > { %v3963_v16 = vpop.f32.mrf.mxu0  ;;  %v9634_v22 = vpop.eup %6704 }
 0x58d   : > { %4017 = vmax.xlane.f32.xlu0 %v4016_v50  ;;  %4014 = vmax.xlane.f32.xlu1 %v4013_v28  ;;  %v9636_v10 = vpop.eup %6706  ;;  %v11560_v28 = vld [vmem:[#allocation37_spill] sm:$0xff]  ;;  %v9651_v3 = vadd.f32 %v9463_v4, %v3963_v16 }
 0x58e   : > { %v3967_v33 = vpop.f32.mrf.mxu0  ;;  %v2744_v30 = vpop.xlane.xlu0 %2743  ;;  %v2780_v5 = vsub.f32 %v11560_v28, %v2741_v49 }
 0x58f   : > { %v2782_v59 = vsub.f32 %v11558_v26, %v2744_v30  ;;  %v2783_v38 = vsub.f32 %v11559_v57, %v2744_v30  ;;  %v9644_v9 = vadd.f32 %v7106_v17, %v3967_v33  ;;  %v2781_v26 = vsub.f32 %v11563_v12, %v2741_v49  ;;  %11564 = vst [vmem:[#allocation39_spill] sm:$0xff] %v9651_v3  ;;  %v11565_v33 = vld [vmem:[#allocation44_spill] sm:$0xff] }
 0x590   : > { %v3969_v50 = vpop.f32.mrf.mxu0  ;;  %v2871_v57 = vadd.f32 %v9636_v10, %v9634_v22  ;;  %v11566_v30 = vld [vmem:[#allocation76_spill] sm:$0xff]  ;;  %v9660_v49 = vadd.f32 %v9473_v19, %v3961_v13 }
 0x591   : > { %11561 = vst [vmem:[#allocation34_spill] sm:$0xff] %v9644_v9  ;;  %v2830_v0 = vmul.f32 1.442695, %v2782_v59  ;;  %v9647_v8 = vadd.f32 %v7107_v37, %v3969_v50  ;;  %2869 = vadd.xlane.f32.xlu1 %v2868_v34  ;;  %v2832_v52 = vmul.f32 1.442695, %v2783_v38  ;;  %v9662_v50 = vpop.eup %6708  ;;  %v11568_v19 = vld [vmem:[#allocation80_spill] sm:$0xff] }
 0x592   : > { %v2747_v44 = vpop.xlane.xlu1 %2746  ;;  %11567 = vst [vmem:[#allocation37_spill] sm:$0xff] %v9660_v49  ;;  %v2826_v38 = vmul.f32 1.442695, %v2780_v5  ;;  %v2828_v28 = vmul.f32 1.442695, %v2781_v26  ;;  %v3971_v12 = vpop.f32.mrf.mxu0 }
 0x593   : > { %11562 = vst [vmem:[#allocation105_spill] sm:$0xff] %v9647_v8  ;;  %6716 = vpow2.f32 %v2830_v0  ;;  %v4022_v17 = vmax.f32 %v9644_v9, %v9647_v8  ;;  %v2784_v59 = vsub.f32 %v11565_v33, %v2747_v44  ;;  %v2785_v37 = vsub.f32 %v11566_v30, %v2747_v44  ;;  %v11569_v44 = vld [vmem:[#allocation30_spill] sm:$0xff] }
 0x594   : > { %6718 = vpow2.f32 %v2832_v52  ;;  %v4019_v0 = vmax.f32 %v9660_v49, %v9651_v3  ;;  %v3973_v26 = vpop.f32.mrf.mxu0 }
 0x595   : > { %6720 = vpow2.f32 %v2822_v36  ;;  %v2834_v4 = vmul.f32 1.442695, %v2784_v59  ;;  %v2836_v16 = vmul.f32 1.442695, %v2785_v37  ;;  %4023 = vmax.xlane.f32.xlu0 %v4022_v17  ;;  %2872 = vadd.xlane.f32.xlu1 %v2871_v57  ;;  %v9666_v36 = vpop.eup %6710  ;;  %v11570_v59 = vld [vmem:[#allocation52_spill] sm:$0xff]  ;;  %v11571_v37 = vld [vmem:[#allocation61_spill] sm:$0xff] }
 0x596   : > { %6722 = vpow2.f32 %v2824_v51  ;;  %v2206_v34 = vpop.xlane.xlu1 %2205  ;;  %v2750_v52 = vpop.xlane.xlu0 %2749 }
 0x597   : > { %6724 = vpow2.f32 %v2834_v4  ;;  %v2786_v13 = vsub.f32 %v11568_v19, %v2750_v52  ;;  %v2787_v17 = vsub.f32 %v11569_v44, %v2750_v52  ;;  %v9670_v33 = vpop.eup %6712  ;;  %v9679_v52 = vadd.f32 %v9481_v24, %v3973_v26 }
 0x598   : > { %6726 = vpow2.f32 %v2836_v16  ;;  %v2874_v16 = vadd.f32 %v9666_v36, %v9662_v50  ;;  %v9676_v8 = vpop.eup %6714 }
 0x599   : > { %4020 = vmax.xlane.f32.xlu1 %v4019_v0  ;;  %6728 = vpow2.f32 %v2826_v38  ;;  %v2838_v5 = vmul.f32 1.442695, %v2786_v13  ;;  %v2840_v51 = vmul.f32 1.442695, %v2787_v17  ;;  %11572 = vst [vmem:[#allocation33_spill] sm:$0xff] %v9679_v52  ;;  %v11573_v13 = vld [vmem:[#allocation68_spill] sm:$0xff] }
 0x59a   : > { %v2753_v57 = vpop.xlane.xlu1 %2752  ;;  %6730 = vpow2.f32 %v2828_v28  ;;  %v11574_v17 = vld [vmem:[#allocation19_spill] sm:$0xff] }
 0x59b   : > { %v2788_v30 = vsub.f32 %v11570_v59, %v2753_v57  ;;  %v2789_v4 = vsub.f32 %v11571_v37, %v2753_v57  ;;  %6732 = vpow2.f32 %v2838_v5  ;;  %v2877_v59 = vadd.f32 %v9676_v8, %v9670_v33 }
 0x59c   : > { %6734 = vpow2.f32 %v2840_v51  ;;  %v9690_v51 = vadd.f32 %v9487_v48, %v3971_v12 }
 0x59d   : > { %v2842_v0 = vmul.f32 1.442695, %v2788_v30  ;;  %v2844_v38 = vmul.f32 1.442695, %v2789_v4  ;;  %2875 = vadd.xlane.f32.xlu1 %v2874_v16  ;;  %6736 = vrcp.f32 %v2206_v34 }
 0x59e   : > { %v2209_v28 = vpop.xlane.xlu1 %2208  ;;  %v2756_v19 = vpop.xlane.xlu0 %2755  ;;  %11577 = vst [vmem:[#allocation80_spill] sm:$0xff] %v9690_v51 }
 0x59f   : > { %6738 = vpow2.f32 %v2842_v0  ;;  %v2790_v44 = vsub.f32 %v11573_v13, %v2756_v19  ;;  %v2791_v57 = vsub.f32 %v11574_v17, %v2756_v19  ;;  %v4025_v0 = vmax.f32 %v9690_v51, %v9679_v52 }
 0x5a0   : > { %v9685_v37 = vpop.eup %6716  ;;  %6740 = vpow2.f32 %v2844_v38 }
 0x5a1   : > { %11575 = vst [vmem:[#allocation44_spill] sm:$0xff] %v9685_v37  ;;  %v9687_v5 = vpop.eup %6718  ;;  %6742 = vrcp.f32 %v2209_v28  ;;  %v2846_v24 = vmul.f32 1.442695, %v2790_v44  ;;  %v2848_v34 = vmul.f32 1.442695, %v2791_v57  ;;  %2878 = vadd.xlane.f32.xlu1 %v2877_v59 }
 0x5a2   : > { %11576 = vst [vmem:[#allocation76_spill] sm:$0xff] %v9687_v5  ;;  %v9692_v26 = vpop.eup %6720  ;;  %v2212_v30 = vpop.xlane.xlu1 %2211  ;;  %v2886_v4 = vadd.f32 %v9687_v5, %v9685_v37 }
 0x5a3   : > { %v9696_v16 = vpop.eup %6722  ;;  %6744 = vpow2.f32 %v2846_v24 }
 0x5a4   : > { %v9700_v38 = vpop.eup %6724  ;;  %6746 = vpow2.f32 %v2848_v34  ;;  %2887 = vadd.xlane.f32.xlu0 %v2886_v4  ;;  %v2880_v13 = vadd.f32 %v9696_v16, %v9692_v26 }
 0x5a5   : > { %11578 = vst [vmem:[#allocation30_spill] sm:$0xff] %v9700_v38  ;;  %v9702_v48 = vpop.eup %6726  ;;  %4026 = vmax.xlane.f32.xlu1 %v4025_v0  ;;  %6748 = vrcp.f32 %v2212_v30 }
 0x5a6   : > { %11579 = vst [vmem:[#allocation52_spill] sm:$0xff] %v9702_v48  ;;  %v2759_v12 = vpop.xlane.xlu1 %2758  ;;  %v2762_v28 = vpop.xlane.xlu0 %2761  ;;  %v2889_v19 = vadd.f32 %v9702_v48, %v9700_v38 }
 0x5a7   : > { %v9708_v44 = vpop.eup %6728  ;;  %v2792_v17 = vsub.f32 %v9231_v47, %v2759_v12  ;;  %v2793_v57 = vsub.f32 %v9225_v15, %v2759_v12  ;;  %v2794_v59 = vsub.f32 %v9234_v20, %v2762_v28  ;;  %v2795_v24 = vsub.f32 %v9237_v43, %v2762_v28 }
 0x5a8   : > { %v9714_v34 = vpop.eup %6730  ;;  %2890 = vadd.xlane.f32.xlu0 %v2889_v19  ;;  %v11584_v19 = vld [vmem:[#allocation41_spill] sm:$0xff] }
 0x5a9   : > { %v9716_v4 = vpop.eup %6732  ;;  %v2850_v0 = vmul.f32 1.442695, %v2792_v17  ;;  %v2852_v52 = vmul.f32 1.442695, %v2793_v57  ;;  %v2854_v51 = vmul.f32 1.442695, %v2794_v59  ;;  %2881 = vadd.xlane.f32.xlu1 %v2880_v13  ;;  %v2883_v20 = vadd.f32 %v9714_v34, %v9708_v44 }
 0x5aa   : > { %11580 = vst [vmem:[#allocation61_spill] sm:$0xff] %v9716_v4  ;;  %v9718_v9 = vpop.eup %6734  ;;  %v2856_v3 = vmul.f32 1.442695, %v2795_v24  ;;  %v2215_v47 = vpop.xlane.xlu1 %2214  ;;  %v11585_v17 = vld [vmem:[#allocation51_spill] sm:$0xff] }
 0x5ab   : > { %11581 = vst [vmem:[#allocation68_spill] sm:$0xff] %v9718_v9  ;;  %v6737_v49 = vpop.eup %6736  ;;  %6750 = vpow2.f32 %v2850_v0  ;;  %v2892_v15 = vadd.f32 %v9718_v9, %v9716_v4  ;;  %v11587_v0 = vld [vmem:[#allocation29_spill] sm:$0xff]  ;;  %v11599_v4 = vld [vmem:[#allocation114_spill] sm:$0xff]  ;;  %v11618_v9 = vld [vmem:[#allocation36_spill] sm:$0xff] }
 0x5ac   : > { %v9724_v43 = vpop.eup %6738  ;;  %6752 = vpow2.f32 %v2852_v52  ;;  %v2269_v13 = vmul.f32 %v6737_v49, %v11584_v19  ;;  %v2268_v52 = vmul.f32 %v6737_v49, %v11587_v0  ;;  %v11591_v49 = vld [vmem:[#allocation27_spill] sm:$0xff] }
 0x5ad   : > { %11582 = vst [vmem:[#allocation19_spill] sm:$0xff] %v9724_v43  ;;  %v9726_v12 = vpop.eup %6740  ;;  %6754 = vpow2.f32 %v2854_v51  ;;  %2893 = vadd.xlane.f32.xlu0 %v2892_v15  ;;  %2884 = vadd.xlane.f32.xlu1 %v2883_v20 }
 0x5ae   : > { %11583 = vst [vmem:[#allocation126_spill] sm:$0xff] %v9726_v12  ;;  %v6743_v28 = vpop.eup %6742  ;;  %6756 = vpow2.f32 %v2856_v3  ;;  %v2218_v30 = vpop.xlane.xlu1 %2217  ;;  %v2895_v59 = vadd.f32 %v9726_v12, %v9724_v43  ;;  %v11619_v12 = vld [vmem:[#allocation46_spill] sm:$0xff] }
 0x5af   : > { %6758 = vrcp.f32 %v2215_v47  ;;  %v2271_v57 = vmul.f32 %v6743_v28, %v11585_v17  ;;  %v2270_v6 = vmul.f32 %v6743_v28, %v11588_v39  ;;  %v9738_v3 = vpop.xlane.xlu0 %3353  ;;  %v11590_v17 = vld [vmem:[#allocation47_spill] sm:$0xff] }
 0x5b0   : > { %v9732_v24 = vpop.eup %6744  ;;  %6760 = vrcp.f32 %v2218_v30  ;;  %v3401_v37 = vsub.f32 %v11618_v9, %v9738_v3 }
 0x5b1   : > { %11586 = vst [vmem:[#allocation41_spill] sm:$0xff] %v9732_v24  ;;  %v9736_v51 = vpop.eup %6746  ;;  %v2301_v15 = vpack.c.bf16 %v2271_v57, %v2269_v13  ;;  %2896 = vadd.xlane.f32.xlu1 %v2895_v59  ;;  %v2300_v47 = vpack.c.bf16 %v2270_v6, %v2268_v52  ;;  %v11594_v59 = vld [vmem:[#allocation60_spill] sm:$0xff]  ;;  %v11596_v52 = vld [vmem:[#allocation111_spill] sm:$0xff] }
 0x5b2   : > { %11589 = vst [vmem:[#allocation51_spill] sm:$0xff] %v9736_v51  ;;  %v9740_v20 = vpop.xlane.xlu1 %2764  ;;  %v2898_v19 = vadd.f32 %v9736_v51, %v9732_v24  ;;  %v6749_v13 = vpop.eup %6748  ;;  %v11598_v24 = vld [vmem:[#allocation38_spill] sm:$0xff] }
 0x5b3   : > { %2412 = vmatprep.mubr.bf16.mxu1 %v2301_v15 }
 0x5b4   : > { %2413 = vmatmul.mubr.bf16.vlgmr.msra.gmra.mxu1 %v2300_v47  ;;  %2899 = vadd.xlane.f32.xlu0 %v2898_v19 }
 0x5b5   : > { %5879 = vmatpush3.bf16.msra.mxu1 %v11590_v17 }
 0x5b6   : > { %5880 = vmatprep.subr.bf16.mxu1 %v11591_v49  ;;  %v2221_v39 = vpop.xlane.xlu1 %2220  ;;  %v9746_v28 = vpop.xlane.xlu0 %3359 }
 0x5b7   : > { %6762 = vrcp.f32 %v2221_v39  ;;  %v2273_v39 = vmul.f32 %v6749_v13, %v9218_v21 }
 0x5b8   : > { %v9748_v57 = vpop.eup %6750 }
 0x5b9   : > { %11592 = vst [vmem:[#allocation29_spill] sm:$0xff] %v9748_v57  ;;  %v9750_v6 = vpop.eup %6752  ;;  %5881 = vmatpush3.bf16.msra.mxu1 %v11594_v59 }
 0x5ba   : > { %11593 = vst [vmem:[#allocation21_spill] sm:$0xff] %v9750_v6  ;;  %v9753_v0 = vpop.eup %6754  ;;  %5882 = vmatprep.subr.bf16.mxu1 %v11596_v52  ;;  %v2224_v15 = vpop.xlane.xlu1 %2223  ;;  %v2901_v19 = vadd.f32 %v9750_v6, %v9748_v57  ;;  %v2272_v52 = vmul.f32 %v6749_v13, %v9211_v29  ;;  %v11603_v13 = vld [vmem:[#allocation96_spill] sm:$0xff] }
 0x5bb   : > { %11595 = vst [vmem:[#allocation47_spill] sm:$0xff] %v9753_v0  ;;  %v2230_v47 = vpop.xlane.xlu0 %2229  ;;  %v9758_v17 = vpop.eup %6756  ;;  %6764 = vrcp.f32 %v2224_v15 }
 0x5bc   : > { %11597 = vst [vmem:[#allocation27_spill] sm:$0xff] %v9758_v17  ;;  %v6759_v49 = vpop.eup %6758  ;;  %2902 = vadd.xlane.f32.xlu1 %v2901_v19  ;;  %v2904_v30 = vadd.f32 %v9758_v17, %v9753_v0  ;;  %v11600_v0 = vld [vmem:[#allocation42_spill] sm:$0xff] }
 0x5bd   : > { %5883 = vmatpush3.bf16.msra.mxu1 %v11598_v24  ;;  %v2275_v59 = vmul.f32 %v6759_v49, %v9246_v14  ;;  %v2274_v51 = vmul.f32 %v6759_v49, %v9240_v53  ;;  %v11601_v24 = vld [vmem:[#allocation84_spill] sm:$0xff]  ;;  %v6761_v29 = vpop.eup %6760  ;;  %v11602_v53 = vld [vmem:[#allocation31_spill] sm:$0xff] }
 0x5be   : > { %5884 = vmatprep.subr.bf16.mxu1 %v11599_v4  ;;  %2905 = vadd.xlane.f32.xlu0 %v2904_v30  ;;  %v9768_v57 = vpop.xlane.xlu1 %3356 }
 0x5bf   : > { %v2233_v6 = vpop.xlane.xlu0 %2232  ;;  %v2303_v19 = vpack.c.bf16 %v2275_v59, %v2273_v39  ;;  %v2302_v43 = vpack.c.bf16 %v2274_v51, %v2272_v52  ;;  %v11605_v39 = vld [vmem:[#allocation24_spill] sm:$0xff]  ;;  %v11606_v52 = vld [vmem:[#allocation43_spill] sm:$0xff] }
 0x5c0   : > { %6766 = vrcp.f32 %v2233_v6  ;;  %v2276_v59 = vmul.f32 %v6761_v29, %v11605_v39 }
 0x5c1   : > { %2420 = vmatprep.mubr.bf16.mxu1 %v2303_v19  ;;  %5885 = vmatpush3.bf16.msra.mxu1 %v11600_v0  ;;  %v11604_v0 = vld [vmem:[#allocation55_spill] sm:$0xff]  ;;  %v11607_v19 = vld [vmem:[#allocation32_spill] sm:$0xff] }
 0x5c2   : > { %2421 = vmatmul.mubr.bf16.gmra.mxu1 %v2302_v43  ;;  %5886 = vmatprep.subr.bf16.mxu1 %v11601_v24  ;;  %v2227_v21 = vpop.xlane.xlu1 %2226  ;;  %v2277_v43 = vmul.f32 %v6761_v29, %v9256_v27  ;;  %v11608_v24 = vld [vmem:[#allocation64_spill] sm:$0xff]  ;;  %v11610_v27 = vld [vmem:[#allocation2_spill] sm:$0xff]  ;;  %v11611_v29 = vld [vmem:[#allocation71_spill] sm:$0xff] }
 0x5c3   : > { %v9772_v14 = vpop.xlane.xlu0 %3365  ;;  %6768 = vrcp.f32 %v2227_v21 }
 0x5c4   : > { %v6763_v4 = vpop.eup %6762  ;;  %6770 = vrcp.f32 %v2230_v47 }
 0x5c5   : > { %5887 = vmatpush3.bf16.msra.mxu1 %v11602_v53  ;;  %v2279_v30 = vmul.f32 %v6763_v4, %v11604_v0  ;;  %v2278_v15 = vmul.f32 %v6763_v4, %v11606_v52  ;;  %v11613_v52 = vld [vmem:[#allocation79_spill] sm:$0xff] }
 0x5c6   : > { %5888 = vmatprep.subr.bf16.mxu1 %v11603_v13  ;;  %v9776_v51 = vpop.xlane.xlu1 %3362  ;;  %v11609_v13 = vld [vmem:[#allocation22_spill] sm:$0xff] }
 0x5c7   : > { %v2236_v49 = vpop.xlane.xlu0 %2235  ;;  %v2305_v6 = vpack.c.bf16 %v2279_v30, %v2277_v43  ;;  %v2304_v21 = vpack.c.bf16 %v2278_v15, %v2276_v59  ;;  %v11612_v43 = vld [vmem:[#allocation40_spill] sm:$0xff] }
 0x5c8   : > { %v6765_v0 = vpop.eup %6764  ;;  %6772 = vrcp.f32 %v2236_v49 }
 0x5c9   : > { %5889 = vmatpush3.bf16.msra.mxu1 %v11607_v19  ;;  %2428 = vmatprep.mubr.bf16.mxu1 %v2305_v6  ;;  %v11614_v6 = vld [vmem:[#allocation26_spill] sm:$0xff] }
 0x5ca   : > { %5890 = vmatprep.subr.bf16.mxu1 %v11608_v24  ;;  %v9784_v47 = vpop.xlane.xlu1 %3368  ;;  %2429 = vmatmul.mubr.bf16.gmra.mxu1 %v2304_v21  ;;  %v3400_v24 = vsub.f32 %v11614_v6, %v9738_v3  ;;  %v11615_v21 = vld [vmem:[#allocation56_spill] sm:$0xff]  ;;  %v2796_v6 = vsub.f32 %v11619_v12, %v9740_v20 }
 0x5cb   : > { %v9786_v53 = vpop.xlane.xlu0 %3371 }
 0x5cc   : > { %v3432_v48 = vmul.f32 1.442695, %v3400_v24  ;;  %v2858_v9 = vmul.f32 1.442695, %v2796_v6 }
 0x5cd   : > { %5891 = vmatpush3.bf16.msra.mxu1 %v11609_v13  ;;  %3610 = vrot.lane.b32.xlu1 %v11610_v27, %s7171_s24  ;;  %v6767_v39 = vpop.eup %6766  ;;  %v2281_v13 = vmul.f32 %v6765_v0, %v11615_v21  ;;  %v11617_v27 = vld [vmem:[#allocation53_spill] sm:$0xff] }
 0x5ce   : > { %5892 = vmatprep.subr.bf16.mxu1 %v11611_v29  ;;  %v2239_v4 = vpop.xlane.xlu1 %2238  ;;  %v11616_v29 = vld [vmem:[#allocation7_spill] sm:$0xff] }
 0x5cf   : > { %v2242_v59 = vpop.xlane.xlu0 %2241  ;;  %6774 = vrcp.f32 %v2239_v4 }
 0x5d0   : > { %v6769_v30 = vpop.eup %6768  ;;  %6776 = vrcp.f32 %v2242_v59 }
 0x5d1   : > { %5893 = vmatpush3.bf16.msra.mxu1 %v11612_v43  ;;  %v6771_v19 = vpop.eup %6770  ;;  %v2283_v49 = vmul.f32 %v6769_v30, %v9337_v35  ;;  %v2280_v43 = vmul.f32 %v6765_v0, %v11617_v27  ;;  %v2282_v17 = vmul.f32 %v6769_v30, %v9328_v58  ;;  %v11621_v58 = vld [vmem:[#allocation8_spill] sm:$0xff]  ;;  %v3434_v0 = vmul.f32 1.442695, %v3401_v37 }
 0x5d2   : > { %5974 = vmatprep.subr.bf16.mxu1 %v11613_v52  ;;  %v9794_v15 = vpop.xlane.xlu1 %3374  ;;  %v2287_v52 = vmul.f32 %v6767_v39, %v9307_v31  ;;  %v2285_v5 = vmul.f32 %v6771_v19, %v9302_v2  ;;  %v2286_v2 = vmul.f32 %v6767_v39, %v9304_v11  ;;  %v3402_v37 = vsub.f32 %v9325_v46, %v9768_v57 }
 0x5d3   : > { %v2307_v4 = vpack.c.bf16 %v2283_v49, %v2281_v13  ;;  %v2306_v38 = vpack.c.bf16 %v2282_v17, %v2280_v43  ;;  %v3378_v27 = vpop.xlane.xlu0 %3377  ;;  %v11623_v17 = vld [vmem:[#allocation54_spill] sm:$0xff]  ;;  %v11625_v49 = vld [vmem:[#allocation83_spill] sm:$0xff] }
 0x5d4   : > { %3626 = vrot.lane.b32.xlu0 %v11616_v29, %s7171_s24  ;;  %v11620_v29 = vld [vmem:[#allocation35_spill] sm:$0xff]  ;;  %v2309_v31 = vpack.c.bf16 %v2287_v52, %v2285_v5  ;;  %v2284_v30 = vmul.f32 %v6771_v19, %v11623_v17  ;;  %v11624_v19 = vld [vmem:[#allocation85_spill] sm:$0xff]  ;;  %v3405_v46 = vsub.f32 %v11625_v49, %v9746_v28  ;;  %v3436_v43 = vmul.f32 1.442695, %v3402_v37 }
 0x5d5   : > { %v2797_v35 = vsub.f32 %v11620_v29, %v9740_v20  ;;  %2436 = vmatprep.mubr.bf16.mxu1 %v2307_v4  ;;  %v11622_v20 = vld [vmem:[#allocation3_spill] sm:$0xff]  ;;  %v6773_v24 = vpop.eup %6772  ;;  %v3404_v29 = vsub.f32 %v11624_v19, %v9746_v28  ;;  %v3977_v4 = vpop.f32.mrf.mxu0  ;;  %v3406_v28 = vsub.f32 %v9354_v45, %v9776_v51  ;;  %v11630_v45 = vld [vmem:[#allocation92_spill] sm:$0xff] }
 0x5d6   : > { %v2245_v21 = vpop.xlane.xlu1 %2244  ;;  %2437 = vmatmul.mubr.bf16.gmra.mxu1 %v2306_v38  ;;  %v3403_v38 = vsub.f32 %v9313_v25, %v9768_v57  ;;  %v2308_v59 = vpack.c.bf16 %v2286_v2, %v2284_v30  ;;  %v3416_v57 = vsub.f32 %v9416_v42, %v3378_v27  ;;  %v11627_v2 = vld [vmem:[#allocation93_spill] sm:$0xff] }
 0x5d7   : > { %2444 = vmatprep.mubr.bf16.mxu1 %v2309_v31  ;;  %v2860_v3 = vmul.f32 1.442695, %v2797_v35  ;;  %6778 = vrcp.f32 %v2245_v21  ;;  %v2248_v5 = vpop.xlane.xlu0 %2247  ;;  %v3417_v21 = vsub.f32 %v9401_v61, %v3378_v27  ;;  %v3440_v35 = vmul.f32 1.442695, %v3404_v29 }
 0x5d8   : > { %3624 = vrot.lane.b32.xlu0 %v11621_v58, %s7171_s24  ;;  %6780 = vpow2.f32 %v3432_v48  ;;  %v2289_v48 = vmul.f32 %v6773_v24, %v9351_v1  ;;  %v3438_v52 = vmul.f32 1.442695, %v3403_v38  ;;  %v2288_v1 = vmul.f32 %v6773_v24, %v9342_v18  ;;  %v11629_v18 = vld [vmem:[#allocation75_spill] sm:$0xff] }
 0x5d9   : > { %6782 = vpow2.f32 %v3434_v0  ;;  %v3442_v31 = vmul.f32 1.442695, %v3405_v46  ;;  %v11626_v0 = vld [vmem:[#allocation98_spill] sm:$0xff]  ;;  %v9839_v17 = vadd.f32 %v11627_v2, %v3977_v4  ;;  %v3464_v61 = vmul.f32 1.442695, %v3416_v57  ;;  %v11636_v57 = vld [vmem:[#allocation103_spill] sm:$0xff] }
 0x5da   : > { %v9814_v12 = vpop.xlane.xlu1 %3380  ;;  %6784 = vpow2.f32 %v2858_v9  ;;  %v3407_v9 = vsub.f32 %v11626_v0, %v9776_v51  ;;  %v3466_v24 = vmul.f32 1.442695, %v3417_v21  ;;  %v11632_v51 = vld [vmem:[#allocation57_spill] sm:$0xff]  ;;  %v3444_v29 = vmul.f32 1.442695, %v3406_v28  ;;  %v11637_v21 = vld [vmem:[#allocation74_spill] sm:$0xff] }
 0x5db   : > { %6786 = vpow2.f32 %v2860_v3  ;;  %11628 = vst [vmem:[#allocation60_spill] sm:$0xff] %v9839_v17  ;;  %v3418_v27 = vsub.f32 %v11629_v18, %v9814_v12  ;;  %v3419_v37 = vsub.f32 %v11630_v45, %v9814_v12  ;;  %v11639_v2 = vld [vmem:[#allocation102_spill] sm:$0xff] }
 0x5dc   : > { %3608 = vrot.lane.b32.xlu0 %v11622_v20, %s7171_s24  ;;  %v6775_v13 = vpop.eup %6774  ;;  %6788 = vrcp.f32 %v2248_v5  ;;  %v11631_v5 = vld [vmem:[#allocation62_spill] sm:$0xff]  ;;  %v3446_v46 = vmul.f32 1.442695, %v3407_v9 }
 0x5dd   : > { %v2291_v39 = vmul.f32 %v6775_v13, %v9382_v32  ;;  %v2290_v25 = vmul.f32 %v6775_v13, %v9371_v7  ;;  %v6777_v32 = vpop.eup %6776  ;;  %v3384_v7 = vpop.xlane.xlu0 %3383 }
 0x5de   : > { %v2251_v11 = vpop.xlane.xlu1 %2250  ;;  %2445 = vmatmul.mubr.bf16.gmra.mxu1 %v2308_v59  ;;  %v2293_v38 = vmul.f32 %v6777_v32, %v11631_v5  ;;  %v3420_v4 = vsub.f32 %v11636_v57, %v3384_v7 }
 0x5df   : > { %6790 = vrcp.f32 %v2251_v11  ;;  %v2311_v6 = vpack.c.bf16 %v2291_v39, %v2289_v48  ;;  %v2310_v3 = vpack.c.bf16 %v2290_v25, %v2288_v1  ;;  %v11633_v11 = vld [vmem:[#allocation89_spill] sm:$0xff]  ;;  %v11634_v39 = vld [vmem:[#allocation91_spill] sm:$0xff]  ;;  %v3468_v25 = vmul.f32 1.442695, %v3418_v27 }
 0x5e0   : > { %6792 = vpow2.f32 %v3436_v43  ;;  %v3408_v48 = vsub.f32 %v11633_v11, %v9772_v14  ;;  %v3409_v19 = vsub.f32 %v11634_v39, %v9772_v14  ;;  %v11635_v43 = vld [vmem:[#allocation58_spill] sm:$0xff]  ;;  %v3421_v1 = vsub.f32 %v11637_v21, %v3384_v7  ;;  %v11638_v14 = vld [vmem:[#allocation88_spill] sm:$0xff]  ;;  %v11640_v7 = vld [vmem:[#allocation95_spill] sm:$0xff] }
 0x5e1   : > { %2452 = vmatprep.mubr.bf16.mxu1 %v2311_v6  ;;  %6794 = vpow2.f32 %v3438_v52  ;;  %v3390_v0 = vpop.xlane.xlu0 %3389  ;;  %v2292_v28 = vmul.f32 %v6777_v32, %v11638_v14  ;;  %v3411_v27 = vsub.f32 %v11640_v7, %v9784_v47  ;;  %v11642_v11 = vld [vmem:[#allocation65_spill] sm:$0xff] }
 0x5e2   : > { %6796 = vpow2.f32 %v3440_v35  ;;  %v3470_v35 = vmul.f32 1.442695, %v3419_v37  ;;  %v9867_v18 = vpop.xlane.xlu1 %3386  ;;  %v3472_v37 = vmul.f32 1.442695, %v3420_v4  ;;  %v3474_v5 = vmul.f32 1.442695, %v3421_v1 }
 0x5e3   : > { %6798 = vpow2.f32 %v3442_v31  ;;  %v3454_v21 = vmul.f32 1.442695, %v3411_v27 }
 0x5e4   : > { %v6779_v42 = vpop.eup %6778  ;;  %6800 = vpow2.f32 %v3464_v61  ;;  %v3410_v61 = vsub.f32 %v11639_v2, %v9784_v47  ;;  %v11644_v47 = vld [vmem:[#allocation81_spill] sm:$0xff] }
 0x5e5   : > { %v9843_v30 = vpop.eup %6780  ;;  %v2295_v59 = vmul.f32 %v6779_v42, %v11632_v51  ;;  %v2294_v52 = vmul.f32 %v6779_v42, %v11635_v43  ;;  %6802 = vpow2.f32 %v3466_v24  ;;  %v3450_v42 = vmul.f32 1.442695, %v3409_v19  ;;  %v11643_v19 = vld [vmem:[#allocation97_spill] sm:$0xff]  ;;  %v11645_v43 = vld [vmem:[#allocation90_spill] sm:$0xff] }
 0x5e6   : > { %2453 = vmatmul.mubr.bf16.gmra.mxu1 %v2310_v3  ;;  %v9849_v13 = vpop.eup %6782  ;;  %v3448_v3 = vmul.f32 1.442695, %v3408_v48  ;;  %6804 = vpow2.f32 %v3444_v29  ;;  %v3425_v48 = vsub.f32 %v11642_v11, %v3390_v0  ;;  %v3396_v39 = vpop.xlane.xlu0 %3395 }
 0x5e7   : > { %v9855_v49 = vpop.eup %6784  ;;  %v2313_v12 = vpack.c.bf16 %v2295_v59, %v2293_v38  ;;  %v3496_v31 = vadd.f32 %v9849_v13, %v9843_v30  ;;  %6806 = vpow2.f32 %v3446_v46  ;;  %v2312_v24 = vpack.c.bf16 %v2294_v52, %v2292_v28  ;;  %v11641_v38 = vld [vmem:[#allocation82_spill] sm:$0xff]  ;;  %v3979_v59 = vpop.f32.mrf.mxu0 }
 0x5e8   : > { %v9858_v6 = vpop.eup %6786  ;;  %6808 = vpow2.f32 %v3468_v25  ;;  %v3424_v51 = vsub.f32 %v11641_v38, %v3390_v0  ;;  %v3412_v52 = vsub.f32 %v11645_v43, %v9786_v53  ;;  %v11646_v25 = vld [vmem:[#allocation104_spill] sm:$0xff]  ;;  %v11648_v28 = vld [vmem:[#allocation78_spill] sm:$0xff]  ;;  %v3428_v7 = vsub.f32 %v9496_v23, %v3396_v39 }
 0x5e9   : > { %2460 = vmatprep.mubr.bf16.mxu1 %v2313_v12  ;;  %v6789_v9 = vpop.eup %6788  ;;  %v2907_v32 = vadd.f32 %v9858_v6, %v9855_v49  ;;  %6810 = vpow2.f32 %v3470_v35  ;;  %v3452_v12 = vmul.f32 1.442695, %v3410_v61  ;;  %v3413_v57 = vsub.f32 %v11646_v25, %v9786_v53  ;;  %v11647_v35 = vld [vmem:[#allocation101_spill] sm:$0xff]  ;;  %v9889_v61 = vpop.xlane.xlu1 %3392 }
 0x5ea   : > { %v2297_v29 = vmul.f32 %v6789_v9, %v11643_v19  ;;  %6812 = vpow2.f32 %v3448_v3  ;;  %v9887_v2 = vadd.f32 %v11648_v28, %v3979_v59  ;;  %v3480_v3 = vmul.f32 1.442695, %v3424_v51  ;;  %v11652_v59 = vld [vmem:[#allocation69_spill] sm:$0xff]  ;;  %v11653_v51 = vld [vmem:[#allocation63_spill] sm:$0xff] }
 0x5eb   : > { %6814 = vpow2.f32 %v3450_v42  ;;  %v3482_v53 = vmul.f32 1.442695, %v3425_v48  ;;  %v11651_v42 = vld [vmem:[#allocation70_spill] sm:$0xff]  ;;  %v3458_v38 = vmul.f32 1.442695, %v3413_v57  ;;  %v3414_v11 = vsub.f32 %v11652_v59, %v9794_v15  ;;  %v11658_v59 = vld [vmem:[#allocation77_spill] sm:$0xff] }
 0x5ec   : > { %v6791_v45 = vpop.eup %6790  ;;  %11649 = vst [vmem:[#allocation111_spill] sm:$0xff] %v9887_v2  ;;  %6816 = vpow2.f32 %v3472_v37  ;;  %v2296_v27 = vmul.f32 %v6789_v9, %v11651_v42  ;;  %v3415_v23 = vsub.f32 %v11653_v51, %v9794_v15  ;;  %v4028_v19 = vmax.f32 %v9839_v17, %v9887_v2 }
 0x5ed   : > { %v2299_v46 = vmul.f32 %v6791_v45, %v11644_v47  ;;  %v9881_v4 = vpop.eup %6792  ;;  %v2298_v0 = vmul.f32 %v6791_v45, %v11647_v35  ;;  %6818 = vpow2.f32 %v3474_v5  ;;  %v3456_v45 = vmul.f32 1.442695, %v3412_v52  ;;  %v11654_v35 = vld [vmem:[#allocation110_spill] sm:$0xff] }
 0x5ee   : > { %2461 = vmatmul.mubr.bf16.gmra.mxu1 %v2312_v24  ;;  %v9884_v14 = vpop.eup %6794  ;;  %v11650_v24 = vld [vmem:[#allocation72_spill] sm:$0xff]  ;;  %6820 = vpow2.f32 %v3452_v12  ;;  %v3460_v15 = vmul.f32 1.442695, %v3414_v11  ;;  %v3462_v43 = vmul.f32 1.442695, %v3415_v23  ;;  %v3426_v11 = vsub.f32 %v11658_v59, %v9889_v61 }
 0x5ef   : > { %v2315_v1 = vpack.c.bf16 %v2299_v46, %v2297_v29  ;;  %v9896_v37 = vpop.eup %6796  ;;  %6822 = vpow2.f32 %v3454_v21  ;;  %v2314_v5 = vpack.c.bf16 %v2298_v0, %v2296_v27  ;;  %v3499_v48 = vadd.f32 %v9884_v14, %v9881_v4  ;;  %v9910_v46 = vpop.xlane.xlu1 %3398 }
 0x5f0   : > { %6824 = vpow2.f32 %v3480_v3  ;;  %v3422_v0 = vsub.f32 %v11654_v35, %v9867_v18 }
 0x5f1   : > { %2908 = vadd.xlane.f32.xlu1 %v2907_v32  ;;  %v3429_v32 = vsub.f32 %v11650_v24, %v3396_v39  ;;  %2468 = vmatprep.mubr.bf16.mxu1 %v2315_v1  ;;  %v9902_v39 = vpop.eup %6798  ;;  %6826 = vpow2.f32 %v3482_v53 }
 0x5f2   : > { %v9904_v9 = vpop.eup %6800  ;;  %6828 = vpow2.f32 %v3456_v45  ;;  %v3502_v52 = vadd.f32 %v9902_v39, %v9896_v37 }
 0x5f3   : > { %v3490_v29 = vmul.f32 1.442695, %v3429_v32  ;;  %v9908_v47 = vpop.eup %6802  ;;  %6830 = vpow2.f32 %v3458_v38  ;;  %v9926_v28 = vpop.xlane.xlu1 %3990  ;;  %v3476_v38 = vmul.f32 1.442695, %v3422_v0 }
 0x5f4   : > { %v9912_v12 = vpop.eup %6804  ;;  %v3520_v21 = vadd.f32 %v9908_v47, %v9904_v9 }
 0x5f5   : > { %3497 = vadd.xlane.f32.xlu1 %v3496_v31  ;;  %v3488_v31 = vmul.f32 1.442695, %v3428_v7  ;;  %v9916_v25 = vpop.eup %6806  ;;  %v11655_v7 = vld [vmem:[#allocation66_spill] sm:$0xff] }
 0x5f6   : > { %2469 = vmatmul.mubr.bf16.gmra.mxu1 %v2314_v5  ;;  %v9918_v57 = vpop.eup %6808  ;;  %v3423_v53 = vsub.f32 %v11655_v7, %v9867_v18  ;;  %v3505_v24 = vadd.f32 %v9916_v25, %v9912_v12  ;;  %v11659_v5 = vld [vmem:[#allocation94_spill] sm:$0xff] }
 0x5f7   : > { %6832 = vpow2.f32 %v3488_v31  ;;  %v9922_v1 = vpop.eup %6810 }
 0x5f8   : > { %6834 = vpow2.f32 %v3490_v29  ;;  %v9928_v3 = vpop.eup %6812  ;;  %v3523_v27 = vadd.f32 %v9922_v1, %v9918_v57  ;;  %v3478_v23 = vmul.f32 1.442695, %v3423_v53 }
 0x5f9   : > { %3500 = vadd.xlane.f32.xlu1 %v3499_v48  ;;  %6836 = vpow2.f32 %v3460_v15  ;;  %v9934_v32 = vpop.eup %6814  ;;  %v3427_v48 = vsub.f32 %v11659_v5, %v9889_v61  ;;  %v3988_v61 = vpop.xlane.xlu0 %3987 }
 0x5fa   : > { %6838 = vpow2.f32 %v3462_v43  ;;  %v9936_v42 = vpop.eup %6816  ;;  %v9944_v51 = vpop.xlane.xlu1 %3996  ;;  %v3508_v31 = vadd.f32 %v9934_v32, %v9928_v3 }
 0x5fb   : > { %4029 = vmax.xlane.f32.xlu0 %v4028_v19  ;;  %11656 = vst [vmem:[#allocation38_spill] sm:$0xff] %v9936_v42  ;;  %v9940_v45 = vpop.eup %6818  ;;  %6840 = vpow2.f32 %v3476_v38  ;;  %v3486_v53 = vmul.f32 1.442695, %v3427_v48  ;;  %v3981_v38 = vpop.f32.mrf.mxu0 }
 0x5fc   : > { %11657 = vst [vmem:[#allocation114_spill] sm:$0xff] %v9940_v45  ;;  %v9946_v18 = vpop.eup %6820  ;;  %v3526_v15 = vadd.f32 %v9940_v45, %v9936_v42  ;;  %6842 = vpow2.f32 %v3478_v23  ;;  %v7109_v42 = vld [vmem:[%s8512_s18 + $0xf0] sm:$0xff] }
 0x5fd   : > { %3503 = vadd.xlane.f32.xlu1 %v3502_v52  ;;  %v9952_v19 = vpop.eup %6822  ;;  %v3484_v52 = vmul.f32 1.442695, %v3426_v11  ;;  %v3983_v58 = vpop.f32.mrf.mxu0  ;;  %v10000_v45 = vadd.f32 %v7109_v42, %v3981_v38 }
 0x5fe   : > { %v9954_v29 = vpop.eup %6824  ;;  %v3511_v59 = vadd.f32 %v9952_v19, %v9946_v18 }
 0x5ff   : > { %3521 = vadd.xlane.f32.xlu0 %v3520_v21  ;;  %11660 = vst [vmem:[#allocation42_spill] sm:$0xff] %v9954_v29  ;;  %v9958_v43 = vpop.eup %6826  ;;  %v11662_v21 = vld [vmem:[#allocation73_spill] sm:$0xff]  ;;  %6844 = vpow2.f32 %v3484_v52  ;;  %11671 = vst [vmem:[#allocation24_spill] sm:$0xff] %v10000_v45 }
 0x600   : > { %11661 = vst [vmem:[#allocation84_spill] sm:$0xff] %v9958_v43  ;;  %v3430_v35 = vsub.f32 %v11662_v21, %v9910_v46  ;;  %v9964_v7 = vpop.eup %6828  ;;  %v3532_v20 = vadd.f32 %v9958_v43, %v9954_v29  ;;  %6846 = vpow2.f32 %v3486_v53 }
 0x601   : > { %3506 = vadd.xlane.f32.xlu1 %v3505_v24  ;;  %v11663_v24 = vld [vmem:[#allocation113_spill] sm:$0xff]  ;;  %v9970_v5 = vpop.eup %6830 }
 0x602   : > { %v9962_v0 = vpop.xlane.xlu1 %4002  ;;  %v3492_v48 = vmul.f32 1.442695, %v3430_v35 }
 0x603   : > { %3524 = vadd.xlane.f32.xlu0 %v3523_v27  ;;  %v3431_v27 = vsub.f32 %v11663_v24, %v9910_v46  ;;  %v11667_v46 = vld [vmem:[#allocation107_spill] sm:$0xff] }
 0x604   : > { %v9972_v11 = vpop.eup %6832  ;;  %6848 = vpow2.f32 %v3492_v48 }
 0x605   : > { %3509 = vadd.xlane.f32.xlu1 %v3508_v31  ;;  %11664 = vst [vmem:[#allocation31_spill] sm:$0xff] %v9972_v11  ;;  %v11665_v31 = vld [vmem:[#allocation112_spill] sm:$0xff]  ;;  %v9977_v23 = vpop.eup %6834  ;;  %v3494_v17 = vmul.f32 1.442695, %v3431_v27 }
 0x606   : > { %v4034_v21 = vsub.f32 %v11665_v31, %v3988_v61  ;;  %11666 = vst [vmem:[#allocation96_spill] sm:$0xff] %v9977_v23  ;;  %v9982_v2 = vpop.eup %6836  ;;  %v3538_v52 = vadd.f32 %v9977_v23, %v9972_v11 }
 0x607   : > { %3527 = vadd.xlane.f32.xlu0 %v3526_v15  ;;  %v4035_v15 = vsub.f32 %v11667_v46, %v3988_v61  ;;  %v9986_v31 = vpop.eup %6838  ;;  %v7108_v46 = vld [vmem:[%s8512_s18 + $0xf8] sm:$0xff]  ;;  %6850 = vpow2.f32 %v3494_v17  ;;  %s7175_s18 = smov 24  }
 0x608   : > { %v4066_v29 = vmul.f32 1.442695, %v4034_v21  ;;  %v9991_v43 = vadd.f32 %v7108_v46, %v3983_v58  ;;  %v3517_v27 = vadd.f32 %v9986_v31, %v9982_v2  ;;  %v11670_v21 = vld [vmem:[#allocation86_spill] sm:$0xff]  ;;  %v10002_v58 = vpop.eup %6840 }
 0x609   : > { %3512 = vadd.xlane.f32.xlu1 %v3511_v59  ;;  %v3514_v59 = vadd.f32 %v9970_v5, %v9964_v7  ;;  %v4068_v35 = vmul.f32 1.442695, %v4035_v15 }
 0x60a   : > { %v9980_v24 = vpop.xlane.xlu1 %4008  ;;  %11668 = vst [vmem:[#allocation55_spill] sm:$0xff] %v9991_v43  ;;  %6852 = vpow2.f32 %v4066_v29  ;;  %v4031_v17 = vmax.f32 %v10000_v45, %v9991_v43 }
 0x60b   : > { %3533 = vadd.xlane.f32.xlu0 %v3532_v20  ;;  %v11669_v20 = vld [vmem:[#allocation106_spill] sm:$0xff]  ;;  %6854 = vpow2.f32 %v4068_v35 }
 0x60c   : > { %v4036_v53 = vsub.f32 %v11669_v20, %v9926_v28 }
 0x60d   : > { %3515 = vadd.xlane.f32.xlu1 %v3514_v59  ;;  %v4037_v59 = vsub.f32 %v11670_v21, %v9926_v28  ;;  %v10008_v28 = vpop.xlane.xlu0 %3993 }
 0x60e   : > { %v2864_v61 = vpop.xlane.xlu1 %2863  ;;  %v4070_v15 = vmul.f32 1.442695, %v4036_v53 }
 0x60f   : > { %3539 = vadd.xlane.f32.xlu0 %v3538_v52  ;;  %6856 = vrcp.f32 %v2864_v61  ;;  %v10006_v52 = vpop.eup %6842  ;;  %v4072_v46 = vmul.f32 1.442695, %v4037_v59 }
 0x610   : > { %v10012_v29 = vpop.eup %6844  ;;  %v3529_v38 = vadd.f32 %v10006_v52, %v10002_v58 }
 0x611   : > { %3518 = vadd.xlane.f32.xlu1 %v3517_v27  ;;  %11673 = vst [vmem:[#allocation32_spill] sm:$0xff] %v10012_v29  ;;  %v10016_v35 = vpop.eup %6846  ;;  %v10018_v61 = vpop.xlane.xlu0 %3999 }
 0x612   : > { %v2867_v48 = vpop.xlane.xlu1 %2866  ;;  %v10020_v53 = vpop.eup %6848  ;;  %v3535_v27 = vadd.f32 %v10016_v35, %v10012_v29 }
 0x613   : > { %6858 = vrcp.f32 %v2867_v48  ;;  %11674 = vst [vmem:[#allocation64_spill] sm:$0xff] %v10020_v53 }
 0x614   : > { %6860 = vpow2.f32 %v4070_v15  ;;  %v10024_v21 = vpop.eup %6850 }
 0x615   : > { %4032 = vmax.xlane.f32.xlu1 %v4031_v17  ;;  %6862 = vpow2.f32 %v4072_v46  ;;  %v10028_v48 = vpop.xlane.xlu0 %4005  ;;  %v3541_v46 = vadd.f32 %v10024_v21, %v10020_v53 }
 0x616   : > { %v10010_v42 = vpop.xlane.xlu1 %4014 }
 0x617   : > { %11672 = vst [vmem:[#allocation43_spill] sm:$0xff] %v10010_v42  ;;  %v10026_v59 = vpop.eup %6852 }
 0x618   : > { %v10030_v15 = vpop.eup %6854 }
 0x619   : > { %3530 = vadd.xlane.f32.xlu1 %v3529_v38  ;;  %11675 = vst [vmem:[#allocation22_spill] sm:$0xff] %v10030_v15  ;;  %v10034_v45 = vpop.xlane.xlu0 %4011 }
 0x61a   : > { %v2870_v20 = vpop.xlane.xlu1 %2869  ;;  %11676 = vst [vmem:[#allocation71_spill] sm:$0xff] %v10034_v45 }
 0x61b   : > { %6864 = vrcp.f32 %v2870_v20 }
 0x61c   : > { %v6857_v38 = vpop.eup %6856 }
 0x61d   : > { %3536 = vadd.xlane.f32.xlu1 %v3535_v27  ;;  %v4130_v27 = vadd.f32 %v10030_v15, %v10026_v59  ;;  %v2927_v11 = vmul.f32 %v6857_v38, %v9590_v62  ;;  %v2926_v20 = vmul.f32 %v6857_v38, %v9588_v60  ;;  %v10050_v45 = vpop.xlane.xlu0 %4017  ;;  %v11679_v60 = vld [vmem:[#allocation67_spill] sm:$0xff]  ;;  %v11682_v38 = vld [vmem:[#allocation28_spill] sm:$0xff] }
 0x61e   : > { %v2873_v17 = vpop.xlane.xlu1 %2872 }
 0x61f   : > { %6866 = vrcp.f32 %v2873_v17 }
 0x620   : > { %v6859_v43 = vpop.eup %6858 }
 0x621   : > { %3542 = vadd.xlane.f32.xlu1 %v3541_v46  ;;  %v2929_v23 = vmul.f32 %v6859_v43, %v9606_v63  ;;  %v10042_v29 = vpop.eup %6860  ;;  %v2928_v53 = vmul.f32 %v6859_v43, %v9604_v55  ;;  %v11678_v46 = vld [vmem:[#allocation10_spill] sm:$0xff]  ;;  %v11680_v55 = vld [vmem:[#allocation11_spill] sm:$0xff]  ;;  %v10057_v43 = vpop.xlane.xlu0 %4023 }
 0x622   : > { %v10036_v42 = vpop.xlane.xlu1 %4020  ;;  %v10046_v17 = vpop.eup %6862  ;;  %11681 = vst [vmem:[#allocation79_spill] sm:$0xff] %v10057_v43 }
 0x623   : > { %11677 = vst [vmem:[#allocation40_spill] sm:$0xff] %v10036_v42  ;;  %v2959_v42 = vpack.c.bf16 %v2929_v23, %v2927_v11  ;;  %v2958_v62 = vpack.c.bf16 %v2928_v53, %v2926_v20  ;;  %v4133_v63 = vadd.f32 %v10046_v17, %v10042_v29  ;;  %v11685_v20 = vld [vmem:[#allocation50_spill] sm:$0xff] }
 0x625   : > { %4272 = vrot.lane.b32.xlu0 %v11678_v46, %s7172_s21  ;;  %4131 = vadd.xlane.f32.xlu1 %v4130_v27  ;;  %v11683_v27 = vld [vmem:[#allocation23_spill] sm:$0xff] }
 0x626   : > { %v2876_v15 = vpop.xlane.xlu1 %2875  ;;  %3054 = vmatprep.mubr.bf16.mxu1 %v2959_v42  ;;  %v4040_v42 = vsub.f32 %v9541_v56, %v9944_v51 }
 0x627   : > { %3055 = vmatmul.mubr.bf16.vlgmr.msra.gmra.mxu1 %v2958_v62  ;;  %6868 = vrcp.f32 %v2876_v15  ;;  %v11684_v15 = vld [vmem:[#allocation13_spill] sm:$0xff] }
 0x628   : > { %5975 = vmatpush3.bf16.msra.mxu1 %v11679_v60  ;;  %v6865_v23 = vpop.eup %6864  ;;  %v4078_v56 = vmul.f32 1.442695, %v4040_v42 }
 0x629   : > { %4270 = vrot.lane.b32.xlu0 %v11680_v55, %s7172_s21  ;;  %5976 = vmatprep.subr.bf16.mxu1 %v11682_v38  ;;  %v2931_v60 = vmul.f32 %v6865_v23, %v9630_v54  ;;  %v2930_v55 = vmul.f32 %v6865_v23, %v9624_v40  ;;  %v11690_v23 = vld [vmem:[#allocation49_spill] sm:$0xff] }
 0x62a   : > { %4134 = vadd.xlane.f32.xlu1 %v4133_v63  ;;  %v2879_v11 = vpop.xlane.xlu1 %2878 }
 0x62b   : > { %6870 = vrcp.f32 %v2879_v11 }
 0x62c   : > { %v6867_v53 = vpop.eup %6866  ;;  %5977 = vmatpush3.bf16.msra.mxu1 %v11683_v27  ;;  %v11687_v27 = vld [vmem:[#allocation25_spill] sm:$0xff]  ;;  %6872 = vpow2.f32 %v4078_v56 }
 0x62d   : > { %4268 = vrot.lane.b32.xlu0 %v11684_v15, %s7172_s21  ;;  %5978 = vmatprep.subr.bf16.mxu1 %v11685_v20  ;;  %v2888_v46 = vpop.xlane.xlu0 %2887  ;;  %v2933_v63 = vmul.f32 %v6867_v53, %v9636_v10  ;;  %v2932_v38 = vmul.f32 %v6867_v53, %v9634_v22  ;;  %v4041_v15 = vsub.f32 %v9544_v41, %v9944_v51  ;;  %v11688_v20 = vld [vmem:[#allocation59_spill] sm:$0xff]  ;;  %v11689_v10 = vld [vmem:[#allocation20_spill] sm:$0xff] }
 0x62e   : > { %v10066_v62 = vpop.xlane.xlu1 %4026  ;;  %v11691_v41 = vld [vmem:[#allocation48_spill] sm:$0xff] }
 0x62f   : > { %11686 = vst [vmem:[#allocation26_spill] sm:$0xff] %v10066_v62  ;;  %v2961_v11 = vpack.c.bf16 %v2933_v63, %v2931_v60  ;;  %v2960_v43 = vpack.c.bf16 %v2932_v38, %v2930_v55  ;;  %v4080_v22 = vmul.f32 1.442695, %v4041_v15  ;;  %v11692_v63 = vld [vmem:[#allocation18_spill] sm:$0xff] }
 0x630   : > { %5979 = vmatpush3.bf16.msra.mxu1 %v11687_v27  ;;  %v11694_v27 = vld [vmem:[#allocation45_spill] sm:$0xff] }
 0x631   : > { %5980 = vmatprep.subr.bf16.mxu1 %v11688_v20  ;;  %3062 = vmatprep.mubr.bf16.mxu1 %v2961_v11  ;;  %v2891_v54 = vpop.xlane.xlu0 %2890 }
 0x632   : > { %v2882_v62 = vpop.xlane.xlu1 %2881  ;;  %3063 = vmatmul.mubr.bf16.gmra.mxu1 %v2960_v43 }
 0x633   : > { %6874 = vrcp.f32 %v2882_v62 }
 0x634   : > { %5981 = vmatpush3.bf16.msra.mxu1 %v11689_v10  ;;  %v6869_v40 = vpop.eup %6868  ;;  %6876 = vrcp.f32 %v2888_v46  ;;  %v11693_v46 = vld [vmem:[#allocation9_spill] sm:$0xff] }
 0x635   : > { %5982 = vmatprep.subr.bf16.mxu1 %v11690_v23  ;;  %6878 = vrcp.f32 %v2891_v54  ;;  %v2935_v51 = vmul.f32 %v6869_v40, %v9666_v36  ;;  %v2934_v60 = vmul.f32 %v6869_v40, %v9662_v50 }
 0x636   : > { %v2885_v42 = vpop.xlane.xlu1 %2884  ;;  %v2894_v11 = vpop.xlane.xlu0 %2893 }
 0x637   : > { %6880 = vrcp.f32 %v2885_v42 }
 0x638   : > { %v6871_v53 = vpop.eup %6870  ;;  %5983 = vmatpush3.bf16.msra.mxu1 %v11691_v41  ;;  %6882 = vpow2.f32 %v4080_v22 }
 0x639   : > { %v2937_v43 = vmul.f32 %v6871_v53, %v9676_v8  ;;  %v2936_v62 = vmul.f32 %v6871_v53, %v9670_v33  ;;  %5984 = vmatprep.subr.bf16.mxu1 %v11692_v63  ;;  %v11695_v8 = vld [vmem:[#allocation12_spill] sm:$0xff]  ;;  %v10089_v50 = vpop.eup %6872 }
 0x63a   : > { %v2897_v55 = vpop.xlane.xlu1 %2896 }
 0x63b   : > { %4256 = vrot.lane.b32.xlu1 %v11693_v46, %s7172_s21  ;;  %v2963_v38 = vpack.c.bf16 %v2937_v43, %v2935_v51  ;;  %v2962_v56 = vpack.c.bf16 %v2936_v62, %v2934_v60  ;;  %6884 = vrcp.f32 %v2897_v55  ;;  %v11696_v51 = vld [vmem:[#allocation52_spill] sm:$0xff]  ;;  %v11697_v60 = vld [vmem:[#allocation87_spill] sm:$0xff] }
 0x63c   : > { %5985 = vmatpush3.bf16.msra.mxu1 %v11694_v27  ;;  %6886 = vrcp.f32 %v2894_v11  ;;  %v4038_v62 = vsub.f32 %v11697_v60, %v10008_v28 }
 0x63d   : > { %3070 = vmatprep.mubr.bf16.mxu1 %v2963_v38  ;;  %v2900_v15 = vpop.xlane.xlu0 %2899 }
 0x63e   : > { %3071 = vmatmul.mubr.bf16.gmra.mxu1 %v2962_v56 }
 0x63f   : > { %4254 = vrot.lane.b32.xlu1 %v11695_v8, %s7172_s21  ;;  %v4074_v8 = vmul.f32 1.442695, %v4038_v62 }
 0x640   : > { %v6875_v36 = vpop.eup %6874 }
 0x641   : > { %v6877_v33 = vpop.eup %6876  ;;  %v2939_v40 = vmul.f32 %v6875_v36, %v9696_v16  ;;  %v2938_v23 = vmul.f32 %v6875_v36, %v9692_v26  ;;  %v11698_v16 = vld [vmem:[#allocation99_spill] sm:$0xff] }
 0x642   : > { %v6879_v20 = vpop.eup %6878  ;;  %v4039_v55 = vsub.f32 %v11698_v16, %v10008_v28 }
 0x643   : > { %v2945_v43 = vmul.f32 %v6879_v20, %v11696_v51  ;;  %v11703_v51 = vld [vmem:[#allocation68_spill] sm:$0xff] }
 0x644   : > { %v6881_v54 = vpop.eup %6880 }
 0x645   : > { %v2903_v10 = vpop.xlane.xlu1 %2902  ;;  %v2941_v22 = vmul.f32 %v6881_v54, %v9714_v34  ;;  %v2940_v42 = vmul.f32 %v6881_v54, %v9708_v44  ;;  %v10095_v53 = vpop.eup %6882  ;;  %v11699_v34 = vld [vmem:[#allocation76_spill] sm:$0xff]  ;;  %v11700_v54 = vld [vmem:[#allocation30_spill] sm:$0xff] }
 0x646   : > { %6888 = vrcp.f32 %v2903_v10  ;;  %v2943_v38 = vmul.f32 %v6877_v33, %v11699_v34  ;;  %v4139_v44 = vadd.f32 %v10095_v53, %v10089_v50  ;;  %v2944_v28 = vmul.f32 %v6879_v20, %v11700_v54  ;;  %v11701_v10 = vld [vmem:[#allocation126_spill] sm:$0xff]  ;;  %v11705_v34 = vld [vmem:[#allocation21_spill] sm:$0xff] }
 0x647   : > { %v10097_v41 = vpop.xlane.xlu0 %2905  ;;  %6890 = vrcp.f32 %v2900_v15  ;;  %v2965_v63 = vpack.c.bf16 %v2941_v22, %v2939_v40  ;;  %v2964_v46 = vpack.c.bf16 %v2940_v42, %v2938_v23  ;;  %v4076_v15 = vmul.f32 1.442695, %v4039_v55  ;;  %v11702_v23 = vld [vmem:[#allocation44_spill] sm:$0xff]  ;;  %v11704_v55 = vld [vmem:[#allocation19_spill] sm:$0xff]  ;;  %v11708_v54 = vld [vmem:[#allocation29_spill] sm:$0xff] }
 0x648   : > { %v6885_v56 = vpop.eup %6884  ;;  %v2967_v27 = vpack.c.bf16 %v2945_v43, %v2943_v38  ;;  %v2942_v42 = vmul.f32 %v6877_v33, %v11702_v23  ;;  %6892 = vpow2.f32 %v4074_v8  ;;  %v11707_v33 = vld [vmem:[#allocation51_spill] sm:$0xff] }
 0x649   : > { %v3611_v26 = vpop.permute.xlu1 %3610  ;;  %3078 = vmatprep.mubr.bf16.mxu1 %v2965_v63  ;;  %v6887_v36 = vpop.eup %6886  ;;  %v2949_v40 = vmul.f32 %v6885_v56, %v11701_v10  ;;  %6894 = vpow2.f32 %v4076_v15  ;;  %v2948_v20 = vmul.f32 %v6885_v56, %v11704_v55  ;;  %v11714_v55 = vld [vmem:[#allocation15_spill] sm:$0xff] }
 0x64a   : > { %3079 = vmatmul.mubr.bf16.gmra.mxu1 %v2964_v46  ;;  %v2947_v60 = vmul.f32 %v6887_v36, %v11703_v51  ;;  %v2966_v43 = vpack.c.bf16 %v2944_v28, %v2942_v42  ;;  %v11711_v42 = vld [vmem:[#allocation16_spill] sm:$0xff]  ;;  %v11712_v51 = vld [vmem:[#allocation109_spill] sm:$0xff] }
 0x64b   : > { %v3627_v11 = vpop.permute.xlu0 %3626  ;;  %3086 = vmatprep.mubr.bf16.mxu1 %v2967_v27 }
 0x64c   : > { %4140 = vadd.xlane.f32.xlu0 %v4139_v44  ;;  %5986 = vmatprep.subr.bf16.mxu1 %v3627_v11  ;;  %v2969_v62 = vpack.c.bf16 %v2949_v40, %v2947_v60  ;;  %v11709_v40 = vld [vmem:[#allocation41_spill] sm:$0xff]  ;;  %v4044_v60 = vsub.f32 %v11712_v51, %v9962_v0 }
 0x64d   : > { %5987 = vmatpush3.bf16.msra.mxu1 %v3611_v26  ;;  %v11706_v26 = vld [vmem:[#allocation61_spill] sm:$0xff] }
 0x64e   : > { %v2946_v44 = vmul.f32 %v6887_v36, %v11706_v26  ;;  %v11710_v36 = vld [vmem:[#allocation14_spill] sm:$0xff] }
 0x64f   : > { %v3625_v22 = vpop.permute.xlu0 %3624 }
 0x650   : > { %5988 = vmatprep.subr.bf16.mxu1 %v3625_v22  ;;  %v2968_v27 = vpack.c.bf16 %v2948_v20, %v2946_v44 }
 0x652   : > { %3087 = vmatmul.mubr.bf16.gmra.mxu1 %v2966_v43  ;;  %v11713_v43 = vld [vmem:[#allocation115_spill] sm:$0xff] }
 0x653   : > { %v6889_v63 = vpop.eup %6888  ;;  %v3609_v46 = vpop.permute.xlu0 %3608  ;;  %3094 = vmatprep.mubr.bf16.mxu1 %v2969_v62  ;;  %v4045_v62 = vsub.f32 %v11713_v43, %v9962_v0 }
 0x654   : > { %5989 = vmatpush3.bf16.msra.mxu1 %v3609_v46  ;;  %v6891_v16 = vpop.eup %6890  ;;  %v2953_v38 = vmul.f32 %v6889_v63, %v11705_v34  ;;  %v2952_v28 = vmul.f32 %v6889_v63, %v11708_v54  ;;  %v4086_v63 = vmul.f32 1.442695, %v4044_v60  ;;  %v11719_v54 = vld [vmem:[#allocation108_spill] sm:$0xff] }
 0x655   : > { %v2951_v11 = vmul.f32 %v6891_v16, %v11707_v33  ;;  %v10115_v15 = vpop.eup %6892  ;;  %v2950_v22 = vmul.f32 %v6891_v16, %v11709_v40  ;;  %v4088_v46 = vmul.f32 1.442695, %v4045_v62 }
 0x656   : > { %v10118_v10 = vpop.eup %6894  ;;  %6896 = vpow2.f32 %v4086_v63 }
 0x657   : > { %v2971_v8 = vpack.c.bf16 %v2953_v38, %v2951_v11  ;;  %v4136_v56 = vadd.f32 %v10118_v10, %v10115_v15  ;;  %v2970_v23 = vpack.c.bf16 %v2952_v28, %v2950_v22  ;;  %6898 = vpow2.f32 %v4088_v46  ;;  %v11716_v38 = vld [vmem:[#allocation6_spill] sm:$0xff]  ;;  %v11718_v11 = vld [vmem:[#allocation100_spill] sm:$0xff] }
 0x658   : > { %6900 = vrcp.f32 %v10097_v41  ;;  %v4043_v28 = vsub.f32 %v11719_v54, %v10018_v61 }
 0x65a   : > { %3095 = vmatmul.mubr.bf16.gmra.mxu1 %v2968_v27  ;;  %v4042_v27 = vsub.f32 %v11718_v11, %v10018_v61 }
 0x65b   : > { %3102 = vmatprep.mubr.bf16.mxu1 %v2971_v8 }
 0x662   : > { %4252 = vrot.lane.b32.xlu0 %v11710_v36, %s7172_s21  ;;  %3103 = vmatmul.mubr.bf16.gmra.mxu1 %v2970_v23  ;;  %v4084_v36 = vmul.f32 1.442695, %v4043_v28 }
 0x663   : > { %4137 = vadd.xlane.f32.xlu1 %v4136_v56  ;;  %v10140_v33 = vpop.eup %6896  ;;  %v4082_v56 = vmul.f32 1.442695, %v4042_v27 }
 0x664   : > { %v10144_v8 = vpop.eup %6898 }
 0x665   : > { %v4145_v23 = vadd.f32 %v10144_v8, %v10140_v33  ;;  %v6901_v43 = vpop.eup %6900 }
 0x666   : > { %4264 = vrot.lane.b32.xlu0 %v11711_v42, %s7172_s21 }
 0x674   : > { %v5798_v16 = vpop.f32.mrf.mxu1  ;;  %4266 = vrot.lane.b32.xlu1 %v11714_v55, %s7172_s21 }
 0x676   : > { %v5799_v20 = vpop.f32.mrf.mxu1 }
 0x677   : > { %v10133_v34 = vadd.f32 %v5799_v20, %v5798_v16  ;;  %v11723_v16 = vld [vmem:[#allocation27_spill] sm:$0xff] }
 0x678   : > { %4250 = vrot.lane.b32.xlu1 %v11716_v38, %s7172_s21  ;;  %v10138_v44 = vpop.f32.mrf.mxu1  ;;  %v2955_v55 = vmul.f32 %v6901_v43, %v11723_v16  ;;  %v11724_v38 = vld [vmem:[#allocation47_spill] sm:$0xff] }
 0x679   : > { %11715 = vst [vmem:[#allocation56_spill] sm:$0xff] %v10133_v34  ;;  %11717 = vst [vmem:[#allocation53_spill] sm:$0xff] %v10138_v44 }
 0x67a   : > { %v2909_v26 = vpop.xlane.xlu1 %2908  ;;  %v10148_v40 = vpop.f32.mrf.mxu1 }
 0x67b   : > { %6902 = vrcp.f32 %v2909_v26  ;;  %11720 = vst [vmem:[#allocation36_spill] sm:$0xff] %v10148_v40  ;;  %v2954_v26 = vmul.f32 %v6901_v43, %v11724_v38 }
 0x67e   : > { %v3498_v0 = vpop.xlane.xlu1 %3497 }
 0x67f   : > { %6904 = vrcp.f32 %v3498_v0 }
 0x682   : > { %v5804_v22 = vpop.f32.mrf.mxu1  ;;  %v3501_v41 = vpop.xlane.xlu1 %3500 }
 0x683   : > { %6906 = vrcp.f32 %v3501_v41 }
 0x684   : > { %v5805_v42 = vpop.f32.mrf.mxu1  ;;  %v10152_v51 = vpop.xlane.xlu0 %4029  ;;  %6908 = vpow2.f32 %v4082_v56 }
 0x685   : > { %v10154_v60 = vadd.f32 %v5805_v42, %v5804_v22  ;;  %4146 = vadd.xlane.f32.xlu0 %v4145_v23  ;;  %6910 = vpow2.f32 %v4084_v36 }
 0x686   : > { %v10156_v62 = vpop.f32.mrf.mxu1  ;;  %v3504_v61 = vpop.xlane.xlu1 %3503 }
 0x687   : > { %11721 = vst [vmem:[#allocation46_spill] sm:$0xff] %v10154_v60  ;;  %11722 = vst [vmem:[#allocation35_spill] sm:$0xff] %v10156_v62  ;;  %6912 = vrcp.f32 %v3504_v61 }
 0x688   : > { %v6903_v63 = vpop.eup %6902  ;;  %v3522_v46 = vpop.xlane.xlu0 %3521 }
 0x689   : > { %v2957_v20 = vmul.f32 %v6903_v63, %v9858_v6  ;;  %v2956_v0 = vmul.f32 %v6903_v63, %v9855_v49  ;;  %v10162_v11 = vpop.f32.mrf.mxu1 }
 0x68a   : > { %11725 = vst [vmem:[#allocation54_spill] sm:$0xff] %v10162_v11  ;;  %v3507_v27 = vpop.xlane.xlu1 %3506 }
 0x68b   : > { %v2973_v54 = vpack.c.bf16 %v2957_v20, %v2955_v55  ;;  %v2972_v28 = vpack.c.bf16 %v2956_v0, %v2954_v26  ;;  %6914 = vrcp.f32 %v3507_v27  ;;  %v5810_v41 = vpop.f32.mrf.mxu1 }
 0x68c   : > { %v3525_v22 = vpop.xlane.xlu0 %3524  ;;  %v6905_v56 = vpop.eup %6904 }
 0x68d   : > { %3110 = vmatprep.mubr.bf16.mxu1 %v2973_v54  ;;  %v5811_v23 = vpop.f32.mrf.mxu1  ;;  %v3561_v49 = vmul.f32 %v6905_v56, %v9849_v13  ;;  %v3560_v63 = vmul.f32 %v6905_v56, %v9843_v30 }
 0x68e   : > { %v3510_v36 = vpop.xlane.xlu1 %3509  ;;  %3111 = vmatmul.mubr.bf16.gmra.mxu1 %v2972_v28  ;;  %v10164_v42 = vadd.f32 %v5811_v23, %v5810_v41 }
 0x68f   : > { %6916 = vrcp.f32 %v3510_v36  ;;  %v10170_v20 = vpop.f32.mrf.mxu1 }
 0x690   : > { %11726 = vst [vmem:[#allocation85_spill] sm:$0xff] %v10164_v42  ;;  %v6907_v6 = vpop.eup %6906  ;;  %v3528_v43 = vpop.xlane.xlu0 %3527  ;;  %11727 = vst [vmem:[#allocation83_spill] sm:$0xff] %v10170_v20 }
 0x691   : > { %v3563_v61 = vmul.f32 %v6907_v6, %v9884_v14  ;;  %v3562_v16 = vmul.f32 %v6907_v6, %v9881_v4  ;;  %v10172_v0 = vpop.eup %6908  ;;  %v10178_v28 = vpop.f32.mrf.mxu1 }
 0x692   : > { %v3513_v55 = vpop.xlane.xlu1 %3512  ;;  %v10176_v54 = vpop.eup %6910  ;;  %11728 = vst [vmem:[#allocation98_spill] sm:$0xff] %v10178_v28 }
 0x693   : > { %6918 = vrcp.f32 %v3513_v55  ;;  %v3593_v38 = vpack.c.bf16 %v3563_v61, %v3561_v49  ;;  %v3592_v26 = vpack.c.bf16 %v3562_v16, %v3560_v63  ;;  %v4142_v56 = vadd.f32 %v10176_v54, %v10172_v0 }
 0x694   : > { %v10174_v27 = vpop.xlane.xlu0 %3533  ;;  %v6913_v14 = vpop.eup %6912  ;;  %6920 = vrcp.f32 %v3525_v22  ;;  %v11729_v22 = vld [vmem:[#allocation4_spill] sm:$0xff] }
 0x695   : > { %3688 = vmatprep.mubr.bf16.mxu1 %v3593_v38  ;;  %v3565_v36 = vmul.f32 %v6913_v14, %v9902_v39  ;;  %v3564_v49 = vmul.f32 %v6913_v14, %v9896_v37  ;;  %v11734_v14 = vld [vmem:[#allocation118_spill] sm:$0xff] }
 0x696   : > { %v3516_v13 = vpop.xlane.xlu1 %3515  ;;  %3689 = vmatmul.mubr.bf16.vlgmr.msra.gmra.mxu1 %v3592_v26  ;;  %v5816_v41 = vpop.f32.mrf.mxu1 }
 0x697   : > { %6922 = vrcp.f32 %v3516_v13 }
 0x698   : > { %v10180_v30 = vpop.xlane.xlu0 %3539  ;;  %v6915_v4 = vpop.eup %6914 }
 0x699   : > { %v3567_v6 = vmul.f32 %v6915_v4, %v9916_v25  ;;  %v3566_v61 = vmul.f32 %v6915_v4, %v9912_v12  ;;  %v5817_v63 = vpop.f32.mrf.mxu1  ;;  %v11733_v25 = vld [vmem:[#allocation7_spill] sm:$0xff]  ;;  %v4048_v4 = vsub.f32 %v11734_v14, %v9980_v24 }
 0x69a   : > { %v3519_v23 = vpop.xlane.xlu1 %3518  ;;  %v10190_v16 = vadd.f32 %v5817_v63, %v5816_v41 }
 0x69b   : > { %4248 = vrot.lane.b32.xlu0 %v11729_v22, %s7172_s21  ;;  %6924 = vrcp.f32 %v3519_v23  ;;  %v3595_v38 = vpack.c.bf16 %v3567_v6, %v3565_v36  ;;  %v3594_v26 = vpack.c.bf16 %v3566_v61, %v3564_v49  ;;  %v10192_v13 = vpop.f32.mrf.mxu1  ;;  %v11735_v61 = vld [vmem:[#allocation119_spill] sm:$0xff] }
 0x69c   : > { %6926 = vrcp.f32 %v3522_v46  ;;  %11730 = vst [vmem:[#allocation93_spill] sm:$0xff] %v10190_v16  ;;  %v4273_v55 = vpop.permute.xlu0 %4272  ;;  %4143 = vadd.xlane.f32.xlu1 %v4142_v56  ;;  %11731 = vst [vmem:[#allocation75_spill] sm:$0xff] %v10192_v13  ;;  %v6917_v39 = vpop.eup %6916  ;;  %v4049_v63 = vsub.f32 %v11735_v61, %v9980_v24 }
 0x69d   : > { %6070 = vmatprep.subr.bf16.mxu1 %v4273_v55  ;;  %3696 = vmatprep.mubr.bf16.mxu1 %v3595_v38  ;;  %v10196_v12 = vpop.f32.mrf.mxu1  ;;  %v3569_v56 = vmul.f32 %v6917_v39, %v9934_v32  ;;  %v3568_v36 = vmul.f32 %v6917_v39, %v9928_v3  ;;  %6928 = vrcp.f32 %v3528_v43 }
 0x69e   : > { %v10194_v37 = vpop.xlane.xlu1 %4032  ;;  %11732 = vst [vmem:[#allocation92_spill] sm:$0xff] %v10196_v12  ;;  %3697 = vmatmul.mubr.bf16.gmra.mxu1 %v3594_v26  ;;  %v4094_v26 = vmul.f32 1.442695, %v4048_v4  ;;  %v4096_v39 = vmul.f32 1.442695, %v4049_v63 }
 0x69f   : > { %4260 = vrot.lane.b32.xlu0 %v11733_v25, %s7172_s21  ;;  %v5822_v41 = vpop.f32.mrf.mxu1 }
 0x6a0   : > { %v6919_v46 = vpop.eup %6918 }
 0x6a1   : > { %v3571_v23 = vmul.f32 %v6919_v46, %v9952_v19  ;;  %v3570_v6 = vmul.f32 %v6919_v46, %v9946_v18  ;;  %v5823_v22 = vpop.f32.mrf.mxu1  ;;  %v6921_v14 = vpop.eup %6920 }
 0x6a2   : > { %v3531_v49 = vpop.xlane.xlu1 %3530  ;;  %v10208_v25 = vadd.f32 %v5823_v22, %v5822_v41 }
 0x6a3   : > { %v3597_v55 = vpack.c.bf16 %v3571_v23, %v3569_v56  ;;  %v3596_v38 = vpack.c.bf16 %v3570_v6, %v3568_v36  ;;  %6930 = vrcp.f32 %v3531_v49  ;;  %v10210_v32 = vpop.f32.mrf.mxu1  ;;  %v3579_v6 = vmul.f32 %v6921_v14, %v9922_v1 }
 0x6a4   : > { %11736 = vst [vmem:[#allocation62_spill] sm:$0xff] %v10208_v25  ;;  %11737 = vst [vmem:[#allocation57_spill] sm:$0xff] %v10210_v32  ;;  %v6923_v19 = vpop.eup %6922  ;;  %6932 = vpow2.f32 %v4094_v26 }
 0x6a5   : > { %3704 = vmatprep.mubr.bf16.mxu1 %v3597_v55  ;;  %v10212_v18 = vpop.f32.mrf.mxu1  ;;  %v3573_v4 = vmul.f32 %v6923_v19, %v9970_v5  ;;  %v3572_v41 = vmul.f32 %v6923_v19, %v9964_v7  ;;  %v11739_v7 = vld [vmem:[#allocation17_spill] sm:$0xff] }
 0x6a6   : > { %v3537_v3 = vpop.xlane.xlu1 %3536  ;;  %11738 = vst [vmem:[#allocation89_spill] sm:$0xff] %v10212_v18  ;;  %3705 = vmatmul.mubr.bf16.gmra.mxu1 %v3596_v38 }
 0x6a7   : > { %v5828_v56 = vpop.f32.mrf.mxu1  ;;  %6934 = vrcp.f32 %v3537_v3 }
 0x6a8   : > { %v6925_v46 = vpop.eup %6924  ;;  %6936 = vpow2.f32 %v4096_v39 }
 0x6a9   : > { %v6927_v24 = vpop.eup %6926  ;;  %v3575_v43 = vmul.f32 %v6925_v46, %v9986_v31  ;;  %v3574_v23 = vmul.f32 %v6925_v46, %v9982_v2  ;;  %v5829_v49 = vpop.f32.mrf.mxu1  ;;  %6938 = vrcp.f32 %v10174_v27  ;;  %v11740_v27 = vld [vmem:[#allocation5_spill] sm:$0xff] }
 0x6aa   : > { %v3543_v36 = vpop.xlane.xlu1 %3542  ;;  %v10220_v22 = vadd.f32 %v5829_v49, %v5828_v56  ;;  %v3577_v5 = vmul.f32 %v6927_v24, %v9908_v47  ;;  %v6929_v1 = vpop.eup %6928  ;;  %v3578_v47 = vmul.f32 %v6921_v14, %v9918_v57  ;;  %v3576_v46 = vmul.f32 %v6927_v24, %v9904_v9 }
 0x6ab   : > { %v3599_v61 = vpack.c.bf16 %v3575_v43, %v3573_v4  ;;  %v3598_v63 = vpack.c.bf16 %v3574_v23, %v3572_v41  ;;  %v10223_v55 = vpop.f32.mrf.mxu1  ;;  %6940 = vrcp.f32 %v3543_v36  ;;  %v11742_v43 = vld [vmem:[#allocation114_spill] sm:$0xff]  ;;  %v4271_v14 = vpop.permute.xlu0 %4270 }
 0x6ac   : > { %v3601_v31 = vpack.c.bf16 %v3579_v6, %v3577_v5  ;;  %v3581_v41 = vmul.f32 %v6929_v1, %v11742_v43  ;;  %v3600_v57 = vpack.c.bf16 %v3578_v47, %v3576_v46  ;;  %v11745_v5 = vld [vmem:[#allocation116_spill] sm:$0xff] }
 0x6ad   : > { %4262 = vrot.lane.b32.xlu1 %v11739_v7, %s7172_s21  ;;  %3712 = vmatprep.mubr.bf16.mxu1 %v3599_v61  ;;  %v10227_v38 = vpop.f32.mrf.mxu1  ;;  %v4046_v7 = vsub.f32 %v11745_v5, %v10028_v48 }
 0x6ae   : > { %v4132_v2 = vpop.xlane.xlu1 %4131  ;;  %3713 = vmatmul.mubr.bf16.gmra.mxu1 %v3598_v63 }
 0x6af   : > { %3720 = vmatprep.mubr.bf16.mxu1 %v3601_v31  ;;  %v5834_v26 = vpop.f32.mrf.mxu1  ;;  %6942 = vrcp.f32 %v4132_v2  ;;  %v11746_v31 = vld [vmem:[#allocation117_spill] sm:$0xff]  ;;  %v4269_v46 = vpop.permute.xlu0 %4268 }
 0x6b0   : > { %v6931_v19 = vpop.eup %6930  ;;  %6944 = vrcp.f32 %v10180_v30 }
 0x6b1   : > { %4246 = vrot.lane.b32.xlu1 %v11740_v27, %s7172_s21  ;;  %v5835_v3 = vpop.f32.mrf.mxu1  ;;  %v3583_v56 = vmul.f32 %v6931_v19, %v10006_v52  ;;  %v10238_v23 = vpop.eup %6932  ;;  %v3582_v63 = vmul.f32 %v6931_v19, %v10002_v58  ;;  %v11749_v58 = vld [vmem:[#allocation84_spill] sm:$0xff] }
 0x6b2   : > { %v10235_v4 = vadd.f32 %v5835_v3, %v5834_v26  ;;  %v4047_v26 = vsub.f32 %v11746_v31, %v10028_v48  ;;  %v11747_v3 = vld [vmem:[#allocation38_spill] sm:$0xff] }
 0x6b3   : > { %v4135_v39 = vpop.xlane.xlu1 %4134  ;;  %v10240_v36 = vpop.f32.mrf.mxu1  ;;  %v3603_v6 = vpack.c.bf16 %v3583_v56, %v3581_v41 }
 0x6b4   : > { %11741 = vst [vmem:[#allocation91_spill] sm:$0xff] %v10235_v4  ;;  %6946 = vrcp.f32 %v4135_v39  ;;  %11743 = vst [vmem:[#allocation58_spill] sm:$0xff] %v10240_v36  ;;  %v6935_v49 = vpop.eup %6934  ;;  %v3580_v39 = vmul.f32 %v6929_v1, %v11747_v3 }
 0x6b5   : > { %v10242_v30 = vpop.f32.mrf.mxu1  ;;  %v10244_v9 = vpop.eup %6936  ;;  %v3587_v2 = vmul.f32 %v6935_v49, %v10016_v35  ;;  %v4090_v35 = vmul.f32 1.442695, %v4046_v7  ;;  %v11751_v7 = vld [vmem:[#allocation42_spill] sm:$0xff] }
 0x6b6   : > { %11744 = vst [vmem:[#allocation103_spill] sm:$0xff] %v10242_v30  ;;  %3721 = vmatmul.mubr.bf16.gmra.mxu1 %v3600_v57  ;;  %v6939_v52 = vpop.eup %6938  ;;  %v4151_v43 = vadd.f32 %v10244_v9, %v10238_v23  ;;  %v3602_v41 = vpack.c.bf16 %v3582_v63, %v3580_v39 }
 0x6b7   : > { %v4257_v61 = vpop.permute.xlu1 %4256  ;;  %3728 = vmatprep.mubr.bf16.mxu1 %v3603_v6  ;;  %v5840_v24 = vpop.f32.mrf.mxu1  ;;  %v3585_v19 = vmul.f32 %v6939_v52, %v11749_v58  ;;  %v4092_v6 = vmul.f32 1.442695, %v4047_v26  ;;  %6948 = vpow2.f32 %v4090_v35  ;;  %v11779_v26 = vld [vmem:[#allocation33_spill] sm:$0xff] }
 0x6b8   : > { %6071 = vmatpush3.bf16.msra.mxu1 %v4257_v61  ;;  %v6941_v57 = vpop.eup %6940 }
 0x6b9   : > { %6072 = vmatprep.subr.bf16.mxu1 %v4271_v14  ;;  %v5841_v27 = vpop.f32.mrf.mxu1  ;;  %v3605_v14 = vpack.c.bf16 %v3587_v2, %v3585_v19  ;;  %v3591_v63 = vmul.f32 %v6941_v57, %v10024_v21  ;;  %6950 = vpow2.f32 %v4092_v6  ;;  %v3584_v2 = vmul.f32 %v6939_v52, %v11751_v7  ;;  %v11755_v19 = vld [vmem:[#allocation22_spill] sm:$0xff] }
 0x6ba   : > { %v10253_v56 = vadd.f32 %v5841_v27, %v5840_v24  ;;  %v11750_v24 = vld [vmem:[#allocation32_spill] sm:$0xff] }
 0x6bb   : > { %v4255_v47 = vpop.permute.xlu1 %4254  ;;  %v3586_v5 = vmul.f32 %v6935_v49, %v11750_v24  ;;  %v11753_v49 = vld [vmem:[#allocation64_spill] sm:$0xff]  ;;  %v11756_v24 = vld [vmem:[#allocation2_spill] sm:$0xff] }
 0x6bc   : > { %11748 = vst [vmem:[#allocation74_spill] sm:$0xff] %v10253_v56  ;;  %6073 = vmatpush3.bf16.msra.mxu1 %v4255_v47  ;;  %v6943_v48 = vpop.eup %6942  ;;  %v11752_v47 = vld [vmem:[#allocation96_spill] sm:$0xff] }
 0x6bd   : > { %6074 = vmatprep.subr.bf16.mxu1 %v4269_v46  ;;  %v6945_v61 = vpop.eup %6944  ;;  %v10260_v31 = vmul.f32 %v6943_v48, %v10026_v59  ;;  %v3604_v39 = vpack.c.bf16 %v3586_v5, %v3584_v2  ;;  %v3590_v59 = vmul.f32 %v6941_v57, %v11753_v49  ;;  %v4195_v21 = vmul.f32 %v6943_v48, %v11755_v19  ;;  %v11759_v48 = vld [vmem:[#allocation121_spill] sm:$0xff]  ;;  %v11760_v2 = vld [vmem:[#allocation124_spill] sm:$0xff]  ;;  %v11764_v19 = vld [vmem:[#allocation39_spill] sm:$0xff] }
 0x6be   : > { %4152 = vadd.xlane.f32.xlu0 %v4151_v43  ;;  %3729 = vmatmul.mubr.bf16.gmra.mxu1 %v3602_v41  ;;  %v3589_v3 = vmul.f32 %v6945_v61, %v11752_v47  ;;  %v4054_v47 = vsub.f32 %v11760_v2, %v10050_v45  ;;  %v11771_v2 = vld [vmem:[#allocation60_spill] sm:$0xff] }
 0x6bf   : > { %3736 = vmatprep.mubr.bf16.mxu1 %v3605_v14 }
 0x6c0   : > { %v3607_v46 = vpack.c.bf16 %v3591_v63, %v3589_v3  ;;  %v4106_v49 = vmul.f32 1.442695, %v4054_v47  ;;  %v4062_v47 = vsub.f32 %v11771_v2, %v10152_v51 }
 0x6c1   : > { %v6947_v1 = vpop.eup %6946 }
 0x6c2   : > { %v10263_v27 = vmul.f32 %v6947_v1, %v10042_v29  ;;  %v4197_v43 = vmul.f32 %v6947_v1, %v10046_v17  ;;  %v11754_v29 = vld [vmem:[#allocation31_spill] sm:$0xff] }
 0x6c3   : > { %v3588_v58 = vmul.f32 %v6945_v61, %v11754_v29  ;;  %v11757_v17 = vld [vmem:[#allocation71_spill] sm:$0xff]  ;;  %v11758_v61 = vld [vmem:[#allocation120_spill] sm:$0xff] }
 0x6c4   : > { %v4227_v35 = vpack.c.bf16 %v4197_v43, %v4195_v21  ;;  %v10274_v52 = vpop.eup %6948  ;;  %v4050_v1 = vsub.f32 %v11758_v61, %v11757_v17  ;;  %v4051_v5 = vsub.f32 %v11759_v48, %v11757_v17  ;;  %v11763_v43 = vld [vmem:[#allocation37_spill] sm:$0xff] }
 0x6c5   : > { %v3606_v41 = vpack.c.bf16 %v3590_v59, %v3588_v58  ;;  %v11762_v59 = vld [vmem:[#allocation40_spill] sm:$0xff]  ;;  %v11768_v17 = vld [vmem:[#allocation105_spill] sm:$0xff] }
 0x6c6   : > { %3737 = vmatmul.mubr.bf16.gmra.mxu1 %v3604_v39  ;;  %v10276_v14 = vpop.eup %6950  ;;  %v4098_v7 = vmul.f32 1.442695, %v4050_v1  ;;  %v4100_v3 = vmul.f32 1.442695, %v4051_v5  ;;  %v11761_v39 = vld [vmem:[#allocation125_spill] sm:$0xff]  ;;  %v4056_v29 = vsub.f32 %v11763_v43, %v11762_v59  ;;  %v4057_v21 = vsub.f32 %v11764_v19, %v11762_v59  ;;  %v11773_v59 = vld [vmem:[#allocation3_spill] sm:$0xff] }
 0x6c7   : > { %3744 = vmatprep.mubr.bf16.mxu1 %v3607_v46  ;;  %v4148_v6 = vadd.f32 %v10276_v14, %v10274_v52  ;;  %v4055_v46 = vsub.f32 %v11761_v39, %v10050_v45  ;;  %v11772_v39 = vld [vmem:[#allocation111_spill] sm:$0xff]  ;;  %v4122_v43 = vmul.f32 1.442695, %v4062_v47 }
 0x6c8   : > { %6952 = vpow2.f32 %v4098_v7  ;;  %v4110_v45 = vmul.f32 1.442695, %v4056_v29  ;;  %v4112_v1 = vmul.f32 1.442695, %v4057_v21 }
 0x6c9   : > { %6954 = vpow2.f32 %v4100_v3  ;;  %v4108_v58 = vmul.f32 1.442695, %v4055_v46  ;;  %v4063_v46 = vsub.f32 %v11772_v39, %v10152_v51 }
 0x6ca   : > { %6956 = vpow2.f32 %v4106_v49 }
 0x6cb   : > { %6958 = vpow2.f32 %v4108_v58  ;;  %v4124_v19 = vmul.f32 1.442695, %v4063_v46 }
 0x6cc   : > { %6960 = vpow2.f32 %v4110_v45  ;;  %v11775_v45 = vld [vmem:[#allocation123_spill] sm:$0xff] }
 0x6cd   : > { %6962 = vpow2.f32 %v4112_v1 }
 0x6ce   : > { %3745 = vmatmul.mubr.bf16.gmra.mxu1 %v3606_v41  ;;  %v11765_v41 = vld [vmem:[#allocation79_spill] sm:$0xff] }
 0x6cf   : > { %4322 = vmatprep.mubr.bf16.mxu1 %v4227_v35  ;;  %v11766_v35 = vld [vmem:[#allocation34_spill] sm:$0xff]  ;;  %v4059_v61 = vsub.f32 %v11768_v17, %v11765_v41 }
 0x6d1   : > { %v4116_v7 = vmul.f32 1.442695, %v4059_v61  ;;  %v11774_v61 = vld [vmem:[#allocation43_spill] sm:$0xff] }
 0x6d2   : > { %v4052_v1 = vsub.f32 %v11775_v45, %v11774_v61 }
 0x6d4   : > { %4244 = vrot.lane.b32.xlu0 %v11756_v24, %s7172_s21  ;;  %v10296_v24 = vpop.f32.mrf.mxu1 }
 0x6d5   : > { %v4141_v57 = vpop.xlane.xlu0 %4140  ;;  %4149 = vadd.xlane.f32.xlu1 %v4148_v6  ;;  %v4058_v6 = vsub.f32 %v11766_v35, %v11765_v41  ;;  %11767 = vst [vmem:[#allocation88_spill] sm:$0xff] %v10296_v24  ;;  %v10314_v58 = vpop.eup %6952 }
 0x6d6   : > { %v10300_v5 = vpop.f32.mrf.mxu1  ;;  %v10318_v41 = vpop.eup %6954 }
 0x6d7   : > { %v4114_v48 = vmul.f32 1.442695, %v4058_v6  ;;  %11769 = vst [vmem:[#allocation102_spill] sm:$0xff] %v10300_v5  ;;  %v10320_v35 = vpop.eup %6956 }
 0x6d8   : > { %v10326_v17 = vpop.eup %6958 }
 0x6d9   : > { %v4253_v63 = vpop.permute.xlu0 %4252  ;;  %6964 = vpow2.f32 %v4114_v48  ;;  %v10334_v47 = vpop.eup %6960 }
 0x6da   : > { %6075 = vmatpush3.bf16.msra.mxu1 %v4253_v63  ;;  %v11770_v63 = vld [vmem:[#allocation8_spill] sm:$0xff]  ;;  %6966 = vrcp.f32 %v4141_v57  ;;  %v4154_v57 = vadd.f32 %v10318_v41, %v10314_v58 }
 0x6db   : > { %6968 = vpow2.f32 %v4116_v7 }
 0x6dd   : > { %v4265_v39 = vpop.permute.xlu0 %4264 }
 0x6e6   : > { %4258 = vrot.lane.b32.xlu1 %v11770_v63, %s7172_s21  ;;  %v11776_v63 = vld [vmem:[#allocation122_spill] sm:$0xff] }
 0x6e7   : > { %v10306_v3 = vpop.f32.mrf.mxu1  ;;  %v4053_v7 = vsub.f32 %v11776_v63, %v11774_v61 }
 0x6e9   : > { %v10310_v49 = vpop.f32.mrf.mxu1  ;;  %v4104_v63 = vmul.f32 1.442695, %v4053_v7 }
 0x6ea   : > { %4242 = vrot.lane.b32.xlu1 %v11773_v59, %s7172_s21  ;;  %v4160_v59 = vadd.f32 %v10326_v17, %v10320_v35 }
 0x6eb   : > { %v10316_v21 = vpop.f32.mrf.mxu1 }
 0x6ec   : > { %v4138_v29 = vpop.xlane.xlu1 %4137 }
 0x6ed   : > { %6970 = vrcp.f32 %v4138_v29  ;;  %v10322_v6 = vpop.f32.mrf.mxu1  ;;  %v4102_v29 = vmul.f32 1.442695, %v4052_v1 }
 0x6ee   : > { %6972 = vpow2.f32 %v4122_v43  ;;  %v10340_v43 = vpop.eup %6962  ;;  %v5899_v12 = vadd.f32 %v10322_v6, %v10316_v21 }
 0x6ef   : > { %6974 = vpow2.f32 %v4124_v19  ;;  %v11777_v19 = vld [vmem:[#allocation26_spill] sm:$0xff]  ;;  %v10344_v45 = vpop.eup %6964  ;;  %v4163_v24 = vadd.f32 %v10340_v43, %v10334_v47 }
 0x6f0   : > { %v4267_v51 = vpop.permute.xlu1 %4266  ;;  %v6967_v61 = vpop.eup %6966  ;;  %6976 = vpow2.f32 %v4102_v29  ;;  %v11781_v29 = vld [vmem:[#allocation55_spill] sm:$0xff] }
 0x6f1   : > { %6076 = vmatprep.subr.bf16.mxu1 %v4267_v51  ;;  %v11778_v51 = vld [vmem:[#allocation80_spill] sm:$0xff]  ;;  %v10350_v5 = vpop.eup %6968  ;;  %v10360_v7 = vmul.f32 %v6967_v61, %v10095_v53  ;;  %6978 = vpow2.f32 %v4104_v63 }
 0x6f2   : > { %v10330_v48 = vpop.f32.mrf.mxu1 }
 0x6f3   : > { %4155 = vadd.xlane.f32.xlu0 %v4154_v57  ;;  %v4060_v57 = vsub.f32 %v11778_v51, %v11777_v19 }
 0x6f4   : > { %v4251_v2 = vpop.permute.xlu1 %4250  ;;  %v10336_v46 = vpop.f32.mrf.mxu1 }
 0x6f5   : > { %6077 = vmatpush3.bf16.msra.mxu1 %v4251_v2  ;;  %v4061_v2 = vsub.f32 %v11779_v26, %v11777_v19  ;;  %v4118_v4 = vmul.f32 1.442695, %v4060_v57  ;;  %v10366_v19 = vmul.f32 %v6967_v61, %v10089_v50  ;;  %v4065_v57 = vsub.f32 %v11781_v29, %v10194_v37 }
 0x6f6   : > { %6078 = vmatprep.subr.bf16.mxu1 %v4265_v39  ;;  %v10348_v56 = vpop.f32.mrf.mxu1  ;;  %v11780_v39 = vld [vmem:[#allocation24_spill] sm:$0xff] }
 0x6f7   : > { %4161 = vadd.xlane.f32.xlu0 %v4160_v59  ;;  %v4064_v51 = vsub.f32 %v11780_v39, %v10194_v37  ;;  %v4120_v30 = vmul.f32 1.442695, %v4061_v2  ;;  %6980 = vpow2.f32 %v4118_v4  ;;  %v4128_v37 = vmul.f32 1.442695, %v4065_v57 }
 0x6f8   : > { %v5904_v36 = vpop.f32.mrf.mxu1 }
 0x6f9   : > { %v4126_v61 = vmul.f32 1.442695, %v4064_v51  ;;  %6982 = vpow2.f32 %v4120_v30 }
 0x6fa   : > { %v6971_v1 = vpop.eup %6970 }
 0x6fb   : > { %4164 = vadd.xlane.f32.xlu0 %v4163_v24  ;;  %v10357_v59 = vmul.f32 %v6971_v1, %v10118_v10  ;;  %v10363_v26 = vmul.f32 %v6971_v1, %v10115_v15  ;;  %v10370_v39 = vpop.eup %6972  ;;  %v4166_v10 = vadd.f32 %v10350_v5, %v10344_v45  ;;  %6984 = vpow2.f32 %v4126_v61 }
 0x6fc   : > { %11782 = vst [vmem:[#allocation95_spill] sm:$0xff] %v10370_v39  ;;  %v10378_v24 = vpop.eup %6974  ;;  %6986 = vpow2.f32 %v4128_v37 }
 0x6fd   : > { %v4172_v2 = vadd.f32 %v10378_v24, %v10370_v39  ;;  %v10382_v29 = vpop.eup %6976 }
 0x6fe   : > { %v5906_v50 = vpop.f32.mrf.mxu1  ;;  %v10384_v53 = vpop.eup %6978 }
 0x6ff   : > { %4167 = vadd.xlane.f32.xlu0 %v4166_v10  ;;  %v4157_v4 = vadd.f32 %v10384_v53, %v10382_v29 }
 0x700   : > { %v5907_v63 = vpop.f32.mrf.mxu1 }
 0x701   : > { %v5908_v62 = vadd.f32 %v5907_v63, %v5906_v50 }
 0x702   : > { %v5909_v1 = vpop.f32.mrf.mxu1 }
 0x703   : > { %4173 = vadd.xlane.f32.xlu0 %v4172_v2 }
 0x704   : > { %v5910_v15 = vpop.f32.mrf.mxu1  ;;  %v10386_v18 = vpop.eup %6980 }
 0x705   : > { %v5911_v60 = vadd.f32 %v5910_v15, %v5909_v1 }
 0x706   : > { %v10390_v30 = vpop.eup %6982 }
 0x707   : > { %v4169_v37 = vadd.f32 %v10390_v30, %v10386_v18  ;;  %v6406_v21 = vpack.i.bf16 %v5911_v60, %v5908_v62 }
 0x708   : > { %v10394_v61 = vpop.eup %6984 }
 0x709   : > { %v10398_v2 = vpop.eup %6986 }
 0x70a   : > { %v5912_v25 = vpop.f32.mrf.mxu1  ;;  %v4175_v42 = vadd.f32 %v10398_v2, %v10394_v61 }
 0x70c   : > { %v5913_v51 = vpop.f32.mrf.mxu1 }
 0x70e   : > { %v10392_v57 = vpop.xlane.xlu0 %4146  ;;  %4158 = vadd.xlane.f32.xlu1 %v4157_v4  ;;  %v5915_v10 = vpop.f32.mrf.mxu1  ;;  %v5896_v4 = vadd.f32 %v10310_v49, %v10306_v3  ;;  %v5905_v3 = vadd.f32 %v5904_v36, %v10348_v56 }
 0x710   : > { %v5916_v32 = vpop.f32.mrf.mxu1  ;;  %v6396_v20 = vpack.i.bf16 %v5899_v12, %v5896_v4  ;;  %v5902_v12 = vadd.f32 %v10336_v46, %v10330_v48 }
 0x711   : > { %v5917_v15 = vadd.f32 %v5916_v32, %v5915_v10 }
 0x712   : > { %v4249_v16 = vpop.permute.xlu0 %4248  ;;  %4170 = vadd.xlane.f32.xlu1 %v4169_v37  ;;  %v5918_v13 = vpop.f32.mrf.mxu1 }
 0x713   : > { %6079 = vmatpush3.bf16.msra.mxu1 %v4249_v16 }
 0x714   : > { %v5919_v28 = vpop.f32.mrf.mxu1 }
 0x715   : > { %v5920_v16 = vadd.f32 %v5919_v28, %v5918_v13 }
 0x716   : > { %4176 = vadd.xlane.f32.xlu1 %v4175_v42  ;;  %v5921_v11 = vpop.f32.mrf.mxu1  ;;  %v4261_v1 = vpop.permute.xlu0 %4260 }
 0x718   : > { %v5922_v37 = vpop.f32.mrf.mxu1 }
 0x719   : > { %6397 = vrot.lane.b32.xlu0 %v6396_v20, %s7173_s1  ;;  %v5923_v34 = vadd.f32 %v5922_v37, %v5921_v11  ;;  %v6401_v20 = vpack.i.bf16 %v5905_v3, %v5902_v12 }
 0x71a   : > { %v5924_v6 = vpop.f32.mrf.mxu1 }
 0x71b   : > { %v6416_v40 = vpack.i.bf16 %v5923_v34, %v5920_v16  ;;  %v5914_v34 = vadd.f32 %v5913_v51, %v5912_v25 }
 0x71c   : > { %v5925_v44 = vpop.f32.mrf.mxu1 }
 0x71d   : > { %6407 = vrot.lane.b32.xlu0 %v6406_v21, %s7173_s1  ;;  %v6411_v13 = vpack.i.bf16 %v5917_v15, %v5914_v34  ;;  %v5926_v63 = vadd.f32 %v5925_v44, %v5924_v6 }
 0x71e   : > { %v5927_v39 = vpop.f32.mrf.mxu1 }
 0x720   : > { %v5928_v42 = vpop.f32.mrf.mxu1 }
 0x721   : > { %6417 = vrot.lane.b32.xlu0 %v6416_v40, %s7173_s1  ;;  %v5929_v50 = vadd.f32 %v5928_v42, %v5927_v39 }
 0x722   : > { %v5930_v49 = vpop.f32.mrf.mxu1 }
 0x723   : > { %v6421_v48 = vpack.i.bf16 %v5929_v50, %v5926_v63 }
 0x724   : > { %v5931_v60 = vpop.f32.mrf.mxu1 }
 0x725   : > { %v4144_v11 = vpop.xlane.xlu1 %4143  ;;  %v10412_v62 = vadd.f32 %v5931_v60, %v5930_v49 }
 0x726   : > { %v5933_v28 = vpop.f32.mrf.mxu1  ;;  %6988 = vrcp.f32 %v4144_v11 }
 0x727   : > { %6402 = vrot.lane.b32.xlu1 %v6401_v20, %s7173_s1  ;;  %6990 = vrcp.f32 %v10392_v57 }
 0x728   : > { %v5934_v56 = vpop.f32.mrf.mxu1 }
 0x729   : > { %v4263_v36 = vpop.permute.xlu1 %4262  ;;  %v10415_v40 = vadd.f32 %v5934_v56, %v5933_v28 }
 0x72a   : > { %6080 = vmatprep.subr.bf16.mxu1 %v4263_v36 }
 0x72b   : > { %6412 = vrot.lane.b32.xlu1 %v6411_v13, %s7173_s1  ;;  %v6471_v32 = vpack.i.bf16 %v10415_v40, %v10412_v62 }
 0x72d   : > { %v4247_v46 = vpop.permute.xlu1 %4246 }
 0x72e   : > { %6081 = vmatpush3.bf16.msra.mxu1 %v4247_v46 }
 0x72f   : > { %6422 = vrot.lane.b32.xlu1 %v6421_v48, %s7173_s1  ;;  %6082 = vmatprep.subr.bf16.mxu1 %v4261_v1 }
 0x733   : > { %v6989_v57 = vpop.eup %6988 }
 0x747   : > { %v4153_v25 = vpop.xlane.xlu0 %4152 }
 0x74b   : > { %v4245_v39 = vpop.permute.xlu0 %4244 }
 0x74c   : > { %6083 = vmatpush3.bf16.msra.mxu1 %v4245_v39  ;;  %v11783_v39 = vpack.c.bf16 %v10263_v27, %v10260_v31  ;;  %v11785_v31 = vpack.c.bf16 %v10366_v19, %v10363_v26 }
 0x74e   : > { %v5936_v51 = vpop.f32.mrf.mxu1 }
 0x750   : > { %v5937_v10 = vpop.f32.mrf.mxu1 }
 0x751   : > { %v10421_v4 = vadd.f32 %v5937_v10, %v5936_v51  ;;  %v11784_v10 = vpack.c.bf16 %v10360_v7, %v10357_v59 }
 0x752   : > { %v5939_v44 = vpop.f32.mrf.mxu1 }
 0x754   : > { %v5940_v37 = vpop.f32.mrf.mxu1 }
 0x755   : > { %v10423_v21 = vadd.f32 %v5940_v37, %v5939_v44  ;;  %v6991_v44 = vpop.eup %6990 }
 0x756   : > { %v5990_v16 = vpop.f32.mrf.mxu1 }
 0x757   : > { %v6481_v6 = vpack.i.bf16 %v10423_v21, %v10421_v4 }
 0x758   : > { %v5991_v3 = vpop.f32.mrf.mxu1 }
 0x759   : > { %v5992_v49 = vadd.f32 %v5991_v3, %v5990_v16 }
 0x75a   : > { %v5993_v42 = vpop.f32.mrf.mxu1 }
 0x75c   : > { %v5994_v12 = vpop.f32.mrf.mxu1 }
 0x75d   : > { %v5995_v20 = vadd.f32 %v5994_v12, %v5993_v42  ;;  %v4205_v12 = vmul.f32 %v6991_v44, %v10144_v8 }
 0x75e   : > { %v4150_v15 = vpop.xlane.xlu1 %4149  ;;  %v5996_v34 = vpop.f32.mrf.mxu1 }
 0x75f   : > { %v6426_v60 = vpack.i.bf16 %v5995_v20, %v5992_v49  ;;  %6992 = vrcp.f32 %v4150_v15 }
 0x760   : > { %v5997_v28 = vpop.f32.mrf.mxu1  ;;  %6994 = vrcp.f32 %v4153_v25  ;;  %v4203_v25 = vmul.f32 %v6989_v57, %v10176_v54  ;;  %v4202_v54 = vmul.f32 %v6989_v57, %v10172_v0 }
 0x761   : > { %6427 = vrot.lane.b32.xlu1 %v6426_v60, %s7174_s20  ;;  %v5998_v56 = vadd.f32 %v5997_v28, %v5996_v34 }
 0x762   : > { %v4259_v13 = vpop.permute.xlu1 %4258  ;;  %v5999_v50 = vpop.f32.mrf.mxu1  ;;  %v4231_v15 = vpack.c.bf16 %v4205_v12, %v4203_v25 }
 0x763   : > { %6084 = vmatprep.subr.bf16.mxu1 %v4259_v13  ;;  %v4204_v13 = vmul.f32 %v6991_v44, %v10140_v33 }
 0x764   : > { %v6000_v36 = vpop.f32.mrf.mxu1 }
 0x765   : > { %v6001_v63 = vadd.f32 %v6000_v36, %v5999_v50 }
 0x766   : > { %v4243_v48 = vpop.permute.xlu1 %4242  ;;  %v6002_v11 = vpop.f32.mrf.mxu1 }
 0x767   : > { %6085 = vmatpush3.bf16.msra.mxu1 %v4243_v48  ;;  %v6431_v46 = vpack.i.bf16 %v6001_v63, %v5998_v56  ;;  %v4230_v63 = vpack.c.bf16 %v4204_v13, %v4202_v54 }
 0x768   : > { %v6003_v1 = vpop.f32.mrf.mxu1 }
 0x769   : > { %6432 = vrot.lane.b32.xlu1 %v6431_v46, %s7174_s20  ;;  %v6004_v16 = vadd.f32 %v6003_v1, %v6002_v11 }
 0x76a   : > { %4323 = vmatmul.mubr.bf16.vlgmr.msra.gmra.mxu1 %v11783_v39  ;;  %v6005_v51 = vpop.f32.mrf.mxu1 }
 0x76b   : > { %4330 = vmatprep.mubr.bf16.mxu1 %v11784_v10 }
 0x76c   : > { %v6006_v37 = vpop.f32.mrf.mxu1  ;;  %v6993_v60 = vpop.eup %6992 }
 0x76d   : > { %v6007_v3 = vadd.f32 %v6006_v37, %v6005_v51  ;;  %v6995_v59 = vpop.eup %6994  ;;  %v4207_v34 = vmul.f32 %v6993_v60, %v10276_v14  ;;  %v4206_v14 = vmul.f32 %v6993_v60, %v10274_v52 }
 0x76e   : > { %v6008_v42 = vpop.f32.mrf.mxu1  ;;  %v4209_v36 = vmul.f32 %v6995_v59, %v10244_v9  ;;  %v4208_v33 = vmul.f32 %v6995_v59, %v10238_v23 }
 0x76f   : > { %v6436_v49 = vpack.i.bf16 %v6007_v3, %v6004_v16 }
 0x770   : > { %v6009_v20 = vpop.f32.mrf.mxu1  ;;  %v4233_v19 = vpack.c.bf16 %v4209_v36, %v4207_v34  ;;  %v4232_v9 = vpack.c.bf16 %v4208_v33, %v4206_v14 }
 0x771   : > { %6437 = vrot.lane.b32.xlu0 %v6436_v49, %s7174_s20  ;;  %v6010_v28 = vadd.f32 %v6009_v20, %v6008_v42 }
 0x772   : > { %4331 = vmatmul.mubr.bf16.gmra.mxu1 %v11785_v31  ;;  %v6011_v27 = vpop.f32.mrf.mxu1 }
 0x773   : > { %4338 = vmatprep.mubr.bf16.mxu1 %v4231_v15 }
 0x774   : > { %v6012_v7 = vpop.f32.mrf.mxu1 }
 0x775   : > { %v6013_v8 = vadd.f32 %v6012_v7, %v6011_v27 }
 0x776   : > { %v10445_v50 = vpop.f32.mrf.mxu1 }
 0x777   : > { %v6441_v56 = vpack.i.bf16 %v6013_v8, %v6010_v28 }
 0x778   : > { %v10448_v26 = vpop.f32.mrf.mxu1 }
 0x779   : > { %6442 = vrot.lane.b32.xlu1 %v6441_v56, %s7174_s20 }
 0x77a   : > { %4339 = vmatmul.mubr.bf16.gmra.mxu1 %v4230_v63  ;;  %v10451_v0 = vpop.f32.mrf.mxu1 }
 0x77b   : > { %4346 = vmatprep.mubr.bf16.mxu1 %v4233_v19 }
 0x77c   : > { %v10454_v48 = vpop.f32.mrf.mxu1  ;;  %v4156_v39 = vpop.xlane.xlu0 %4155 }
 0x77d   : > { %6996 = vrcp.f32 %v4156_v39 }
 0x77e   : > { %v10457_v11 = vpop.f32.mrf.mxu1 }
 0x780   : > { %v10459_v46 = vpop.f32.mrf.mxu1  ;;  %v4162_v37 = vpop.xlane.xlu0 %4161 }
 0x782   : > { %4347 = vmatmul.mubr.bf16.gmra.mxu1 %v4232_v9  ;;  %v10461_v1 = vpop.f32.mrf.mxu1 }
 0x784   : > { %v10463_v57 = vpop.f32.mrf.mxu1  ;;  %v4165_v49 = vpop.xlane.xlu0 %4164 }
 0x785   : > { %6998 = vrcp.f32 %v4165_v49 }
 0x786   : > { %v6026_v51 = vpop.f32.mrf.mxu1  ;;  %7000 = vrcp.f32 %v4162_v37 }
 0x788   : > { %v6027_v10 = vpop.f32.mrf.mxu1  ;;  %v4168_v54 = vpop.xlane.xlu0 %4167 }
 0x789   : > { %v10465_v44 = vadd.f32 %v6027_v10, %v6026_v51 }
 0x78a   : > { %v6029_v52 = vpop.f32.mrf.mxu1  ;;  %v6997_v34 = vpop.eup %6996 }
 0x78b   : > { %v4211_v63 = vmul.f32 %v6997_v34, %v10318_v41  ;;  %v4210_v19 = vmul.f32 %v6997_v34, %v10314_v58  ;;  %v5833_v58 = vadd.f32 %v10227_v38, %v10223_v55 }
 0x78c   : > { %v6030_v25 = vpop.f32.mrf.mxu1  ;;  %v4174_v56 = vpop.xlane.xlu0 %4173 }
 0x78d   : > { %v10467_v16 = vadd.f32 %v6030_v25, %v6029_v52 }
 0x78e   : > { %v6032_v23 = vpop.f32.mrf.mxu1 }
 0x78f   : > { %v6491_v3 = vpack.i.bf16 %v10467_v16, %v10465_v44 }
 0x790   : > { %v6033_v42 = vpop.f32.mrf.mxu1 }
 0x791   : > { %v10471_v12 = vadd.f32 %v6033_v42, %v6032_v23 }
 0x792   : > { %v6035_v20 = vpop.f32.mrf.mxu1  ;;  %v6999_v28 = vpop.eup %6998 }
 0x793   : > { %v7001_v13 = vpop.eup %7000  ;;  %v4217_v9 = vmul.f32 %v6999_v28, %v10340_v43  ;;  %v4216_v43 = vmul.f32 %v6999_v28, %v10334_v47 }
 0x794   : > { %v6036_v15 = vpop.f32.mrf.mxu1  ;;  %v4215_v52 = vmul.f32 %v7001_v13, %v10326_v17 }
 0x795   : > { %v10473_v60 = vadd.f32 %v6036_v15, %v6035_v20  ;;  %v4214_v20 = vmul.f32 %v7001_v13, %v10320_v35  ;;  %v11786_v35 = vld [vmem:[#allocation95_spill] sm:$0xff] }
 0x796   : > { %v4237_v37 = vpack.c.bf16 %v4217_v9, %v4215_v52 }
 0x797   : > { %v4159_v31 = vpop.xlane.xlu1 %4158  ;;  %v6501_v27 = vpack.i.bf16 %v10473_v60, %v10471_v12  ;;  %v4236_v55 = vpack.c.bf16 %v4216_v43, %v4214_v20 }
 0x798   : > { %7002 = vrcp.f32 %v4159_v31 }
 0x79b   : > { %v4171_v59 = vpop.xlane.xlu1 %4170 }
 0x79c   : > { %7004 = vrcp.f32 %v4171_v59 }
 0x79d   : > { %7006 = vrcp.f32 %v4168_v54 }
 0x79f   : > { %v4177_v7 = vpop.xlane.xlu1 %4176 }
 0x7a0   : > { %7008 = vrcp.f32 %v4177_v7 }
 0x7a1   : > { %7010 = vrcp.f32 %v4174_v56 }
 0x7a3   : > { %v10477_v8 = vpop.permute.xlu1 %6402 }
 0x7a5   : > { %v7003_v36 = vpop.eup %7002 }
 0x7a6   : > { %v4213_v14 = vmul.f32 %v7003_v36, %v10384_v53  ;;  %v4212_v33 = vmul.f32 %v7003_v36, %v10382_v29 }
 0x7a7   : > { %v10484_v39 = vpop.permute.xlu1 %6412 }
 0x7a8   : > { %v4235_v51 = vpack.c.bf16 %v4213_v14, %v4211_v63  ;;  %v4234_v10 = vpack.c.bf16 %v4212_v33, %v4210_v19  ;;  %v6019_v14 = vadd.f32 %v10454_v48, %v10451_v0  ;;  %v6025_v0 = vadd.f32 %v10463_v57, %v10461_v1 }
 0x7a9   : > { %v7005_v25 = vpop.eup %7004 }
 0x7aa   : > { %4354 = vmatprep.mubr.bf16.mxu1 %v4235_v51  ;;  %v7007_v29 = vpop.eup %7006  ;;  %v4221_v49 = vmul.f32 %v7005_v25, %v10390_v30  ;;  %v4220_v47 = vmul.f32 %v7005_v25, %v10386_v18  ;;  %v6520_v18 = vld [vmem:[%s11027_s9 + $0x8] sm:$0xff]   ;;  %v6016_v51 = vadd.f32 %v10448_v26, %v10445_v50  ;;  %v6022_v50 = vadd.f32 %v10459_v46, %v10457_v11 }
 0x7ab   : > { %v6423_v41 = vpop.permute.xlu1 %6422  ;;  %4355 = vmatmul.mubr.bf16.gmra.mxu1 %v4234_v10  ;;  %v4219_v15 = vmul.f32 %v7007_v29, %v10350_v5  ;;  %v4218_v7 = vmul.f32 %v7007_v29, %v10344_v45  ;;  %6226 = vmatprep.subr.bf16.mxu0 %v6520_v18 }
 0x7ac   : > { %v6425_v53 = vunpack.i.h.bf16 %v6423_v41  ;;  %v6424_v23 = vunpack.i.l.bf16 %v6423_v41  ;;  %4362 = vmatprep.mubr.bf16.mxu1 %v4237_v37  ;;  %6227 = vmatpush3.bf16.msra.mxu0 %v6520_v18  ;;  %v6451_v52 = vpack.i.bf16 %v6019_v14, %v6016_v51 }
 0x7ad   : > { %v4239_v38 = vpack.c.bf16 %v4221_v49, %v4219_v15  ;;  %v7009_v31 = vpop.eup %7008  ;;  %v4238_v34 = vpack.c.bf16 %v4220_v47, %v4218_v7 }
 0x7ae   : > { %v10491_v42 = vsel %vm1874_vm1, %v5833_v58, %v6425_v53  ;;  %v10495_v17 = vsel %vm1874_vm1, %v10220_v22, %v6424_v23  ;;  %v7011_v59 = vpop.eup %7010  ;;  %v4225_v54 = vmul.f32 %v7009_v31, %v10398_v2  ;;  %v4224_v5 = vmul.f32 %v7009_v31, %v10394_v61  ;;  %v6521_v61 = vld [vmem:[%s11027_s9] sm:$0xff]  }
 0x7af   : > { %v4223_v22 = vmul.f32 %v7011_v59, %v10378_v24  ;;  %v4222_v28 = vmul.f32 %v7011_v59, %v11786_v35  ;;  %6228 = vmatprep.subr.bf16.mxu0 %v6521_v61  ;;  %v6461_v23 = vpack.i.bf16 %v6025_v0, %v6022_v50  ;;  %v11789_v0 = vld [vmem:[#allocation56_spill] sm:$0xff] }
 0x7b0   : > { %6229 = vmatpush3.bf16.msra.mxu0 %v6521_v61 }
 0x7b1   : > { %v4241_v30 = vpack.c.bf16 %v4225_v54, %v4223_v22  ;;  %v4240_v13 = vpack.c.bf16 %v4224_v5, %v4222_v28 }
 0x7b3   : > { %4363 = vmatmul.mubr.bf16.gmra.mxu1 %v4236_v55 }
 0x7b4   : > { %4370 = vmatprep.mubr.bf16.mxu1 %v4239_v38 }
 0x7bb   : > { %4371 = vmatmul.mubr.bf16.gmra.mxu1 %v4238_v34 }
 0x7bc   : > { %4378 = vmatprep.mubr.bf16.mxu1 %v4241_v30 }
 0x7c3   : > { %4379 = vmatmul.mubr.bf16.gmra.mxu1 %v4240_v13 }
 0x82a   : > { %v6086_v36 = vpop.f32.mrf.mxu1 }
 0x82c   : > { %v6087_v56 = vpop.f32.mrf.mxu1 }
 0x82d   : > { %v6088_v24 = vadd.f32 %v6087_v56, %v6086_v36 }
 0x82e   : > { %v6089_v63 = vpop.f32.mrf.mxu1 }
 0x830   : > { %v6090_v45 = vpop.f32.mrf.mxu1 }
 0x831   : > { %v6091_v2 = vadd.f32 %v6090_v45, %v6089_v63 }
 0x832   : > { %v6092_v19 = vpop.f32.mrf.mxu1 }
 0x833   : > { %v6446_v33 = vpack.i.bf16 %v6091_v2, %v6088_v24 }
 0x834   : > { %v6093_v9 = vpop.f32.mrf.mxu1 }
 0x835   : > { %6447 = vrot.lane.b32.xlu0 %v6446_v33, %s7175_s18  ;;  %v6094_v25 = vadd.f32 %v6093_v9, %v6092_v19  ;;  %v6398_v19 = vpop.permute.xlu0 %6397  ;;  %v6428_v33 = vpop.permute.xlu1 %6427 }
 0x836   : > { %v6095_v10 = vpop.f32.mrf.mxu1  ;;  %v6400_v12 = vunpack.i.h.bf16 %v6398_v19  ;;  %v6399_v60 = vunpack.i.l.bf16 %v6398_v19  ;;  %v6429_v51 = vunpack.i.l.bf16 %v6428_v33 }
 0x838   : > { %v6096_v37 = vpop.f32.mrf.mxu1 }
 0x839   : > { %v6097_v41 = vadd.f32 %v6096_v37, %v6095_v10  ;;  %6452 = vrot.lane.b32.xlu0 %v6451_v52, %s7174_s20  ;;  %v6408_v61 = vpop.permute.xlu0 %6407  ;;  %v11787_v10 = vld [vmem:[#allocation53_spill] sm:$0xff]  ;;  %v11788_v52 = vld [vmem:[#allocation36_spill] sm:$0xff] }
 0x83a   : > { %v6098_v58 = vpop.f32.mrf.mxu1  ;;  %v5803_v37 = vadd.f32 %v11788_v52, %v11787_v10 }
 0x83b   : > { %v6456_v48 = vpack.i.bf16 %v6097_v41, %v6094_v25  ;;  %v6433_v25 = vpop.permute.xlu1 %6432 }
 0x83c   : > { %v6099_v53 = vpop.f32.mrf.mxu1 }
 0x83d   : > { %6457 = vrot.lane.b32.xlu1 %v6456_v48, %s7175_s18  ;;  %v6100_v43 = vadd.f32 %v6099_v53, %v6098_v58  ;;  %v10546_v14 = vpop.permute.xlu0 %6417  ;;  %v4580_v58 = vsel %vm1874_vm1, %v5803_v37, %v6400_v12  ;;  %v4579_v48 = vsel %vm1874_vm1, %v11789_v0, %v6399_v60 }
 0x83e   : > { %v6101_v26 = vpop.f32.mrf.mxu1 }
 0x840   : > { %v6102_v29 = vpop.f32.mrf.mxu1 }
 0x841   : > { %v6103_v49 = vadd.f32 %v6102_v29, %v6101_v26  ;;  %6462 = vrot.lane.b32.xlu1 %v6461_v23, %s7174_s20  ;;  %v6438_v9 = vpop.permute.xlu0 %6437  ;;  %v4596_v26 = vsel %vm4595_vm2, %v4579_v48, %v6429_v51  ;;  %v11797_v51 = vld [vmem:[#allocation92_spill] sm:$0xff] }
 0x842   : > { %v6104_v20 = vpop.f32.mrf.mxu1 }
 0x843   : > { %v6466_v15 = vpack.i.bf16 %v6103_v49, %v6100_v43  ;;  %v6443_v49 = vpop.permute.xlu1 %6442 }
 0x844   : > { %v6105_v55 = vpop.f32.mrf.mxu1  ;;  %v6445_v12 = vunpack.i.h.bf16 %v6443_v49  ;;  %v6444_v60 = vunpack.i.l.bf16 %v6443_v49 }
 0x845   : > { %6467 = vrot.lane.b32.xlu0 %v6466_v15, %s7175_s18  ;;  %v6106_v38 = vadd.f32 %v6105_v55, %v6104_v20  ;;  %v6405_v15 = vunpack.i.h.bf16 %v10477_v8  ;;  %v6404_v55 = vunpack.i.l.bf16 %v10477_v8 }
 0x846   : > { %v6107_v1 = vpop.f32.mrf.mxu1 }
 0x848   : > { %v6108_v57 = vpop.f32.mrf.mxu1 }
 0x849   : > { %v6109_v31 = vadd.f32 %v6108_v57, %v6107_v1  ;;  %6472 = vrot.lane.b32.xlu0 %v6471_v32, %s7173_s1  ;;  %v6435_v1 = vunpack.i.h.bf16 %v6433_v25  ;;  %v6434_v57 = vunpack.i.l.bf16 %v6433_v25  ;;  %v11798_v25 = vld [vmem:[#allocation93_spill] sm:$0xff] }
 0x84b   : > { %v6476_v11 = vpack.i.bf16 %v6109_v31, %v6106_v38  ;;  %v11790_v38 = vld [vmem:[#allocation35_spill] sm:$0xff]  ;;  %v11791_v31 = vld [vmem:[#allocation54_spill] sm:$0xff] }
 0x84d   : > { %6477 = vrot.lane.b32.xlu1 %v6476_v11, %s7175_s18  ;;  %v5809_v11 = vadd.f32 %v11791_v31, %v11790_v38  ;;  %v11801_v31 = vld [vmem:[#allocation62_spill] sm:$0xff] }
 0x851   : > { %6482 = vrot.lane.b32.xlu1 %v6481_v6, %s7173_s1 }
 0x86b   : > { %v6110_v46 = vpop.f32.mrf.mxu1 }
 0x86d   : > { %v6111_v59 = vpop.f32.mrf.mxu1 }
 0x86e   : > { %v6112_v7 = vadd.f32 %v6111_v59, %v6110_v46  ;;  %v4582_v59 = vsel %vm1874_vm1, %v5809_v11, %v6405_v15  ;;  %v11799_v15 = vld [vmem:[#allocation57_spill] sm:$0xff] }
 0x86f   : > { %v6113_v47 = vpop.f32.mrf.mxu1 }
 0x871   : > { %v6114_v54 = vpop.f32.mrf.mxu1 }
 0x872   : > { %v6115_v22 = vadd.f32 %v6114_v54, %v6113_v47  ;;  %v11792_v47 = vld [vmem:[#allocation46_spill] sm:$0xff] }
 0x873   : > { %v6116_v34 = vpop.f32.mrf.mxu1  ;;  %v4581_v54 = vsel %vm1874_vm1, %v11792_v47, %v6404_v55  ;;  %v11800_v55 = vld [vmem:[#allocation89_spill] sm:$0xff] }
 0x874   : > { %v6486_v30 = vpack.i.bf16 %v6115_v22, %v6112_v7 }
 0x875   : > { %v6117_v5 = vpop.f32.mrf.mxu1 }
 0x876   : > { %6487 = vrot.lane.b32.xlu0 %v6486_v30, %s7175_s18  ;;  %v6118_v32 = vadd.f32 %v6117_v5, %v6116_v34  ;;  %v4599_v34 = vsel %vm4595_vm2, %v4582_v59, %v6435_v1  ;;  %v4598_v30 = vsel %vm4595_vm2, %v4581_v54, %v6434_v57  ;;  %v5827_v1 = vadd.f32 %v11800_v55, %v11799_v15  ;;  %v10634_v15 = vld [vmem:[%s11028_s10] ss:$0 sm:$0xff] }
 0x877   : > { %v6119_v62 = vpop.f32.mrf.mxu1 }
 0x879   : > { %v6120_v40 = vpop.f32.mrf.mxu1 }
 0x87a   : > { %v6121_v35 = vadd.f32 %v6120_v40, %v6119_v62  ;;  %6492 = vrot.lane.b32.xlu0 %v6491_v3, %s7174_s20 }
 0x87b   : > { %v6122_v4 = vpop.f32.mrf.mxu1 }
 0x87c   : > { %v6496_v21 = vpack.i.bf16 %v6121_v35, %v6118_v32  ;;  %v6410_v32 = vunpack.i.h.bf16 %v6408_v61  ;;  %v6409_v35 = vunpack.i.l.bf16 %v6408_v61 }
 0x87d   : > { %v6123_v6 = vpop.f32.mrf.mxu1 }
 0x87e   : > { %6497 = vrot.lane.b32.xlu1 %v6496_v21, %s7175_s18  ;;  %v6124_v36 = vadd.f32 %v6123_v6, %v6122_v4  ;;  %v6440_v4 = vunpack.i.h.bf16 %v6438_v9  ;;  %v6439_v21 = vunpack.i.l.bf16 %v6438_v9  ;;  %v11793_v6 = vld [vmem:[#allocation83_spill] sm:$0xff]  ;;  %v6414_v9 = vunpack.i.l.bf16 %v10484_v39 }
 0x87f   : > { %v6125_v28 = vpop.f32.mrf.mxu1 }
 0x881   : > { %v6126_v13 = vpop.f32.mrf.mxu1 }
 0x882   : > { %v6127_v56 = vadd.f32 %v6126_v13, %v6125_v28  ;;  %6502 = vrot.lane.b32.xlu1 %v6501_v27, %s7174_s20  ;;  %v6430_v27 = vunpack.i.h.bf16 %v6428_v33  ;;  %v11794_v28 = vld [vmem:[#allocation98_spill] sm:$0xff]  ;;  %v6415_v33 = vunpack.i.h.bf16 %v10484_v39  ;;  %s11808_s20 = sshll.u32 %s7451_s23, 3 }
 0x883   : > { %v6128_v63 = vpop.f32.mrf.mxu1  ;;  %v5815_v13 = vadd.f32 %v11794_v28, %v11793_v6  ;;  %s10953_s25 = scalar_lea.vmem %s11035_s17, %s11808_s20 }
 0x884   : > { %v6506_v18 = vpack.i.bf16 %v6127_v56, %v6124_v36  ;;  %v4597_v23 = vsel %vm4595_vm2, %v4580_v58, %v6430_v27  ;;  %v11796_v27 = vld [vmem:[#allocation75_spill] sm:$0xff] }
 0x885   : > { %v6129_v45 = vpop.f32.mrf.mxu1  ;;  %v4584_v56 = vsel %vm1874_vm1, %v5815_v13, %v6410_v32  ;;  %v5821_v10 = vadd.f32 %v11797_v51, %v11796_v27 }
 0x886   : > { %6507 = vrot.lane.b32.xlu0 %v6506_v18, %s7175_s18  ;;  %v6130_v3 = vadd.f32 %v6129_v45, %v6128_v63  ;;  %v11795_v63 = vld [vmem:[#allocation85_spill] sm:$0xff] }
 0x887   : > { %v6131_v44 = vpop.f32.mrf.mxu1  ;;  %v4583_v18 = vsel %vm1874_vm1, %v11795_v63, %v6409_v35  ;;  %v4586_v37 = vsel %vm1874_vm1, %v5821_v10, %v6415_v33 }
 0x888   : > { %v4603_v48 = vsel %vm4595_vm2, %v4586_v37, %v6445_v12  ;;  %v11805_v37 = vld [vmem:[#allocation88_spill] sm:$0xff] }
 0x889   : > { %v6132_v16 = vpop.f32.mrf.mxu1 }
 0x88a   : > { %v6133_v24 = vadd.f32 %v6132_v16, %v6131_v44  ;;  %v4600_v16 = vsel %vm4595_vm2, %v4583_v18, %v6439_v21  ;;  %v11802_v18 = vld [vmem:[#allocation58_spill] sm:$0xff] }
 0x88c   : > { %v6511_v2 = vpack.i.bf16 %v6133_v24, %v6130_v3  ;;  %v4601_v3 = vsel %vm4595_vm2, %v4584_v56, %v6440_v4 }
 0x88e   : > { %6512 = vrot.lane.b32.xlu1 %v6511_v2, %s7175_s18 }
 0x8a7   : > { %v6448_v41 = vpop.permute.xlu0 %6447 }
 0x8a8   : > { %v6450_v53 = vunpack.i.h.bf16 %v6448_v41  ;;  %v6449_v50 = vunpack.i.l.bf16 %v6448_v41  ;;  %v4585_v41 = vsel %vm1874_vm1, %v11798_v25, %v6414_v9  ;;  %v11806_v25 = vld [vmem:[#allocation102_spill] sm:$0xff] }
 0x8aa   : > { %v4613_v29 = vsel %vm4612_vm3, %v4596_v26, %v6449_v50  ;;  %v4614_v43 = vsel %vm4612_vm3, %v4597_v23, %v6450_v53  ;;  %v4602_v53 = vsel %vm4595_vm2, %v4585_v41, %v6444_v60  ;;  %v5845_v41 = vadd.f32 %v11806_v25, %v11805_v37 }
 0x8ab   : > { %v4629_v20 = vpack.c.bf16 %v4614_v43, %v4613_v29  ;;  %v6453_v62 = vpop.permute.xlu0 %6452  ;;  %v6420_v29 = vunpack.i.h.bf16 %v10546_v14  ;;  %v6419_v43 = vunpack.i.l.bf16 %v10546_v14 }
 0x8ac   : > { %v6455_v49 = vunpack.i.h.bf16 %v6453_v62 }
 0x8ad   : > { %6230 = vmatprep.mubr.msk.bf16.mxu0 %vm684_vm0, %v4629_v20  ;;  %v6454_v20 = vunpack.i.l.bf16 %v6453_v62  ;;  %v4588_v38 = vsel %vm1874_vm1, %v5827_v1, %v6420_v29  ;;  %v4587_v11 = vsel %vm1874_vm1, %v11801_v31, %v6419_v43  ;;  %v7110_v31 = vld [vmem:[%s7475_s19] sm:$0xff] }
 0x8ae   : > { %v4605_v54 = vsel %vm4595_vm2, %v4588_v38, %v6455_v49 }
 0x8af   : > { %v6458_v46 = vpop.permute.xlu1 %6457  ;;  %v4604_v47 = vsel %vm4595_vm2, %v4587_v11, %v6454_v20 }
 0x8b0   : > { %v6460_v7 = vunpack.i.h.bf16 %v6458_v46  ;;  %v6459_v22 = vunpack.i.l.bf16 %v6458_v46 }
 0x8b2   : > { %v4616_v8 = vsel %vm4612_vm3, %v4599_v34, %v6460_v7  ;;  %v4615_v5 = vsel %vm4612_vm3, %v4598_v30, %v6459_v22 }
 0x8b3   : > { %v4630_v40 = vpack.c.bf16 %v4616_v8, %v4615_v5  ;;  %v6463_v19 = vpop.permute.xlu1 %6462 }
 0x8b4   : > { %v6465_v30 = vunpack.i.h.bf16 %v6463_v19  ;;  %v6464_v8 = vunpack.i.l.bf16 %v6463_v19 }
 0x8b5   : > { %6231 = vmatmul.mubr.msk.bf16.vlgmr.msra.gmra.mxu0 %vm684_vm0, %v4630_v40 }
 0x8b6   : > { %v4607_v32 = vsel %vm4595_vm2, %v10491_v42, %v6465_v30  ;;  %v4606_v35 = vsel %vm4595_vm2, %v10495_v17, %v6464_v8  ;;  %v7113_v30 = vld [vmem:[%s7475_s19 + $0x18] sm:$0xff] }
 0x8b7   : > { %v6468_v36 = vpop.permute.xlu0 %6467 }
 0x8b8   : > { %v6470_v45 = vunpack.i.h.bf16 %v6468_v36  ;;  %v6469_v44 = vunpack.i.l.bf16 %v6468_v36 }
 0x8ba   : > { %v4617_v24 = vsel %vm4612_vm3, %v4600_v16, %v6469_v44  ;;  %v4618_v2 = vsel %vm4612_vm3, %v4601_v3, %v6470_v45  ;;  %v11803_v45 = vld [vmem:[#allocation103_spill] sm:$0xff] }
 0x8bb   : > { %v4631_v61 = vpack.c.bf16 %v4618_v2, %v4617_v24  ;;  %v6473_v23 = vpop.permute.xlu0 %6472  ;;  %v5839_v44 = vadd.f32 %v11803_v45, %v11802_v18  ;;  %v11804_v3 = vld [vmem:[#allocation91_spill] sm:$0xff] }
 0x8bc   : > { %v6475_v13 = vunpack.i.h.bf16 %v6473_v23  ;;  %v6474_v36 = vunpack.i.l.bf16 %v6473_v23 }
 0x8bd   : > { %6234 = vmatprep.mubr.msk.bf16.mxu0 %vm684_vm0, %v4631_v61 }
 0x8be   : > { %v4592_v42 = vsel %vm1874_vm1, %v5839_v44, %v6475_v13  ;;  %v4591_v17 = vsel %vm1874_vm1, %v11804_v3, %v6474_v36  ;;  %v7117_v3 = vld [vmem:[%s7475_s19 + $0x38] sm:$0xff] }
 0x8bf   : > { %v6478_v52 = vpop.permute.xlu1 %6477 }
 0x8c0   : > { %v6480_v58 = vunpack.i.h.bf16 %v6478_v52  ;;  %v6479_v0 = vunpack.i.l.bf16 %v6478_v52 }
 0x8c2   : > { %v4620_v39 = vsel %vm4612_vm3, %v4603_v48, %v6480_v58  ;;  %v4619_v50 = vsel %vm4612_vm3, %v4602_v53, %v6479_v0  ;;  %v11807_v48 = vld [vmem:[#allocation74_spill] sm:$0xff] }
 0x8c3   : > { %v4632_v26 = vpack.c.bf16 %v4620_v39, %v4619_v50  ;;  %v6483_v22 = vpop.permute.xlu1 %6482 }
 0x8c4   : > { %v6485_v27 = vunpack.i.h.bf16 %v6483_v22  ;;  %v6484_v51 = vunpack.i.l.bf16 %v6483_v22  ;;  %v7112_v22 = vld [vmem:[%s7475_s19 + $0x8] sm:$0xff] }
 0x8c5   : > { %6235 = vmatmul.mubr.msk.bf16.gmra.mxu0 %vm684_vm0, %v4632_v26 }
 0x8c6   : > { %v4594_v0 = vsel %vm1874_vm1, %v5845_v41, %v6485_v27  ;;  %v4593_v53 = vsel %vm1874_vm1, %v11807_v48, %v6484_v51  ;;  %v7118_v27 = vld [vmem:[%s7475_s19 + $0x40] sm:$0xff] }
 0x8e8   : > { %v6488_v57 = vpop.permute.xlu0 %6487 }
 0x8e9   : > { %v6490_v46 = vunpack.i.h.bf16 %v6488_v57  ;;  %v6489_v59 = vunpack.i.l.bf16 %v6488_v57 }
 0x8eb   : > { %v4621_v7 = vsel %vm4612_vm3, %v4604_v47, %v6489_v59  ;;  %v4622_v14 = vsel %vm4612_vm3, %v4605_v54, %v6490_v46  ;;  %v7111_v59 = vld [vmem:[%s7475_s19 + $0x10] sm:$0xff] }
 0x8ec   : > { %v4633_v34 = vpack.c.bf16 %v4622_v14, %v4621_v7  ;;  %v6493_v4 = vpop.permute.xlu0 %6492 }
 0x8ed   : > { %v6495_v56 = vunpack.i.h.bf16 %v6493_v4  ;;  %v6494_v63 = vunpack.i.l.bf16 %v6493_v4 }
 0x8ee   : > { %6238 = vmatprep.mubr.msk.bf16.mxu0 %vm684_vm0, %v4633_v34 }
 0x8ef   : > { %v4608_v19 = vsel %vm4595_vm2, %v4591_v17, %v6494_v63  ;;  %v4609_v61 = vsel %vm4595_vm2, %v4592_v42, %v6495_v56  ;;  %v7115_v56 = vld [vmem:[%s7475_s19 + $0x30] sm:$0xff] }
 0x8f0   : > { %v6498_v5 = vpop.permute.xlu1 %6497 }
 0x8f1   : > { %v6500_v62 = vunpack.i.h.bf16 %v6498_v5  ;;  %v6499_v40 = vunpack.i.l.bf16 %v6498_v5 }
 0x8f3   : > { %v4624_v21 = vsel %vm4612_vm3, %v4607_v32, %v6500_v62  ;;  %v4623_v6 = vsel %vm4612_vm3, %v4606_v35, %v6499_v40 }
 0x8f4   : > { %v4634_v28 = vpack.c.bf16 %v4624_v21, %v4623_v6  ;;  %v6503_v33 = vpop.permute.xlu1 %6502 }
 0x8f5   : > { %v6505_v10 = vunpack.i.h.bf16 %v6503_v33  ;;  %v6504_v52 = vunpack.i.l.bf16 %v6503_v33 }
 0x8f6   : > { %6239 = vmatmul.mubr.msk.bf16.gmra.mxu0 %vm684_vm0, %v4634_v28  ;;  %v7114_v28 = vld [vmem:[%s7475_s19 + $0x20] sm:$0xff] }
 0x8f7   : > { %v4611_v26 = vsel %vm4595_vm2, %v4594_v0, %v6505_v10  ;;  %v4610_v23 = vsel %vm4595_vm2, %v4593_v53, %v6504_v52  ;;  %v7119_v52 = vld [vmem:[%s7475_s19 + $0x50] sm:$0xff]  ;;  %v7120_v0 = vld [vmem:[%s7475_s19 + $0x48] sm:$0xff]  ;;  %v7121_v53 = vld [vmem:[%s7475_s19 + $0x58] sm:$0xff] }
 0x8f8   : > { %v6508_v16 = vpop.permute.xlu0 %6507 }
 0x8f9   : > { %v6510_v24 = vunpack.i.h.bf16 %v6508_v16  ;;  %v6509_v2 = vunpack.i.l.bf16 %v6508_v16  ;;  %v7116_v16 = vld [vmem:[%s7475_s19 + $0x28] sm:$0xff] }
 0x8fb   : > { %v4625_v9 = vsel %vm4612_vm3, %v4608_v19, %v6509_v2  ;;  %v4626_v12 = vsel %vm4612_vm3, %v4609_v61, %v6510_v24 }
 0x8fc   : > { %v4635_v60 = vpack.c.bf16 %v4626_v12, %v4625_v9 }
 0x8fe   : > { %6242 = vmatprep.mubr.msk.bf16.mxu0 %vm684_vm0, %v4635_v60 }
 0x900   : > { %v6513_v58 = vpop.permute.xlu1 %6512 }
 0x901   : > { %v6515_v39 = vunpack.i.h.bf16 %v6513_v58  ;;  %v6514_v50 = vunpack.i.l.bf16 %v6513_v58 }
 0x903   : > { %v4628_v29 = vsel %vm4612_vm3, %v4611_v26, %v6515_v39  ;;  %v4627_v43 = vsel %vm4612_vm3, %v4610_v23, %v6514_v50 }
 0x904   : > { %v4636_v49 = vpack.c.bf16 %v4628_v29, %v4627_v43 }
 0x906   : > { %6243 = vmatmul.mubr.msk.bf16.gmra.mxu0 %vm684_vm0, %v4636_v49 }
 0x975   : > { %v6232_v20 = vpop.f32.mrf.mxu0 }
 0x976   : > { %v4727_v1 = vadd.f32 %v6232_v20, %v10634_v15 }
 0x977   : > { %v4718_v55 = vpop.f32.mrf.mxu0 }
 0x978   : > { %v4719_v57 = vadd.f32 %v10634_v15, %v4718_v55  ;;  %v10642_v47 = vadd.f32 %v7111_v59, %v4727_v1  ;;  %v7122_v1 = vld [vmem:[%s7475_s19 + $0x60] sm:$0xff] }
 0x979   : > { %v6233_v38 = vpop.f32.mrf.mxu0 }
 0x97a   : > { %v10639_v11 = vadd.f32 %v7110_v31, %v4719_v57  ;;  %v4730_v54 = vadd.f32 %v6233_v38, %v10634_v15  ;;  %v4805_v62 = vsel %vm684_vm0, %v10642_v47, 0.0  ;;  %v7123_v31 = vld [vmem:[%s7475_s19 + $0x70] sm:$0xff] }
 0x97b   : > { %v4721_v46 = vpop.f32.mrf.mxu0 }
 0x97c   : > { %v4722_v7 = vadd.f32 %v10634_v15, %v4721_v46  ;;  %v4799_v14 = vsel %vm684_vm0, %v10639_v11, 0.0  ;;  %v10652_v8 = vadd.f32 %v7113_v30, %v4730_v54  ;;  %v7125_v30 = vld [vmem:[%s7475_s19 + $0x78] sm:$0xff] }
 0x97d   : > { %4800 = vadd.xlane.f32.xlu0 %v4799_v14  ;;  %v7124_v14 = vld [vmem:[%s7475_s19 + $0x68] sm:$0xff] }
 0x97e   : > { %v10649_v34 = vadd.f32 %v7112_v22, %v4722_v7  ;;  %v4808_v40 = vsel %vm684_vm0, %v10652_v8, 0.0 }
 0x980   : > { %v4802_v5 = vsel %vm684_vm0, %v10649_v34, 0.0 }
 0x981   : > { %4803 = vadd.xlane.f32.xlu1 %v4802_v5  ;;  %4806 = vadd.xlane.f32.xlu0 %v4805_v62 }
 0x985   : > { %v6236_v32 = vpop.f32.mrf.mxu0  ;;  %4809 = vadd.xlane.f32.xlu0 %v4808_v40 }
 0x986   : > { %v4743_v4 = vadd.f32 %v6236_v32, %v10634_v15 }
 0x987   : > { %v4734_v35 = vpop.f32.mrf.mxu0 }
 0x988   : > { %v4735_v21 = vadd.f32 %v10634_v15, %v4734_v35  ;;  %v10666_v63 = vadd.f32 %v7115_v56, %v4743_v4 }
 0x989   : > { %v6237_v6 = vpop.f32.mrf.mxu0 }
 0x98a   : > { %v10663_v13 = vadd.f32 %v7114_v28, %v4735_v21  ;;  %v4746_v18 = vadd.f32 %v6237_v6, %v10634_v15  ;;  %v4817_v2 = vsel %vm684_vm0, %v10666_v63, 0.0 }
 0x98b   : > { %v4737_v36 = vpop.f32.mrf.mxu0 }
 0x98c   : > { %v4738_v45 = vadd.f32 %v10634_v15, %v4737_v36  ;;  %v4811_v44 = vsel %vm684_vm0, %v10663_v13, 0.0  ;;  %v10676_v17 = vadd.f32 %v7117_v3, %v4746_v18 }
 0x98d   : > { %4812 = vadd.xlane.f32.xlu0 %v4811_v44 }
 0x98e   : > { %v10673_v42 = vadd.f32 %v7116_v16, %v4738_v45  ;;  %v4820_v19 = vsel %vm684_vm0, %v10676_v17, 0.0 }
 0x990   : > { %v4814_v24 = vsel %vm684_vm0, %v10673_v42, 0.0 }
 0x991   : > { %4815 = vadd.xlane.f32.xlu1 %v4814_v24  ;;  %4818 = vadd.xlane.f32.xlu0 %v4817_v2 }
 0x995   : > { %4821 = vadd.xlane.f32.xlu1 %v4820_v19 }
 0x9b6   : > { %v6240_v61 = vpop.f32.mrf.mxu0 }
 0x9b7   : > { %v4759_v9 = vadd.f32 %v6240_v61, %v10634_v15 }
 0x9b8   : > { %v4750_v33 = vpop.f32.mrf.mxu0 }
 0x9b9   : > { %v4751_v12 = vadd.f32 %v10634_v15, %v4750_v33  ;;  %v10690_v37 = vadd.f32 %v7119_v52, %v4759_v9 }
 0x9ba   : > { %v6241_v60 = vpop.f32.mrf.mxu0 }
 0x9bb   : > { %v10687_v51 = vadd.f32 %v7118_v27, %v4751_v12  ;;  %v4762_v25 = vadd.f32 %v6241_v60, %v10634_v15  ;;  %v4829_v26 = vsel %vm684_vm0, %v10690_v37, 0.0 }
 0x9bc   : > { %v4753_v10 = vpop.f32.mrf.mxu0 }
 0x9bd   : > { %v4754_v41 = vadd.f32 %v10634_v15, %v4753_v10  ;;  %v4823_v58 = vsel %vm684_vm0, %v10687_v51, 0.0  ;;  %v10700_v39 = vadd.f32 %v7121_v53, %v4762_v25 }
 0x9be   : > { %4824 = vadd.xlane.f32.xlu0 %v4823_v58 }
 0x9bf   : > { %v10697_v48 = vadd.f32 %v7120_v0, %v4754_v41  ;;  %v4832_v23 = vsel %vm684_vm0, %v10700_v39, 0.0 }
 0x9c1   : > { %v4826_v50 = vsel %vm684_vm0, %v10697_v48, 0.0 }
 0x9c2   : > { %4827 = vadd.xlane.f32.xlu1 %v4826_v50  ;;  %4830 = vadd.xlane.f32.xlu0 %v4829_v26 }
 0x9c6   : > { %v6244_v29 = vpop.f32.mrf.mxu0  ;;  %4833 = vadd.xlane.f32.xlu1 %v4832_v23 }
 0x9c7   : > { %v4775_v49 = vadd.f32 %v6244_v29, %v10634_v15 }
 0x9c8   : > { %v4766_v43 = vpop.f32.mrf.mxu0 }
 0x9c9   : > { %v4767_v20 = vadd.f32 %v10634_v15, %v4766_v43  ;;  %v10714_v46 = vadd.f32 %v7123_v31, %v4775_v49 }
 0x9ca   : > { %v6245_v55 = vpop.f32.mrf.mxu0 }
 0x9cb   : > { %v10711_v57 = vadd.f32 %v7122_v1, %v4767_v20  ;;  %v4778_v59 = vadd.f32 %v6245_v55, %v10634_v15  ;;  %v4841_v40 = vsel %vm684_vm0, %v10714_v46, 0.0 }
 0x9cc   : > { %v4769_v38 = vpop.f32.mrf.mxu0 }
 0x9cd   : > { %v4770_v54 = vadd.f32 %v10634_v15, %v4769_v38  ;;  %v4835_v7 = vsel %vm684_vm0, %v10711_v57, 0.0  ;;  %v10724_v5 = vadd.f32 %v7125_v30, %v4778_v59  ;;  %v6522_v59 = vld [vmem:[%s11031_s13 + $0x8] sm:$0xff]  }
 0x9ce   : > { %4836 = vadd.xlane.f32.xlu0 %v4835_v7  ;;  %6246 = vmatprep.subr.bf16.mxu1 %v6522_v59 }
 0x9cf   : > { %v10721_v22 = vadd.f32 %v7124_v14, %v4770_v54  ;;  %v4844_v15 = vsel %vm684_vm0, %v10724_v5, 0.0  ;;  %6247 = vmatpush3.bf16.msra.mxu1 %v6522_v59  ;;  %v6523_v54 = vld [vmem:[%s11031_s13] sm:$0xff]  }
 0x9d0   : > { %6248 = vmatprep.subr.bf16.mxu1 %v6523_v54 }
 0x9d1   : > { %v4838_v62 = vsel %vm684_vm0, %v10721_v22, 0.0 }
 0x9d2   : > { %4839 = vadd.xlane.f32.xlu1 %v4838_v62  ;;  %4842 = vadd.xlane.f32.xlu0 %v4841_v40 }
 0x9d3   : > { %6249 = vmatpush3.bf16.msra.mxu1 %v6523_v54 }
 0x9d6   : > { %4845 = vadd.xlane.f32.xlu1 %v4844_v15 }
 0xa06   : > { %v4801_v32 = vpop.xlane.xlu0 %4800 }
 0xa07   : > { %v4847_v35 = vmul.f32 0.03125, %v4801_v32 }
 0xa09   : > { %v10733_v4 = vsub.f32 %v10639_v11, %v4847_v35 }
 0xa0a   : > { %v4804_v21 = vpop.xlane.xlu1 %4803  ;;  %v4807_v6 = vpop.xlane.xlu0 %4806 }
 0xa0b   : > { %v4848_v28 = vmul.f32 0.03125, %v4804_v21  ;;  %v4849_v36 = vmul.f32 0.03125, %v4807_v6  ;;  %v4879_v56 = vmul.f32 %v10733_v4, %v10733_v4 }
 0xa0d   : > { %v10738_v18 = vsub.f32 %v10649_v34, %v4848_v28  ;;  %v10741_v45 = vsub.f32 %v10642_v47, %v4849_v36  ;;  %v4895_v44 = vsel %vm684_vm0, %v4879_v56, 0.0 }
 0xa0e   : > { %4896 = vadd.xlane.f32.xlu0 %v4895_v44  ;;  %v4810_v16 = vpop.xlane.xlu0 %4809 }
 0xa0f   : > { %v4850_v3 = vmul.f32 0.03125, %v4810_v16  ;;  %v4880_v24 = vmul.f32 %v10738_v18, %v10738_v18  ;;  %v4881_v2 = vmul.f32 %v10741_v45, %v10741_v45 }
 0xa11   : > { %v10749_v19 = vsub.f32 %v10652_v8, %v4850_v3  ;;  %v4898_v61 = vsel %vm684_vm0, %v4880_v24, 0.0  ;;  %v4901_v33 = vsel %vm684_vm0, %v4881_v2, 0.0 }
 0xa12   : > { %4899 = vadd.xlane.f32.xlu1 %v4898_v61  ;;  %4902 = vadd.xlane.f32.xlu0 %v4901_v33 }
 0xa13   : > { %v4882_v9 = vmul.f32 %v10749_v19, %v10749_v19 }
 0xa15   : > { %v4904_v12 = vsel %vm684_vm0, %v4882_v9, 0.0 }
 0xa16   : > { %4905 = vadd.xlane.f32.xlu1 %v4904_v12  ;;  %v4813_v60 = vpop.xlane.xlu0 %4812 }
 0xa17   : > { %v4851_v27 = vmul.f32 0.03125, %v4813_v60 }
 0xa19   : > { %v10757_v10 = vsub.f32 %v10663_v13, %v4851_v27 }
 0xa1a   : > { %v4816_v52 = vpop.xlane.xlu1 %4815  ;;  %v4819_v25 = vpop.xlane.xlu0 %4818 }
 0xa1b   : > { %v4852_v41 = vmul.f32 0.03125, %v4816_v52  ;;  %v4853_v58 = vmul.f32 0.03125, %v4819_v25  ;;  %v4883_v0 = vmul.f32 %v10757_v10, %v10757_v10 }
 0xa1d   : > { %v10762_v53 = vsub.f32 %v10673_v42, %v4852_v41  ;;  %v10765_v50 = vsub.f32 %v10666_v63, %v4853_v58  ;;  %v4907_v26 = vsel %vm684_vm0, %v4883_v0, 0.0 }
 0xa1e   : > { %v4822_v23 = vpop.xlane.xlu1 %4821  ;;  %4908 = vadd.xlane.f32.xlu0 %v4907_v26 }
 0xa1f   : > { %v4854_v29 = vmul.f32 0.03125, %v4822_v23  ;;  %v4884_v43 = vmul.f32 %v10762_v53, %v10762_v53  ;;  %v4885_v49 = vmul.f32 %v10765_v50, %v10765_v50 }
 0xa21   : > { %v10773_v20 = vsub.f32 %v10676_v17, %v4854_v29  ;;  %v4910_v55 = vsel %vm684_vm0, %v4884_v43, 0.0  ;;  %v4913_v1 = vsel %vm684_vm0, %v4885_v49, 0.0 }
 0xa22   : > { %4911 = vadd.xlane.f32.xlu1 %v4910_v55  ;;  %4914 = vadd.xlane.f32.xlu0 %v4913_v1 }
 0xa23   : > { %v4886_v38 = vmul.f32 %v10773_v20, %v10773_v20 }
 0xa25   : > { %v4916_v31 = vsel %vm684_vm0, %v4886_v38, 0.0 }
 0xa26   : > { %4917 = vadd.xlane.f32.xlu1 %v4916_v31 }
 0xa47   : > { %v4825_v7 = vpop.xlane.xlu0 %4824 }
 0xa48   : > { %v4855_v14 = vmul.f32 0.03125, %v4825_v7 }
 0xa4a   : > { %v10787_v30 = vsub.f32 %v10687_v51, %v4855_v14 }
 0xa4b   : > { %v4828_v62 = vpop.xlane.xlu1 %4827  ;;  %v4831_v40 = vpop.xlane.xlu0 %4830 }
 0xa4c   : > { %v4856_v15 = vmul.f32 0.03125, %v4828_v62  ;;  %v4857_v32 = vmul.f32 0.03125, %v4831_v40  ;;  %v4887_v35 = vmul.f32 %v10787_v30, %v10787_v30 }
 0xa4e   : > { %v10792_v21 = vsub.f32 %v10697_v48, %v4856_v15  ;;  %v10795_v6 = vsub.f32 %v10690_v37, %v4857_v32  ;;  %v4919_v28 = vsel %vm684_vm0, %v4887_v35, 0.0 }
 0xa4f   : > { %v4834_v36 = vpop.xlane.xlu1 %4833  ;;  %4920 = vadd.xlane.f32.xlu0 %v4919_v28 }
 0xa50   : > { %v4858_v56 = vmul.f32 0.03125, %v4834_v36  ;;  %v4888_v44 = vmul.f32 %v10792_v21, %v10792_v21  ;;  %v4889_v16 = vmul.f32 %v10795_v6, %v10795_v6 }
 0xa52   : > { %v10803_v3 = vsub.f32 %v10700_v39, %v4858_v56  ;;  %v4922_v24 = vsel %vm684_vm0, %v4888_v44, 0.0  ;;  %v4925_v2 = vsel %vm684_vm0, %v4889_v16, 0.0 }
 0xa53   : > { %4923 = vadd.xlane.f32.xlu1 %v4922_v24  ;;  %4926 = vadd.xlane.f32.xlu0 %v4925_v2 }
 0xa54   : > { %v4890_v61 = vmul.f32 %v10803_v3, %v10803_v3 }
 0xa56   : > { %v4928_v33 = vsel %vm684_vm0, %v4890_v61, 0.0 }
 0xa57   : > { %4929 = vadd.xlane.f32.xlu1 %v4928_v33  ;;  %v4837_v9 = vpop.xlane.xlu0 %4836  ;;  %v10837_v33 = vld [vmem:[%s11029_s11] ss:$0 sm:$0xff] }
 0xa58   : > { %v4859_v12 = vmul.f32 0.03125, %v4837_v9 }
 0xa5a   : > { %v10811_v60 = vsub.f32 %v10711_v57, %v4859_v12 }
 0xa5b   : > { %v4840_v27 = vpop.xlane.xlu1 %4839  ;;  %v4843_v52 = vpop.xlane.xlu0 %4842 }
 0xa5c   : > { %v4860_v25 = vmul.f32 0.03125, %v4840_v27  ;;  %v4861_v41 = vmul.f32 0.03125, %v4843_v52  ;;  %v4891_v58 = vmul.f32 %v10811_v60, %v10811_v60 }
 0xa5e   : > { %v10816_v0 = vsub.f32 %v10721_v22, %v4860_v25  ;;  %v10819_v26 = vsub.f32 %v10714_v46, %v4861_v41  ;;  %v4931_v23 = vsel %vm684_vm0, %v4891_v58, 0.0 }
 0xa5f   : > { %v4846_v29 = vpop.xlane.xlu1 %4845  ;;  %4932 = vadd.xlane.f32.xlu0 %v4931_v23 }
 0xa60   : > { %v4862_v43 = vmul.f32 0.03125, %v4846_v29  ;;  %v4892_v49 = vmul.f32 %v10816_v0, %v10816_v0  ;;  %v4893_v55 = vmul.f32 %v10819_v26, %v10819_v26 }
 0xa62   : > { %v10827_v1 = vsub.f32 %v10724_v5, %v4862_v43  ;;  %v4934_v38 = vsel %vm684_vm0, %v4892_v49, 0.0  ;;  %v4937_v31 = vsel %vm684_vm0, %v4893_v55, 0.0  ;;  %v10844_v43 = vld [vmem:[%s11030_s12] ss:$0 sm:$0xff] }
 0xa63   : > { %4935 = vadd.xlane.f32.xlu1 %v4934_v38  ;;  %4938 = vadd.xlane.f32.xlu0 %v4937_v31 }
 0xa64   : > { %v4894_v59 = vmul.f32 %v10827_v1, %v10827_v1 }
 0xa66   : > { %v4940_v54 = vsel %vm684_vm0, %v4894_v59, 0.0 }
 0xa67   : > { %4941 = vadd.xlane.f32.xlu1 %v4940_v54 }
 0xa97   : > { %v4897_v7 = vpop.xlane.xlu0 %4896 }
 0xa98   : > { %v4943_v14 = vmul.f32 0.03125, %v4897_v7 }
 0xa9a   : > { %v4959_v62 = vadd.f32 1e-05, %v4943_v14 }
 0xa9b   : > { %v4900_v40 = vpop.xlane.xlu1 %4899  ;;  %v4903_v15 = vpop.xlane.xlu0 %4902 }
 0xa9c   : > { %7012 = vrsqrt.f32 %v4959_v62  ;;  %v4944_v32 = vmul.f32 0.03125, %v4900_v40  ;;  %v4945_v35 = vmul.f32 0.03125, %v4903_v15 }
 0xa9e   : > { %v4960_v28 = vadd.f32 1e-05, %v4944_v32  ;;  %v4961_v36 = vadd.f32 1e-05, %v4945_v35 }
 0xa9f   : > { %v4906_v56 = vpop.xlane.xlu1 %4905 }
 0xaa0   : > { %7014 = vrsqrt.f32 %v4960_v28  ;;  %v4946_v44 = vmul.f32 0.03125, %v4906_v56 }
 0xaa1   : > { %7016 = vrsqrt.f32 %v4961_v36 }
 0xaa2   : > { %v4962_v16 = vadd.f32 1e-05, %v4946_v44 }
 0xaa4   : > { %7018 = vrsqrt.f32 %v4962_v16 }
 0xaa7   : > { %v4909_v24 = vpop.xlane.xlu0 %4908 }
 0xaa8   : > { %v4947_v2 = vmul.f32 0.03125, %v4909_v24 }
 0xaa9   : > { %v7013_v61 = vpop.eup %7012 }
 0xaaa   : > { %v4963_v9 = vadd.f32 1e-05, %v4947_v2  ;;  %v4991_v12 = vmul.f32 %v7013_v61, %v10733_v4 }
 0xaab   : > { %v4912_v27 = vpop.xlane.xlu1 %4911  ;;  %v4915_v52 = vpop.xlane.xlu0 %4914 }
 0xaac   : > { %7020 = vrsqrt.f32 %v4963_v9  ;;  %v4948_v25 = vmul.f32 0.03125, %v4912_v27  ;;  %v4949_v41 = vmul.f32 0.03125, %v4915_v52  ;;  %v5013_v23 = vmul.f32 %v10837_v33, %v4991_v12 }
 0xaad   : > { %v7015_v58 = vpop.eup %7014 }
 0xaae   : > { %v7017_v29 = vpop.eup %7016  ;;  %v4964_v49 = vadd.f32 1e-05, %v4948_v25  ;;  %v4965_v55 = vadd.f32 1e-05, %v4949_v41  ;;  %v4992_v38 = vmul.f32 %v7015_v58, %v10738_v18  ;;  %v5035_v14 = vadd.f32 %v10844_v43, %v5013_v23 }
 0xaaf   : > { %v4993_v4 = vmul.f32 %v7017_v29, %v10741_v45  ;;  %v4918_v31 = vpop.xlane.xlu1 %4917 }
 0xab0   : > { %7022 = vrsqrt.f32 %v4964_v49  ;;  %v4950_v59 = vmul.f32 0.03125, %v4918_v31  ;;  %v5014_v54 = vmul.f32 %v10837_v33, %v4992_v38 }
 0xab1   : > { %v7019_v7 = vpop.eup %7018  ;;  %7024 = vrsqrt.f32 %v4965_v55  ;;  %v5015_v62 = vmul.f32 %v10837_v33, %v4993_v4 }
 0xab2   : > { %v4994_v40 = vmul.f32 %v7019_v7, %v10749_v19  ;;  %v4966_v15 = vadd.f32 1e-05, %v4950_v59  ;;  %v5036_v32 = vadd.f32 %v10844_v43, %v5014_v54 }
 0xab3   : > { %v5037_v35 = vadd.f32 %v10844_v43, %v5015_v62 }
 0xab4   : > { %v5016_v18 = vmul.f32 %v10837_v33, %v4994_v40  ;;  %7026 = vrsqrt.f32 %v4966_v15  ;;  %v5051_v45 = vpack.c.bf16 %v5036_v32, %v5035_v14 }
 0xab6   : > { %v5038_v28 = vadd.f32 %v10844_v43, %v5016_v18  ;;  %6250 = vmatprep.mubr.msk.bf16.mxu1 %vm684_vm0, %v5051_v45 }
 0xab8   : > { %v5052_v36 = vpack.c.bf16 %v5038_v28, %v5037_v35 }
 0xab9   : > { %v7021_v56 = vpop.eup %7020 }
 0xaba   : > { %6251 = vmatmul.mubr.msk.bf16.vlgmr.msra.gmra.mxu1 %vm684_vm0, %v5052_v36  ;;  %v4995_v44 = vmul.f32 %v7021_v56, %v10757_v10 }
 0xabc   : > { %v5017_v2 = vmul.f32 %v10837_v33, %v4995_v44 }
 0xabd   : > { %v7023_v19 = vpop.eup %7022 }
 0xabe   : > { %v7025_v16 = vpop.eup %7024  ;;  %v4996_v24 = vmul.f32 %v7023_v19, %v10762_v53  ;;  %v5039_v52 = vadd.f32 %v10844_v43, %v5017_v2 }
 0xabf   : > { %v4997_v61 = vmul.f32 %v7025_v16, %v10765_v50 }
 0xac0   : > { %v5018_v9 = vmul.f32 %v10837_v33, %v4996_v24 }
 0xac1   : > { %v7027_v12 = vpop.eup %7026  ;;  %v5019_v41 = vmul.f32 %v10837_v33, %v4997_v61 }
 0xac2   : > { %v4998_v27 = vmul.f32 %v7027_v12, %v10773_v20  ;;  %v5040_v25 = vadd.f32 %v10844_v43, %v5018_v9 }
 0xac3   : > { %v5041_v53 = vadd.f32 %v10844_v43, %v5019_v41 }
 0xac4   : > { %v5053_v10 = vpack.c.bf16 %v5040_v25, %v5039_v52  ;;  %v5020_v58 = vmul.f32 %v10837_v33, %v4998_v27 }
 0xac6   : > { %6254 = vmatprep.mubr.msk.bf16.mxu1 %vm684_vm0, %v5053_v10  ;;  %v5042_v50 = vadd.f32 %v10844_v43, %v5020_v58 }
 0xac8   : > { %v5054_v23 = vpack.c.bf16 %v5042_v50, %v5041_v53 }
 0xaca   : > { %6255 = vmatmul.mubr.msk.bf16.gmra.mxu1 %vm684_vm0, %v5054_v23 }
 0xad8   : > { %v4921_v29 = vpop.xlane.xlu0 %4920 }
 0xad9   : > { %v4951_v20 = vmul.f32 0.03125, %v4921_v29 }
 0xadb   : > { %v4967_v49 = vadd.f32 1e-05, %v4951_v20 }
 0xadc   : > { %v4924_v55 = vpop.xlane.xlu1 %4923  ;;  %v4927_v38 = vpop.xlane.xlu0 %4926 }
 0xadd   : > { %7028 = vrsqrt.f32 %v4967_v49  ;;  %v4952_v4 = vmul.f32 0.03125, %v4924_v55  ;;  %v4953_v31 = vmul.f32 0.03125, %v4927_v38  ;;  %v6524_v49 = vld [vmem:[%s11033_s15 + $0x38] sm:$0xff]  }
 0xade   : > { %6266 = vmatprep.subr.bf16.mxu0 %v6524_v49  ;;  %6298 = vmatprep.subr.bf16.mxu1 %v6524_v49 }
 0xadf   : > { %v4968_v59 = vadd.f32 1e-05, %v4952_v4  ;;  %v4969_v54 = vadd.f32 1e-05, %v4953_v31  ;;  %6267 = vmatpush3.bf16.msra.mxu0 %v6524_v49  ;;  %6306 = vmatpush3.bf16.msra.mxu1 %v6524_v49 }
 0xae0   : > { %v4930_v7 = vpop.xlane.xlu1 %4929 }
 0xae1   : > { %7030 = vrsqrt.f32 %v4968_v59  ;;  %v4954_v14 = vmul.f32 0.03125, %v4930_v7  ;;  %v6525_v59 = vld [vmem:[%s11033_s15 + $0x30] sm:$0xff]  }
 0xae2   : > { %7032 = vrsqrt.f32 %v4969_v54  ;;  %6268 = vmatprep.subr.bf16.mxu0 %v6525_v59  ;;  %6299 = vmatprep.subr.bf16.mxu1 %v6525_v59 }
 0xae3   : > { %v4970_v62 = vadd.f32 1e-05, %v4954_v14  ;;  %6269 = vmatpush3.bf16.msra.mxu0 %v6525_v59  ;;  %6307 = vmatpush3.bf16.msra.mxu1 %v6525_v59 }
 0xae5   : > { %7034 = vrsqrt.f32 %v4970_v62 }
 0xae8   : > { %v4933_v40 = vpop.xlane.xlu0 %4932 }
 0xae9   : > { %v4955_v15 = vmul.f32 0.03125, %v4933_v40 }
 0xaea   : > { %v7029_v32 = vpop.eup %7028 }
 0xaeb   : > { %v4971_v18 = vadd.f32 1e-05, %v4955_v15  ;;  %v4999_v45 = vmul.f32 %v7029_v32, %v10787_v30  ;;  %v6526_v15 = vld [vmem:[%s11033_s15 + $0x28] sm:$0xff]  }
 0xaec   : > { %v4936_v35 = vpop.xlane.xlu1 %4935  ;;  %v4939_v28 = vpop.xlane.xlu0 %4938  ;;  %6270 = vmatprep.subr.bf16.mxu0 %v6526_v15  ;;  %6300 = vmatprep.subr.bf16.mxu1 %v6526_v15 }
 0xaed   : > { %7036 = vrsqrt.f32 %v4971_v18  ;;  %v4956_v36 = vmul.f32 0.03125, %v4936_v35  ;;  %v4957_v56 = vmul.f32 0.03125, %v4939_v28  ;;  %v5021_v19 = vmul.f32 %v10837_v33, %v4999_v45  ;;  %6271 = vmatpush3.bf16.msra.mxu0 %v6526_v15  ;;  %6308 = vmatpush3.bf16.msra.mxu1 %v6526_v15  ;;  %v6527_v45 = vld [vmem:[%s11033_s15 + $0x20] sm:$0xff]   ;;  %v6530_v28 = vld [vmem:[%s11033_s15 + $0x8] sm:$0xff]  }
 0xaee   : > { %v7031_v44 = vpop.eup %7030  ;;  %6272 = vmatprep.subr.bf16.mxu0 %v6527_v45  ;;  %6301 = vmatprep.subr.bf16.mxu1 %v6527_v45 }
 0xaef   : > { %v7033_v16 = vpop.eup %7032  ;;  %v4972_v24 = vadd.f32 1e-05, %v4956_v36  ;;  %v4973_v2 = vadd.f32 1e-05, %v4957_v56  ;;  %v5000_v61 = vmul.f32 %v7031_v44, %v10792_v21  ;;  %v5043_v25 = vadd.f32 %v10844_v43, %v5021_v19  ;;  %v6531_v36 = vld [vmem:[%s11033_s15] sm:$0xff]  }
 0xaf0   : > { %v5001_v9 = vmul.f32 %v7033_v16, %v10795_v6  ;;  %v4942_v12 = vpop.xlane.xlu1 %4941  ;;  %v10927_v56 = vld [vmem:[%s11032_s14] ss:$0 sm:$0xff] }
 0xaf1   : > { %7038 = vrsqrt.f32 %v4972_v24  ;;  %v4958_v27 = vmul.f32 0.03125, %v4942_v12  ;;  %v5022_v30 = vmul.f32 %v10837_v33, %v5000_v61  ;;  %6273 = vmatpush3.bf16.msra.mxu0 %v6527_v45  ;;  %6309 = vmatpush3.bf16.msra.mxu1 %v6527_v45 }
 0xaf2   : > { %v7035_v52 = vpop.eup %7034  ;;  %7040 = vrsqrt.f32 %v4973_v2  ;;  %v5023_v53 = vmul.f32 %v10837_v33, %v5001_v9 }
 0xaf3   : > { %v5002_v41 = vmul.f32 %v7035_v52, %v10803_v3  ;;  %v4974_v10 = vadd.f32 1e-05, %v4958_v27  ;;  %v5044_v58 = vadd.f32 %v10844_v43, %v5022_v30 }
 0xaf4   : > { %v5045_v50 = vadd.f32 %v10844_v43, %v5023_v53 }
 0xaf5   : > { %7042 = vrsqrt.f32 %v4974_v10  ;;  %v5055_v21 = vpack.c.bf16 %v5044_v58, %v5043_v25  ;;  %v5024_v6 = vmul.f32 %v10837_v33, %v5002_v41 }
 0xaf7   : > { %6258 = vmatprep.mubr.msk.bf16.mxu1 %vm684_vm0, %v5055_v21  ;;  %v5046_v23 = vadd.f32 %v10844_v43, %v5024_v6 }
 0xaf9   : > { %v5056_v29 = vpack.c.bf16 %v5046_v23, %v5045_v50 }
 0xafa   : > { %v7037_v20 = vpop.eup %7036 }
 0xafb   : > { %6259 = vmatmul.mubr.msk.bf16.gmra.mxu1 %vm684_vm0, %v5056_v29  ;;  %v5003_v3 = vmul.f32 %v7037_v20, %v10811_v60 }
 0xafd   : > { %v5025_v31 = vmul.f32 %v10837_v33, %v5003_v3 }
 0xafe   : > { %v7039_v55 = vpop.eup %7038 }
 0xaff   : > { %v7041_v38 = vpop.eup %7040  ;;  %v5004_v4 = vmul.f32 %v7039_v55, %v10816_v0  ;;  %v5047_v62 = vadd.f32 %v10844_v43, %v5025_v31 }
 0xb00   : > { %v5005_v60 = vmul.f32 %v7041_v38, %v10819_v26 }
 0xb01   : > { %v5026_v54 = vmul.f32 %v10837_v33, %v5004_v4 }
 0xb02   : > { %v7043_v7 = vpop.eup %7042  ;;  %v5027_v40 = vmul.f32 %v10837_v33, %v5005_v60 }
 0xb03   : > { %v5006_v14 = vmul.f32 %v7043_v7, %v10827_v1  ;;  %v5048_v0 = vadd.f32 %v10844_v43, %v5026_v54 }
 0xb04   : > { %v5049_v1 = vadd.f32 %v10844_v43, %v5027_v40 }
 0xb05   : > { %v5057_v26 = vpack.c.bf16 %v5048_v0, %v5047_v62  ;;  %v5028_v32 = vmul.f32 %v10837_v33, %v5006_v14  ;;  %v6528_v33 = vld [vmem:[%s11033_s15 + $0x18] sm:$0xff]  }
 0xb06   : > { %6274 = vmatprep.subr.bf16.mxu0 %v6528_v33  ;;  %6302 = vmatprep.subr.bf16.mxu1 %v6528_v33 }
 0xb07   : > { %6262 = vmatprep.mubr.msk.bf16.mxu1 %vm684_vm0, %v5057_v26  ;;  %v5050_v18 = vadd.f32 %v10844_v43, %v5028_v32  ;;  %6275 = vmatpush3.bf16.msra.mxu0 %v6528_v33  ;;  %v6529_v43 = vld [vmem:[%s11033_s15 + $0x10] sm:$0xff]  }
 0xb08   : > { %6310 = vmatpush3.bf16.msra.mxu1 %v6528_v33  ;;  %6276 = vmatprep.subr.bf16.mxu0 %v6529_v43 }
 0xb09   : > { %v5058_v35 = vpack.c.bf16 %v5050_v18, %v5049_v1  ;;  %6303 = vmatprep.subr.bf16.mxu1 %v6529_v43 }
 0xb0b   : > { %6263 = vmatmul.mubr.msk.bf16.gmra.mxu1 %vm684_vm0, %v5058_v35  ;;  %6277 = vmatpush3.bf16.msra.mxu0 %v6529_v43 }
 0xb0c   : > { %6311 = vmatpush3.bf16.msra.mxu1 %v6529_v43  ;;  %6278 = vmatprep.subr.bf16.mxu0 %v6530_v28 }
 0xb0d   : > { %6304 = vmatprep.subr.bf16.mxu1 %v6530_v28 }
 0xb0f   : > { %6279 = vmatpush3.bf16.msra.mxu0 %v6530_v28 }
 0xb10   : > { %6312 = vmatpush3.bf16.msra.mxu1 %v6530_v28  ;;  %6280 = vmatprep.subr.bf16.mxu0 %v6531_v36 }
 0xb11   : > { %6305 = vmatprep.subr.bf16.mxu1 %v6531_v36 }
 0xb13   : > { %6281 = vmatpush3.bf16.msra.mxu0 %v6531_v36 }
 0xb14   : > { %6313 = vmatpush3.bf16.msra.mxu1 %v6531_v36 }
 0xb7a   : > { %v6252_v44 = vpop.f32.mrf.mxu1 }
 0xb7b   : > { %v5149_v19 = vadd.f32 %v6252_v44, %v10927_v56 }
 0xb7c   : > { %v5140_v16 = vpop.f32.mrf.mxu1 }
 0xb7d   : > { %v5141_v24 = vadd.f32 %v10927_v56, %v5140_v16  ;;  %v5221_v2 = vmul.f32 0.70710677, %v5149_v19  ;;  %v5205_v40 = vmul.f32 0.5, %v5149_v19 }
 0xb7e   : > { %v6253_v61 = vpop.f32.mrf.mxu1 }
 0xb7f   : > { %v5219_v9 = vmul.f32 0.70710677, %v5141_v24  ;;  %v5152_v12 = vadd.f32 %v6253_v61, %v10927_v56  ;;  %v5203_v7 = vmul.f32 0.5, %v5141_v24 }
 0xb80   : > { %v5143_v27 = vpop.f32.mrf.mxu1 }
 0xb81   : > { %7044 = verf.f32 %v5219_v9  ;;  %v5222_v30 = vmul.f32 0.70710677, %v5152_v12  ;;  %v5144_v52 = vadd.f32 %v10927_v56, %v5143_v27  ;;  %v5206_v60 = vmul.f32 0.5, %v5152_v12 }
 0xb82   : > { %7046 = verf.f32 %v5221_v2 }
 0xb83   : > { %7048 = verf.f32 %v5222_v30  ;;  %v5220_v25 = vmul.f32 0.70710677, %v5144_v52  ;;  %v5204_v14 = vmul.f32 0.5, %v5144_v52 }
 0xb85   : > { %7050 = verf.f32 %v5220_v25 }
 0xb8a   : > { %v6256_v41 = vpop.f32.mrf.mxu1 }
 0xb8b   : > { %v5165_v10 = vadd.f32 %v6256_v41, %v10927_v56 }
 0xb8c   : > { %v5156_v58 = vpop.f32.mrf.mxu1 }
 0xb8d   : > { %v5225_v53 = vmul.f32 0.70710677, %v5165_v10  ;;  %v5157_v21 = vadd.f32 %v10927_v56, %v5156_v58  ;;  %v5209_v9 = vmul.f32 0.5, %v5165_v10 }
 0xb8e   : > { %v7045_v6 = vpop.eup %7044  ;;  %v6257_v50 = vpop.f32.mrf.mxu1 }
 0xb8f   : > { %v7047_v23 = vpop.eup %7046  ;;  %v5223_v20 = vmul.f32 0.70710677, %v5157_v21  ;;  %v5168_v3 = vadd.f32 %v6257_v50, %v10927_v56  ;;  %v5251_v55 = vadd.f32 1.0, %v7045_v6  ;;  %7052 = verf.f32 %v5225_v53 }
 0xb90   : > { %v7049_v29 = vpop.eup %7048  ;;  %v5159_v49 = vpop.f32.mrf.mxu1  ;;  %v5253_v59 = vadd.f32 1.0, %v7047_v23  ;;  %v5207_v2 = vmul.f32 0.5, %v5157_v21 }
 0xb91   : > { %v5254_v38 = vadd.f32 1.0, %v7049_v29  ;;  %v5160_v4 = vadd.f32 %v10927_v56, %v5159_v49  ;;  %7054 = verf.f32 %v5223_v20  ;;  %v5226_v54 = vmul.f32 0.70710677, %v5168_v3 }
 0xb92   : > { %v7051_v31 = vpop.eup %7050  ;;  %v5267_v26 = vmul.f32 %v5251_v55, %v5203_v7  ;;  %v5269_v1 = vmul.f32 %v5253_v59, %v5205_v40  ;;  %v5210_v16 = vmul.f32 0.5, %v5168_v3 }
 0xb93   : > { %v5252_v62 = vadd.f32 1.0, %v7051_v31  ;;  %v5224_v0 = vmul.f32 0.70710677, %v5160_v4  ;;  %v5270_v15 = vmul.f32 %v5254_v38, %v5206_v60  ;;  %7056 = verf.f32 %v5226_v54 }
 0xb94   : > { %v5208_v19 = vmul.f32 0.5, %v5160_v4 }
 0xb95   : > { %v5268_v32 = vmul.f32 %v5252_v62, %v5204_v14  ;;  %7058 = verf.f32 %v5224_v0  ;;  %v5284_v45 = vpack.c.bf16 %v5270_v15, %v5269_v1 }
 0xb97   : > { %v5283_v18 = vpack.c.bf16 %v5268_v32, %v5267_v26 }
 0xb99   : > { %6282 = vmatprep.mubr.bf16.mxu0 %v5283_v18 }
 0xb9a   : > { %6283 = vmatmul.mubr.bf16.vlgmr.msra.gmra.mxu0 %v5284_v45 }
 0xb9c   : > { %v7053_v35 = vpop.eup %7052 }
 0xb9d   : > { %v5257_v44 = vadd.f32 1.0, %v7053_v35 }
 0xb9e   : > { %v7055_v33 = vpop.eup %7054 }
 0xb9f   : > { %v5255_v28 = vadd.f32 1.0, %v7055_v33  ;;  %v5273_v52 = vmul.f32 %v5257_v44, %v5209_v9 }
 0xba0   : > { %v7057_v43 = vpop.eup %7056 }
 0xba1   : > { %v5258_v24 = vadd.f32 1.0, %v7057_v43  ;;  %v5271_v27 = vmul.f32 %v5255_v28, %v5207_v2 }
 0xba2   : > { %v7059_v36 = vpop.eup %7058 }
 0xba3   : > { %v5256_v61 = vadd.f32 1.0, %v7059_v36  ;;  %v5274_v12 = vmul.f32 %v5258_v24, %v5210_v16 }
 0xba5   : > { %v5272_v30 = vmul.f32 %v5256_v61, %v5208_v19  ;;  %v5286_v41 = vpack.c.bf16 %v5274_v12, %v5273_v52 }
 0xba7   : > { %v5285_v25 = vpack.c.bf16 %v5272_v30, %v5271_v27 }
 0xba9   : > { %6286 = vmatprep.mubr.bf16.mxu0 %v5285_v25 }
 0xbaa   : > { %6287 = vmatmul.mubr.bf16.gmra.mxu0 %v5286_v41 }
 0xbbb   : > { %v6260_v58 = vpop.f32.mrf.mxu1 }
 0xbbc   : > { %v5181_v53 = vadd.f32 %v6260_v58, %v10927_v56 }
 0xbbd   : > { %v5172_v6 = vpop.f32.mrf.mxu1 }
 0xbbe   : > { %v5173_v50 = vadd.f32 %v10927_v56, %v5172_v6  ;;  %v5229_v23 = vmul.f32 0.70710677, %v5181_v53  ;;  %v5213_v16 = vmul.f32 0.5, %v5181_v53 }
 0xbbf   : > { %v6261_v29 = vpop.f32.mrf.mxu1 }
 0xbc0   : > { %v5227_v21 = vmul.f32 0.70710677, %v5173_v50  ;;  %v5184_v20 = vadd.f32 %v6261_v29, %v10927_v56  ;;  %v5211_v43 = vmul.f32 0.5, %v5173_v50 }
 0xbc1   : > { %v5175_v10 = vpop.f32.mrf.mxu1 }
 0xbc2   : > { %7060 = verf.f32 %v5227_v21  ;;  %v5230_v3 = vmul.f32 0.70710677, %v5184_v20  ;;  %v5176_v49 = vadd.f32 %v10927_v56, %v5175_v10  ;;  %v5214_v35 = vmul.f32 0.5, %v5184_v20 }
 0xbc3   : > { %7062 = verf.f32 %v5229_v23 }
 0xbc4   : > { %7064 = verf.f32 %v5230_v3  ;;  %v5228_v55 = vmul.f32 0.70710677, %v5176_v49  ;;  %v5212_v28 = vmul.f32 0.5, %v5176_v49 }
 0xbc6   : > { %7066 = verf.f32 %v5228_v55 }
 0xbcb   : > { %v6264_v38 = vpop.f32.mrf.mxu1 }
 0xbcc   : > { %v5197_v4 = vadd.f32 %v6264_v38, %v10927_v56  ;;  %v5709_v38 = vld [vmem:[%s11034_s16] ss:$0 sm:$0xff] }
 0xbcd   : > { %v5188_v31 = vpop.f32.mrf.mxu1 }
 0xbce   : > { %v5233_v59 = vmul.f32 0.70710677, %v5197_v4  ;;  %v5189_v60 = vadd.f32 %v10927_v56, %v5188_v31  ;;  %v5217_v29 = vmul.f32 0.5, %v5197_v4 }
 0xbcf   : > { %v7061_v54 = vpop.eup %7060  ;;  %v6265_v7 = vpop.f32.mrf.mxu1 }
 0xbd0   : > { %v7063_v14 = vpop.eup %7062  ;;  %v5231_v0 = vmul.f32 0.70710677, %v5189_v60  ;;  %v5200_v40 = vadd.f32 %v6265_v7, %v10927_v56  ;;  %v5259_v26 = vadd.f32 1.0, %v7061_v54  ;;  %7068 = verf.f32 %v5233_v59 }
 0xbd1   : > { %v7065_v62 = vpop.eup %7064  ;;  %v5191_v15 = vpop.f32.mrf.mxu1  ;;  %v5261_v45 = vadd.f32 1.0, %v7063_v14  ;;  %v5215_v53 = vmul.f32 0.5, %v5189_v60 }
 0xbd2   : > { %v5262_v32 = vadd.f32 1.0, %v7065_v62  ;;  %v5192_v1 = vadd.f32 %v10927_v56, %v5191_v15  ;;  %7070 = verf.f32 %v5231_v0  ;;  %v5234_v33 = vmul.f32 0.70710677, %v5200_v40 }
 0xbd3   : > { %v7067_v18 = vpop.eup %7066  ;;  %v5275_v2 = vmul.f32 %v5259_v26, %v5211_v43  ;;  %v5277_v61 = vmul.f32 %v5261_v45, %v5213_v16  ;;  %v5218_v58 = vmul.f32 0.5, %v5200_v40 }
 0xbd4   : > { %v5260_v36 = vadd.f32 1.0, %v7067_v18  ;;  %v5232_v44 = vmul.f32 0.70710677, %v5192_v1  ;;  %v5278_v24 = vmul.f32 %v5262_v32, %v5214_v35  ;;  %7072 = verf.f32 %v5234_v33 }
 0xbd5   : > { %v5216_v50 = vmul.f32 0.5, %v5192_v1 }
 0xbd6   : > { %v5276_v19 = vmul.f32 %v5260_v36, %v5212_v28  ;;  %7074 = verf.f32 %v5232_v44  ;;  %v5288_v12 = vpack.c.bf16 %v5278_v24, %v5277_v61 }
 0xbd8   : > { %v5287_v9 = vpack.c.bf16 %v5276_v19, %v5275_v2 }
 0xbda   : > { %6290 = vmatprep.mubr.bf16.mxu1 %v5287_v9 }
 0xbdb   : > { %6291 = vmatmul.mubr.bf16.vlgmr.msra.gmra.mxu1 %v5288_v12 }
 0xbdd   : > { %v7069_v56 = vpop.eup %7068 }
 0xbde   : > { %v5265_v41 = vadd.f32 1.0, %v7069_v56 }
 0xbdf   : > { %v7071_v27 = vpop.eup %7070 }
 0xbe0   : > { %v5263_v52 = vadd.f32 1.0, %v7071_v27  ;;  %v5281_v3 = vmul.f32 %v5265_v41, %v5217_v29 }
 0xbe1   : > { %v7073_v30 = vpop.eup %7072 }
 0xbe2   : > { %v5266_v6 = vadd.f32 1.0, %v7073_v30  ;;  %v5279_v20 = vmul.f32 %v5263_v52, %v5215_v53 }
 0xbe3   : > { %v7075_v25 = vpop.eup %7074 }
 0xbe4   : > { %v5264_v23 = vadd.f32 1.0, %v7075_v25  ;;  %v5282_v21 = vmul.f32 %v5266_v6, %v5218_v58 }
 0xbe6   : > { %v5280_v10 = vmul.f32 %v5264_v23, %v5216_v50  ;;  %v5290_v55 = vpack.c.bf16 %v5282_v21, %v5281_v3 }
 0xbe8   : > { %v5289_v49 = vpack.c.bf16 %v5280_v10, %v5279_v20 }
 0xbea   : > { %6294 = vmatprep.mubr.bf16.mxu1 %v5289_v49 }
 0xbeb   : > { %6295 = vmatmul.mubr.bf16.gmra.mxu1 %v5290_v55 }
 0xc5a   : > { %v6284_v31 = vpop.f32.mrf.mxu0 }
 0xc5b   : > { %v5405_v59 = vadd.f32 %v6284_v31, %v5709_v38 }
 0xc5c   : > { %v5396_v4 = vpop.f32.mrf.mxu0 }
 0xc5d   : > { %v5461_v60 = vadd.f32 %v5405_v59, %v10642_v47  ;;  %v5397_v54 = vadd.f32 %v5709_v38, %v5396_v4 }
 0xc5e   : > { %v6285_v7 = vpop.f32.mrf.mxu0 }
 0xc5f   : > { %5477 = vst.msk [vmem:[%s10953_s25 + $0x10] sm:$0xff] %vm684_vm0, %v5461_v60  ;;  %v5459_v14 = vadd.f32 %v5397_v54, %v10639_v11  ;;  %v5408_v62 = vadd.f32 %v6285_v7, %v5709_v38 }
 0xc60   : > { %v5399_v0 = vpop.f32.mrf.mxu0 }
 0xc61   : > { %5475 = vst.msk [vmem:[%s10953_s25] sm:$0xff] %vm684_vm0, %v5459_v14  ;;  %v5462_v40 = vadd.f32 %v5408_v62, %v10652_v8  ;;  %v5400_v15 = vadd.f32 %v5709_v38, %v5399_v0 }
 0xc63   : > { %5478 = vst.msk [vmem:[%s10953_s25 + $0x18] sm:$0xff] %vm684_vm0, %v5462_v40  ;;  %v5460_v47 = vadd.f32 %v5400_v15, %v10649_v34 }
 0xc65   : > { %5476 = vst.msk [vmem:[%s10953_s25 + $0x8] sm:$0xff] %vm684_vm0, %v5460_v47 }
 0xc6a   : > { %v6288_v26 = vpop.f32.mrf.mxu0 }
 0xc6b   : > { %v5421_v32 = vadd.f32 %v6288_v26, %v5709_v38 }
 0xc6c   : > { %v5412_v1 = vpop.f32.mrf.mxu0 }
 0xc6d   : > { %v5465_v11 = vadd.f32 %v5421_v32, %v10666_v63  ;;  %v5413_v18 = vadd.f32 %v5709_v38, %v5412_v1 }
 0xc6e   : > { %v6289_v45 = vpop.f32.mrf.mxu0 }
 0xc6f   : > { %5481 = vst.msk [vmem:[%s10953_s25 + $0x30] sm:$0xff] %vm684_vm0, %v5465_v11  ;;  %v5463_v8 = vadd.f32 %v5413_v18, %v10663_v13  ;;  %v5424_v35 = vadd.f32 %v6289_v45, %v5709_v38 }
 0xc70   : > { %v5415_v33 = vpop.f32.mrf.mxu0 }
 0xc71   : > { %5479 = vst.msk [vmem:[%s10953_s25 + $0x20] sm:$0xff] %vm684_vm0, %v5463_v8  ;;  %v5466_v34 = vadd.f32 %v5424_v35, %v10676_v17  ;;  %v5416_v43 = vadd.f32 %v5709_v38, %v5415_v33 }
 0xc73   : > { %5482 = vst.msk [vmem:[%s10953_s25 + $0x38] sm:$0xff] %vm684_vm0, %v5466_v34  ;;  %v5464_v63 = vadd.f32 %v5416_v43, %v10673_v42 }
 0xc75   : > { %5480 = vst.msk [vmem:[%s10953_s25 + $0x28] sm:$0xff] %vm684_vm0, %v5464_v63 }
 0xc9b   : > { %v6292_v28 = vpop.f32.mrf.mxu1 }
 0xc9c   : > { %v5437_v36 = vadd.f32 %v6292_v28, %v5709_v38 }
 0xc9d   : > { %v5428_v44 = vpop.f32.mrf.mxu1 }
 0xc9e   : > { %v5469_v13 = vadd.f32 %v5437_v36, %v10690_v37  ;;  %v5429_v16 = vadd.f32 %v5709_v38, %v5428_v44 }
 0xc9f   : > { %v6293_v24 = vpop.f32.mrf.mxu1 }
 0xca0   : > { %5485 = vst.msk [vmem:[%s10953_s25 + $0x50] sm:$0xff] %vm684_vm0, %v5469_v13  ;;  %v5467_v17 = vadd.f32 %v5429_v16, %v10687_v51  ;;  %v5440_v2 = vadd.f32 %v6293_v24, %v5709_v38 }
 0xca1   : > { %v5431_v19 = vpop.f32.mrf.mxu1 }
 0xca2   : > { %5483 = vst.msk [vmem:[%s10953_s25 + $0x40] sm:$0xff] %vm684_vm0, %v5467_v17  ;;  %v5470_v42 = vadd.f32 %v5440_v2, %v10700_v39  ;;  %v5432_v61 = vadd.f32 %v5709_v38, %v5431_v19 }
 0xca4   : > { %5486 = vst.msk [vmem:[%s10953_s25 + $0x58] sm:$0xff] %vm684_vm0, %v5470_v42  ;;  %v5468_v37 = vadd.f32 %v5432_v61, %v10697_v48 }
 0xca6   : > { %5484 = vst.msk [vmem:[%s10953_s25 + $0x48] sm:$0xff] %vm684_vm0, %v5468_v37 }
 0xcab   : > { %v6296_v9 = vpop.f32.mrf.mxu1 }
 0xcac   : > { %v5453_v12 = vadd.f32 %v6296_v9, %v5709_v38 }
 0xcad   : > { %v5444_v56 = vpop.f32.mrf.mxu1 }
 0xcae   : > { %v5473_v51 = vadd.f32 %v5453_v12, %v10714_v46  ;;  %v5445_v27 = vadd.f32 %v5709_v38, %v5444_v56 }
 0xcaf   : > { %v6297_v30 = vpop.f32.mrf.mxu1 }
 0xcb0   : > { %5489 = vst.msk [vmem:[%s10953_s25 + $0x70] sm:$0xff] %vm684_vm0, %v5473_v51  ;;  %v5471_v39 = vadd.f32 %v5445_v27, %v10711_v57  ;;  %v5456_v52 = vadd.f32 %v6297_v30, %v5709_v38 }
 0xcb1   : > { %v5447_v25 = vpop.f32.mrf.mxu1 }
 0xcb2   : > { %5487 = vst.msk [vmem:[%s10953_s25 + $0x60] sm:$0xff] %vm684_vm0, %v5471_v39  ;;  %v5474_v48 = vadd.f32 %v5456_v52, %v10724_v5  ;;  %v5448_v41 = vadd.f32 %v5709_v38, %v5447_v25 }
 0xcb4   : > { %5490 = vst.msk [vmem:[%s10953_s25 + $0x78] sm:$0xff] %vm684_vm0, %v5474_v48  ;;  %v5472_v58 = vadd.f32 %v5448_v41, %v10721_v22 }
 0xcb6   : > { %5488 = vst.msk [vmem:[%s10953_s25 + $0x68] sm:$0xff] %vm684_vm0, %v5472_v58 }
 0xcb7 PF: > { %s27_s28 = sadd.s32 1, %s7164_s28   ;;  %s11809_s24 = smov %s7156_s26 }
 0xcb8   : > { %p24_p7 = scmp.ge.s32.totalorder %s27_s28, 6   ;;  %s11810_s25 = smov %s7160_s27 }
 0xcb9   : > { %s11811_s26 = smov %s11814_s29  ;;  %s11812_s27 = smov %s11818_s0 }
 0xcba   :  { %26 = sbr.rel (!%p24_p7) target bundleno = 4 (0x4), region = 124 }

</bundles_post_ra>
